<compile_context>
chip_gen: v7x
topology: tpu7x:2x2x1
jax: 0.10.0
libtpu: 0.0.40
codegen_flags: <defaults>
</compile_context>

<pallas_src>
import functools

import jax
import jax.numpy as jnp
import numpy as np
from jax.experimental import pallas as pl
from jax.experimental.pallas import tpu as pltpu


def _round_up(x, m):
    return ((x + m - 1) // m) * m


@functools.lru_cache(maxsize=1)
def _vmem_limit_bytes():
    """Per-chip scoped-VMEM limit: ~3/4 of physical, capped at 96 MiB."""
    phys = 64 * 1024 * 1024  # conservative default (v7x per-TC physical VMEM)
    try:
        info = pltpu.get_tpu_info()
        phys = int(getattr(info, "vmem_capacity_bytes", phys) or phys)
    except Exception:
        pass
    return int(min(phys * 3 // 4, 96 * 1024 * 1024))


def _pick_block_m(M, bytes_per_col, *, budget_bytes, cap=8192):
    """Largest power-of-2 multiple of 128 whose footprint fits the budget."""
    m128 = _round_up(max(M, 1), 128)
    best = 128
    bm = 128
    while bm <= min(cap, m128) and bm * bytes_per_col <= budget_bytes:
        best = bm
        bm *= 2
    return min(best, m128)


def _tap_masks(H, W):
    """[9, H*W] bf16 multiplicative masks realizing padding=1 zero borders."""
    m = np.ones((9, H, W), np.float32)
    for t in range(9):
        dy, dx = divmod(t, 3)
        if dy == 0:
            m[t, 0, :] = 0.0
        if dy == 2:
            m[t, H - 1, :] = 0.0
        if dx == 0:
            m[t, :, 0] = 0.0
        if dx == 2:
            m[t, :, W - 1] = 0.0
    return jnp.asarray(m.reshape(9, H * W), dtype=jnp.bfloat16)


# ----------------------------------------------------------------------------
# Kernel 1: fused double conv3x3 + ReLU UNet++ block (one block per call)
#   - skip-concat branches arrive as separate refs (concat fused along K)
#   - taps staged into bf16 [9*Cin, HW] scratch -> single MXU GEMM per conv
#   - output stored lane-dense as [Cout, HW]
# ----------------------------------------------------------------------------
def _fused_double_conv_kernel(*refs, H, W):
    B = len(refs) - 8                      # number of skip branches
    mask_ref = refs[0]                     # [9, HW] bf16
    x_refs = refs[1:1 + B]                 # each [1, C_b, HW] bf16
    w1_ref, b1_ref, w2_ref, b2_ref, o_ref, k1_ref, k2_ref = refs[1 + B:]
    cin_total = sum(int(r.shape[1]) for r in x_refs)
    cmid = int(w1_ref.shape[0])

    def stage(src, dst_ref, k_stride, row_off):
        # src: [Cb, HW]; writes the 9 shifted+masked taps into dst_ref rows
        # t*k_stride + row_off .. + Cb  (tap-major, channel-minor K layout).
        cb = int(src.shape[0])
        for t in range(9):
            dy, dx = divmod(t, 3)
            off = (dy - 1) * W + (dx - 1)
            # wrapped elements of the roll always land on masked positions,
            # so roll + mask == zero-padded shift (padding=1 semantics).
            v = src if off == 0 else jnp.roll(src, -off, axis=1)
            if (dy, dx) != (1, 1):
                v = v * mask_ref[t:t + 1, :]
            r0 = t * k_stride + row_off
            dst_ref[r0:r0 + cb, :] = v.astype(dst_ref.dtype)

    # ---- conv1: stage every branch's taps (conv over concat == concat on K) ----
    c_off = 0
    for b in range(B):
        stage(x_refs[b][0], k1_ref, cin_total, c_off)
        c_off += int(x_refs[b].shape[1])

    acc1 = jnp.dot(w1_ref[...], k1_ref[...], preferred_element_type=jnp.float32)
    h1 = jnp.maximum(acc1 + b1_ref[...], 0.0)            # [Cmid, HW] f32

    # ---- conv2: stage from the VMEM-resident intermediate (never hits HBM) ----
    stage(h1, k2_ref, cmid, 0)
    acc2 = jnp.dot(w2_ref[...], k2_ref[...], preferred_element_type=jnp.float32)
    h2 = jnp.maximum(acc2 + b2_ref[...], 0.0)             # [Cout, HW] f32

    o_ref[0] = h2.astype(o_ref.dtype)                     # lane-dense store


def conv_block(branches, block_params, H, W):
    """branches: list of [N, C_b, H*W] bf16 arrays in skip-concat order."""
    (w1, b1), (w2, b2) = block_params
    N = int(branches[0].shape[0])
    HW = H * W
    branch_channels = tuple(int(br.shape[1]) for br in branches)
    cin_total = sum(branch_channels)
    cmid, cout = int(w1.shape[0]), int(w2.shape[0])
    assert int(w1.shape[1]) == 9 * cin_total, (w1.shape, branch_channels)
    assert int(w2.shape[1]) == 9 * cmid, (w2.shape, cmid)

    vmem_limit = _vmem_limit_bytes()
    est = (2 * 2 * cin_total * HW                              # in blocks (x2 bufs)
           + 2 * 2 * cout * HW                                 # out blocks (x2 bufs)
           + 2 * 2 * 9 * (cmid * cin_total + cout * cmid)      # weights
           + 2 * 9 * (cin_total + cmid) * HW                   # staging scratches
           + 4 * HW * (cin_total + 2 * cmid + cout)            # live f32 values
           + 2 * 9 * HW)                                       # tap masks
    # TODO(synk): tile H with a 1-row halo (manual DMA) before this fires on
    # large images; that also gives each core >= 4-8 grid steps.
    assert est < vmem_limit, (
        f"per-image working set (~{est} B) exceeds VMEM budget {vmem_limit} B; "
        "halo'ed spatial tiling is required")

    masks = _tap_masks(H, W)
    branches = [br.astype(jnp.bfloat16) for br in branches]
    kernel = functools.partial(_fused_double_conv_kernel, H=H, W=W)

    in_specs = [pl.BlockSpec((9, HW), lambda n: (0, 0))]
    in_specs += [pl.BlockSpec((1, cb, HW), lambda n: (n, 0, 0))
                 for cb in branch_channels]
    in_specs += [
        pl.BlockSpec((cmid, 9 * cin_total), lambda n: (0, 0)),
        pl.BlockSpec((cmid, 1), lambda n: (0, 0)),
        pl.BlockSpec((cout, 9 * cmid), lambda n: (0, 0)),
        pl.BlockSpec((cout, 1), lambda n: (0, 0)),
    ]

    out = pl.pallas_call(
        kernel,
        out_shape=jax.ShapeDtypeStruct((N, cout, HW), jnp.bfloat16),
        grid=(N,),
        in_specs=in_specs,
        out_specs=pl.BlockSpec((1, cout, HW), lambda n: (n, 0, 0)),
        scratch_shapes=[pltpu.VMEM((9 * cin_total, HW), jnp.bfloat16),
                        pltpu.VMEM((9 * cmid, HW), jnp.bfloat16)],
        compiler_params=pltpu.CompilerParams(
            dimension_semantics=("parallel",),
            vmem_limit_bytes=vmem_limit,
        ),
    )(masks, *branches, w1, b1, w2, b2)
    return out                                              # [N, Cout, HW] bf16


# ----------------------------------------------------------------------------
# Kernel 2: 1x1 segmentation head, consumes the native [N, C, HW] layout
#   logits[n, :, m_tile] = W[n_class, C] @ x[n, :, m_tile] + b
# ----------------------------------------------------------------------------
def _head_kernel(x_ref, w_ref, b_ref, o_ref):
    acc = jnp.dot(w_ref[...], x_ref[0], preferred_element_type=jnp.float32)
    o_ref[0] = (acc + b_ref[...]).astype(o_ref.dtype)


def conv1x1_head(x_ncm, w_t, b):
    """x: [N, C, M] bf16, w_t: [n_class, C] bf16, b: [n_class, 1] f32 -> f32."""
    N, C, M = (int(s) for s in x_ncm.shape)
    n_class = int(w_t.shape[0])
    vmem_limit = _vmem_limit_bytes()

    bytes_per_col = 2 * (C * 2 + n_class * 4)      # double-buffered in + out
    block_m = _pick_block_m(M, bytes_per_col, budget_bytes=vmem_limit // 2)
    num_tiles = pl.cdiv(M, block_m)
    M_pad = num_tiles * block_m
    x_pad = x_ncm if M_pad == M else jnp.pad(x_ncm, ((0, 0), (0, 0), (0, M_pad - M)))

    out = pl.pallas_call(
        _head_kernel,
        out_shape=jax.ShapeDtypeStruct((N, n_class, M_pad), jnp.float32),
        grid=(N, num_tiles),
        in_specs=[
            pl.BlockSpec((1, C, block_m), lambda n, i: (n, 0, i)),
            pl.BlockSpec((n_class, C), lambda n, i: (0, 0)),
            pl.BlockSpec((n_class, 1), lambda n, i: (0, 0)),
        ],
        out_specs=pl.BlockSpec((1, n_class, block_m), lambda n, i: (n, 0, i)),
        compiler_params=pltpu.CompilerParams(
            dimension_semantics=("parallel", "parallel"),
            vmem_limit_bytes=vmem_limit,
        ),
    )(x_pad, w_t, b)
    return out[:, :, :M] if M_pad != M else out             # [N, n_class, M] f32


# ----------------------------------------------------------------------------
# Pool / upsample glue (tiny XLA reshapes/repeats), flattened [N, C, H*W] layout
# ----------------------------------------------------------------------------
def maxpool2(x_flat, H, W):
    # TODO(synk): assumes even H, W at every scale (true for the sizes used here).
    N, C, _ = x_flat.shape
    x = x_flat.reshape(N, C, H // 2, 2, W // 2, 2)
    return x.max(axis=(3, 5)).reshape(N, C, (H // 2) * (W // 2))


def up2_nearest(x_flat, H, W):
    N, C, _ = x_flat.shape
    x = x_flat.reshape(N, C, H, W)
    x = jnp.repeat(jnp.repeat(x, 2, axis=2), 2, axis=3)
    return x.reshape(N, C, (2 * H) * (2 * W))


# ----------------------------------------------------------------------------
# Parameter init (deterministic, synthetic), flipped tap-major weight layout
# ----------------------------------------------------------------------------
def _init_conv3(key, cin, cout, cin_pad=None):
    cin_pad = cin if cin_pad is None else cin_pad
    wkey, bkey = jax.random.split(key)
    w = jax.random.normal(wkey, (3, 3, cin, cout), jnp.float32) / np.sqrt(9 * cin)
    if cin_pad != cin:
        w = jnp.pad(w, ((0, 0), (0, 0), (0, cin_pad - cin), (0, 0)))
    # [cout, 9*cin_pad], column index = (ky*3+kx)*cin_pad + c  (tap-major)
    w_t = jnp.transpose(w, (3, 0, 1, 2)).reshape(cout, 9 * cin_pad)
    b = 0.01 * jax.random.normal(bkey, (cout, 1), jnp.float32)
    return w_t.astype(jnp.bfloat16), b


def _init_block(key, cin, cmid, cin_pad=None):
    k1, k2 = jax.random.split(key)
    return (_init_conv3(k1, cin, cmid, cin_pad), _init_conv3(k2, cmid, cmid))


def _init_head(key, cin, n_class):
    wkey, bkey = jax.random.split(key)
    w_t = (jax.random.normal(wkey, (n_class, cin), jnp.float32)
           / np.sqrt(cin)).astype(jnp.bfloat16)
    b = 0.01 * jax.random.normal(bkey, (n_class, 1), jnp.float32)
    return w_t, b


def init_params(key, in_ch, n_class):
    c0, c1, c2 = 8, 16, 32  # encoder widths at scales 1, 1/2, 1/4
    in_ch_pad = _round_up(in_ch, 8)  # keep every K offset 8-aligned
    keys = jax.random.split(key, 7)
    return {
        "x00": _init_block(keys[0], in_ch, c0, cin_pad=in_ch_pad),
        "x10": _init_block(keys[1], c0, c1),
        "x20": _init_block(keys[2], c1, c2),
        "x01": _init_block(keys[3], c0 + c1, c0),
        "x11": _init_block(keys[4], c1 + c2, c1),
        "x02": _init_block(keys[5], c0 + c0 + c1, c0),
        "head": _init_head(keys[6], c0, n_class),
    }


# ----------------------------------------------------------------------------
# UNet++ forward (nested dense skip connections, logits output like smp)
# ----------------------------------------------------------------------------
def seg_qyl_forward(x_nchw, params):
    N, C_in, H, W = (int(s) for s in x_nchw.shape)
    x = x_nchw.astype(jnp.bfloat16).reshape(N, C_in, H * W)
    cin_pad = int(params["x00"][0][0].shape[1]) // 9
    if cin_pad > C_in:  # zero-pad channels; matching weight columns are zero too
        x = jnp.pad(x, ((0, 0), (0, cin_pad - C_in), (0, 0)))

    x00 = conv_block([x], params["x00"], H, W)                              # 1
    x10 = conv_block([maxpool2(x00, H, W)], params["x10"], H // 2, W // 2)  # 1/2
    x20 = conv_block([maxpool2(x10, H // 2, W // 2)], params["x20"],
                     H // 4, W // 4)                                        # 1/4

    # dense skips: concat is fused into the kernels (branches in concat order)
    x01 = conv_block([x00, up2_nearest(x10, H // 2, W // 2)], params["x01"], H, W)
    x11 = conv_block([x10, up2_nearest(x20, H // 4, W // 4)], params["x11"],
                     H // 2, W // 2)
    x02 = conv_block([x00, x01, up2_nearest(x11, H // 2, W // 2)],
                     params["x02"], H, W)

    w_h, b_h = params["head"]
    logits = conv1x1_head(x02, w_h, b_h)                    # [N, n_class, HW] f32
    n_class = int(w_h.shape[0])
    return logits.reshape(N, n_class, H, W)


# ----------------------------------------------------------------------------
if __name__ == "__main__":
    key = jax.random.PRNGKey(0)
    pkey, xkey = jax.random.split(key)

    N, C_IN, H, W = 2, 3, 16, 16
    N_CLASS = 4

    params = init_params(pkey, C_IN, N_CLASS)
    x = jax.random.normal(xkey, (N, C_IN, H, W), jnp.float32)

    fwd = jax.jit(seg_qyl_forward)
    out = jax.block_until_ready(fwd(x, params))

    assert out.shape == (N, N_CLASS, H, W), out.shape
    assert out.dtype == jnp.float32
    assert bool(jnp.all(jnp.isfinite(out)))
    print("KERNEL_OK")
</pallas_src>

<mosaic_0001>
module attributes {stable_mosaic.version = 11 : i64} {
  func.func @_fused_double_conv_kernel(%arg0: i32, %arg1: memref<9x256xbf16, #tpu.memory_space<vmem>>, %arg2: memref<1x8x256xbf16, #tpu.memory_space<vmem>>, %arg3: memref<8x72xbf16, #tpu.memory_space<vmem>>, %arg4: memref<8x1xf32, #tpu.memory_space<vmem>>, %arg5: memref<8x72xbf16, #tpu.memory_space<vmem>>, %arg6: memref<8x1xf32, #tpu.memory_space<vmem>>, %arg7: memref<1x8x256xbf16, #tpu.memory_space<vmem>>, %arg8: memref<72x256xbf16, #tpu.memory_space<vmem>>, %arg9: memref<72x256xbf16, #tpu.memory_space<vmem>>) attributes {dimension_semantics = [#tpu.dimension_semantics<parallel>], iteration_bounds = array<i64: 2>, scalar_prefetch = 0 : i64, scratch_operands = 2 : i64, tpu.core_type = #tpu.core_type<tc>, window_params = [{pipeline_mode = #tpu.pipeline_mode<synchronous>, transform_indices = @transform_0, window_bounds = array<i64: 9, 256>}, {transform_indices = @transform_1, window_bounds = array<i64: 1, 8, 256>}, {pipeline_mode = #tpu.pipeline_mode<synchronous>, transform_indices = @transform_2, window_bounds = array<i64: 8, 72>}, {pipeline_mode = #tpu.pipeline_mode<synchronous>, transform_indices = @transform_3, window_bounds = array<i64: 8, 1>}, {pipeline_mode = #tpu.pipeline_mode<synchronous>, transform_indices = @transform_4, window_bounds = array<i64: 8, 72>}, {pipeline_mode = #tpu.pipeline_mode<synchronous>, transform_indices = @transform_5, window_bounds = array<i64: 8, 1>}, {transform_indices = @transform_6, window_bounds = array<i64: 1, 8, 256>}]} {
    %c0 = arith.constant 0 : index
    %c0_0 = arith.constant 0 : index
    %c0_1 = arith.constant 0 : index
    %0 = vector.load %arg2[%c0, %c0_0, %c0_1] : memref<1x8x256xbf16, #tpu.memory_space<vmem>>, vector<1x8x256xbf16>
    %1 = vector.shape_cast %0 : vector<1x8x256xbf16> to vector<8x256xbf16>
    %2 = vector.extract_strided_slice %1 {offsets = [0, 239], sizes = [8, 17], strides = [1, 1]} : vector<8x256xbf16> to vector<8x17xbf16>
    %3 = vector.extract_strided_slice %1 {offsets = [0, 0], sizes = [8, 239], strides = [1, 1]} : vector<8x256xbf16> to vector<8x239xbf16>
    %4 = tpu.concatenate %2, %3 in 1 : vector<8x17xbf16>, vector<8x239xbf16> -> vector<8x256xbf16>
    %c0_2 = arith.constant 0 : index
    %c0_3 = arith.constant 0 : index
    %5 = vector.load %arg1[%c0_2, %c0_3] : memref<9x256xbf16, #tpu.memory_space<vmem>>, vector<1x256xbf16>
    %6 = vector.broadcast %5 : vector<1x256xbf16> to vector<8x256xbf16>
    %7 = arith.mulf %4, %6 : vector<8x256xbf16>
    %c0_4 = arith.constant 0 : index
    %c0_5 = arith.constant 0 : index
    %8 = vector.load %arg8[%c0_4, %c0_5] : memref<72x256xbf16, #tpu.memory_space<vmem>>, vector<8x256xbf16>
    tpu.vector_store %arg8[%c0_4, %c0_5], %7 {strides = array<i32>} : memref<72x256xbf16, #tpu.memory_space<vmem>>, vector<8x256xbf16>,
    %9 = vector.extract_strided_slice %1 {offsets = [0, 240], sizes = [8, 16], strides = [1, 1]} : vector<8x256xbf16> to vector<8x16xbf16>
    %10 = vector.extract_strided_slice %1 {offsets = [0, 0], sizes = [8, 240], strides = [1, 1]} : vector<8x256xbf16> to vector<8x240xbf16>
    %11 = tpu.concatenate %9, %10 in 1 : vector<8x16xbf16>, vector<8x240xbf16> -> vector<8x256xbf16>
    %c1 = arith.constant 1 : index
    %c0_6 = arith.constant 0 : index
    %12 = vector.load %arg1[%c1, %c0_6] : memref<9x256xbf16, #tpu.memory_space<vmem>>, vector<1x256xbf16>
    %13 = vector.broadcast %12 : vector<1x256xbf16> to vector<8x256xbf16>
    %14 = arith.mulf %11, %13 : vector<8x256xbf16>
    %c8 = arith.constant 8 : index
    %c0_7 = arith.constant 0 : index
    %15 = vector.load %arg8[%c8, %c0_7] : memref<72x256xbf16, #tpu.memory_space<vmem>>, vector<8x256xbf16>
    tpu.vector_store %arg8[%c8, %c0_7], %14 {strides = array<i32>} : memref<72x256xbf16, #tpu.memory_space<vmem>>, vector<8x256xbf16>,
    %16 = vector.extract_strided_slice %1 {offsets = [0, 241], sizes = [8, 15], strides = [1, 1]} : vector<8x256xbf16> to vector<8x15xbf16>
    %17 = vector.extract_strided_slice %1 {offsets = [0, 0], sizes = [8, 241], strides = [1, 1]} : vector<8x256xbf16> to vector<8x241xbf16>
    %18 = tpu.concatenate %16, %17 in 1 : vector<8x15xbf16>, vector<8x241xbf16> -> vector<8x256xbf16>
    %c2 = arith.constant 2 : index
    %c0_8 = arith.constant 0 : index
    %19 = vector.load %arg1[%c2, %c0_8] : memref<9x256xbf16, #tpu.memory_space<vmem>>, vector<1x256xbf16>
    %20 = vector.broadcast %19 : vector<1x256xbf16> to vector<8x256xbf16>
    %21 = arith.mulf %18, %20 : vector<8x256xbf16>
    %c16 = arith.constant 16 : index
    %c0_9 = arith.constant 0 : index
    %22 = vector.load %arg8[%c16, %c0_9] : memref<72x256xbf16, #tpu.memory_space<vmem>>, vector<8x256xbf16>
    tpu.vector_store %arg8[%c16, %c0_9], %21 {strides = array<i32>} : memref<72x256xbf16, #tpu.memory_space<vmem>>, vector<8x256xbf16>,
    %23 = vector.extract_strided_slice %1 {offsets = [0, 255], sizes = [8, 1], strides = [1, 1]} : vector<8x256xbf16> to vector<8x1xbf16>
    %24 = vector.extract_strided_slice %1 {offsets = [0, 0], sizes = [8, 255], strides = [1, 1]} : vector<8x256xbf16> to vector<8x255xbf16>
    %25 = tpu.concatenate %23, %24 in 1 : vector<8x1xbf16>, vector<8x255xbf16> -> vector<8x256xbf16>
    %c3 = arith.constant 3 : index
    %c0_10 = arith.constant 0 : index
    %26 = vector.load %arg1[%c3, %c0_10] : memref<9x256xbf16, #tpu.memory_space<vmem>>, vector<1x256xbf16>
    %27 = vector.broadcast %26 : vector<1x256xbf16> to vector<8x256xbf16>
    %28 = arith.mulf %25, %27 : vector<8x256xbf16>
    %c24 = arith.constant 24 : index
    %c0_11 = arith.constant 0 : index
    %29 = vector.load %arg8[%c24, %c0_11] : memref<72x256xbf16, #tpu.memory_space<vmem>>, vector<8x256xbf16>
    tpu.vector_store %arg8[%c24, %c0_11], %28 {strides = array<i32>} : memref<72x256xbf16, #tpu.memory_space<vmem>>, vector<8x256xbf16>,
    %c32 = arith.constant 32 : index
    %c0_12 = arith.constant 0 : index
    %30 = vector.load %arg8[%c32, %c0_12] : memref<72x256xbf16, #tpu.memory_space<vmem>>, vector<8x256xbf16>
    tpu.vector_store %arg8[%c32, %c0_12], %1 {strides = array<i32>} : memref<72x256xbf16, #tpu.memory_space<vmem>>, vector<8x256xbf16>,
    %31 = vector.extract_strided_slice %1 {offsets = [0, 1], sizes = [8, 255], strides = [1, 1]} : vector<8x256xbf16> to vector<8x255xbf16>
    %32 = vector.extract_strided_slice %1 {offsets = [0, 0], sizes = [8, 1], strides = [1, 1]} : vector<8x256xbf16> to vector<8x1xbf16>
    %33 = tpu.concatenate %31, %32 in 1 : vector<8x255xbf16>, vector<8x1xbf16> -> vector<8x256xbf16>
    %c5 = arith.constant 5 : index
    %c0_13 = arith.constant 0 : index
    %34 = vector.load %arg1[%c5, %c0_13] : memref<9x256xbf16, #tpu.memory_space<vmem>>, vector<1x256xbf16>
    %35 = vector.broadcast %34 : vector<1x256xbf16> to vector<8x256xbf16>
    %36 = arith.mulf %33, %35 : vector<8x256xbf16>
    %c40 = arith.constant 40 : index
    %c0_14 = arith.constant 0 : index
    %37 = vector.load %arg8[%c40, %c0_14] : memref<72x256xbf16, #tpu.memory_space<vmem>>, vector<8x256xbf16>
    tpu.vector_store %arg8[%c40, %c0_14], %36 {strides = array<i32>} : memref<72x256xbf16, #tpu.memory_space<vmem>>, vector<8x256xbf16>,
    %38 = vector.extract_strided_slice %1 {offsets = [0, 15], sizes = [8, 241], strides = [1, 1]} : vector<8x256xbf16> to vector<8x241xbf16>
    %39 = vector.extract_strided_slice %1 {offsets = [0, 0], sizes = [8, 15], strides = [1, 1]} : vector<8x256xbf16> to vector<8x15xbf16>
    %40 = tpu.concatenate %38, %39 in 1 : vector<8x241xbf16>, vector<8x15xbf16> -> vector<8x256xbf16>
    %c6 = arith.constant 6 : index
    %c0_15 = arith.constant 0 : index
    %41 = vector.load %arg1[%c6, %c0_15] : memref<9x256xbf16, #tpu.memory_space<vmem>>, vector<1x256xbf16>
    %42 = vector.broadcast %41 : vector<1x256xbf16> to vector<8x256xbf16>
    %43 = arith.mulf %40, %42 : vector<8x256xbf16>
    %c48 = arith.constant 48 : index
    %c0_16 = arith.constant 0 : index
    %44 = vector.load %arg8[%c48, %c0_16] : memref<72x256xbf16, #tpu.memory_space<vmem>>, vector<8x256xbf16>
    tpu.vector_store %arg8[%c48, %c0_16], %43 {strides = array<i32>} : memref<72x256xbf16, #tpu.memory_space<vmem>>, vector<8x256xbf16>,
    %45 = vector.extract_strided_slice %1 {offsets = [0, 16], sizes = [8, 240], strides = [1, 1]} : vector<8x256xbf16> to vector<8x240xbf16>
    %46 = vector.extract_strided_slice %1 {offsets = [0, 0], sizes = [8, 16], strides = [1, 1]} : vector<8x256xbf16> to vector<8x16xbf16>
    %47 = tpu.concatenate %45, %46 in 1 : vector<8x240xbf16>, vector<8x16xbf16> -> vector<8x256xbf16>
    %c7 = arith.constant 7 : index
    %c0_17 = arith.constant 0 : index
    %48 = vector.load %arg1[%c7, %c0_17] : memref<9x256xbf16, #tpu.memory_space<vmem>>, vector<1x256xbf16>
    %49 = vector.broadcast %48 : vector<1x256xbf16> to vector<8x256xbf16>
    %50 = arith.mulf %47, %49 : vector<8x256xbf16>
    %c56 = arith.constant 56 : index
    %c0_18 = arith.constant 0 : index
    %51 = vector.load %arg8[%c56, %c0_18] : memref<72x256xbf16, #tpu.memory_space<vmem>>, vector<8x256xbf16>
    tpu.vector_store %arg8[%c56, %c0_18], %50 {strides = array<i32>} : memref<72x256xbf16, #tpu.memory_space<vmem>>, vector<8x256xbf16>,
    %52 = vector.extract_strided_slice %1 {offsets = [0, 17], sizes = [8, 239], strides = [1, 1]} : vector<8x256xbf16> to vector<8x239xbf16>
    %53 = vector.extract_strided_slice %1 {offsets = [0, 0], sizes = [8, 17], strides = [1, 1]} : vector<8x256xbf16> to vector<8x17xbf16>
    %54 = tpu.concatenate %52, %53 in 1 : vector<8x239xbf16>, vector<8x17xbf16> -> vector<8x256xbf16>
    %c8_19 = arith.constant 8 : index
    %c0_20 = arith.constant 0 : index
    %55 = vector.load %arg1[%c8_19, %c0_20] : memref<9x256xbf16, #tpu.memory_space<vmem>>, vector<1x256xbf16>
    %56 = vector.broadcast %55 : vector<1x256xbf16> to vector<8x256xbf16>
    %57 = arith.mulf %54, %56 : vector<8x256xbf16>
    %c64 = arith.constant 64 : index
    %c0_21 = arith.constant 0 : index
    %58 = vector.load %arg8[%c64, %c0_21] : memref<72x256xbf16, #tpu.memory_space<vmem>>, vector<8x256xbf16>
    tpu.vector_store %arg8[%c64, %c0_21], %57 {strides = array<i32>} : memref<72x256xbf16, #tpu.memory_space<vmem>>, vector<8x256xbf16>,
    %c0_22 = arith.constant 0 : index
    %c0_23 = arith.constant 0 : index
    %59 = vector.load %arg3[%c0_22, %c0_23] : memref<8x72xbf16, #tpu.memory_space<vmem>>, vector<8x72xbf16>
    %c0_24 = arith.constant 0 : index
    %c0_25 = arith.constant 0 : index
    %60 = vector.load %arg8[%c0_24, %c0_25] : memref<72x256xbf16, #tpu.memory_space<vmem>>, vector<72x256xbf16>
    %cst = arith.constant dense<0.000000e+00> : vector<8x256xf32>
    %61 = tpu.matmul %59, %60, %cst {dimension_numbers = #tpu.dot_dimension_numbers<[1], [0], [0], [1], [0, 0, 1, 1], [], []>} : vector<8x72xbf16>, vector<72x256xbf16>, vector<8x256xf32> -> vector<8x256xf32>
    %c0_26 = arith.constant 0 : index
    %c0_27 = arith.constant 0 : index
    %62 = vector.load %arg4[%c0_26, %c0_27] : memref<8x1xf32, #tpu.memory_space<vmem>>, vector<8x1xf32>
    %63 = vector.broadcast %62 : vector<8x1xf32> to vector<8x256xf32>
    %64 = arith.addf %61, %63 : vector<8x256xf32>
    %cst_28 = arith.constant 0.000000e+00 : f32
    %65 = vector.broadcast %cst_28 : f32 to vector<8x256xf32>
    %66 = arith.maximumf %64, %65 : vector<8x256xf32>
    %67 = vector.extract_strided_slice %66 {offsets = [0, 239], sizes = [8, 17], strides = [1, 1]} : vector<8x256xf32> to vector<8x17xf32>
    %68 = vector.extract_strided_slice %66 {offsets = [0, 0], sizes = [8, 239], strides = [1, 1]} : vector<8x256xf32> to vector<8x239xf32>
    %69 = tpu.concatenate %67, %68 in 1 : vector<8x17xf32>, vector<8x239xf32> -> vector<8x256xf32>
    %c0_29 = arith.constant 0 : index
    %c0_30 = arith.constant 0 : index
    %70 = vector.load %arg1[%c0_29, %c0_30] : memref<9x256xbf16, #tpu.memory_space<vmem>>, vector<1x256xbf16>
    %71 = arith.extf %70 : vector<1x256xbf16> to vector<1x256xf32>
    %72 = vector.broadcast %71 : vector<1x256xf32> to vector<8x256xf32>
    %73 = arith.mulf %69, %72 : vector<8x256xf32>
    %74 = arith.truncf %73 : vector<8x256xf32> to vector<8x256xbf16>
    %c0_31 = arith.constant 0 : index
    %c0_32 = arith.constant 0 : index
    %75 = vector.load %arg9[%c0_31, %c0_32] : memref<72x256xbf16, #tpu.memory_space<vmem>>, vector<8x256xbf16>
    tpu.vector_store %arg9[%c0_31, %c0_32], %74 {strides = array<i32>} : memref<72x256xbf16, #tpu.memory_space<vmem>>, vector<8x256xbf16>,
    %76 = vector.extract_strided_slice %66 {offsets = [0, 240], sizes = [8, 16], strides = [1, 1]} : vector<8x256xf32> to vector<8x16xf32>
    %77 = vector.extract_strided_slice %66 {offsets = [0, 0], sizes = [8, 240], strides = [1, 1]} : vector<8x256xf32> to vector<8x240xf32>
    %78 = tpu.concatenate %76, %77 in 1 : vector<8x16xf32>, vector<8x240xf32> -> vector<8x256xf32>
    %c1_33 = arith.constant 1 : index
    %c0_34 = arith.constant 0 : index
    %79 = vector.load %arg1[%c1_33, %c0_34] : memref<9x256xbf16, #tpu.memory_space<vmem>>, vector<1x256xbf16>
    %80 = arith.extf %79 : vector<1x256xbf16> to vector<1x256xf32>
    %81 = vector.broadcast %80 : vector<1x256xf32> to vector<8x256xf32>
    %82 = arith.mulf %78, %81 : vector<8x256xf32>
    %83 = arith.truncf %82 : vector<8x256xf32> to vector<8x256xbf16>
    %c8_35 = arith.constant 8 : index
    %c0_36 = arith.constant 0 : index
    %84 = vector.load %arg9[%c8_35, %c0_36] : memref<72x256xbf16, #tpu.memory_space<vmem>>, vector<8x256xbf16>
    tpu.vector_store %arg9[%c8_35, %c0_36], %83 {strides = array<i32>} : memref<72x256xbf16, #tpu.memory_space<vmem>>, vector<8x256xbf16>,
    %85 = vector.extract_strided_slice %66 {offsets = [0, 241], sizes = [8, 15], strides = [1, 1]} : vector<8x256xf32> to vector<8x15xf32>
    %86 = vector.extract_strided_slice %66 {offsets = [0, 0], sizes = [8, 241], strides = [1, 1]} : vector<8x256xf32> to vector<8x241xf32>
    %87 = tpu.concatenate %85, %86 in 1 : vector<8x15xf32>, vector<8x241xf32> -> vector<8x256xf32>
    %c2_37 = arith.constant 2 : index
    %c0_38 = arith.constant 0 : index
    %88 = vector.load %arg1[%c2_37, %c0_38] : memref<9x256xbf16, #tpu.memory_space<vmem>>, vector<1x256xbf16>
    %89 = arith.extf %88 : vector<1x256xbf16> to vector<1x256xf32>
    %90 = vector.broadcast %89 : vector<1x256xf32> to vector<8x256xf32>
    %91 = arith.mulf %87, %90 : vector<8x256xf32>
    %92 = arith.truncf %91 : vector<8x256xf32> to vector<8x256xbf16>
    %c16_39 = arith.constant 16 : index
    %c0_40 = arith.constant 0 : index
    %93 = vector.load %arg9[%c16_39, %c0_40] : memref<72x256xbf16, #tpu.memory_space<vmem>>, vector<8x256xbf16>
    tpu.vector_store %arg9[%c16_39, %c0_40], %92 {strides = array<i32>} : memref<72x256xbf16, #tpu.memory_space<vmem>>, vector<8x256xbf16>,
    %94 = vector.extract_strided_slice %66 {offsets = [0, 255], sizes = [8, 1], strides = [1, 1]} : vector<8x256xf32> to vector<8x1xf32>
    %95 = vector.extract_strided_slice %66 {offsets = [0, 0], sizes = [8, 255], strides = [1, 1]} : vector<8x256xf32> to vector<8x255xf32>
    %96 = tpu.concatenate %94, %95 in 1 : vector<8x1xf32>, vector<8x255xf32> -> vector<8x256xf32>
    %c3_41 = arith.constant 3 : index
    %c0_42 = arith.constant 0 : index
    %97 = vector.load %arg1[%c3_41, %c0_42] : memref<9x256xbf16, #tpu.memory_space<vmem>>, vector<1x256xbf16>
    %98 = arith.extf %97 : vector<1x256xbf16> to vector<1x256xf32>
    %99 = vector.broadcast %98 : vector<1x256xf32> to vector<8x256xf32>
    %100 = arith.mulf %96, %99 : vector<8x256xf32>
    %101 = arith.truncf %100 : vector<8x256xf32> to vector<8x256xbf16>
    %c24_43 = arith.constant 24 : index
    %c0_44 = arith.constant 0 : index
    %102 = vector.load %arg9[%c24_43, %c0_44] : memref<72x256xbf16, #tpu.memory_space<vmem>>, vector<8x256xbf16>
    tpu.vector_store %arg9[%c24_43, %c0_44], %101 {strides = array<i32>} : memref<72x256xbf16, #tpu.memory_space<vmem>>, vector<8x256xbf16>,
    %103 = arith.truncf %66 : vector<8x256xf32> to vector<8x256xbf16>
    %c32_45 = arith.constant 32 : index
    %c0_46 = arith.constant 0 : index
    %104 = vector.load %arg9[%c32_45, %c0_46] : memref<72x256xbf16, #tpu.memory_space<vmem>>, vector<8x256xbf16>
    tpu.vector_store %arg9[%c32_45, %c0_46], %103 {strides = array<i32>} : memref<72x256xbf16, #tpu.memory_space<vmem>>, vector<8x256xbf16>,
    %105 = vector.extract_strided_slice %66 {offsets = [0, 1], sizes = [8, 255], strides = [1, 1]} : vector<8x256xf32> to vector<8x255xf32>
    %106 = vector.extract_strided_slice %66 {offsets = [0, 0], sizes = [8, 1], strides = [1, 1]} : vector<8x256xf32> to vector<8x1xf32>
    %107 = tpu.concatenate %105, %106 in 1 : vector<8x255xf32>, vector<8x1xf32> -> vector<8x256xf32>
    %c5_47 = arith.constant 5 : index
    %c0_48 = arith.constant 0 : index
    %108 = vector.load %arg1[%c5_47, %c0_48] : memref<9x256xbf16, #tpu.memory_space<vmem>>, vector<1x256xbf16>
    %109 = arith.extf %108 : vector<1x256xbf16> to vector<1x256xf32>
    %110 = vector.broadcast %109 : vector<1x256xf32> to vector<8x256xf32>
    %111 = arith.mulf %107, %110 : vector<8x256xf32>
    %112 = arith.truncf %111 : vector<8x256xf32> to vector<8x256xbf16>
    %c40_49 = arith.constant 40 : index
    %c0_50 = arith.constant 0 : index
    %113 = vector.load %arg9[%c40_49, %c0_50] : memref<72x256xbf16, #tpu.memory_space<vmem>>, vector<8x256xbf16>
    tpu.vector_store %arg9[%c40_49, %c0_50], %112 {strides = array<i32>} : memref<72x256xbf16, #tpu.memory_space<vmem>>, vector<8x256xbf16>,
    %114 = vector.extract_strided_slice %66 {offsets = [0, 15], sizes = [8, 241], strides = [1, 1]} : vector<8x256xf32> to vector<8x241xf32>
    %115 = vector.extract_strided_slice %66 {offsets = [0, 0], sizes = [8, 15], strides = [1, 1]} : vector<8x256xf32> to vector<8x15xf32>
    %116 = tpu.concatenate %114, %115 in 1 : vector<8x241xf32>, vector<8x15xf32> -> vector<8x256xf32>
    %c6_51 = arith.constant 6 : index
    %c0_52 = arith.constant 0 : index
    %117 = vector.load %arg1[%c6_51, %c0_52] : memref<9x256xbf16, #tpu.memory_space<vmem>>, vector<1x256xbf16>
    %118 = arith.extf %117 : vector<1x256xbf16> to vector<1x256xf32>
    %119 = vector.broadcast %118 : vector<1x256xf32> to vector<8x256xf32>
    %120 = arith.mulf %116, %119 : vector<8x256xf32>
    %121 = arith.truncf %120 : vector<8x256xf32> to vector<8x256xbf16>
    %c48_53 = arith.constant 48 : index
    %c0_54 = arith.constant 0 : index
    %122 = vector.load %arg9[%c48_53, %c0_54] : memref<72x256xbf16, #tpu.memory_space<vmem>>, vector<8x256xbf16>
    tpu.vector_store %arg9[%c48_53, %c0_54], %121 {strides = array<i32>} : memref<72x256xbf16, #tpu.memory_space<vmem>>, vector<8x256xbf16>,
    %123 = vector.extract_strided_slice %66 {offsets = [0, 16], sizes = [8, 240], strides = [1, 1]} : vector<8x256xf32> to vector<8x240xf32>
    %124 = vector.extract_strided_slice %66 {offsets = [0, 0], sizes = [8, 16], strides = [1, 1]} : vector<8x256xf32> to vector<8x16xf32>
    %125 = tpu.concatenate %123, %124 in 1 : vector<8x240xf32>, vector<8x16xf32> -> vector<8x256xf32>
    %c7_55 = arith.constant 7 : index
    %c0_56 = arith.constant 0 : index
    %126 = vector.load %arg1[%c7_55, %c0_56] : memref<9x256xbf16, #tpu.memory_space<vmem>>, vector<1x256xbf16>
    %127 = arith.extf %126 : vector<1x256xbf16> to vector<1x256xf32>
    %128 = vector.broadcast %127 : vector<1x256xf32> to vector<8x256xf32>
    %129 = arith.mulf %125, %128 : vector<8x256xf32>
    %130 = arith.truncf %129 : vector<8x256xf32> to vector<8x256xbf16>
    %c56_57 = arith.constant 56 : index
    %c0_58 = arith.constant 0 : index
    %131 = vector.load %arg9[%c56_57, %c0_58] : memref<72x256xbf16, #tpu.memory_space<vmem>>, vector<8x256xbf16>
    tpu.vector_store %arg9[%c56_57, %c0_58], %130 {strides = array<i32>} : memref<72x256xbf16, #tpu.memory_space<vmem>>, vector<8x256xbf16>,
    %132 = vector.extract_strided_slice %66 {offsets = [0, 17], sizes = [8, 239], strides = [1, 1]} : vector<8x256xf32> to vector<8x239xf32>
    %133 = vector.extract_strided_slice %66 {offsets = [0, 0], sizes = [8, 17], strides = [1, 1]} : vector<8x256xf32> to vector<8x17xf32>
    %134 = tpu.concatenate %132, %133 in 1 : vector<8x239xf32>, vector<8x17xf32> -> vector<8x256xf32>
    %c8_59 = arith.constant 8 : index
    %c0_60 = arith.constant 0 : index
    %135 = vector.load %arg1[%c8_59, %c0_60] : memref<9x256xbf16, #tpu.memory_space<vmem>>, vector<1x256xbf16>
    %136 = arith.extf %135 : vector<1x256xbf16> to vector<1x256xf32>
    %137 = vector.broadcast %136 : vector<1x256xf32> to vector<8x256xf32>
    %138 = arith.mulf %134, %137 : vector<8x256xf32>
    %139 = arith.truncf %138 : vector<8x256xf32> to vector<8x256xbf16>
    %c64_61 = arith.constant 64 : index
    %c0_62 = arith.constant 0 : index
    %140 = vector.load %arg9[%c64_61, %c0_62] : memref<72x256xbf16, #tpu.memory_space<vmem>>, vector<8x256xbf16>
    tpu.vector_store %arg9[%c64_61, %c0_62], %139 {strides = array<i32>} : memref<72x256xbf16, #tpu.memory_space<vmem>>, vector<8x256xbf16>,
    %c0_63 = arith.constant 0 : index
    %c0_64 = arith.constant 0 : index
    %141 = vector.load %arg5[%c0_63, %c0_64] : memref<8x72xbf16, #tpu.memory_space<vmem>>, vector<8x72xbf16>
    %c0_65 = arith.constant 0 : index
    %c0_66 = arith.constant 0 : index
    %142 = vector.load %arg9[%c0_65, %c0_66] : memref<72x256xbf16, #tpu.memory_space<vmem>>, vector<72x256xbf16>
    %cst_67 = arith.constant dense<0.000000e+00> : vector<8x256xf32>
    %143 = tpu.matmul %141, %142, %cst_67 {dimension_numbers = #tpu.dot_dimension_numbers<[1], [0], [0], [1], [0, 0, 1, 1], [], []>} : vector<8x72xbf16>, vector<72x256xbf16>, vector<8x256xf32> -> vector<8x256xf32>
    %c0_68 = arith.constant 0 : index
    %c0_69 = arith.constant 0 : index
    %144 = vector.load %arg6[%c0_68, %c0_69] : memref<8x1xf32, #tpu.memory_space<vmem>>, vector<8x1xf32>
    %145 = vector.broadcast %144 : vector<8x1xf32> to vector<8x256xf32>
    %146 = arith.addf %143, %145 : vector<8x256xf32>
    %cst_70 = arith.constant 0.000000e+00 : f32
    %147 = vector.broadcast %cst_70 : f32 to vector<8x256xf32>
    %148 = arith.maximumf %146, %147 : vector<8x256xf32>
    %149 = arith.truncf %148 : vector<8x256xf32> to vector<8x256xbf16>
    %c0_71 = arith.constant 0 : index
    %c0_72 = arith.constant 0 : index
    %c0_73 = arith.constant 0 : index
    %150 = vector.load %arg7[%c0_71, %c0_72, %c0_73] : memref<1x8x256xbf16, #tpu.memory_space<vmem>>, vector<1x8x256xbf16>
    %151 = vector.shape_cast %150 : vector<1x8x256xbf16> to vector<8x256xbf16>
    %152 = vector.shape_cast %149 : vector<8x256xbf16> to vector<1x8x256xbf16>
    tpu.vector_store %arg7[%c0_71, %c0_72, %c0_73], %152 {strides = array<i32>} : memref<1x8x256xbf16, #tpu.memory_space<vmem>>, vector<1x8x256xbf16>,
    return
  }
  func.func @transform_0(%arg0: i32) -> (i32, i32) {
    %c0_i32 = arith.constant 0 : i32
    %c0_i32_0 = arith.constant 0 : i32
    %c0_i32_1 = arith.constant 0 : i32
    return %c0_i32, %c0_i32_0 : i32, i32
  }
  func.func @transform_1(%arg0: i32) -> (i32, i32, i32) {
    %c0_i32 = arith.constant 0 : i32
    %c0_i32_0 = arith.constant 0 : i32
    %c0_i32_1 = arith.constant 0 : i32
    return %arg0, %c0_i32, %c0_i32_0 : i32, i32, i32
  }
  func.func @transform_2(%arg0: i32) -> (i32, i32) {
    %c0_i32 = arith.constant 0 : i32
    %c0_i32_0 = arith.constant 0 : i32
    %c0_i32_1 = arith.constant 0 : i32
    return %c0_i32, %c0_i32_0 : i32, i32
  }
  func.func @transform_3(%arg0: i32) -> (i32, i32) {
    %c0_i32 = arith.constant 0 : i32
    %c0_i32_0 = arith.constant 0 : i32
    %c0_i32_1 = arith.constant 0 : i32
    return %c0_i32, %c0_i32_0 : i32, i32
  }
  func.func @transform_4(%arg0: i32) -> (i32, i32) {
    %c0_i32 = arith.constant 0 : i32
    %c0_i32_0 = arith.constant 0 : i32
    %c0_i32_1 = arith.constant 0 : i32
    return %c0_i32, %c0_i32_0 : i32, i32
  }
  func.func @transform_5(%arg0: i32) -> (i32, i32) {
    %c0_i32 = arith.constant 0 : i32
    %c0_i32_0 = arith.constant 0 : i32
    %c0_i32_1 = arith.constant 0 : i32
    return %c0_i32, %c0_i32_0 : i32, i32
  }
  func.func @transform_6(%arg0: i32) -> (i32, i32, i32) {
    %c0_i32 = arith.constant 0 : i32
    %c0_i32_0 = arith.constant 0 : i32
    %c0_i32_1 = arith.constant 0 : i32
    return %arg0, %c0_i32, %c0_i32_0 : i32, i32, i32
  }
}

module attributes {stable_mosaic.version = 11 : i64} {
  func.func @_fused_double_conv_kernel(%arg0: i32, %arg1: memref<9x64xbf16, #tpu.memory_space<vmem>>, %arg2: memref<1x8x64xbf16, #tpu.memory_space<vmem>>, %arg3: memref<16x72xbf16, #tpu.memory_space<vmem>>, %arg4: memref<16x1xf32, #tpu.memory_space<vmem>>, %arg5: memref<16x144xbf16, #tpu.memory_space<vmem>>, %arg6: memref<16x1xf32, #tpu.memory_space<vmem>>, %arg7: memref<1x16x64xbf16, #tpu.memory_space<vmem>>, %arg8: memref<72x64xbf16, #tpu.memory_space<vmem>>, %arg9: memref<144x64xbf16, #tpu.memory_space<vmem>>) attributes {dimension_semantics = [#tpu.dimension_semantics<parallel>], iteration_bounds = array<i64: 2>, scalar_prefetch = 0 : i64, scratch_operands = 2 : i64, tpu.core_type = #tpu.core_type<tc>, window_params = [{pipeline_mode = #tpu.pipeline_mode<synchronous>, transform_indices = @transform_0, window_bounds = array<i64: 9, 64>}, {transform_indices = @transform_1, window_bounds = array<i64: 1, 8, 64>}, {pipeline_mode = #tpu.pipeline_mode<synchronous>, transform_indices = @transform_2, window_bounds = array<i64: 16, 72>}, {pipeline_mode = #tpu.pipeline_mode<synchronous>, transform_indices = @transform_3, window_bounds = array<i64: 16, 1>}, {pipeline_mode = #tpu.pipeline_mode<synchronous>, transform_indices = @transform_4, window_bounds = array<i64: 16, 144>}, {pipeline_mode = #tpu.pipeline_mode<synchronous>, transform_indices = @transform_5, window_bounds = array<i64: 16, 1>}, {transform_indices = @transform_6, window_bounds = array<i64: 1, 16, 64>}]} {
    %c0 = arith.constant 0 : index
    %c0_0 = arith.constant 0 : index
    %c0_1 = arith.constant 0 : index
    %0 = vector.load %arg2[%c0, %c0_0, %c0_1] : memref<1x8x64xbf16, #tpu.memory_space<vmem>>, vector<1x8x64xbf16>
    %1 = vector.shape_cast %0 : vector<1x8x64xbf16> to vector<8x64xbf16>
    %2 = vector.extract_strided_slice %1 {offsets = [0, 55], sizes = [8, 9], strides = [1, 1]} : vector<8x64xbf16> to vector<8x9xbf16>
    %3 = vector.extract_strided_slice %1 {offsets = [0, 0], sizes = [8, 55], strides = [1, 1]} : vector<8x64xbf16> to vector<8x55xbf16>
    %4 = tpu.concatenate %2, %3 in 1 : vector<8x9xbf16>, vector<8x55xbf16> -> vector<8x64xbf16>
    %c0_2 = arith.constant 0 : index
    %c0_3 = arith.constant 0 : index
    %5 = vector.load %arg1[%c0_2, %c0_3] : memref<9x64xbf16, #tpu.memory_space<vmem>>, vector<1x64xbf16>
    %6 = vector.broadcast %5 : vector<1x64xbf16> to vector<8x64xbf16>
    %7 = arith.mulf %4, %6 : vector<8x64xbf16>
    %c0_4 = arith.constant 0 : index
    %c0_5 = arith.constant 0 : index
    %8 = vector.load %arg8[%c0_4, %c0_5] : memref<72x64xbf16, #tpu.memory_space<vmem>>, vector<8x64xbf16>
    tpu.vector_store %arg8[%c0_4, %c0_5], %7 {strides = array<i32>} : memref<72x64xbf16, #tpu.memory_space<vmem>>, vector<8x64xbf16>,
    %9 = vector.extract_strided_slice %1 {offsets = [0, 56], sizes = [8, 8], strides = [1, 1]} : vector<8x64xbf16> to vector<8x8xbf16>
    %10 = vector.extract_strided_slice %1 {offsets = [0, 0], sizes = [8, 56], strides = [1, 1]} : vector<8x64xbf16> to vector<8x56xbf16>
    %11 = tpu.concatenate %9, %10 in 1 : vector<8x8xbf16>, vector<8x56xbf16> -> vector<8x64xbf16>
    %c1 = arith.constant 1 : index
    %c0_6 = arith.constant 0 : index
    %12 = vector.load %arg1[%c1, %c0_6] : memref<9x64xbf16, #tpu.memory_space<vmem>>, vector<1x64xbf16>
    %13 = vector.broadcast %12 : vector<1x64xbf16> to vector<8x64xbf16>
    %14 = arith.mulf %11, %13 : vector<8x64xbf16>
    %c8 = arith.constant 8 : index
    %c0_7 = arith.constant 0 : index
    %15 = vector.load %arg8[%c8, %c0_7] : memref<72x64xbf16, #tpu.memory_space<vmem>>, vector<8x64xbf16>
    tpu.vector_store %arg8[%c8, %c0_7], %14 {strides = array<i32>} : memref<72x64xbf16, #tpu.memory_space<vmem>>, vector<8x64xbf16>,
    %16 = vector.extract_strided_slice %1 {offsets = [0, 57], sizes = [8, 7], strides = [1, 1]} : vector<8x64xbf16> to vector<8x7xbf16>
    %17 = vector.extract_strided_slice %1 {offsets = [0, 0], sizes = [8, 57], strides = [1, 1]} : vector<8x64xbf16> to vector<8x57xbf16>
    %18 = tpu.concatenate %16, %17 in 1 : vector<8x7xbf16>, vector<8x57xbf16> -> vector<8x64xbf16>
    %c2 = arith.constant 2 : index
    %c0_8 = arith.constant 0 : index
    %19 = vector.load %arg1[%c2, %c0_8] : memref<9x64xbf16, #tpu.memory_space<vmem>>, vector<1x64xbf16>
    %20 = vector.broadcast %19 : vector<1x64xbf16> to vector<8x64xbf16>
    %21 = arith.mulf %18, %20 : vector<8x64xbf16>
    %c16 = arith.constant 16 : index
    %c0_9 = arith.constant 0 : index
    %22 = vector.load %arg8[%c16, %c0_9] : memref<72x64xbf16, #tpu.memory_space<vmem>>, vector<8x64xbf16>
    tpu.vector_store %arg8[%c16, %c0_9], %21 {strides = array<i32>} : memref<72x64xbf16, #tpu.memory_space<vmem>>, vector<8x64xbf16>,
    %23 = vector.extract_strided_slice %1 {offsets = [0, 63], sizes = [8, 1], strides = [1, 1]} : vector<8x64xbf16> to vector<8x1xbf16>
    %24 = vector.extract_strided_slice %1 {offsets = [0, 0], sizes = [8, 63], strides = [1, 1]} : vector<8x64xbf16> to vector<8x63xbf16>
    %25 = tpu.concatenate %23, %24 in 1 : vector<8x1xbf16>, vector<8x63xbf16> -> vector<8x64xbf16>
    %c3 = arith.constant 3 : index
    %c0_10 = arith.constant 0 : index
    %26 = vector.load %arg1[%c3, %c0_10] : memref<9x64xbf16, #tpu.memory_space<vmem>>, vector<1x64xbf16>
    %27 = vector.broadcast %26 : vector<1x64xbf16> to vector<8x64xbf16>
    %28 = arith.mulf %25, %27 : vector<8x64xbf16>
    %c24 = arith.constant 24 : index
    %c0_11 = arith.constant 0 : index
    %29 = vector.load %arg8[%c24, %c0_11] : memref<72x64xbf16, #tpu.memory_space<vmem>>, vector<8x64xbf16>
    tpu.vector_store %arg8[%c24, %c0_11], %28 {strides = array<i32>} : memref<72x64xbf16, #tpu.memory_space<vmem>>, vector<8x64xbf16>,
    %c32 = arith.constant 32 : index
    %c0_12 = arith.constant 0 : index
    %30 = vector.load %arg8[%c32, %c0_12] : memref<72x64xbf16, #tpu.memory_space<vmem>>, vector<8x64xbf16>
    tpu.vector_store %arg8[%c32, %c0_12], %1 {strides = array<i32>} : memref<72x64xbf16, #tpu.memory_space<vmem>>, vector<8x64xbf16>,
    %31 = vector.extract_strided_slice %1 {offsets = [0, 1], sizes = [8, 63], strides = [1, 1]} : vector<8x64xbf16> to vector<8x63xbf16>
    %32 = vector.extract_strided_slice %1 {offsets = [0, 0], sizes = [8, 1], strides = [1, 1]} : vector<8x64xbf16> to vector<8x1xbf16>
    %33 = tpu.concatenate %31, %32 in 1 : vector<8x63xbf16>, vector<8x1xbf16> -> vector<8x64xbf16>
    %c5 = arith.constant 5 : index
    %c0_13 = arith.constant 0 : index
    %34 = vector.load %arg1[%c5, %c0_13] : memref<9x64xbf16, #tpu.memory_space<vmem>>, vector<1x64xbf16>
    %35 = vector.broadcast %34 : vector<1x64xbf16> to vector<8x64xbf16>
    %36 = arith.mulf %33, %35 : vector<8x64xbf16>
    %c40 = arith.constant 40 : index
    %c0_14 = arith.constant 0 : index
    %37 = vector.load %arg8[%c40, %c0_14] : memref<72x64xbf16, #tpu.memory_space<vmem>>, vector<8x64xbf16>
    tpu.vector_store %arg8[%c40, %c0_14], %36 {strides = array<i32>} : memref<72x64xbf16, #tpu.memory_space<vmem>>, vector<8x64xbf16>,
    %38 = vector.extract_strided_slice %1 {offsets = [0, 7], sizes = [8, 57], strides = [1, 1]} : vector<8x64xbf16> to vector<8x57xbf16>
    %39 = vector.extract_strided_slice %1 {offsets = [0, 0], sizes = [8, 7], strides = [1, 1]} : vector<8x64xbf16> to vector<8x7xbf16>
    %40 = tpu.concatenate %38, %39 in 1 : vector<8x57xbf16>, vector<8x7xbf16> -> vector<8x64xbf16>
    %c6 = arith.constant 6 : index
    %c0_15 = arith.constant 0 : index
    %41 = vector.load %arg1[%c6, %c0_15] : memref<9x64xbf16, #tpu.memory_space<vmem>>, vector<1x64xbf16>
    %42 = vector.broadcast %41 : vector<1x64xbf16> to vector<8x64xbf16>
    %43 = arith.mulf %40, %42 : vector<8x64xbf16>
    %c48 = arith.constant 48 : index
    %c0_16 = arith.constant 0 : index
    %44 = vector.load %arg8[%c48, %c0_16] : memref<72x64xbf16, #tpu.memory_space<vmem>>, vector<8x64xbf16>
    tpu.vector_store %arg8[%c48, %c0_16], %43 {strides = array<i32>} : memref<72x64xbf16, #tpu.memory_space<vmem>>, vector<8x64xbf16>,
    %45 = vector.extract_strided_slice %1 {offsets = [0, 8], sizes = [8, 56], strides = [1, 1]} : vector<8x64xbf16> to vector<8x56xbf16>
    %46 = vector.extract_strided_slice %1 {offsets = [0, 0], sizes = [8, 8], strides = [1, 1]} : vector<8x64xbf16> to vector<8x8xbf16>
    %47 = tpu.concatenate %45, %46 in 1 : vector<8x56xbf16>, vector<8x8xbf16> -> vector<8x64xbf16>
    %c7 = arith.constant 7 : index
    %c0_17 = arith.constant 0 : index
    %48 = vector.load %arg1[%c7, %c0_17] : memref<9x64xbf16, #tpu.memory_space<vmem>>, vector<1x64xbf16>
    %49 = vector.broadcast %48 : vector<1x64xbf16> to vector<8x64xbf16>
    %50 = arith.mulf %47, %49 : vector<8x64xbf16>
    %c56 = arith.constant 56 : index
    %c0_18 = arith.constant 0 : index
    %51 = vector.load %arg8[%c56, %c0_18] : memref<72x64xbf16, #tpu.memory_space<vmem>>, vector<8x64xbf16>
    tpu.vector_store %arg8[%c56, %c0_18], %50 {strides = array<i32>} : memref<72x64xbf16, #tpu.memory_space<vmem>>, vector<8x64xbf16>,
    %52 = vector.extract_strided_slice %1 {offsets = [0, 9], sizes = [8, 55], strides = [1, 1]} : vector<8x64xbf16> to vector<8x55xbf16>
    %53 = vector.extract_strided_slice %1 {offsets = [0, 0], sizes = [8, 9], strides = [1, 1]} : vector<8x64xbf16> to vector<8x9xbf16>
    %54 = tpu.concatenate %52, %53 in 1 : vector<8x55xbf16>, vector<8x9xbf16> -> vector<8x64xbf16>
    %c8_19 = arith.constant 8 : index
    %c0_20 = arith.constant 0 : index
    %55 = vector.load %arg1[%c8_19, %c0_20] : memref<9x64xbf16, #tpu.memory_space<vmem>>, vector<1x64xbf16>
    %56 = vector.broadcast %55 : vector<1x64xbf16> to vector<8x64xbf16>
    %57 = arith.mulf %54, %56 : vector<8x64xbf16>
    %c64 = arith.constant 64 : index
    %c0_21 = arith.constant 0 : index
    %58 = vector.load %arg8[%c64, %c0_21] : memref<72x64xbf16, #tpu.memory_space<vmem>>, vector<8x64xbf16>
    tpu.vector_store %arg8[%c64, %c0_21], %57 {strides = array<i32>} : memref<72x64xbf16, #tpu.memory_space<vmem>>, vector<8x64xbf16>,
    %c0_22 = arith.constant 0 : index
    %c0_23 = arith.constant 0 : index
    %59 = vector.load %arg3[%c0_22, %c0_23] : memref<16x72xbf16, #tpu.memory_space<vmem>>, vector<16x72xbf16>
    %c0_24 = arith.constant 0 : index
    %c0_25 = arith.constant 0 : index
    %60 = vector.load %arg8[%c0_24, %c0_25] : memref<72x64xbf16, #tpu.memory_space<vmem>>, vector<72x64xbf16>
    %cst = arith.constant dense<0.000000e+00> : vector<16x64xf32>
    %61 = tpu.matmul %59, %60, %cst {dimension_numbers = #tpu.dot_dimension_numbers<[1], [0], [0], [1], [0, 0, 1, 1], [], []>} : vector<16x72xbf16>, vector<72x64xbf16>, vector<16x64xf32> -> vector<16x64xf32>
    %c0_26 = arith.constant 0 : index
    %c0_27 = arith.constant 0 : index
    %62 = vector.load %arg4[%c0_26, %c0_27] : memref<16x1xf32, #tpu.memory_space<vmem>>, vector<16x1xf32>
    %63 = vector.broadcast %62 : vector<16x1xf32> to vector<16x64xf32>
    %64 = arith.addf %61, %63 : vector<16x64xf32>
    %cst_28 = arith.constant 0.000000e+00 : f32
    %65 = vector.broadcast %cst_28 : f32 to vector<16x64xf32>
    %66 = arith.maximumf %64, %65 : vector<16x64xf32>
    %67 = vector.extract_strided_slice %66 {offsets = [0, 55], sizes = [16, 9], strides = [1, 1]} : vector<16x64xf32> to vector<16x9xf32>
    %68 = vector.extract_strided_slice %66 {offsets = [0, 0], sizes = [16, 55], strides = [1, 1]} : vector<16x64xf32> to vector<16x55xf32>
    %69 = tpu.concatenate %67, %68 in 1 : vector<16x9xf32>, vector<16x55xf32> -> vector<16x64xf32>
    %c0_29 = arith.constant 0 : index
    %c0_30 = arith.constant 0 : index
    %70 = vector.load %arg1[%c0_29, %c0_30] : memref<9x64xbf16, #tpu.memory_space<vmem>>, vector<1x64xbf16>
    %71 = arith.extf %70 : vector<1x64xbf16> to vector<1x64xf32>
    %72 = vector.broadcast %71 : vector<1x64xf32> to vector<16x64xf32>
    %73 = arith.mulf %69, %72 : vector<16x64xf32>
    %74 = arith.truncf %73 : vector<16x64xf32> to vector<16x64xbf16>
    %c0_31 = arith.constant 0 : index
    %c0_32 = arith.constant 0 : index
    %75 = vector.load %arg9[%c0_31, %c0_32] : memref<144x64xbf16, #tpu.memory_space<vmem>>, vector<16x64xbf16>
    tpu.vector_store %arg9[%c0_31, %c0_32], %74 {strides = array<i32>} : memref<144x64xbf16, #tpu.memory_space<vmem>>, vector<16x64xbf16>,
    %76 = vector.extract_strided_slice %66 {offsets = [0, 56], sizes = [16, 8], strides = [1, 1]} : vector<16x64xf32> to vector<16x8xf32>
    %77 = vector.extract_strided_slice %66 {offsets = [0, 0], sizes = [16, 56], strides = [1, 1]} : vector<16x64xf32> to vector<16x56xf32>
    %78 = tpu.concatenate %76, %77 in 1 : vector<16x8xf32>, vector<16x56xf32> -> vector<16x64xf32>
    %c1_33 = arith.constant 1 : index
    %c0_34 = arith.constant 0 : index
    %79 = vector.load %arg1[%c1_33, %c0_34] : memref<9x64xbf16, #tpu.memory_space<vmem>>, vector<1x64xbf16>
    %80 = arith.extf %79 : vector<1x64xbf16> to vector<1x64xf32>
    %81 = vector.broadcast %80 : vector<1x64xf32> to vector<16x64xf32>
    %82 = arith.mulf %78, %81 : vector<16x64xf32>
    %83 = arith.truncf %82 : vector<16x64xf32> to vector<16x64xbf16>
    %c16_35 = arith.constant 16 : index
    %c0_36 = arith.constant 0 : index
    %84 = vector.load %arg9[%c16_35, %c0_36] : memref<144x64xbf16, #tpu.memory_space<vmem>>, vector<16x64xbf16>
    tpu.vector_store %arg9[%c16_35, %c0_36], %83 {strides = array<i32>} : memref<144x64xbf16, #tpu.memory_space<vmem>>, vector<16x64xbf16>,
    %85 = vector.extract_strided_slice %66 {offsets = [0, 57], sizes = [16, 7], strides = [1, 1]} : vector<16x64xf32> to vector<16x7xf32>
    %86 = vector.extract_strided_slice %66 {offsets = [0, 0], sizes = [16, 57], strides = [1, 1]} : vector<16x64xf32> to vector<16x57xf32>
    %87 = tpu.concatenate %85, %86 in 1 : vector<16x7xf32>, vector<16x57xf32> -> vector<16x64xf32>
    %c2_37 = arith.constant 2 : index
    %c0_38 = arith.constant 0 : index
    %88 = vector.load %arg1[%c2_37, %c0_38] : memref<9x64xbf16, #tpu.memory_space<vmem>>, vector<1x64xbf16>
    %89 = arith.extf %88 : vector<1x64xbf16> to vector<1x64xf32>
    %90 = vector.broadcast %89 : vector<1x64xf32> to vector<16x64xf32>
    %91 = arith.mulf %87, %90 : vector<16x64xf32>
    %92 = arith.truncf %91 : vector<16x64xf32> to vector<16x64xbf16>
    %c32_39 = arith.constant 32 : index
    %c0_40 = arith.constant 0 : index
    %93 = vector.load %arg9[%c32_39, %c0_40] : memref<144x64xbf16, #tpu.memory_space<vmem>>, vector<16x64xbf16>
    tpu.vector_store %arg9[%c32_39, %c0_40], %92 {strides = array<i32>} : memref<144x64xbf16, #tpu.memory_space<vmem>>, vector<16x64xbf16>,
    %94 = vector.extract_strided_slice %66 {offsets = [0, 63], sizes = [16, 1], strides = [1, 1]} : vector<16x64xf32> to vector<16x1xf32>
    %95 = vector.extract_strided_slice %66 {offsets = [0, 0], sizes = [16, 63], strides = [1, 1]} : vector<16x64xf32> to vector<16x63xf32>
    %96 = tpu.concatenate %94, %95 in 1 : vector<16x1xf32>, vector<16x63xf32> -> vector<16x64xf32>
    %c3_41 = arith.constant 3 : index
    %c0_42 = arith.constant 0 : index
    %97 = vector.load %arg1[%c3_41, %c0_42] : memref<9x64xbf16, #tpu.memory_space<vmem>>, vector<1x64xbf16>
    %98 = arith.extf %97 : vector<1x64xbf16> to vector<1x64xf32>
    %99 = vector.broadcast %98 : vector<1x64xf32> to vector<16x64xf32>
    %100 = arith.mulf %96, %99 : vector<16x64xf32>
    %101 = arith.truncf %100 : vector<16x64xf32> to vector<16x64xbf16>
    %c48_43 = arith.constant 48 : index
    %c0_44 = arith.constant 0 : index
    %102 = vector.load %arg9[%c48_43, %c0_44] : memref<144x64xbf16, #tpu.memory_space<vmem>>, vector<16x64xbf16>
    tpu.vector_store %arg9[%c48_43, %c0_44], %101 {strides = array<i32>} : memref<144x64xbf16, #tpu.memory_space<vmem>>, vector<16x64xbf16>,
    %103 = arith.truncf %66 : vector<16x64xf32> to vector<16x64xbf16>
    %c64_45 = arith.constant 64 : index
    %c0_46 = arith.constant 0 : index
    %104 = vector.load %arg9[%c64_45, %c0_46] : memref<144x64xbf16, #tpu.memory_space<vmem>>, vector<16x64xbf16>
    tpu.vector_store %arg9[%c64_45, %c0_46], %103 {strides = array<i32>} : memref<144x64xbf16, #tpu.memory_space<vmem>>, vector<16x64xbf16>,
    %105 = vector.extract_strided_slice %66 {offsets = [0, 1], sizes = [16, 63], strides = [1, 1]} : vector<16x64xf32> to vector<16x63xf32>
    %106 = vector.extract_strided_slice %66 {offsets = [0, 0], sizes = [16, 1], strides = [1, 1]} : vector<16x64xf32> to vector<16x1xf32>
    %107 = tpu.concatenate %105, %106 in 1 : vector<16x63xf32>, vector<16x1xf32> -> vector<16x64xf32>
    %c5_47 = arith.constant 5 : index
    %c0_48 = arith.constant 0 : index
    %108 = vector.load %arg1[%c5_47, %c0_48] : memref<9x64xbf16, #tpu.memory_space<vmem>>, vector<1x64xbf16>
    %109 = arith.extf %108 : vector<1x64xbf16> to vector<1x64xf32>
    %110 = vector.broadcast %109 : vector<1x64xf32> to vector<16x64xf32>
    %111 = arith.mulf %107, %110 : vector<16x64xf32>
    %112 = arith.truncf %111 : vector<16x64xf32> to vector<16x64xbf16>
    %c80 = arith.constant 80 : index
    %c0_49 = arith.constant 0 : index
    %113 = vector.load %arg9[%c80, %c0_49] : memref<144x64xbf16, #tpu.memory_space<vmem>>, vector<16x64xbf16>
    tpu.vector_store %arg9[%c80, %c0_49], %112 {strides = array<i32>} : memref<144x64xbf16, #tpu.memory_space<vmem>>, vector<16x64xbf16>,
    %114 = vector.extract_strided_slice %66 {offsets = [0, 7], sizes = [16, 57], strides = [1, 1]} : vector<16x64xf32> to vector<16x57xf32>
    %115 = vector.extract_strided_slice %66 {offsets = [0, 0], sizes = [16, 7], strides = [1, 1]} : vector<16x64xf32> to vector<16x7xf32>
    %116 = tpu.concatenate %114, %115 in 1 : vector<16x57xf32>, vector<16x7xf32> -> vector<16x64xf32>
    %c6_50 = arith.constant 6 : index
    %c0_51 = arith.constant 0 : index
    %117 = vector.load %arg1[%c6_50, %c0_51] : memref<9x64xbf16, #tpu.memory_space<vmem>>, vector<1x64xbf16>
    %118 = arith.extf %117 : vector<1x64xbf16> to vector<1x64xf32>
    %119 = vector.broadcast %118 : vector<1x64xf32> to vector<16x64xf32>
    %120 = arith.mulf %116, %119 : vector<16x64xf32>
    %121 = arith.truncf %120 : vector<16x64xf32> to vector<16x64xbf16>
    %c96 = arith.constant 96 : index
    %c0_52 = arith.constant 0 : index
    %122 = vector.load %arg9[%c96, %c0_52] : memref<144x64xbf16, #tpu.memory_space<vmem>>, vector<16x64xbf16>
    tpu.vector_store %arg9[%c96, %c0_52], %121 {strides = array<i32>} : memref<144x64xbf16, #tpu.memory_space<vmem>>, vector<16x64xbf16>,
    %123 = vector.extract_strided_slice %66 {offsets = [0, 8], sizes = [16, 56], strides = [1, 1]} : vector<16x64xf32> to vector<16x56xf32>
    %124 = vector.extract_strided_slice %66 {offsets = [0, 0], sizes = [16, 8], strides = [1, 1]} : vector<16x64xf32> to vector<16x8xf32>
    %125 = tpu.concatenate %123, %124 in 1 : vector<16x56xf32>, vector<16x8xf32> -> vector<16x64xf32>
    %c7_53 = arith.constant 7 : index
    %c0_54 = arith.constant 0 : index
    %126 = vector.load %arg1[%c7_53, %c0_54] : memref<9x64xbf16, #tpu.memory_space<vmem>>, vector<1x64xbf16>
    %127 = arith.extf %126 : vector<1x64xbf16> to vector<1x64xf32>
    %128 = vector.broadcast %127 : vector<1x64xf32> to vector<16x64xf32>
    %129 = arith.mulf %125, %128 : vector<16x64xf32>
    %130 = arith.truncf %129 : vector<16x64xf32> to vector<16x64xbf16>
    %c112 = arith.constant 112 : index
    %c0_55 = arith.constant 0 : index
    %131 = vector.load %arg9[%c112, %c0_55] : memref<144x64xbf16, #tpu.memory_space<vmem>>, vector<16x64xbf16>
    tpu.vector_store %arg9[%c112, %c0_55], %130 {strides = array<i32>} : memref<144x64xbf16, #tpu.memory_space<vmem>>, vector<16x64xbf16>,
    %132 = vector.extract_strided_slice %66 {offsets = [0, 9], sizes = [16, 55], strides = [1, 1]} : vector<16x64xf32> to vector<16x55xf32>
    %133 = vector.extract_strided_slice %66 {offsets = [0, 0], sizes = [16, 9], strides = [1, 1]} : vector<16x64xf32> to vector<16x9xf32>
    %134 = tpu.concatenate %132, %133 in 1 : vector<16x55xf32>, vector<16x9xf32> -> vector<16x64xf32>
    %c8_56 = arith.constant 8 : index
    %c0_57 = arith.constant 0 : index
    %135 = vector.load %arg1[%c8_56, %c0_57] : memref<9x64xbf16, #tpu.memory_space<vmem>>, vector<1x64xbf16>
    %136 = arith.extf %135 : vector<1x64xbf16> to vector<1x64xf32>
    %137 = vector.broadcast %136 : vector<1x64xf32> to vector<16x64xf32>
    %138 = arith.mulf %134, %137 : vector<16x64xf32>
    %139 = arith.truncf %138 : vector<16x64xf32> to vector<16x64xbf16>
    %c128 = arith.constant 128 : index
    %c0_58 = arith.constant 0 : index
    %140 = vector.load %arg9[%c128, %c0_58] : memref<144x64xbf16, #tpu.memory_space<vmem>>, vector<16x64xbf16>
    tpu.vector_store %arg9[%c128, %c0_58], %139 {strides = array<i32>} : memref<144x64xbf16, #tpu.memory_space<vmem>>, vector<16x64xbf16>,
    %c0_59 = arith.constant 0 : index
    %c0_60 = arith.constant 0 : index
    %141 = vector.load %arg5[%c0_59, %c0_60] : memref<16x144xbf16, #tpu.memory_space<vmem>>, vector<16x144xbf16>
    %c0_61 = arith.constant 0 : index
    %c0_62 = arith.constant 0 : index
    %142 = vector.load %arg9[%c0_61, %c0_62] : memref<144x64xbf16, #tpu.memory_space<vmem>>, vector<144x64xbf16>
    %cst_63 = arith.constant dense<0.000000e+00> : vector<16x64xf32>
    %143 = tpu.matmul %141, %142, %cst_63 {dimension_numbers = #tpu.dot_dimension_numbers<[1], [0], [0], [1], [0, 0, 1, 1], [], []>} : vector<16x144xbf16>, vector<144x64xbf16>, vector<16x64xf32> -> vector<16x64xf32>
    %c0_64 = arith.constant 0 : index
    %c0_65 = arith.constant 0 : index
    %144 = vector.load %arg6[%c0_64, %c0_65] : memref<16x1xf32, #tpu.memory_space<vmem>>, vector<16x1xf32>
    %145 = vector.broadcast %144 : vector<16x1xf32> to vector<16x64xf32>
    %146 = arith.addf %143, %145 : vector<16x64xf32>
    %cst_66 = arith.constant 0.000000e+00 : f32
    %147 = vector.broadcast %cst_66 : f32 to vector<16x64xf32>
    %148 = arith.maximumf %146, %147 : vector<16x64xf32>
    %149 = arith.truncf %148 : vector<16x64xf32> to vector<16x64xbf16>
    %c0_67 = arith.constant 0 : index
    %c0_68 = arith.constant 0 : index
    %c0_69 = arith.constant 0 : index
    %150 = vector.load %arg7[%c0_67, %c0_68, %c0_69] : memref<1x16x64xbf16, #tpu.memory_space<vmem>>, vector<1x16x64xbf16>
    %151 = vector.shape_cast %150 : vector<1x16x64xbf16> to vector<16x64xbf16>
    %152 = vector.shape_cast %149 : vector<16x64xbf16> to vector<1x16x64xbf16>
    tpu.vector_store %arg7[%c0_67, %c0_68, %c0_69], %152 {strides = array<i32>} : memref<1x16x64xbf16, #tpu.memory_space<vmem>>, vector<1x16x64xbf16>,
    return
  }
  func.func @transform_0(%arg0: i32) -> (i32, i32) {
    %c0_i32 = arith.constant 0 : i32
    %c0_i32_0 = arith.constant 0 : i32
    %c0_i32_1 = arith.constant 0 : i32
    return %c0_i32, %c0_i32_0 : i32, i32
  }
  func.func @transform_1(%arg0: i32) -> (i32, i32, i32) {
    %c0_i32 = arith.constant 0 : i32
    %c0_i32_0 = arith.constant 0 : i32
    %c0_i32_1 = arith.constant 0 : i32
    return %arg0, %c0_i32, %c0_i32_0 : i32, i32, i32
  }
  func.func @transform_2(%arg0: i32) -> (i32, i32) {
    %c0_i32 = arith.constant 0 : i32
    %c0_i32_0 = arith.constant 0 : i32
    %c0_i32_1 = arith.constant 0 : i32
    return %c0_i32, %c0_i32_0 : i32, i32
  }
  func.func @transform_3(%arg0: i32) -> (i32, i32) {
    %c0_i32 = arith.constant 0 : i32
    %c0_i32_0 = arith.constant 0 : i32
    %c0_i32_1 = arith.constant 0 : i32
    return %c0_i32, %c0_i32_0 : i32, i32
  }
  func.func @transform_4(%arg0: i32) -> (i32, i32) {
    %c0_i32 = arith.constant 0 : i32
    %c0_i32_0 = arith.constant 0 : i32
    %c0_i32_1 = arith.constant 0 : i32
    return %c0_i32, %c0_i32_0 : i32, i32
  }
  func.func @transform_5(%arg0: i32) -> (i32, i32) {
    %c0_i32 = arith.constant 0 : i32
    %c0_i32_0 = arith.constant 0 : i32
    %c0_i32_1 = arith.constant 0 : i32
    return %c0_i32, %c0_i32_0 : i32, i32
  }
  func.func @transform_6(%arg0: i32) -> (i32, i32, i32) {
    %c0_i32 = arith.constant 0 : i32
    %c0_i32_0 = arith.constant 0 : i32
    %c0_i32_1 = arith.constant 0 : i32
    return %arg0, %c0_i32, %c0_i32_0 : i32, i32, i32
  }
}

module attributes {stable_mosaic.version = 11 : i64} {
  func.func @_fused_double_conv_kernel(%arg0: i32, %arg1: memref<9x16xbf16, #tpu.memory_space<vmem>>, %arg2: memref<1x16x16xbf16, #tpu.memory_space<vmem>>, %arg3: memref<32x144xbf16, #tpu.memory_space<vmem>>, %arg4: memref<32x1xf32, #tpu.memory_space<vmem>>, %arg5: memref<32x288xbf16, #tpu.memory_space<vmem>>, %arg6: memref<32x1xf32, #tpu.memory_space<vmem>>, %arg7: memref<1x32x16xbf16, #tpu.memory_space<vmem>>, %arg8: memref<144x16xbf16, #tpu.memory_space<vmem>>, %arg9: memref<288x16xbf16, #tpu.memory_space<vmem>>) attributes {dimension_semantics = [#tpu.dimension_semantics<parallel>], iteration_bounds = array<i64: 2>, scalar_prefetch = 0 : i64, scratch_operands = 2 : i64, tpu.core_type = #tpu.core_type<tc>, window_params = [{pipeline_mode = #tpu.pipeline_mode<synchronous>, transform_indices = @transform_0, window_bounds = array<i64: 9, 16>}, {transform_indices = @transform_1, window_bounds = array<i64: 1, 16, 16>}, {pipeline_mode = #tpu.pipeline_mode<synchronous>, transform_indices = @transform_2, window_bounds = array<i64: 32, 144>}, {pipeline_mode = #tpu.pipeline_mode<synchronous>, transform_indices = @transform_3, window_bounds = array<i64: 32, 1>}, {pipeline_mode = #tpu.pipeline_mode<synchronous>, transform_indices = @transform_4, window_bounds = array<i64: 32, 288>}, {pipeline_mode = #tpu.pipeline_mode<synchronous>, transform_indices = @transform_5, window_bounds = array<i64: 32, 1>}, {transform_indices = @transform_6, window_bounds = array<i64: 1, 32, 16>}]} {
    %c0 = arith.constant 0 : index
    %c0_0 = arith.constant 0 : index
    %c0_1 = arith.constant 0 : index
    %0 = vector.load %arg2[%c0, %c0_0, %c0_1] : memref<1x16x16xbf16, #tpu.memory_space<vmem>>, vector<1x16x16xbf16>
    %1 = vector.shape_cast %0 : vector<1x16x16xbf16> to vector<16x16xbf16>
    %2 = vector.extract_strided_slice %1 {offsets = [0, 11], sizes = [16, 5], strides = [1, 1]} : vector<16x16xbf16> to vector<16x5xbf16>
    %3 = vector.extract_strided_slice %1 {offsets = [0, 0], sizes = [16, 11], strides = [1, 1]} : vector<16x16xbf16> to vector<16x11xbf16>
    %4 = tpu.concatenate %2, %3 in 1 : vector<16x5xbf16>, vector<16x11xbf16> -> vector<16x16xbf16>
    %c0_2 = arith.constant 0 : index
    %c0_3 = arith.constant 0 : index
    %5 = vector.load %arg1[%c0_2, %c0_3] : memref<9x16xbf16, #tpu.memory_space<vmem>>, vector<1x16xbf16>
    %6 = vector.broadcast %5 : vector<1x16xbf16> to vector<16x16xbf16>
    %7 = arith.mulf %4, %6 : vector<16x16xbf16>
    %c0_4 = arith.constant 0 : index
    %c0_5 = arith.constant 0 : index
    %8 = vector.load %arg8[%c0_4, %c0_5] : memref<144x16xbf16, #tpu.memory_space<vmem>>, vector<16x16xbf16>
    tpu.vector_store %arg8[%c0_4, %c0_5], %7 {strides = array<i32>} : memref<144x16xbf16, #tpu.memory_space<vmem>>, vector<16x16xbf16>,
    %9 = vector.extract_strided_slice %1 {offsets = [0, 12], sizes = [16, 4], strides = [1, 1]} : vector<16x16xbf16> to vector<16x4xbf16>
    %10 = vector.extract_strided_slice %1 {offsets = [0, 0], sizes = [16, 12], strides = [1, 1]} : vector<16x16xbf16> to vector<16x12xbf16>
    %11 = tpu.concatenate %9, %10 in 1 : vector<16x4xbf16>, vector<16x12xbf16> -> vector<16x16xbf16>
    %c1 = arith.constant 1 : index
    %c0_6 = arith.constant 0 : index
    %12 = vector.load %arg1[%c1, %c0_6] : memref<9x16xbf16, #tpu.memory_space<vmem>>, vector<1x16xbf16>
    %13 = vector.broadcast %12 : vector<1x16xbf16> to vector<16x16xbf16>
    %14 = arith.mulf %11, %13 : vector<16x16xbf16>
    %c16 = arith.constant 16 : index
    %c0_7 = arith.constant 0 : index
    %15 = vector.load %arg8[%c16, %c0_7] : memref<144x16xbf16, #tpu.memory_space<vmem>>, vector<16x16xbf16>
    tpu.vector_store %arg8[%c16, %c0_7], %14 {strides = array<i32>} : memref<144x16xbf16, #tpu.memory_space<vmem>>, vector<16x16xbf16>,
    %16 = vector.extract_strided_slice %1 {offsets = [0, 13], sizes = [16, 3], strides = [1, 1]} : vector<16x16xbf16> to vector<16x3xbf16>
    %17 = vector.extract_strided_slice %1 {offsets = [0, 0], sizes = [16, 13], strides = [1, 1]} : vector<16x16xbf16> to vector<16x13xbf16>
    %18 = tpu.concatenate %16, %17 in 1 : vector<16x3xbf16>, vector<16x13xbf16> -> vector<16x16xbf16>
    %c2 = arith.constant 2 : index
    %c0_8 = arith.constant 0 : index
    %19 = vector.load %arg1[%c2, %c0_8] : memref<9x16xbf16, #tpu.memory_space<vmem>>, vector<1x16xbf16>
    %20 = vector.broadcast %19 : vector<1x16xbf16> to vector<16x16xbf16>
    %21 = arith.mulf %18, %20 : vector<16x16xbf16>
    %c32 = arith.constant 32 : index
    %c0_9 = arith.constant 0 : index
    %22 = vector.load %arg8[%c32, %c0_9] : memref<144x16xbf16, #tpu.memory_space<vmem>>, vector<16x16xbf16>
    tpu.vector_store %arg8[%c32, %c0_9], %21 {strides = array<i32>} : memref<144x16xbf16, #tpu.memory_space<vmem>>, vector<16x16xbf16>,
    %23 = vector.extract_strided_slice %1 {offsets = [0, 15], sizes = [16, 1], strides = [1, 1]} : vector<16x16xbf16> to vector<16x1xbf16>
    %24 = vector.extract_strided_slice %1 {offsets = [0, 0], sizes = [16, 15], strides = [1, 1]} : vector<16x16xbf16> to vector<16x15xbf16>
    %25 = tpu.concatenate %23, %24 in 1 : vector<16x1xbf16>, vector<16x15xbf16> -> vector<16x16xbf16>
    %c3 = arith.constant 3 : index
    %c0_10 = arith.constant 0 : index
    %26 = vector.load %arg1[%c3, %c0_10] : memref<9x16xbf16, #tpu.memory_space<vmem>>, vector<1x16xbf16>
    %27 = vector.broadcast %26 : vector<1x16xbf16> to vector<16x16xbf16>
    %28 = arith.mulf %25, %27 : vector<16x16xbf16>
    %c48 = arith.constant 48 : index
    %c0_11 = arith.constant 0 : index
    %29 = vector.load %arg8[%c48, %c0_11] : memref<144x16xbf16, #tpu.memory_space<vmem>>, vector<16x16xbf16>
    tpu.vector_store %arg8[%c48, %c0_11], %28 {strides = array<i32>} : memref<144x16xbf16, #tpu.memory_space<vmem>>, vector<16x16xbf16>,
    %c64 = arith.constant 64 : index
    %c0_12 = arith.constant 0 : index
    %30 = vector.load %arg8[%c64, %c0_12] : memref<144x16xbf16, #tpu.memory_space<vmem>>, vector<16x16xbf16>
    tpu.vector_store %arg8[%c64, %c0_12], %1 {strides = array<i32>} : memref<144x16xbf16, #tpu.memory_space<vmem>>, vector<16x16xbf16>,
    %31 = vector.extract_strided_slice %1 {offsets = [0, 1], sizes = [16, 15], strides = [1, 1]} : vector<16x16xbf16> to vector<16x15xbf16>
    %32 = vector.extract_strided_slice %1 {offsets = [0, 0], sizes = [16, 1], strides = [1, 1]} : vector<16x16xbf16> to vector<16x1xbf16>
    %33 = tpu.concatenate %31, %32 in 1 : vector<16x15xbf16>, vector<16x1xbf16> -> vector<16x16xbf16>
    %c5 = arith.constant 5 : index
    %c0_13 = arith.constant 0 : index
    %34 = vector.load %arg1[%c5, %c0_13] : memref<9x16xbf16, #tpu.memory_space<vmem>>, vector<1x16xbf16>
    %35 = vector.broadcast %34 : vector<1x16xbf16> to vector<16x16xbf16>
    %36 = arith.mulf %33, %35 : vector<16x16xbf16>
    %c80 = arith.constant 80 : index
    %c0_14 = arith.constant 0 : index
    %37 = vector.load %arg8[%c80, %c0_14] : memref<144x16xbf16, #tpu.memory_space<vmem>>, vector<16x16xbf16>
    tpu.vector_store %arg8[%c80, %c0_14], %36 {strides = array<i32>} : memref<144x16xbf16, #tpu.memory_space<vmem>>, vector<16x16xbf16>,
    %38 = vector.extract_strided_slice %1 {offsets = [0, 3], sizes = [16, 13], strides = [1, 1]} : vector<16x16xbf16> to vector<16x13xbf16>
    %39 = vector.extract_strided_slice %1 {offsets = [0, 0], sizes = [16, 3], strides = [1, 1]} : vector<16x16xbf16> to vector<16x3xbf16>
    %40 = tpu.concatenate %38, %39 in 1 : vector<16x13xbf16>, vector<16x3xbf16> -> vector<16x16xbf16>
    %c6 = arith.constant 6 : index
    %c0_15 = arith.constant 0 : index
    %41 = vector.load %arg1[%c6, %c0_15] : memref<9x16xbf16, #tpu.memory_space<vmem>>, vector<1x16xbf16>
    %42 = vector.broadcast %41 : vector<1x16xbf16> to vector<16x16xbf16>
    %43 = arith.mulf %40, %42 : vector<16x16xbf16>
    %c96 = arith.constant 96 : index
    %c0_16 = arith.constant 0 : index
    %44 = vector.load %arg8[%c96, %c0_16] : memref<144x16xbf16, #tpu.memory_space<vmem>>, vector<16x16xbf16>
    tpu.vector_store %arg8[%c96, %c0_16], %43 {strides = array<i32>} : memref<144x16xbf16, #tpu.memory_space<vmem>>, vector<16x16xbf16>,
    %45 = vector.extract_strided_slice %1 {offsets = [0, 4], sizes = [16, 12], strides = [1, 1]} : vector<16x16xbf16> to vector<16x12xbf16>
    %46 = vector.extract_strided_slice %1 {offsets = [0, 0], sizes = [16, 4], strides = [1, 1]} : vector<16x16xbf16> to vector<16x4xbf16>
    %47 = tpu.concatenate %45, %46 in 1 : vector<16x12xbf16>, vector<16x4xbf16> -> vector<16x16xbf16>
    %c7 = arith.constant 7 : index
    %c0_17 = arith.constant 0 : index
    %48 = vector.load %arg1[%c7, %c0_17] : memref<9x16xbf16, #tpu.memory_space<vmem>>, vector<1x16xbf16>
    %49 = vector.broadcast %48 : vector<1x16xbf16> to vector<16x16xbf16>
    %50 = arith.mulf %47, %49 : vector<16x16xbf16>
    %c112 = arith.constant 112 : index
    %c0_18 = arith.constant 0 : index
    %51 = vector.load %arg8[%c112, %c0_18] : memref<144x16xbf16, #tpu.memory_space<vmem>>, vector<16x16xbf16>
    tpu.vector_store %arg8[%c112, %c0_18], %50 {strides = array<i32>} : memref<144x16xbf16, #tpu.memory_space<vmem>>, vector<16x16xbf16>,
    %52 = vector.extract_strided_slice %1 {offsets = [0, 5], sizes = [16, 11], strides = [1, 1]} : vector<16x16xbf16> to vector<16x11xbf16>
    %53 = vector.extract_strided_slice %1 {offsets = [0, 0], sizes = [16, 5], strides = [1, 1]} : vector<16x16xbf16> to vector<16x5xbf16>
    %54 = tpu.concatenate %52, %53 in 1 : vector<16x11xbf16>, vector<16x5xbf16> -> vector<16x16xbf16>
    %c8 = arith.constant 8 : index
    %c0_19 = arith.constant 0 : index
    %55 = vector.load %arg1[%c8, %c0_19] : memref<9x16xbf16, #tpu.memory_space<vmem>>, vector<1x16xbf16>
    %56 = vector.broadcast %55 : vector<1x16xbf16> to vector<16x16xbf16>
    %57 = arith.mulf %54, %56 : vector<16x16xbf16>
    %c128 = arith.constant 128 : index
    %c0_20 = arith.constant 0 : index
    %58 = vector.load %arg8[%c128, %c0_20] : memref<144x16xbf16, #tpu.memory_space<vmem>>, vector<16x16xbf16>
    tpu.vector_store %arg8[%c128, %c0_20], %57 {strides = array<i32>} : memref<144x16xbf16, #tpu.memory_space<vmem>>, vector<16x16xbf16>,
    %c0_21 = arith.constant 0 : index
    %c0_22 = arith.constant 0 : index
    %59 = vector.load %arg3[%c0_21, %c0_22] : memref<32x144xbf16, #tpu.memory_space<vmem>>, vector<32x144xbf16>
    %c0_23 = arith.constant 0 : index
    %c0_24 = arith.constant 0 : index
    %60 = vector.load %arg8[%c0_23, %c0_24] : memref<144x16xbf16, #tpu.memory_space<vmem>>, vector<144x16xbf16>
    %cst = arith.constant dense<0.000000e+00> : vector<32x16xf32>
    %61 = tpu.matmul %59, %60, %cst {dimension_numbers = #tpu.dot_dimension_numbers<[1], [0], [0], [1], [0, 0, 1, 1], [], []>} : vector<32x144xbf16>, vector<144x16xbf16>, vector<32x16xf32> -> vector<32x16xf32>
    %c0_25 = arith.constant 0 : index
    %c0_26 = arith.constant 0 : index
    %62 = vector.load %arg4[%c0_25, %c0_26] : memref<32x1xf32, #tpu.memory_space<vmem>>, vector<32x1xf32>
    %63 = vector.broadcast %62 : vector<32x1xf32> to vector<32x16xf32>
    %64 = arith.addf %61, %63 : vector<32x16xf32>
    %cst_27 = arith.constant 0.000000e+00 : f32
    %65 = vector.broadcast %cst_27 : f32 to vector<32x16xf32>
    %66 = arith.maximumf %64, %65 : vector<32x16xf32>
    %67 = vector.extract_strided_slice %66 {offsets = [0, 11], sizes = [32, 5], strides = [1, 1]} : vector<32x16xf32> to vector<32x5xf32>
    %68 = vector.extract_strided_slice %66 {offsets = [0, 0], sizes = [32, 11], strides = [1, 1]} : vector<32x16xf32> to vector<32x11xf32>
    %69 = tpu.concatenate %67, %68 in 1 : vector<32x5xf32>, vector<32x11xf32> -> vector<32x16xf32>
    %c0_28 = arith.constant 0 : index
    %c0_29 = arith.constant 0 : index
    %70 = vector.load %arg1[%c0_28, %c0_29] : memref<9x16xbf16, #tpu.memory_space<vmem>>, vector<1x16xbf16>
    %71 = arith.extf %70 : vector<1x16xbf16> to vector<1x16xf32>
    %72 = vector.broadcast %71 : vector<1x16xf32> to vector<32x16xf32>
    %73 = arith.mulf %69, %72 : vector<32x16xf32>
    %74 = arith.truncf %73 : vector<32x16xf32> to vector<32x16xbf16>
    %c0_30 = arith.constant 0 : index
    %c0_31 = arith.constant 0 : index
    %75 = vector.load %arg9[%c0_30, %c0_31] : memref<288x16xbf16, #tpu.memory_space<vmem>>, vector<32x16xbf16>
    tpu.vector_store %arg9[%c0_30, %c0_31], %74 {strides = array<i32>} : memref<288x16xbf16, #tpu.memory_space<vmem>>, vector<32x16xbf16>,
    %76 = vector.extract_strided_slice %66 {offsets = [0, 12], sizes = [32, 4], strides = [1, 1]} : vector<32x16xf32> to vector<32x4xf32>
    %77 = vector.extract_strided_slice %66 {offsets = [0, 0], sizes = [32, 12], strides = [1, 1]} : vector<32x16xf32> to vector<32x12xf32>
    %78 = tpu.concatenate %76, %77 in 1 : vector<32x4xf32>, vector<32x12xf32> -> vector<32x16xf32>
    %c1_32 = arith.constant 1 : index
    %c0_33 = arith.constant 0 : index
    %79 = vector.load %arg1[%c1_32, %c0_33] : memref<9x16xbf16, #tpu.memory_space<vmem>>, vector<1x16xbf16>
    %80 = arith.extf %79 : vector<1x16xbf16> to vector<1x16xf32>
    %81 = vector.broadcast %80 : vector<1x16xf32> to vector<32x16xf32>
    %82 = arith.mulf %78, %81 : vector<32x16xf32>
    %83 = arith.truncf %82 : vector<32x16xf32> to vector<32x16xbf16>
    %c32_34 = arith.constant 32 : index
    %c0_35 = arith.constant 0 : index
    %84 = vector.load %arg9[%c32_34, %c0_35] : memref<288x16xbf16, #tpu.memory_space<vmem>>, vector<32x16xbf16>
    tpu.vector_store %arg9[%c32_34, %c0_35], %83 {strides = array<i32>} : memref<288x16xbf16, #tpu.memory_space<vmem>>, vector<32x16xbf16>,
    %85 = vector.extract_strided_slice %66 {offsets = [0, 13], sizes = [32, 3], strides = [1, 1]} : vector<32x16xf32> to vector<32x3xf32>
    %86 = vector.extract_strided_slice %66 {offsets = [0, 0], sizes = [32, 13], strides = [1, 1]} : vector<32x16xf32> to vector<32x13xf32>
    %87 = tpu.concatenate %85, %86 in 1 : vector<32x3xf32>, vector<32x13xf32> -> vector<32x16xf32>
    %c2_36 = arith.constant 2 : index
    %c0_37 = arith.constant 0 : index
    %88 = vector.load %arg1[%c2_36, %c0_37] : memref<9x16xbf16, #tpu.memory_space<vmem>>, vector<1x16xbf16>
    %89 = arith.extf %88 : vector<1x16xbf16> to vector<1x16xf32>
    %90 = vector.broadcast %89 : vector<1x16xf32> to vector<32x16xf32>
    %91 = arith.mulf %87, %90 : vector<32x16xf32>
    %92 = arith.truncf %91 : vector<32x16xf32> to vector<32x16xbf16>
    %c64_38 = arith.constant 64 : index
    %c0_39 = arith.constant 0 : index
    %93 = vector.load %arg9[%c64_38, %c0_39] : memref<288x16xbf16, #tpu.memory_space<vmem>>, vector<32x16xbf16>
    tpu.vector_store %arg9[%c64_38, %c0_39], %92 {strides = array<i32>} : memref<288x16xbf16, #tpu.memory_space<vmem>>, vector<32x16xbf16>,
    %94 = vector.extract_strided_slice %66 {offsets = [0, 15], sizes = [32, 1], strides = [1, 1]} : vector<32x16xf32> to vector<32x1xf32>
    %95 = vector.extract_strided_slice %66 {offsets = [0, 0], sizes = [32, 15], strides = [1, 1]} : vector<32x16xf32> to vector<32x15xf32>
    %96 = tpu.concatenate %94, %95 in 1 : vector<32x1xf32>, vector<32x15xf32> -> vector<32x16xf32>
    %c3_40 = arith.constant 3 : index
    %c0_41 = arith.constant 0 : index
    %97 = vector.load %arg1[%c3_40, %c0_41] : memref<9x16xbf16, #tpu.memory_space<vmem>>, vector<1x16xbf16>
    %98 = arith.extf %97 : vector<1x16xbf16> to vector<1x16xf32>
    %99 = vector.broadcast %98 : vector<1x16xf32> to vector<32x16xf32>
    %100 = arith.mulf %96, %99 : vector<32x16xf32>
    %101 = arith.truncf %100 : vector<32x16xf32> to vector<32x16xbf16>
    %c96_42 = arith.constant 96 : index
    %c0_43 = arith.constant 0 : index
    %102 = vector.load %arg9[%c96_42, %c0_43] : memref<288x16xbf16, #tpu.memory_space<vmem>>, vector<32x16xbf16>
    tpu.vector_store %arg9[%c96_42, %c0_43], %101 {strides = array<i32>} : memref<288x16xbf16, #tpu.memory_space<vmem>>, vector<32x16xbf16>,
    %103 = arith.truncf %66 : vector<32x16xf32> to vector<32x16xbf16>
    %c128_44 = arith.constant 128 : index
    %c0_45 = arith.constant 0 : index
    %104 = vector.load %arg9[%c128_44, %c0_45] : memref<288x16xbf16, #tpu.memory_space<vmem>>, vector<32x16xbf16>
    tpu.vector_store %arg9[%c128_44, %c0_45], %103 {strides = array<i32>} : memref<288x16xbf16, #tpu.memory_space<vmem>>, vector<32x16xbf16>,
    %105 = vector.extract_strided_slice %66 {offsets = [0, 1], sizes = [32, 15], strides = [1, 1]} : vector<32x16xf32> to vector<32x15xf32>
    %106 = vector.extract_strided_slice %66 {offsets = [0, 0], sizes = [32, 1], strides = [1, 1]} : vector<32x16xf32> to vector<32x1xf32>
    %107 = tpu.concatenate %105, %106 in 1 : vector<32x15xf32>, vector<32x1xf32> -> vector<32x16xf32>
    %c5_46 = arith.constant 5 : index
    %c0_47 = arith.constant 0 : index
    %108 = vector.load %arg1[%c5_46, %c0_47] : memref<9x16xbf16, #tpu.memory_space<vmem>>, vector<1x16xbf16>
    %109 = arith.extf %108 : vector<1x16xbf16> to vector<1x16xf32>
    %110 = vector.broadcast %109 : vector<1x16xf32> to vector<32x16xf32>
    %111 = arith.mulf %107, %110 : vector<32x16xf32>
    %112 = arith.truncf %111 : vector<32x16xf32> to vector<32x16xbf16>
    %c160 = arith.constant 160 : index
    %c0_48 = arith.constant 0 : index
    %113 = vector.load %arg9[%c160, %c0_48] : memref<288x16xbf16, #tpu.memory_space<vmem>>, vector<32x16xbf16>
    tpu.vector_store %arg9[%c160, %c0_48], %112 {strides = array<i32>} : memref<288x16xbf16, #tpu.memory_space<vmem>>, vector<32x16xbf16>,
    %114 = vector.extract_strided_slice %66 {offsets = [0, 3], sizes = [32, 13], strides = [1, 1]} : vector<32x16xf32> to vector<32x13xf32>
    %115 = vector.extract_strided_slice %66 {offsets = [0, 0], sizes = [32, 3], strides = [1, 1]} : vector<32x16xf32> to vector<32x3xf32>
    %116 = tpu.concatenate %114, %115 in 1 : vector<32x13xf32>, vector<32x3xf32> -> vector<32x16xf32>
    %c6_49 = arith.constant 6 : index
    %c0_50 = arith.constant 0 : index
    %117 = vector.load %arg1[%c6_49, %c0_50] : memref<9x16xbf16, #tpu.memory_space<vmem>>, vector<1x16xbf16>
    %118 = arith.extf %117 : vector<1x16xbf16> to vector<1x16xf32>
    %119 = vector.broadcast %118 : vector<1x16xf32> to vector<32x16xf32>
    %120 = arith.mulf %116, %119 : vector<32x16xf32>
    %121 = arith.truncf %120 : vector<32x16xf32> to vector<32x16xbf16>
    %c192 = arith.constant 192 : index
    %c0_51 = arith.constant 0 : index
    %122 = vector.load %arg9[%c192, %c0_51] : memref<288x16xbf16, #tpu.memory_space<vmem>>, vector<32x16xbf16>
    tpu.vector_store %arg9[%c192, %c0_51], %121 {strides = array<i32>} : memref<288x16xbf16, #tpu.memory_space<vmem>>, vector<32x16xbf16>,
    %123 = vector.extract_strided_slice %66 {offsets = [0, 4], sizes = [32, 12], strides = [1, 1]} : vector<32x16xf32> to vector<32x12xf32>
    %124 = vector.extract_strided_slice %66 {offsets = [0, 0], sizes = [32, 4], strides = [1, 1]} : vector<32x16xf32> to vector<32x4xf32>
    %125 = tpu.concatenate %123, %124 in 1 : vector<32x12xf32>, vector<32x4xf32> -> vector<32x16xf32>
    %c7_52 = arith.constant 7 : index
    %c0_53 = arith.constant 0 : index
    %126 = vector.load %arg1[%c7_52, %c0_53] : memref<9x16xbf16, #tpu.memory_space<vmem>>, vector<1x16xbf16>
    %127 = arith.extf %126 : vector<1x16xbf16> to vector<1x16xf32>
    %128 = vector.broadcast %127 : vector<1x16xf32> to vector<32x16xf32>
    %129 = arith.mulf %125, %128 : vector<32x16xf32>
    %130 = arith.truncf %129 : vector<32x16xf32> to vector<32x16xbf16>
    %c224 = arith.constant 224 : index
    %c0_54 = arith.constant 0 : index
    %131 = vector.load %arg9[%c224, %c0_54] : memref<288x16xbf16, #tpu.memory_space<vmem>>, vector<32x16xbf16>
    tpu.vector_store %arg9[%c224, %c0_54], %130 {strides = array<i32>} : memref<288x16xbf16, #tpu.memory_space<vmem>>, vector<32x16xbf16>,
    %132 = vector.extract_strided_slice %66 {offsets = [0, 5], sizes = [32, 11], strides = [1, 1]} : vector<32x16xf32> to vector<32x11xf32>
    %133 = vector.extract_strided_slice %66 {offsets = [0, 0], sizes = [32, 5], strides = [1, 1]} : vector<32x16xf32> to vector<32x5xf32>
    %134 = tpu.concatenate %132, %133 in 1 : vector<32x11xf32>, vector<32x5xf32> -> vector<32x16xf32>
    %c8_55 = arith.constant 8 : index
    %c0_56 = arith.constant 0 : index
    %135 = vector.load %arg1[%c8_55, %c0_56] : memref<9x16xbf16, #tpu.memory_space<vmem>>, vector<1x16xbf16>
    %136 = arith.extf %135 : vector<1x16xbf16> to vector<1x16xf32>
    %137 = vector.broadcast %136 : vector<1x16xf32> to vector<32x16xf32>
    %138 = arith.mulf %134, %137 : vector<32x16xf32>
    %139 = arith.truncf %138 : vector<32x16xf32> to vector<32x16xbf16>
    %c256 = arith.constant 256 : index
    %c0_57 = arith.constant 0 : index
    %140 = vector.load %arg9[%c256, %c0_57] : memref<288x16xbf16, #tpu.memory_space<vmem>>, vector<32x16xbf16>
    tpu.vector_store %arg9[%c256, %c0_57], %139 {strides = array<i32>} : memref<288x16xbf16, #tpu.memory_space<vmem>>, vector<32x16xbf16>,
    %c0_58 = arith.constant 0 : index
    %c0_59 = arith.constant 0 : index
    %141 = vector.load %arg5[%c0_58, %c0_59] : memref<32x288xbf16, #tpu.memory_space<vmem>>, vector<32x288xbf16>
    %c0_60 = arith.constant 0 : index
    %c0_61 = arith.constant 0 : index
    %142 = vector.load %arg9[%c0_60, %c0_61] : memref<288x16xbf16, #tpu.memory_space<vmem>>, vector<288x16xbf16>
    %cst_62 = arith.constant dense<0.000000e+00> : vector<32x16xf32>
    %143 = tpu.matmul %141, %142, %cst_62 {dimension_numbers = #tpu.dot_dimension_numbers<[1], [0], [0], [1], [0, 0, 1, 1], [], []>} : vector<32x288xbf16>, vector<288x16xbf16>, vector<32x16xf32> -> vector<32x16xf32>
    %c0_63 = arith.constant 0 : index
    %c0_64 = arith.constant 0 : index
    %144 = vector.load %arg6[%c0_63, %c0_64] : memref<32x1xf32, #tpu.memory_space<vmem>>, vector<32x1xf32>
    %145 = vector.broadcast %144 : vector<32x1xf32> to vector<32x16xf32>
    %146 = arith.addf %143, %145 : vector<32x16xf32>
    %cst_65 = arith.constant 0.000000e+00 : f32
    %147 = vector.broadcast %cst_65 : f32 to vector<32x16xf32>
    %148 = arith.maximumf %146, %147 : vector<32x16xf32>
    %149 = arith.truncf %148 : vector<32x16xf32> to vector<32x16xbf16>
    %c0_66 = arith.constant 0 : index
    %c0_67 = arith.constant 0 : index
    %c0_68 = arith.constant 0 : index
    %150 = vector.load %arg7[%c0_66, %c0_67, %c0_68] : memref<1x32x16xbf16, #tpu.memory_space<vmem>>, vector<1x32x16xbf16>
    %151 = vector.shape_cast %150 : vector<1x32x16xbf16> to vector<32x16xbf16>
    %152 = vector.shape_cast %149 : vector<32x16xbf16> to vector<1x32x16xbf16>
    tpu.vector_store %arg7[%c0_66, %c0_67, %c0_68], %152 {strides = array<i32>} : memref<1x32x16xbf16, #tpu.memory_space<vmem>>, vector<1x32x16xbf16>,
    return
  }
  func.func @transform_0(%arg0: i32) -> (i32, i32) {
    %c0_i32 = arith.constant 0 : i32
    %c0_i32_0 = arith.constant 0 : i32
    %c0_i32_1 = arith.constant 0 : i32
    return %c0_i32, %c0_i32_0 : i32, i32
  }
  func.func @transform_1(%arg0: i32) -> (i32, i32, i32) {
    %c0_i32 = arith.constant 0 : i32
    %c0_i32_0 = arith.constant 0 : i32
    %c0_i32_1 = arith.constant 0 : i32
    return %arg0, %c0_i32, %c0_i32_0 : i32, i32, i32
  }
  func.func @transform_2(%arg0: i32) -> (i32, i32) {
    %c0_i32 = arith.constant 0 : i32
    %c0_i32_0 = arith.constant 0 : i32
    %c0_i32_1 = arith.constant 0 : i32
    return %c0_i32, %c0_i32_0 : i32, i32
  }
  func.func @transform_3(%arg0: i32) -> (i32, i32) {
    %c0_i32 = arith.constant 0 : i32
    %c0_i32_0 = arith.constant 0 : i32
    %c0_i32_1 = arith.constant 0 : i32
    return %c0_i32, %c0_i32_0 : i32, i32
  }
  func.func @transform_4(%arg0: i32) -> (i32, i32) {
    %c0_i32 = arith.constant 0 : i32
    %c0_i32_0 = arith.constant 0 : i32
    %c0_i32_1 = arith.constant 0 : i32
    return %c0_i32, %c0_i32_0 : i32, i32
  }
  func.func @transform_5(%arg0: i32) -> (i32, i32) {
    %c0_i32 = arith.constant 0 : i32
    %c0_i32_0 = arith.constant 0 : i32
    %c0_i32_1 = arith.constant 0 : i32
    return %c0_i32, %c0_i32_0 : i32, i32
  }
  func.func @transform_6(%arg0: i32) -> (i32, i32, i32) {
    %c0_i32 = arith.constant 0 : i32
    %c0_i32_0 = arith.constant 0 : i32
    %c0_i32_1 = arith.constant 0 : i32
    return %arg0, %c0_i32, %c0_i32_0 : i32, i32, i32
  }
}

module attributes {stable_mosaic.version = 11 : i64} {
  func.func @_fused_double_conv_kernel(%arg0: i32, %arg1: memref<9x64xbf16, #tpu.memory_space<vmem>>, %arg2: memref<1x16x64xbf16, #tpu.memory_space<vmem>>, %arg3: memref<1x32x64xbf16, #tpu.memory_space<vmem>>, %arg4: memref<16x432xbf16, #tpu.memory_space<vmem>>, %arg5: memref<16x1xf32, #tpu.memory_space<vmem>>, %arg6: memref<16x144xbf16, #tpu.memory_space<vmem>>, %arg7: memref<16x1xf32, #tpu.memory_space<vmem>>, %arg8: memref<1x16x64xbf16, #tpu.memory_space<vmem>>, %arg9: memref<432x64xbf16, #tpu.memory_space<vmem>>, %arg10: memref<144x64xbf16, #tpu.memory_space<vmem>>) attributes {dimension_semantics = [#tpu.dimension_semantics<parallel>], iteration_bounds = array<i64: 2>, scalar_prefetch = 0 : i64, scratch_operands = 2 : i64, tpu.core_type = #tpu.core_type<tc>, window_params = [{pipeline_mode = #tpu.pipeline_mode<synchronous>, transform_indices = @transform_0, window_bounds = array<i64: 9, 64>}, {transform_indices = @transform_1, window_bounds = array<i64: 1, 16, 64>}, {transform_indices = @transform_2, window_bounds = array<i64: 1, 32, 64>}, {pipeline_mode = #tpu.pipeline_mode<synchronous>, transform_indices = @transform_3, window_bounds = array<i64: 16, 432>}, {pipeline_mode = #tpu.pipeline_mode<synchronous>, transform_indices = @transform_4, window_bounds = array<i64: 16, 1>}, {pipeline_mode = #tpu.pipeline_mode<synchronous>, transform_indices = @transform_5, window_bounds = array<i64: 16, 144>}, {pipeline_mode = #tpu.pipeline_mode<synchronous>, transform_indices = @transform_6, window_bounds = array<i64: 16, 1>}, {transform_indices = @transform_7, window_bounds = array<i64: 1, 16, 64>}]} {
    %c0 = arith.constant 0 : index
    %c0_0 = arith.constant 0 : index
    %c0_1 = arith.constant 0 : index
    %0 = vector.load %arg2[%c0, %c0_0, %c0_1] : memref<1x16x64xbf16, #tpu.memory_space<vmem>>, vector<1x16x64xbf16>
    %1 = vector.shape_cast %0 : vector<1x16x64xbf16> to vector<16x64xbf16>
    %2 = vector.extract_strided_slice %1 {offsets = [0, 55], sizes = [16, 9], strides = [1, 1]} : vector<16x64xbf16> to vector<16x9xbf16>
    %3 = vector.extract_strided_slice %1 {offsets = [0, 0], sizes = [16, 55], strides = [1, 1]} : vector<16x64xbf16> to vector<16x55xbf16>
    %4 = tpu.concatenate %2, %3 in 1 : vector<16x9xbf16>, vector<16x55xbf16> -> vector<16x64xbf16>
    %c0_2 = arith.constant 0 : index
    %c0_3 = arith.constant 0 : index
    %5 = vector.load %arg1[%c0_2, %c0_3] : memref<9x64xbf16, #tpu.memory_space<vmem>>, vector<1x64xbf16>
    %6 = vector.broadcast %5 : vector<1x64xbf16> to vector<16x64xbf16>
    %7 = arith.mulf %4, %6 : vector<16x64xbf16>
    %c0_4 = arith.constant 0 : index
    %c0_5 = arith.constant 0 : index
    %8 = vector.load %arg9[%c0_4, %c0_5] : memref<432x64xbf16, #tpu.memory_space<vmem>>, vector<16x64xbf16>
    tpu.vector_store %arg9[%c0_4, %c0_5], %7 {strides = array<i32>} : memref<432x64xbf16, #tpu.memory_space<vmem>>, vector<16x64xbf16>,
    %9 = vector.extract_strided_slice %1 {offsets = [0, 56], sizes = [16, 8], strides = [1, 1]} : vector<16x64xbf16> to vector<16x8xbf16>
    %10 = vector.extract_strided_slice %1 {offsets = [0, 0], sizes = [16, 56], strides = [1, 1]} : vector<16x64xbf16> to vector<16x56xbf16>
    %11 = tpu.concatenate %9, %10 in 1 : vector<16x8xbf16>, vector<16x56xbf16> -> vector<16x64xbf16>
    %c1 = arith.constant 1 : index
    %c0_6 = arith.constant 0 : index
    %12 = vector.load %arg1[%c1, %c0_6] : memref<9x64xbf16, #tpu.memory_space<vmem>>, vector<1x64xbf16>
    %13 = vector.broadcast %12 : vector<1x64xbf16> to vector<16x64xbf16>
    %14 = arith.mulf %11, %13 : vector<16x64xbf16>
    %c48 = arith.constant 48 : index
    %c0_7 = arith.constant 0 : index
    %15 = vector.load %arg9[%c48, %c0_7] : memref<432x64xbf16, #tpu.memory_space<vmem>>, vector<16x64xbf16>
    tpu.vector_store %arg9[%c48, %c0_7], %14 {strides = array<i32>} : memref<432x64xbf16, #tpu.memory_space<vmem>>, vector<16x64xbf16>,
    %16 = vector.extract_strided_slice %1 {offsets = [0, 57], sizes = [16, 7], strides = [1, 1]} : vector<16x64xbf16> to vector<16x7xbf16>
    %17 = vector.extract_strided_slice %1 {offsets = [0, 0], sizes = [16, 57], strides = [1, 1]} : vector<16x64xbf16> to vector<16x57xbf16>
    %18 = tpu.concatenate %16, %17 in 1 : vector<16x7xbf16>, vector<16x57xbf16> -> vector<16x64xbf16>
    %c2 = arith.constant 2 : index
    %c0_8 = arith.constant 0 : index
    %19 = vector.load %arg1[%c2, %c0_8] : memref<9x64xbf16, #tpu.memory_space<vmem>>, vector<1x64xbf16>
    %20 = vector.broadcast %19 : vector<1x64xbf16> to vector<16x64xbf16>
    %21 = arith.mulf %18, %20 : vector<16x64xbf16>
    %c96 = arith.constant 96 : index
    %c0_9 = arith.constant 0 : index
    %22 = vector.load %arg9[%c96, %c0_9] : memref<432x64xbf16, #tpu.memory_space<vmem>>, vector<16x64xbf16>
    tpu.vector_store %arg9[%c96, %c0_9], %21 {strides = array<i32>} : memref<432x64xbf16, #tpu.memory_space<vmem>>, vector<16x64xbf16>,
    %23 = vector.extract_strided_slice %1 {offsets = [0, 63], sizes = [16, 1], strides = [1, 1]} : vector<16x64xbf16> to vector<16x1xbf16>
    %24 = vector.extract_strided_slice %1 {offsets = [0, 0], sizes = [16, 63], strides = [1, 1]} : vector<16x64xbf16> to vector<16x63xbf16>
    %25 = tpu.concatenate %23, %24 in 1 : vector<16x1xbf16>, vector<16x63xbf16> -> vector<16x64xbf16>
    %c3 = arith.constant 3 : index
    %c0_10 = arith.constant 0 : index
    %26 = vector.load %arg1[%c3, %c0_10] : memref<9x64xbf16, #tpu.memory_space<vmem>>, vector<1x64xbf16>
    %27 = vector.broadcast %26 : vector<1x64xbf16> to vector<16x64xbf16>
    %28 = arith.mulf %25, %27 : vector<16x64xbf16>
    %c144 = arith.constant 144 : index
    %c0_11 = arith.constant 0 : index
    %29 = vector.load %arg9[%c144, %c0_11] : memref<432x64xbf16, #tpu.memory_space<vmem>>, vector<16x64xbf16>
    tpu.vector_store %arg9[%c144, %c0_11], %28 {strides = array<i32>} : memref<432x64xbf16, #tpu.memory_space<vmem>>, vector<16x64xbf16>,
    %c192 = arith.constant 192 : index
    %c0_12 = arith.constant 0 : index
    %30 = vector.load %arg9[%c192, %c0_12] : memref<432x64xbf16, #tpu.memory_space<vmem>>, vector<16x64xbf16>
    tpu.vector_store %arg9[%c192, %c0_12], %1 {strides = array<i32>} : memref<432x64xbf16, #tpu.memory_space<vmem>>, vector<16x64xbf16>,
    %31 = vector.extract_strided_slice %1 {offsets = [0, 1], sizes = [16, 63], strides = [1, 1]} : vector<16x64xbf16> to vector<16x63xbf16>
    %32 = vector.extract_strided_slice %1 {offsets = [0, 0], sizes = [16, 1], strides = [1, 1]} : vector<16x64xbf16> to vector<16x1xbf16>
    %33 = tpu.concatenate %31, %32 in 1 : vector<16x63xbf16>, vector<16x1xbf16> -> vector<16x64xbf16>
    %c5 = arith.constant 5 : index
    %c0_13 = arith.constant 0 : index
    %34 = vector.load %arg1[%c5, %c0_13] : memref<9x64xbf16, #tpu.memory_space<vmem>>, vector<1x64xbf16>
    %35 = vector.broadcast %34 : vector<1x64xbf16> to vector<16x64xbf16>
    %36 = arith.mulf %33, %35 : vector<16x64xbf16>
    %c240 = arith.constant 240 : index
    %c0_14 = arith.constant 0 : index
    %37 = vector.load %arg9[%c240, %c0_14] : memref<432x64xbf16, #tpu.memory_space<vmem>>, vector<16x64xbf16>
    tpu.vector_store %arg9[%c240, %c0_14], %36 {strides = array<i32>} : memref<432x64xbf16, #tpu.memory_space<vmem>>, vector<16x64xbf16>,
    %38 = vector.extract_strided_slice %1 {offsets = [0, 7], sizes = [16, 57], strides = [1, 1]} : vector<16x64xbf16> to vector<16x57xbf16>
    %39 = vector.extract_strided_slice %1 {offsets = [0, 0], sizes = [16, 7], strides = [1, 1]} : vector<16x64xbf16> to vector<16x7xbf16>
    %40 = tpu.concatenate %38, %39 in 1 : vector<16x57xbf16>, vector<16x7xbf16> -> vector<16x64xbf16>
    %c6 = arith.constant 6 : index
    %c0_15 = arith.constant 0 : index
    %41 = vector.load %arg1[%c6, %c0_15] : memref<9x64xbf16, #tpu.memory_space<vmem>>, vector<1x64xbf16>
    %42 = vector.broadcast %41 : vector<1x64xbf16> to vector<16x64xbf16>
    %43 = arith.mulf %40, %42 : vector<16x64xbf16>
    %c288 = arith.constant 288 : index
    %c0_16 = arith.constant 0 : index
    %44 = vector.load %arg9[%c288, %c0_16] : memref<432x64xbf16, #tpu.memory_space<vmem>>, vector<16x64xbf16>
    tpu.vector_store %arg9[%c288, %c0_16], %43 {strides = array<i32>} : memref<432x64xbf16, #tpu.memory_space<vmem>>, vector<16x64xbf16>,
    %45 = vector.extract_strided_slice %1 {offsets = [0, 8], sizes = [16, 56], strides = [1, 1]} : vector<16x64xbf16> to vector<16x56xbf16>
    %46 = vector.extract_strided_slice %1 {offsets = [0, 0], sizes = [16, 8], strides = [1, 1]} : vector<16x64xbf16> to vector<16x8xbf16>
    %47 = tpu.concatenate %45, %46 in 1 : vector<16x56xbf16>, vector<16x8xbf16> -> vector<16x64xbf16>
    %c7 = arith.constant 7 : index
    %c0_17 = arith.constant 0 : index
    %48 = vector.load %arg1[%c7, %c0_17] : memref<9x64xbf16, #tpu.memory_space<vmem>>, vector<1x64xbf16>
    %49 = vector.broadcast %48 : vector<1x64xbf16> to vector<16x64xbf16>
    %50 = arith.mulf %47, %49 : vector<16x64xbf16>
    %c336 = arith.constant 336 : index
    %c0_18 = arith.constant 0 : index
    %51 = vector.load %arg9[%c336, %c0_18] : memref<432x64xbf16, #tpu.memory_space<vmem>>, vector<16x64xbf16>
    tpu.vector_store %arg9[%c336, %c0_18], %50 {strides = array<i32>} : memref<432x64xbf16, #tpu.memory_space<vmem>>, vector<16x64xbf16>,
    %52 = vector.extract_strided_slice %1 {offsets = [0, 9], sizes = [16, 55], strides = [1, 1]} : vector<16x64xbf16> to vector<16x55xbf16>
    %53 = vector.extract_strided_slice %1 {offsets = [0, 0], sizes = [16, 9], strides = [1, 1]} : vector<16x64xbf16> to vector<16x9xbf16>
    %54 = tpu.concatenate %52, %53 in 1 : vector<16x55xbf16>, vector<16x9xbf16> -> vector<16x64xbf16>
    %c8 = arith.constant 8 : index
    %c0_19 = arith.constant 0 : index
    %55 = vector.load %arg1[%c8, %c0_19] : memref<9x64xbf16, #tpu.memory_space<vmem>>, vector<1x64xbf16>
    %56 = vector.broadcast %55 : vector<1x64xbf16> to vector<16x64xbf16>
    %57 = arith.mulf %54, %56 : vector<16x64xbf16>
    %c384 = arith.constant 384 : index
    %c0_20 = arith.constant 0 : index
    %58 = vector.load %arg9[%c384, %c0_20] : memref<432x64xbf16, #tpu.memory_space<vmem>>, vector<16x64xbf16>
    tpu.vector_store %arg9[%c384, %c0_20], %57 {strides = array<i32>} : memref<432x64xbf16, #tpu.memory_space<vmem>>, vector<16x64xbf16>,
    %c0_21 = arith.constant 0 : index
    %c0_22 = arith.constant 0 : index
    %c0_23 = arith.constant 0 : index
    %59 = vector.load %arg3[%c0_21, %c0_22, %c0_23] : memref<1x32x64xbf16, #tpu.memory_space<vmem>>, vector<1x32x64xbf16>
    %60 = vector.shape_cast %59 : vector<1x32x64xbf16> to vector<32x64xbf16>
    %61 = vector.extract_strided_slice %60 {offsets = [0, 55], sizes = [32, 9], strides = [1, 1]} : vector<32x64xbf16> to vector<32x9xbf16>
    %62 = vector.extract_strided_slice %60 {offsets = [0, 0], sizes = [32, 55], strides = [1, 1]} : vector<32x64xbf16> to vector<32x55xbf16>
    %63 = tpu.concatenate %61, %62 in 1 : vector<32x9xbf16>, vector<32x55xbf16> -> vector<32x64xbf16>
    %c0_24 = arith.constant 0 : index
    %c0_25 = arith.constant 0 : index
    %64 = vector.load %arg1[%c0_24, %c0_25] : memref<9x64xbf16, #tpu.memory_space<vmem>>, vector<1x64xbf16>
    %65 = vector.broadcast %64 : vector<1x64xbf16> to vector<32x64xbf16>
    %66 = arith.mulf %63, %65 : vector<32x64xbf16>
    %c16 = arith.constant 16 : index
    %c0_26 = arith.constant 0 : index
    %67 = vector.load %arg9[%c16, %c0_26] : memref<432x64xbf16, #tpu.memory_space<vmem>>, vector<32x64xbf16>
    tpu.vector_store %arg9[%c16, %c0_26], %66 {strides = array<i32>} : memref<432x64xbf16, #tpu.memory_space<vmem>>, vector<32x64xbf16>,
    %68 = vector.extract_strided_slice %60 {offsets = [0, 56], sizes = [32, 8], strides = [1, 1]} : vector<32x64xbf16> to vector<32x8xbf16>
    %69 = vector.extract_strided_slice %60 {offsets = [0, 0], sizes = [32, 56], strides = [1, 1]} : vector<32x64xbf16> to vector<32x56xbf16>
    %70 = tpu.concatenate %68, %69 in 1 : vector<32x8xbf16>, vector<32x56xbf16> -> vector<32x64xbf16>
    %c1_27 = arith.constant 1 : index
    %c0_28 = arith.constant 0 : index
    %71 = vector.load %arg1[%c1_27, %c0_28] : memref<9x64xbf16, #tpu.memory_space<vmem>>, vector<1x64xbf16>
    %72 = vector.broadcast %71 : vector<1x64xbf16> to vector<32x64xbf16>
    %73 = arith.mulf %70, %72 : vector<32x64xbf16>
    %c64 = arith.constant 64 : index
    %c0_29 = arith.constant 0 : index
    %74 = vector.load %arg9[%c64, %c0_29] : memref<432x64xbf16, #tpu.memory_space<vmem>>, vector<32x64xbf16>
    tpu.vector_store %arg9[%c64, %c0_29], %73 {strides = array<i32>} : memref<432x64xbf16, #tpu.memory_space<vmem>>, vector<32x64xbf16>,
    %75 = vector.extract_strided_slice %60 {offsets = [0, 57], sizes = [32, 7], strides = [1, 1]} : vector<32x64xbf16> to vector<32x7xbf16>
    %76 = vector.extract_strided_slice %60 {offsets = [0, 0], sizes = [32, 57], strides = [1, 1]} : vector<32x64xbf16> to vector<32x57xbf16>
    %77 = tpu.concatenate %75, %76 in 1 : vector<32x7xbf16>, vector<32x57xbf16> -> vector<32x64xbf16>
    %c2_30 = arith.constant 2 : index
    %c0_31 = arith.constant 0 : index
    %78 = vector.load %arg1[%c2_30, %c0_31] : memref<9x64xbf16, #tpu.memory_space<vmem>>, vector<1x64xbf16>
    %79 = vector.broadcast %78 : vector<1x64xbf16> to vector<32x64xbf16>
    %80 = arith.mulf %77, %79 : vector<32x64xbf16>
    %c112 = arith.constant 112 : index
    %c0_32 = arith.constant 0 : index
    %81 = vector.load %arg9[%c112, %c0_32] : memref<432x64xbf16, #tpu.memory_space<vmem>>, vector<32x64xbf16>
    tpu.vector_store %arg9[%c112, %c0_32], %80 {strides = array<i32>} : memref<432x64xbf16, #tpu.memory_space<vmem>>, vector<32x64xbf16>,
    %82 = vector.extract_strided_slice %60 {offsets = [0, 63], sizes = [32, 1], strides = [1, 1]} : vector<32x64xbf16> to vector<32x1xbf16>
    %83 = vector.extract_strided_slice %60 {offsets = [0, 0], sizes = [32, 63], strides = [1, 1]} : vector<32x64xbf16> to vector<32x63xbf16>
    %84 = tpu.concatenate %82, %83 in 1 : vector<32x1xbf16>, vector<32x63xbf16> -> vector<32x64xbf16>
    %c3_33 = arith.constant 3 : index
    %c0_34 = arith.constant 0 : index
    %85 = vector.load %arg1[%c3_33, %c0_34] : memref<9x64xbf16, #tpu.memory_space<vmem>>, vector<1x64xbf16>
    %86 = vector.broadcast %85 : vector<1x64xbf16> to vector<32x64xbf16>
    %87 = arith.mulf %84, %86 : vector<32x64xbf16>
    %c160 = arith.constant 160 : index
    %c0_35 = arith.constant 0 : index
    %88 = vector.load %arg9[%c160, %c0_35] : memref<432x64xbf16, #tpu.memory_space<vmem>>, vector<32x64xbf16>
    tpu.vector_store %arg9[%c160, %c0_35], %87 {strides = array<i32>} : memref<432x64xbf16, #tpu.memory_space<vmem>>, vector<32x64xbf16>,
    %c208 = arith.constant 208 : index
    %c0_36 = arith.constant 0 : index
    %89 = vector.load %arg9[%c208, %c0_36] : memref<432x64xbf16, #tpu.memory_space<vmem>>, vector<32x64xbf16>
    tpu.vector_store %arg9[%c208, %c0_36], %60 {strides = array<i32>} : memref<432x64xbf16, #tpu.memory_space<vmem>>, vector<32x64xbf16>,
    %90 = vector.extract_strided_slice %60 {offsets = [0, 1], sizes = [32, 63], strides = [1, 1]} : vector<32x64xbf16> to vector<32x63xbf16>
    %91 = vector.extract_strided_slice %60 {offsets = [0, 0], sizes = [32, 1], strides = [1, 1]} : vector<32x64xbf16> to vector<32x1xbf16>
    %92 = tpu.concatenate %90, %91 in 1 : vector<32x63xbf16>, vector<32x1xbf16> -> vector<32x64xbf16>
    %c5_37 = arith.constant 5 : index
    %c0_38 = arith.constant 0 : index
    %93 = vector.load %arg1[%c5_37, %c0_38] : memref<9x64xbf16, #tpu.memory_space<vmem>>, vector<1x64xbf16>
    %94 = vector.broadcast %93 : vector<1x64xbf16> to vector<32x64xbf16>
    %95 = arith.mulf %92, %94 : vector<32x64xbf16>
    %c256 = arith.constant 256 : index
    %c0_39 = arith.constant 0 : index
    %96 = vector.load %arg9[%c256, %c0_39] : memref<432x64xbf16, #tpu.memory_space<vmem>>, vector<32x64xbf16>
    tpu.vector_store %arg9[%c256, %c0_39], %95 {strides = array<i32>} : memref<432x64xbf16, #tpu.memory_space<vmem>>, vector<32x64xbf16>,
    %97 = vector.extract_strided_slice %60 {offsets = [0, 7], sizes = [32, 57], strides = [1, 1]} : vector<32x64xbf16> to vector<32x57xbf16>
    %98 = vector.extract_strided_slice %60 {offsets = [0, 0], sizes = [32, 7], strides = [1, 1]} : vector<32x64xbf16> to vector<32x7xbf16>
    %99 = tpu.concatenate %97, %98 in 1 : vector<32x57xbf16>, vector<32x7xbf16> -> vector<32x64xbf16>
    %c6_40 = arith.constant 6 : index
    %c0_41 = arith.constant 0 : index
    %100 = vector.load %arg1[%c6_40, %c0_41] : memref<9x64xbf16, #tpu.memory_space<vmem>>, vector<1x64xbf16>
    %101 = vector.broadcast %100 : vector<1x64xbf16> to vector<32x64xbf16>
    %102 = arith.mulf %99, %101 : vector<32x64xbf16>
    %c304 = arith.constant 304 : index
    %c0_42 = arith.constant 0 : index
    %103 = vector.load %arg9[%c304, %c0_42] : memref<432x64xbf16, #tpu.memory_space<vmem>>, vector<32x64xbf16>
    tpu.vector_store %arg9[%c304, %c0_42], %102 {strides = array<i32>} : memref<432x64xbf16, #tpu.memory_space<vmem>>, vector<32x64xbf16>,
    %104 = vector.extract_strided_slice %60 {offsets = [0, 8], sizes = [32, 56], strides = [1, 1]} : vector<32x64xbf16> to vector<32x56xbf16>
    %105 = vector.extract_strided_slice %60 {offsets = [0, 0], sizes = [32, 8], strides = [1, 1]} : vector<32x64xbf16> to vector<32x8xbf16>
    %106 = tpu.concatenate %104, %105 in 1 : vector<32x56xbf16>, vector<32x8xbf16> -> vector<32x64xbf16>
    %c7_43 = arith.constant 7 : index
    %c0_44 = arith.constant 0 : index
    %107 = vector.load %arg1[%c7_43, %c0_44] : memref<9x64xbf16, #tpu.memory_space<vmem>>, vector<1x64xbf16>
    %108 = vector.broadcast %107 : vector<1x64xbf16> to vector<32x64xbf16>
    %109 = arith.mulf %106, %108 : vector<32x64xbf16>
    %c352 = arith.constant 352 : index
    %c0_45 = arith.constant 0 : index
    %110 = vector.load %arg9[%c352, %c0_45] : memref<432x64xbf16, #tpu.memory_space<vmem>>, vector<32x64xbf16>
    tpu.vector_store %arg9[%c352, %c0_45], %109 {strides = array<i32>} : memref<432x64xbf16, #tpu.memory_space<vmem>>, vector<32x64xbf16>,
    %111 = vector.extract_strided_slice %60 {offsets = [0, 9], sizes = [32, 55], strides = [1, 1]} : vector<32x64xbf16> to vector<32x55xbf16>
    %112 = vector.extract_strided_slice %60 {offsets = [0, 0], sizes = [32, 9], strides = [1, 1]} : vector<32x64xbf16> to vector<32x9xbf16>
    %113 = tpu.concatenate %111, %112 in 1 : vector<32x55xbf16>, vector<32x9xbf16> -> vector<32x64xbf16>
    %c8_46 = arith.constant 8 : index
    %c0_47 = arith.constant 0 : index
    %114 = vector.load %arg1[%c8_46, %c0_47] : memref<9x64xbf16, #tpu.memory_space<vmem>>, vector<1x64xbf16>
    %115 = vector.broadcast %114 : vector<1x64xbf16> to vector<32x64xbf16>
    %116 = arith.mulf %113, %115 : vector<32x64xbf16>
    %c400 = arith.constant 400 : index
    %c0_48 = arith.constant 0 : index
    %117 = vector.load %arg9[%c400, %c0_48] : memref<432x64xbf16, #tpu.memory_space<vmem>>, vector<32x64xbf16>
    tpu.vector_store %arg9[%c400, %c0_48], %116 {strides = array<i32>} : memref<432x64xbf16, #tpu.memory_space<vmem>>, vector<32x64xbf16>,
    %c0_49 = arith.constant 0 : index
    %c0_50 = arith.constant 0 : index
    %118 = vector.load %arg4[%c0_49, %c0_50] : memref<16x432xbf16, #tpu.memory_space<vmem>>, vector<16x432xbf16>
    %c0_51 = arith.constant 0 : index
    %c0_52 = arith.constant 0 : index
    %119 = vector.load %arg9[%c0_51, %c0_52] : memref<432x64xbf16, #tpu.memory_space<vmem>>, vector<432x64xbf16>
    %cst = arith.constant dense<0.000000e+00> : vector<16x64xf32>
    %120 = tpu.matmul %118, %119, %cst {dimension_numbers = #tpu.dot_dimension_numbers<[1], [0], [0], [1], [0, 0, 1, 1], [], []>} : vector<16x432xbf16>, vector<432x64xbf16>, vector<16x64xf32> -> vector<16x64xf32>
    %c0_53 = arith.constant 0 : index
    %c0_54 = arith.constant 0 : index
    %121 = vector.load %arg5[%c0_53, %c0_54] : memref<16x1xf32, #tpu.memory_space<vmem>>, vector<16x1xf32>
    %122 = vector.broadcast %121 : vector<16x1xf32> to vector<16x64xf32>
    %123 = arith.addf %120, %122 : vector<16x64xf32>
    %cst_55 = arith.constant 0.000000e+00 : f32
    %124 = vector.broadcast %cst_55 : f32 to vector<16x64xf32>
    %125 = arith.maximumf %123, %124 : vector<16x64xf32>
    %126 = vector.extract_strided_slice %125 {offsets = [0, 55], sizes = [16, 9], strides = [1, 1]} : vector<16x64xf32> to vector<16x9xf32>
    %127 = vector.extract_strided_slice %125 {offsets = [0, 0], sizes = [16, 55], strides = [1, 1]} : vector<16x64xf32> to vector<16x55xf32>
    %128 = tpu.concatenate %126, %127 in 1 : vector<16x9xf32>, vector<16x55xf32> -> vector<16x64xf32>
    %c0_56 = arith.constant 0 : index
    %c0_57 = arith.constant 0 : index
    %129 = vector.load %arg1[%c0_56, %c0_57] : memref<9x64xbf16, #tpu.memory_space<vmem>>, vector<1x64xbf16>
    %130 = arith.extf %129 : vector<1x64xbf16> to vector<1x64xf32>
    %131 = vector.broadcast %130 : vector<1x64xf32> to vector<16x64xf32>
    %132 = arith.mulf %128, %131 : vector<16x64xf32>
    %133 = arith.truncf %132 : vector<16x64xf32> to vector<16x64xbf16>
    %c0_58 = arith.constant 0 : index
    %c0_59 = arith.constant 0 : index
    %134 = vector.load %arg10[%c0_58, %c0_59] : memref<144x64xbf16, #tpu.memory_space<vmem>>, vector<16x64xbf16>
    tpu.vector_store %arg10[%c0_58, %c0_59], %133 {strides = array<i32>} : memref<144x64xbf16, #tpu.memory_space<vmem>>, vector<16x64xbf16>,
    %135 = vector.extract_strided_slice %125 {offsets = [0, 56], sizes = [16, 8], strides = [1, 1]} : vector<16x64xf32> to vector<16x8xf32>
    %136 = vector.extract_strided_slice %125 {offsets = [0, 0], sizes = [16, 56], strides = [1, 1]} : vector<16x64xf32> to vector<16x56xf32>
    %137 = tpu.concatenate %135, %136 in 1 : vector<16x8xf32>, vector<16x56xf32> -> vector<16x64xf32>
    %c1_60 = arith.constant 1 : index
    %c0_61 = arith.constant 0 : index
    %138 = vector.load %arg1[%c1_60, %c0_61] : memref<9x64xbf16, #tpu.memory_space<vmem>>, vector<1x64xbf16>
    %139 = arith.extf %138 : vector<1x64xbf16> to vector<1x64xf32>
    %140 = vector.broadcast %139 : vector<1x64xf32> to vector<16x64xf32>
    %141 = arith.mulf %137, %140 : vector<16x64xf32>
    %142 = arith.truncf %141 : vector<16x64xf32> to vector<16x64xbf16>
    %c16_62 = arith.constant 16 : index
    %c0_63 = arith.constant 0 : index
    %143 = vector.load %arg10[%c16_62, %c0_63] : memref<144x64xbf16, #tpu.memory_space<vmem>>, vector<16x64xbf16>
    tpu.vector_store %arg10[%c16_62, %c0_63], %142 {strides = array<i32>} : memref<144x64xbf16, #tpu.memory_space<vmem>>, vector<16x64xbf16>,
    %144 = vector.extract_strided_slice %125 {offsets = [0, 57], sizes = [16, 7], strides = [1, 1]} : vector<16x64xf32> to vector<16x7xf32>
    %145 = vector.extract_strided_slice %125 {offsets = [0, 0], sizes = [16, 57], strides = [1, 1]} : vector<16x64xf32> to vector<16x57xf32>
    %146 = tpu.concatenate %144, %145 in 1 : vector<16x7xf32>, vector<16x57xf32> -> vector<16x64xf32>
    %c2_64 = arith.constant 2 : index
    %c0_65 = arith.constant 0 : index
    %147 = vector.load %arg1[%c2_64, %c0_65] : memref<9x64xbf16, #tpu.memory_space<vmem>>, vector<1x64xbf16>
    %148 = arith.extf %147 : vector<1x64xbf16> to vector<1x64xf32>
    %149 = vector.broadcast %148 : vector<1x64xf32> to vector<16x64xf32>
    %150 = arith.mulf %146, %149 : vector<16x64xf32>
    %151 = arith.truncf %150 : vector<16x64xf32> to vector<16x64xbf16>
    %c32 = arith.constant 32 : index
    %c0_66 = arith.constant 0 : index
    %152 = vector.load %arg10[%c32, %c0_66] : memref<144x64xbf16, #tpu.memory_space<vmem>>, vector<16x64xbf16>
    tpu.vector_store %arg10[%c32, %c0_66], %151 {strides = array<i32>} : memref<144x64xbf16, #tpu.memory_space<vmem>>, vector<16x64xbf16>,
    %153 = vector.extract_strided_slice %125 {offsets = [0, 63], sizes = [16, 1], strides = [1, 1]} : vector<16x64xf32> to vector<16x1xf32>
    %154 = vector.extract_strided_slice %125 {offsets = [0, 0], sizes = [16, 63], strides = [1, 1]} : vector<16x64xf32> to vector<16x63xf32>
    %155 = tpu.concatenate %153, %154 in 1 : vector<16x1xf32>, vector<16x63xf32> -> vector<16x64xf32>
    %c3_67 = arith.constant 3 : index
    %c0_68 = arith.constant 0 : index
    %156 = vector.load %arg1[%c3_67, %c0_68] : memref<9x64xbf16, #tpu.memory_space<vmem>>, vector<1x64xbf16>
    %157 = arith.extf %156 : vector<1x64xbf16> to vector<1x64xf32>
    %158 = vector.broadcast %157 : vector<1x64xf32> to vector<16x64xf32>
    %159 = arith.mulf %155, %158 : vector<16x64xf32>
    %160 = arith.truncf %159 : vector<16x64xf32> to vector<16x64xbf16>
    %c48_69 = arith.constant 48 : index
    %c0_70 = arith.constant 0 : index
    %161 = vector.load %arg10[%c48_69, %c0_70] : memref<144x64xbf16, #tpu.memory_space<vmem>>, vector<16x64xbf16>
    tpu.vector_store %arg10[%c48_69, %c0_70], %160 {strides = array<i32>} : memref<144x64xbf16, #tpu.memory_space<vmem>>, vector<16x64xbf16>,
    %162 = arith.truncf %125 : vector<16x64xf32> to vector<16x64xbf16>
    %c64_71 = arith.constant 64 : index
    %c0_72 = arith.constant 0 : index
    %163 = vector.load %arg10[%c64_71, %c0_72] : memref<144x64xbf16, #tpu.memory_space<vmem>>, vector<16x64xbf16>
    tpu.vector_store %arg10[%c64_71, %c0_72], %162 {strides = array<i32>} : memref<144x64xbf16, #tpu.memory_space<vmem>>, vector<16x64xbf16>,
    %164 = vector.extract_strided_slice %125 {offsets = [0, 1], sizes = [16, 63], strides = [1, 1]} : vector<16x64xf32> to vector<16x63xf32>
    %165 = vector.extract_strided_slice %125 {offsets = [0, 0], sizes = [16, 1], strides = [1, 1]} : vector<16x64xf32> to vector<16x1xf32>
    %166 = tpu.concatenate %164, %165 in 1 : vector<16x63xf32>, vector<16x1xf32> -> vector<16x64xf32>
    %c5_73 = arith.constant 5 : index
    %c0_74 = arith.constant 0 : index
    %167 = vector.load %arg1[%c5_73, %c0_74] : memref<9x64xbf16, #tpu.memory_space<vmem>>, vector<1x64xbf16>
    %168 = arith.extf %167 : vector<1x64xbf16> to vector<1x64xf32>
    %169 = vector.broadcast %168 : vector<1x64xf32> to vector<16x64xf32>
    %170 = arith.mulf %166, %169 : vector<16x64xf32>
    %171 = arith.truncf %170 : vector<16x64xf32> to vector<16x64xbf16>
    %c80 = arith.constant 80 : index
    %c0_75 = arith.constant 0 : index
    %172 = vector.load %arg10[%c80, %c0_75] : memref<144x64xbf16, #tpu.memory_space<vmem>>, vector<16x64xbf16>
    tpu.vector_store %arg10[%c80, %c0_75], %171 {strides = array<i32>} : memref<144x64xbf16, #tpu.memory_space<vmem>>, vector<16x64xbf16>,
    %173 = vector.extract_strided_slice %125 {offsets = [0, 7], sizes = [16, 57], strides = [1, 1]} : vector<16x64xf32> to vector<16x57xf32>
    %174 = vector.extract_strided_slice %125 {offsets = [0, 0], sizes = [16, 7], strides = [1, 1]} : vector<16x64xf32> to vector<16x7xf32>
    %175 = tpu.concatenate %173, %174 in 1 : vector<16x57xf32>, vector<16x7xf32> -> vector<16x64xf32>
    %c6_76 = arith.constant 6 : index
    %c0_77 = arith.constant 0 : index
    %176 = vector.load %arg1[%c6_76, %c0_77] : memref<9x64xbf16, #tpu.memory_space<vmem>>, vector<1x64xbf16>
    %177 = arith.extf %176 : vector<1x64xbf16> to vector<1x64xf32>
    %178 = vector.broadcast %177 : vector<1x64xf32> to vector<16x64xf32>
    %179 = arith.mulf %175, %178 : vector<16x64xf32>
    %180 = arith.truncf %179 : vector<16x64xf32> to vector<16x64xbf16>
    %c96_78 = arith.constant 96 : index
    %c0_79 = arith.constant 0 : index
    %181 = vector.load %arg10[%c96_78, %c0_79] : memref<144x64xbf16, #tpu.memory_space<vmem>>, vector<16x64xbf16>
    tpu.vector_store %arg10[%c96_78, %c0_79], %180 {strides = array<i32>} : memref<144x64xbf16, #tpu.memory_space<vmem>>, vector<16x64xbf16>,
    %182 = vector.extract_strided_slice %125 {offsets = [0, 8], sizes = [16, 56], strides = [1, 1]} : vector<16x64xf32> to vector<16x56xf32>
    %183 = vector.extract_strided_slice %125 {offsets = [0, 0], sizes = [16, 8], strides = [1, 1]} : vector<16x64xf32> to vector<16x8xf32>
    %184 = tpu.concatenate %182, %183 in 1 : vector<16x56xf32>, vector<16x8xf32> -> vector<16x64xf32>
    %c7_80 = arith.constant 7 : index
    %c0_81 = arith.constant 0 : index
    %185 = vector.load %arg1[%c7_80, %c0_81] : memref<9x64xbf16, #tpu.memory_space<vmem>>, vector<1x64xbf16>
    %186 = arith.extf %185 : vector<1x64xbf16> to vector<1x64xf32>
    %187 = vector.broadcast %186 : vector<1x64xf32> to vector<16x64xf32>
    %188 = arith.mulf %184, %187 : vector<16x64xf32>
    %189 = arith.truncf %188 : vector<16x64xf32> to vector<16x64xbf16>
    %c112_82 = arith.constant 112 : index
    %c0_83 = arith.constant 0 : index
    %190 = vector.load %arg10[%c112_82, %c0_83] : memref<144x64xbf16, #tpu.memory_space<vmem>>, vector<16x64xbf16>
    tpu.vector_store %arg10[%c112_82, %c0_83], %189 {strides = array<i32>} : memref<144x64xbf16, #tpu.memory_space<vmem>>, vector<16x64xbf16>,
    %191 = vector.extract_strided_slice %125 {offsets = [0, 9], sizes = [16, 55], strides = [1, 1]} : vector<16x64xf32> to vector<16x55xf32>
    %192 = vector.extract_strided_slice %125 {offsets = [0, 0], sizes = [16, 9], strides = [1, 1]} : vector<16x64xf32> to vector<16x9xf32>
    %193 = tpu.concatenate %191, %192 in 1 : vector<16x55xf32>, vector<16x9xf32> -> vector<16x64xf32>
    %c8_84 = arith.constant 8 : index
    %c0_85 = arith.constant 0 : index
    %194 = vector.load %arg1[%c8_84, %c0_85] : memref<9x64xbf16, #tpu.memory_space<vmem>>, vector<1x64xbf16>
    %195 = arith.extf %194 : vector<1x64xbf16> to vector<1x64xf32>
    %196 = vector.broadcast %195 : vector<1x64xf32> to vector<16x64xf32>
    %197 = arith.mulf %193, %196 : vector<16x64xf32>
    %198 = arith.truncf %197 : vector<16x64xf32> to vector<16x64xbf16>
    %c128 = arith.constant 128 : index
    %c0_86 = arith.constant 0 : index
    %199 = vector.load %arg10[%c128, %c0_86] : memref<144x64xbf16, #tpu.memory_space<vmem>>, vector<16x64xbf16>
    tpu.vector_store %arg10[%c128, %c0_86], %198 {strides = array<i32>} : memref<144x64xbf16, #tpu.memory_space<vmem>>, vector<16x64xbf16>,
    %c0_87 = arith.constant 0 : index
    %c0_88 = arith.constant 0 : index
    %200 = vector.load %arg6[%c0_87, %c0_88] : memref<16x144xbf16, #tpu.memory_space<vmem>>, vector<16x144xbf16>
    %c0_89 = arith.constant 0 : index
    %c0_90 = arith.constant 0 : index
    %201 = vector.load %arg10[%c0_89, %c0_90] : memref<144x64xbf16, #tpu.memory_space<vmem>>, vector<144x64xbf16>
    %cst_91 = arith.constant dense<0.000000e+00> : vector<16x64xf32>
    %202 = tpu.matmul %200, %201, %cst_91 {dimension_numbers = #tpu.dot_dimension_numbers<[1], [0], [0], [1], [0, 0, 1, 1], [], []>} : vector<16x144xbf16>, vector<144x64xbf16>, vector<16x64xf32> -> vector<16x64xf32>
    %c0_92 = arith.constant 0 : index
    %c0_93 = arith.constant 0 : index
    %203 = vector.load %arg7[%c0_92, %c0_93] : memref<16x1xf32, #tpu.memory_space<vmem>>, vector<16x1xf32>
    %204 = vector.broadcast %203 : vector<16x1xf32> to vector<16x64xf32>
    %205 = arith.addf %202, %204 : vector<16x64xf32>
    %cst_94 = arith.constant 0.000000e+00 : f32
    %206 = vector.broadcast %cst_94 : f32 to vector<16x64xf32>
    %207 = arith.maximumf %205, %206 : vector<16x64xf32>
    %208 = arith.truncf %207 : vector<16x64xf32> to vector<16x64xbf16>
    %c0_95 = arith.constant 0 : index
    %c0_96 = arith.constant 0 : index
    %c0_97 = arith.constant 0 : index
    %209 = vector.load %arg8[%c0_95, %c0_96, %c0_97] : memref<1x16x64xbf16, #tpu.memory_space<vmem>>, vector<1x16x64xbf16>
    %210 = vector.shape_cast %209 : vector<1x16x64xbf16> to vector<16x64xbf16>
    %211 = vector.shape_cast %208 : vector<16x64xbf16> to vector<1x16x64xbf16>
    tpu.vector_store %arg8[%c0_95, %c0_96, %c0_97], %211 {strides = array<i32>} : memref<1x16x64xbf16, #tpu.memory_space<vmem>>, vector<1x16x64xbf16>,
    return
  }
  func.func @transform_0(%arg0: i32) -> (i32, i32) {
    %c0_i32 = arith.constant 0 : i32
    %c0_i32_0 = arith.constant 0 : i32
    %c0_i32_1 = arith.constant 0 : i32
    return %c0_i32, %c0_i32_0 : i32, i32
  }
  func.func @transform_1(%arg0: i32) -> (i32, i32, i32) {
    %c0_i32 = arith.constant 0 : i32
    %c0_i32_0 = arith.constant 0 : i32
    %c0_i32_1 = arith.constant 0 : i32
    return %arg0, %c0_i32, %c0_i32_0 : i32, i32, i32
  }
  func.func @transform_2(%arg0: i32) -> (i32, i32, i32) {
    %c0_i32 = arith.constant 0 : i32
    %c0_i32_0 = arith.constant 0 : i32
    %c0_i32_1 = arith.constant 0 : i32
    return %arg0, %c0_i32, %c0_i32_0 : i32, i32, i32
  }
  func.func @transform_3(%arg0: i32) -> (i32, i32) {
    %c0_i32 = arith.constant 0 : i32
    %c0_i32_0 = arith.constant 0 : i32
    %c0_i32_1 = arith.constant 0 : i32
    return %c0_i32, %c0_i32_0 : i32, i32
  }
  func.func @transform_4(%arg0: i32) -> (i32, i32) {
    %c0_i32 = arith.constant 0 : i32
    %c0_i32_0 = arith.constant 0 : i32
    %c0_i32_1 = arith.constant 0 : i32
    return %c0_i32, %c0_i32_0 : i32, i32
  }
  func.func @transform_5(%arg0: i32) -> (i32, i32) {
    %c0_i32 = arith.constant 0 : i32
    %c0_i32_0 = arith.constant 0 : i32
    %c0_i32_1 = arith.constant 0 : i32
    return %c0_i32, %c0_i32_0 : i32, i32
  }
  func.func @transform_6(%arg0: i32) -> (i32, i32) {
    %c0_i32 = arith.constant 0 : i32
    %c0_i32_0 = arith.constant 0 : i32
    %c0_i32_1 = arith.constant 0 : i32
    return %c0_i32, %c0_i32_0 : i32, i32
  }
  func.func @transform_7(%arg0: i32) -> (i32, i32, i32) {
    %c0_i32 = arith.constant 0 : i32
    %c0_i32_0 = arith.constant 0 : i32
    %c0_i32_1 = arith.constant 0 : i32
    return %arg0, %c0_i32, %c0_i32_0 : i32, i32, i32
  }
}

module attributes {stable_mosaic.version = 11 : i64} {
  func.func @_fused_double_conv_kernel(%arg0: i32, %arg1: memref<9x256xbf16, #tpu.memory_space<vmem>>, %arg2: memref<1x8x256xbf16, #tpu.memory_space<vmem>>, %arg3: memref<1x16x256xbf16, #tpu.memory_space<vmem>>, %arg4: memref<8x216xbf16, #tpu.memory_space<vmem>>, %arg5: memref<8x1xf32, #tpu.memory_space<vmem>>, %arg6: memref<8x72xbf16, #tpu.memory_space<vmem>>, %arg7: memref<8x1xf32, #tpu.memory_space<vmem>>, %arg8: memref<1x8x256xbf16, #tpu.memory_space<vmem>>, %arg9: memref<216x256xbf16, #tpu.memory_space<vmem>>, %arg10: memref<72x256xbf16, #tpu.memory_space<vmem>>) attributes {dimension_semantics = [#tpu.dimension_semantics<parallel>], iteration_bounds = array<i64: 2>, scalar_prefetch = 0 : i64, scratch_operands = 2 : i64, tpu.core_type = #tpu.core_type<tc>, window_params = [{pipeline_mode = #tpu.pipeline_mode<synchronous>, transform_indices = @transform_0, window_bounds = array<i64: 9, 256>}, {transform_indices = @transform_1, window_bounds = array<i64: 1, 8, 256>}, {transform_indices = @transform_2, window_bounds = array<i64: 1, 16, 256>}, {pipeline_mode = #tpu.pipeline_mode<synchronous>, transform_indices = @transform_3, window_bounds = array<i64: 8, 216>}, {pipeline_mode = #tpu.pipeline_mode<synchronous>, transform_indices = @transform_4, window_bounds = array<i64: 8, 1>}, {pipeline_mode = #tpu.pipeline_mode<synchronous>, transform_indices = @transform_5, window_bounds = array<i64: 8, 72>}, {pipeline_mode = #tpu.pipeline_mode<synchronous>, transform_indices = @transform_6, window_bounds = array<i64: 8, 1>}, {transform_indices = @transform_7, window_bounds = array<i64: 1, 8, 256>}]} {
    %c0 = arith.constant 0 : index
    %c0_0 = arith.constant 0 : index
    %c0_1 = arith.constant 0 : index
    %0 = vector.load %arg2[%c0, %c0_0, %c0_1] : memref<1x8x256xbf16, #tpu.memory_space<vmem>>, vector<1x8x256xbf16>
    %1 = vector.shape_cast %0 : vector<1x8x256xbf16> to vector<8x256xbf16>
    %2 = vector.extract_strided_slice %1 {offsets = [0, 239], sizes = [8, 17], strides = [1, 1]} : vector<8x256xbf16> to vector<8x17xbf16>
    %3 = vector.extract_strided_slice %1 {offsets = [0, 0], sizes = [8, 239], strides = [1, 1]} : vector<8x256xbf16> to vector<8x239xbf16>
    %4 = tpu.concatenate %2, %3 in 1 : vector<8x17xbf16>, vector<8x239xbf16> -> vector<8x256xbf16>
    %c0_2 = arith.constant 0 : index
    %c0_3 = arith.constant 0 : index
    %5 = vector.load %arg1[%c0_2, %c0_3] : memref<9x256xbf16, #tpu.memory_space<vmem>>, vector<1x256xbf16>
    %6 = vector.broadcast %5 : vector<1x256xbf16> to vector<8x256xbf16>
    %7 = arith.mulf %4, %6 : vector<8x256xbf16>
    %c0_4 = arith.constant 0 : index
    %c0_5 = arith.constant 0 : index
    %8 = vector.load %arg9[%c0_4, %c0_5] : memref<216x256xbf16, #tpu.memory_space<vmem>>, vector<8x256xbf16>
    tpu.vector_store %arg9[%c0_4, %c0_5], %7 {strides = array<i32>} : memref<216x256xbf16, #tpu.memory_space<vmem>>, vector<8x256xbf16>,
    %9 = vector.extract_strided_slice %1 {offsets = [0, 240], sizes = [8, 16], strides = [1, 1]} : vector<8x256xbf16> to vector<8x16xbf16>
    %10 = vector.extract_strided_slice %1 {offsets = [0, 0], sizes = [8, 240], strides = [1, 1]} : vector<8x256xbf16> to vector<8x240xbf16>
    %11 = tpu.concatenate %9, %10 in 1 : vector<8x16xbf16>, vector<8x240xbf16> -> vector<8x256xbf16>
    %c1 = arith.constant 1 : index
    %c0_6 = arith.constant 0 : index
    %12 = vector.load %arg1[%c1, %c0_6] : memref<9x256xbf16, #tpu.memory_space<vmem>>, vector<1x256xbf16>
    %13 = vector.broadcast %12 : vector<1x256xbf16> to vector<8x256xbf16>
    %14 = arith.mulf %11, %13 : vector<8x256xbf16>
    %c24 = arith.constant 24 : index
    %c0_7 = arith.constant 0 : index
    %15 = vector.load %arg9[%c24, %c0_7] : memref<216x256xbf16, #tpu.memory_space<vmem>>, vector<8x256xbf16>
    tpu.vector_store %arg9[%c24, %c0_7], %14 {strides = array<i32>} : memref<216x256xbf16, #tpu.memory_space<vmem>>, vector<8x256xbf16>,
    %16 = vector.extract_strided_slice %1 {offsets = [0, 241], sizes = [8, 15], strides = [1, 1]} : vector<8x256xbf16> to vector<8x15xbf16>
    %17 = vector.extract_strided_slice %1 {offsets = [0, 0], sizes = [8, 241], strides = [1, 1]} : vector<8x256xbf16> to vector<8x241xbf16>
    %18 = tpu.concatenate %16, %17 in 1 : vector<8x15xbf16>, vector<8x241xbf16> -> vector<8x256xbf16>
    %c2 = arith.constant 2 : index
    %c0_8 = arith.constant 0 : index
    %19 = vector.load %arg1[%c2, %c0_8] : memref<9x256xbf16, #tpu.memory_space<vmem>>, vector<1x256xbf16>
    %20 = vector.broadcast %19 : vector<1x256xbf16> to vector<8x256xbf16>
    %21 = arith.mulf %18, %20 : vector<8x256xbf16>
    %c48 = arith.constant 48 : index
    %c0_9 = arith.constant 0 : index
    %22 = vector.load %arg9[%c48, %c0_9] : memref<216x256xbf16, #tpu.memory_space<vmem>>, vector<8x256xbf16>
    tpu.vector_store %arg9[%c48, %c0_9], %21 {strides = array<i32>} : memref<216x256xbf16, #tpu.memory_space<vmem>>, vector<8x256xbf16>,
    %23 = vector.extract_strided_slice %1 {offsets = [0, 255], sizes = [8, 1], strides = [1, 1]} : vector<8x256xbf16> to vector<8x1xbf16>
    %24 = vector.extract_strided_slice %1 {offsets = [0, 0], sizes = [8, 255], strides = [1, 1]} : vector<8x256xbf16> to vector<8x255xbf16>
    %25 = tpu.concatenate %23, %24 in 1 : vector<8x1xbf16>, vector<8x255xbf16> -> vector<8x256xbf16>
    %c3 = arith.constant 3 : index
    %c0_10 = arith.constant 0 : index
    %26 = vector.load %arg1[%c3, %c0_10] : memref<9x256xbf16, #tpu.memory_space<vmem>>, vector<1x256xbf16>
    %27 = vector.broadcast %26 : vector<1x256xbf16> to vector<8x256xbf16>
    %28 = arith.mulf %25, %27 : vector<8x256xbf16>
    %c72 = arith.constant 72 : index
    %c0_11 = arith.constant 0 : index
    %29 = vector.load %arg9[%c72, %c0_11] : memref<216x256xbf16, #tpu.memory_space<vmem>>, vector<8x256xbf16>
    tpu.vector_store %arg9[%c72, %c0_11], %28 {strides = array<i32>} : memref<216x256xbf16, #tpu.memory_space<vmem>>, vector<8x256xbf16>,
    %c96 = arith.constant 96 : index
    %c0_12 = arith.constant 0 : index
    %30 = vector.load %arg9[%c96, %c0_12] : memref<216x256xbf16, #tpu.memory_space<vmem>>, vector<8x256xbf16>
    tpu.vector_store %arg9[%c96, %c0_12], %1 {strides = array<i32>} : memref<216x256xbf16, #tpu.memory_space<vmem>>, vector<8x256xbf16>,
    %31 = vector.extract_strided_slice %1 {offsets = [0, 1], sizes = [8, 255], strides = [1, 1]} : vector<8x256xbf16> to vector<8x255xbf16>
    %32 = vector.extract_strided_slice %1 {offsets = [0, 0], sizes = [8, 1], strides = [1, 1]} : vector<8x256xbf16> to vector<8x1xbf16>
    %33 = tpu.concatenate %31, %32 in 1 : vector<8x255xbf16>, vector<8x1xbf16> -> vector<8x256xbf16>
    %c5 = arith.constant 5 : index
    %c0_13 = arith.constant 0 : index
    %34 = vector.load %arg1[%c5, %c0_13] : memref<9x256xbf16, #tpu.memory_space<vmem>>, vector<1x256xbf16>
    %35 = vector.broadcast %34 : vector<1x256xbf16> to vector<8x256xbf16>
    %36 = arith.mulf %33, %35 : vector<8x256xbf16>
    %c120 = arith.constant 120 : index
    %c0_14 = arith.constant 0 : index
    %37 = vector.load %arg9[%c120, %c0_14] : memref<216x256xbf16, #tpu.memory_space<vmem>>, vector<8x256xbf16>
    tpu.vector_store %arg9[%c120, %c0_14], %36 {strides = array<i32>} : memref<216x256xbf16, #tpu.memory_space<vmem>>, vector<8x256xbf16>,
    %38 = vector.extract_strided_slice %1 {offsets = [0, 15], sizes = [8, 241], strides = [1, 1]} : vector<8x256xbf16> to vector<8x241xbf16>
    %39 = vector.extract_strided_slice %1 {offsets = [0, 0], sizes = [8, 15], strides = [1, 1]} : vector<8x256xbf16> to vector<8x15xbf16>
    %40 = tpu.concatenate %38, %39 in 1 : vector<8x241xbf16>, vector<8x15xbf16> -> vector<8x256xbf16>
    %c6 = arith.constant 6 : index
    %c0_15 = arith.constant 0 : index
    %41 = vector.load %arg1[%c6, %c0_15] : memref<9x256xbf16, #tpu.memory_space<vmem>>, vector<1x256xbf16>
    %42 = vector.broadcast %41 : vector<1x256xbf16> to vector<8x256xbf16>
    %43 = arith.mulf %40, %42 : vector<8x256xbf16>
    %c144 = arith.constant 144 : index
    %c0_16 = arith.constant 0 : index
    %44 = vector.load %arg9[%c144, %c0_16] : memref<216x256xbf16, #tpu.memory_space<vmem>>, vector<8x256xbf16>
    tpu.vector_store %arg9[%c144, %c0_16], %43 {strides = array<i32>} : memref<216x256xbf16, #tpu.memory_space<vmem>>, vector<8x256xbf16>,
    %45 = vector.extract_strided_slice %1 {offsets = [0, 16], sizes = [8, 240], strides = [1, 1]} : vector<8x256xbf16> to vector<8x240xbf16>
    %46 = vector.extract_strided_slice %1 {offsets = [0, 0], sizes = [8, 16], strides = [1, 1]} : vector<8x256xbf16> to vector<8x16xbf16>
    %47 = tpu.concatenate %45, %46 in 1 : vector<8x240xbf16>, vector<8x16xbf16> -> vector<8x256xbf16>
    %c7 = arith.constant 7 : index
    %c0_17 = arith.constant 0 : index
    %48 = vector.load %arg1[%c7, %c0_17] : memref<9x256xbf16, #tpu.memory_space<vmem>>, vector<1x256xbf16>
    %49 = vector.broadcast %48 : vector<1x256xbf16> to vector<8x256xbf16>
    %50 = arith.mulf %47, %49 : vector<8x256xbf16>
    %c168 = arith.constant 168 : index
    %c0_18 = arith.constant 0 : index
    %51 = vector.load %arg9[%c168, %c0_18] : memref<216x256xbf16, #tpu.memory_space<vmem>>, vector<8x256xbf16>
    tpu.vector_store %arg9[%c168, %c0_18], %50 {strides = array<i32>} : memref<216x256xbf16, #tpu.memory_space<vmem>>, vector<8x256xbf16>,
    %52 = vector.extract_strided_slice %1 {offsets = [0, 17], sizes = [8, 239], strides = [1, 1]} : vector<8x256xbf16> to vector<8x239xbf16>
    %53 = vector.extract_strided_slice %1 {offsets = [0, 0], sizes = [8, 17], strides = [1, 1]} : vector<8x256xbf16> to vector<8x17xbf16>
    %54 = tpu.concatenate %52, %53 in 1 : vector<8x239xbf16>, vector<8x17xbf16> -> vector<8x256xbf16>
    %c8 = arith.constant 8 : index
    %c0_19 = arith.constant 0 : index
    %55 = vector.load %arg1[%c8, %c0_19] : memref<9x256xbf16, #tpu.memory_space<vmem>>, vector<1x256xbf16>
    %56 = vector.broadcast %55 : vector<1x256xbf16> to vector<8x256xbf16>
    %57 = arith.mulf %54, %56 : vector<8x256xbf16>
    %c192 = arith.constant 192 : index
    %c0_20 = arith.constant 0 : index
    %58 = vector.load %arg9[%c192, %c0_20] : memref<216x256xbf16, #tpu.memory_space<vmem>>, vector<8x256xbf16>
    tpu.vector_store %arg9[%c192, %c0_20], %57 {strides = array<i32>} : memref<216x256xbf16, #tpu.memory_space<vmem>>, vector<8x256xbf16>,
    %c0_21 = arith.constant 0 : index
    %c0_22 = arith.constant 0 : index
    %c0_23 = arith.constant 0 : index
    %59 = vector.load %arg3[%c0_21, %c0_22, %c0_23] : memref<1x16x256xbf16, #tpu.memory_space<vmem>>, vector<1x16x256xbf16>
    %60 = vector.shape_cast %59 : vector<1x16x256xbf16> to vector<16x256xbf16>
    %61 = vector.extract_strided_slice %60 {offsets = [0, 239], sizes = [16, 17], strides = [1, 1]} : vector<16x256xbf16> to vector<16x17xbf16>
    %62 = vector.extract_strided_slice %60 {offsets = [0, 0], sizes = [16, 239], strides = [1, 1]} : vector<16x256xbf16> to vector<16x239xbf16>
    %63 = tpu.concatenate %61, %62 in 1 : vector<16x17xbf16>, vector<16x239xbf16> -> vector<16x256xbf16>
    %c0_24 = arith.constant 0 : index
    %c0_25 = arith.constant 0 : index
    %64 = vector.load %arg1[%c0_24, %c0_25] : memref<9x256xbf16, #tpu.memory_space<vmem>>, vector<1x256xbf16>
    %65 = vector.broadcast %64 : vector<1x256xbf16> to vector<16x256xbf16>
    %66 = arith.mulf %63, %65 : vector<16x256xbf16>
    %c8_26 = arith.constant 8 : index
    %c0_27 = arith.constant 0 : index
    %67 = vector.load %arg9[%c8_26, %c0_27] : memref<216x256xbf16, #tpu.memory_space<vmem>>, vector<16x256xbf16>
    tpu.vector_store %arg9[%c8_26, %c0_27], %66 {strides = array<i32>} : memref<216x256xbf16, #tpu.memory_space<vmem>>, vector<16x256xbf16>,
    %68 = vector.extract_strided_slice %60 {offsets = [0, 240], sizes = [16, 16], strides = [1, 1]} : vector<16x256xbf16> to vector<16x16xbf16>
    %69 = vector.extract_strided_slice %60 {offsets = [0, 0], sizes = [16, 240], strides = [1, 1]} : vector<16x256xbf16> to vector<16x240xbf16>
    %70 = tpu.concatenate %68, %69 in 1 : vector<16x16xbf16>, vector<16x240xbf16> -> vector<16x256xbf16>
    %c1_28 = arith.constant 1 : index
    %c0_29 = arith.constant 0 : index
    %71 = vector.load %arg1[%c1_28, %c0_29] : memref<9x256xbf16, #tpu.memory_space<vmem>>, vector<1x256xbf16>
    %72 = vector.broadcast %71 : vector<1x256xbf16> to vector<16x256xbf16>
    %73 = arith.mulf %70, %72 : vector<16x256xbf16>
    %c32 = arith.constant 32 : index
    %c0_30 = arith.constant 0 : index
    %74 = vector.load %arg9[%c32, %c0_30] : memref<216x256xbf16, #tpu.memory_space<vmem>>, vector<16x256xbf16>
    tpu.vector_store %arg9[%c32, %c0_30], %73 {strides = array<i32>} : memref<216x256xbf16, #tpu.memory_space<vmem>>, vector<16x256xbf16>,
    %75 = vector.extract_strided_slice %60 {offsets = [0, 241], sizes = [16, 15], strides = [1, 1]} : vector<16x256xbf16> to vector<16x15xbf16>
    %76 = vector.extract_strided_slice %60 {offsets = [0, 0], sizes = [16, 241], strides = [1, 1]} : vector<16x256xbf16> to vector<16x241xbf16>
    %77 = tpu.concatenate %75, %76 in 1 : vector<16x15xbf16>, vector<16x241xbf16> -> vector<16x256xbf16>
    %c2_31 = arith.constant 2 : index
    %c0_32 = arith.constant 0 : index
    %78 = vector.load %arg1[%c2_31, %c0_32] : memref<9x256xbf16, #tpu.memory_space<vmem>>, vector<1x256xbf16>
    %79 = vector.broadcast %78 : vector<1x256xbf16> to vector<16x256xbf16>
    %80 = arith.mulf %77, %79 : vector<16x256xbf16>
    %c56 = arith.constant 56 : index
    %c0_33 = arith.constant 0 : index
    %81 = vector.load %arg9[%c56, %c0_33] : memref<216x256xbf16, #tpu.memory_space<vmem>>, vector<16x256xbf16>
    tpu.vector_store %arg9[%c56, %c0_33], %80 {strides = array<i32>} : memref<216x256xbf16, #tpu.memory_space<vmem>>, vector<16x256xbf16>,
    %82 = vector.extract_strided_slice %60 {offsets = [0, 255], sizes = [16, 1], strides = [1, 1]} : vector<16x256xbf16> to vector<16x1xbf16>
    %83 = vector.extract_strided_slice %60 {offsets = [0, 0], sizes = [16, 255], strides = [1, 1]} : vector<16x256xbf16> to vector<16x255xbf16>
    %84 = tpu.concatenate %82, %83 in 1 : vector<16x1xbf16>, vector<16x255xbf16> -> vector<16x256xbf16>
    %c3_34 = arith.constant 3 : index
    %c0_35 = arith.constant 0 : index
    %85 = vector.load %arg1[%c3_34, %c0_35] : memref<9x256xbf16, #tpu.memory_space<vmem>>, vector<1x256xbf16>
    %86 = vector.broadcast %85 : vector<1x256xbf16> to vector<16x256xbf16>
    %87 = arith.mulf %84, %86 : vector<16x256xbf16>
    %c80 = arith.constant 80 : index
    %c0_36 = arith.constant 0 : index
    %88 = vector.load %arg9[%c80, %c0_36] : memref<216x256xbf16, #tpu.memory_space<vmem>>, vector<16x256xbf16>
    tpu.vector_store %arg9[%c80, %c0_36], %87 {strides = array<i32>} : memref<216x256xbf16, #tpu.memory_space<vmem>>, vector<16x256xbf16>,
    %c104 = arith.constant 104 : index
    %c0_37 = arith.constant 0 : index
    %89 = vector.load %arg9[%c104, %c0_37] : memref<216x256xbf16, #tpu.memory_space<vmem>>, vector<16x256xbf16>
    tpu.vector_store %arg9[%c104, %c0_37], %60 {strides = array<i32>} : memref<216x256xbf16, #tpu.memory_space<vmem>>, vector<16x256xbf16>,
    %90 = vector.extract_strided_slice %60 {offsets = [0, 1], sizes = [16, 255], strides = [1, 1]} : vector<16x256xbf16> to vector<16x255xbf16>
    %91 = vector.extract_strided_slice %60 {offsets = [0, 0], sizes = [16, 1], strides = [1, 1]} : vector<16x256xbf16> to vector<16x1xbf16>
    %92 = tpu.concatenate %90, %91 in 1 : vector<16x255xbf16>, vector<16x1xbf16> -> vector<16x256xbf16>
    %c5_38 = arith.constant 5 : index
    %c0_39 = arith.constant 0 : index
    %93 = vector.load %arg1[%c5_38, %c0_39] : memref<9x256xbf16, #tpu.memory_space<vmem>>, vector<1x256xbf16>
    %94 = vector.broadcast %93 : vector<1x256xbf16> to vector<16x256xbf16>
    %95 = arith.mulf %92, %94 : vector<16x256xbf16>
    %c128 = arith.constant 128 : index
    %c0_40 = arith.constant 0 : index
    %96 = vector.load %arg9[%c128, %c0_40] : memref<216x256xbf16, #tpu.memory_space<vmem>>, vector<16x256xbf16>
    tpu.vector_store %arg9[%c128, %c0_40], %95 {strides = array<i32>} : memref<216x256xbf16, #tpu.memory_space<vmem>>, vector<16x256xbf16>,
    %97 = vector.extract_strided_slice %60 {offsets = [0, 15], sizes = [16, 241], strides = [1, 1]} : vector<16x256xbf16> to vector<16x241xbf16>
    %98 = vector.extract_strided_slice %60 {offsets = [0, 0], sizes = [16, 15], strides = [1, 1]} : vector<16x256xbf16> to vector<16x15xbf16>
    %99 = tpu.concatenate %97, %98 in 1 : vector<16x241xbf16>, vector<16x15xbf16> -> vector<16x256xbf16>
    %c6_41 = arith.constant 6 : index
    %c0_42 = arith.constant 0 : index
    %100 = vector.load %arg1[%c6_41, %c0_42] : memref<9x256xbf16, #tpu.memory_space<vmem>>, vector<1x256xbf16>
    %101 = vector.broadcast %100 : vector<1x256xbf16> to vector<16x256xbf16>
    %102 = arith.mulf %99, %101 : vector<16x256xbf16>
    %c152 = arith.constant 152 : index
    %c0_43 = arith.constant 0 : index
    %103 = vector.load %arg9[%c152, %c0_43] : memref<216x256xbf16, #tpu.memory_space<vmem>>, vector<16x256xbf16>
    tpu.vector_store %arg9[%c152, %c0_43], %102 {strides = array<i32>} : memref<216x256xbf16, #tpu.memory_space<vmem>>, vector<16x256xbf16>,
    %104 = vector.extract_strided_slice %60 {offsets = [0, 16], sizes = [16, 240], strides = [1, 1]} : vector<16x256xbf16> to vector<16x240xbf16>
    %105 = vector.extract_strided_slice %60 {offsets = [0, 0], sizes = [16, 16], strides = [1, 1]} : vector<16x256xbf16> to vector<16x16xbf16>
    %106 = tpu.concatenate %104, %105 in 1 : vector<16x240xbf16>, vector<16x16xbf16> -> vector<16x256xbf16>
    %c7_44 = arith.constant 7 : index
    %c0_45 = arith.constant 0 : index
    %107 = vector.load %arg1[%c7_44, %c0_45] : memref<9x256xbf16, #tpu.memory_space<vmem>>, vector<1x256xbf16>
    %108 = vector.broadcast %107 : vector<1x256xbf16> to vector<16x256xbf16>
    %109 = arith.mulf %106, %108 : vector<16x256xbf16>
    %c176 = arith.constant 176 : index
    %c0_46 = arith.constant 0 : index
    %110 = vector.load %arg9[%c176, %c0_46] : memref<216x256xbf16, #tpu.memory_space<vmem>>, vector<16x256xbf16>
    tpu.vector_store %arg9[%c176, %c0_46], %109 {strides = array<i32>} : memref<216x256xbf16, #tpu.memory_space<vmem>>, vector<16x256xbf16>,
    %111 = vector.extract_strided_slice %60 {offsets = [0, 17], sizes = [16, 239], strides = [1, 1]} : vector<16x256xbf16> to vector<16x239xbf16>
    %112 = vector.extract_strided_slice %60 {offsets = [0, 0], sizes = [16, 17], strides = [1, 1]} : vector<16x256xbf16> to vector<16x17xbf16>
    %113 = tpu.concatenate %111, %112 in 1 : vector<16x239xbf16>, vector<16x17xbf16> -> vector<16x256xbf16>
    %c8_47 = arith.constant 8 : index
    %c0_48 = arith.constant 0 : index
    %114 = vector.load %arg1[%c8_47, %c0_48] : memref<9x256xbf16, #tpu.memory_space<vmem>>, vector<1x256xbf16>
    %115 = vector.broadcast %114 : vector<1x256xbf16> to vector<16x256xbf16>
    %116 = arith.mulf %113, %115 : vector<16x256xbf16>
    %c200 = arith.constant 200 : index
    %c0_49 = arith.constant 0 : index
    %117 = vector.load %arg9[%c200, %c0_49] : memref<216x256xbf16, #tpu.memory_space<vmem>>, vector<16x256xbf16>
    tpu.vector_store %arg9[%c200, %c0_49], %116 {strides = array<i32>} : memref<216x256xbf16, #tpu.memory_space<vmem>>, vector<16x256xbf16>,
    %c0_50 = arith.constant 0 : index
    %c0_51 = arith.constant 0 : index
    %118 = vector.load %arg4[%c0_50, %c0_51] : memref<8x216xbf16, #tpu.memory_space<vmem>>, vector<8x216xbf16>
    %c0_52 = arith.constant 0 : index
    %c0_53 = arith.constant 0 : index
    %119 = vector.load %arg9[%c0_52, %c0_53] : memref<216x256xbf16, #tpu.memory_space<vmem>>, vector<216x256xbf16>
    %cst = arith.constant dense<0.000000e+00> : vector<8x256xf32>
    %120 = tpu.matmul %118, %119, %cst {dimension_numbers = #tpu.dot_dimension_numbers<[1], [0], [0], [1], [0, 0, 1, 1], [], []>} : vector<8x216xbf16>, vector<216x256xbf16>, vector<8x256xf32> -> vector<8x256xf32>
    %c0_54 = arith.constant 0 : index
    %c0_55 = arith.constant 0 : index
    %121 = vector.load %arg5[%c0_54, %c0_55] : memref<8x1xf32, #tpu.memory_space<vmem>>, vector<8x1xf32>
    %122 = vector.broadcast %121 : vector<8x1xf32> to vector<8x256xf32>
    %123 = arith.addf %120, %122 : vector<8x256xf32>
    %cst_56 = arith.constant 0.000000e+00 : f32
    %124 = vector.broadcast %cst_56 : f32 to vector<8x256xf32>
    %125 = arith.maximumf %123, %124 : vector<8x256xf32>
    %126 = vector.extract_strided_slice %125 {offsets = [0, 239], sizes = [8, 17], strides = [1, 1]} : vector<8x256xf32> to vector<8x17xf32>
    %127 = vector.extract_strided_slice %125 {offsets = [0, 0], sizes = [8, 239], strides = [1, 1]} : vector<8x256xf32> to vector<8x239xf32>
    %128 = tpu.concatenate %126, %127 in 1 : vector<8x17xf32>, vector<8x239xf32> -> vector<8x256xf32>
    %c0_57 = arith.constant 0 : index
    %c0_58 = arith.constant 0 : index
    %129 = vector.load %arg1[%c0_57, %c0_58] : memref<9x256xbf16, #tpu.memory_space<vmem>>, vector<1x256xbf16>
    %130 = arith.extf %129 : vector<1x256xbf16> to vector<1x256xf32>
    %131 = vector.broadcast %130 : vector<1x256xf32> to vector<8x256xf32>
    %132 = arith.mulf %128, %131 : vector<8x256xf32>
    %133 = arith.truncf %132 : vector<8x256xf32> to vector<8x256xbf16>
    %c0_59 = arith.constant 0 : index
    %c0_60 = arith.constant 0 : index
    %134 = vector.load %arg10[%c0_59, %c0_60] : memref<72x256xbf16, #tpu.memory_space<vmem>>, vector<8x256xbf16>
    tpu.vector_store %arg10[%c0_59, %c0_60], %133 {strides = array<i32>} : memref<72x256xbf16, #tpu.memory_space<vmem>>, vector<8x256xbf16>,
    %135 = vector.extract_strided_slice %125 {offsets = [0, 240], sizes = [8, 16], strides = [1, 1]} : vector<8x256xf32> to vector<8x16xf32>
    %136 = vector.extract_strided_slice %125 {offsets = [0, 0], sizes = [8, 240], strides = [1, 1]} : vector<8x256xf32> to vector<8x240xf32>
    %137 = tpu.concatenate %135, %136 in 1 : vector<8x16xf32>, vector<8x240xf32> -> vector<8x256xf32>
    %c1_61 = arith.constant 1 : index
    %c0_62 = arith.constant 0 : index
    %138 = vector.load %arg1[%c1_61, %c0_62] : memref<9x256xbf16, #tpu.memory_space<vmem>>, vector<1x256xbf16>
    %139 = arith.extf %138 : vector<1x256xbf16> to vector<1x256xf32>
    %140 = vector.broadcast %139 : vector<1x256xf32> to vector<8x256xf32>
    %141 = arith.mulf %137, %140 : vector<8x256xf32>
    %142 = arith.truncf %141 : vector<8x256xf32> to vector<8x256xbf16>
    %c8_63 = arith.constant 8 : index
    %c0_64 = arith.constant 0 : index
    %143 = vector.load %arg10[%c8_63, %c0_64] : memref<72x256xbf16, #tpu.memory_space<vmem>>, vector<8x256xbf16>
    tpu.vector_store %arg10[%c8_63, %c0_64], %142 {strides = array<i32>} : memref<72x256xbf16, #tpu.memory_space<vmem>>, vector<8x256xbf16>,
    %144 = vector.extract_strided_slice %125 {offsets = [0, 241], sizes = [8, 15], strides = [1, 1]} : vector<8x256xf32> to vector<8x15xf32>
    %145 = vector.extract_strided_slice %125 {offsets = [0, 0], sizes = [8, 241], strides = [1, 1]} : vector<8x256xf32> to vector<8x241xf32>
    %146 = tpu.concatenate %144, %145 in 1 : vector<8x15xf32>, vector<8x241xf32> -> vector<8x256xf32>
    %c2_65 = arith.constant 2 : index
    %c0_66 = arith.constant 0 : index
    %147 = vector.load %arg1[%c2_65, %c0_66] : memref<9x256xbf16, #tpu.memory_space<vmem>>, vector<1x256xbf16>
    %148 = arith.extf %147 : vector<1x256xbf16> to vector<1x256xf32>
    %149 = vector.broadcast %148 : vector<1x256xf32> to vector<8x256xf32>
    %150 = arith.mulf %146, %149 : vector<8x256xf32>
    %151 = arith.truncf %150 : vector<8x256xf32> to vector<8x256xbf16>
    %c16 = arith.constant 16 : index
    %c0_67 = arith.constant 0 : index
    %152 = vector.load %arg10[%c16, %c0_67] : memref<72x256xbf16, #tpu.memory_space<vmem>>, vector<8x256xbf16>
    tpu.vector_store %arg10[%c16, %c0_67], %151 {strides = array<i32>} : memref<72x256xbf16, #tpu.memory_space<vmem>>, vector<8x256xbf16>,
    %153 = vector.extract_strided_slice %125 {offsets = [0, 255], sizes = [8, 1], strides = [1, 1]} : vector<8x256xf32> to vector<8x1xf32>
    %154 = vector.extract_strided_slice %125 {offsets = [0, 0], sizes = [8, 255], strides = [1, 1]} : vector<8x256xf32> to vector<8x255xf32>
    %155 = tpu.concatenate %153, %154 in 1 : vector<8x1xf32>, vector<8x255xf32> -> vector<8x256xf32>
    %c3_68 = arith.constant 3 : index
    %c0_69 = arith.constant 0 : index
    %156 = vector.load %arg1[%c3_68, %c0_69] : memref<9x256xbf16, #tpu.memory_space<vmem>>, vector<1x256xbf16>
    %157 = arith.extf %156 : vector<1x256xbf16> to vector<1x256xf32>
    %158 = vector.broadcast %157 : vector<1x256xf32> to vector<8x256xf32>
    %159 = arith.mulf %155, %158 : vector<8x256xf32>
    %160 = arith.truncf %159 : vector<8x256xf32> to vector<8x256xbf16>
    %c24_70 = arith.constant 24 : index
    %c0_71 = arith.constant 0 : index
    %161 = vector.load %arg10[%c24_70, %c0_71] : memref<72x256xbf16, #tpu.memory_space<vmem>>, vector<8x256xbf16>
    tpu.vector_store %arg10[%c24_70, %c0_71], %160 {strides = array<i32>} : memref<72x256xbf16, #tpu.memory_space<vmem>>, vector<8x256xbf16>,
    %162 = arith.truncf %125 : vector<8x256xf32> to vector<8x256xbf16>
    %c32_72 = arith.constant 32 : index
    %c0_73 = arith.constant 0 : index
    %163 = vector.load %arg10[%c32_72, %c0_73] : memref<72x256xbf16, #tpu.memory_space<vmem>>, vector<8x256xbf16>
    tpu.vector_store %arg10[%c32_72, %c0_73], %162 {strides = array<i32>} : memref<72x256xbf16, #tpu.memory_space<vmem>>, vector<8x256xbf16>,
    %164 = vector.extract_strided_slice %125 {offsets = [0, 1], sizes = [8, 255], strides = [1, 1]} : vector<8x256xf32> to vector<8x255xf32>
    %165 = vector.extract_strided_slice %125 {offsets = [0, 0], sizes = [8, 1], strides = [1, 1]} : vector<8x256xf32> to vector<8x1xf32>
    %166 = tpu.concatenate %164, %165 in 1 : vector<8x255xf32>, vector<8x1xf32> -> vector<8x256xf32>
    %c5_74 = arith.constant 5 : index
    %c0_75 = arith.constant 0 : index
    %167 = vector.load %arg1[%c5_74, %c0_75] : memref<9x256xbf16, #tpu.memory_space<vmem>>, vector<1x256xbf16>
    %168 = arith.extf %167 : vector<1x256xbf16> to vector<1x256xf32>
    %169 = vector.broadcast %168 : vector<1x256xf32> to vector<8x256xf32>
    %170 = arith.mulf %166, %169 : vector<8x256xf32>
    %171 = arith.truncf %170 : vector<8x256xf32> to vector<8x256xbf16>
    %c40 = arith.constant 40 : index
    %c0_76 = arith.constant 0 : index
    %172 = vector.load %arg10[%c40, %c0_76] : memref<72x256xbf16, #tpu.memory_space<vmem>>, vector<8x256xbf16>
    tpu.vector_store %arg10[%c40, %c0_76], %171 {strides = array<i32>} : memref<72x256xbf16, #tpu.memory_space<vmem>>, vector<8x256xbf16>,
    %173 = vector.extract_strided_slice %125 {offsets = [0, 15], sizes = [8, 241], strides = [1, 1]} : vector<8x256xf32> to vector<8x241xf32>
    %174 = vector.extract_strided_slice %125 {offsets = [0, 0], sizes = [8, 15], strides = [1, 1]} : vector<8x256xf32> to vector<8x15xf32>
    %175 = tpu.concatenate %173, %174 in 1 : vector<8x241xf32>, vector<8x15xf32> -> vector<8x256xf32>
    %c6_77 = arith.constant 6 : index
    %c0_78 = arith.constant 0 : index
    %176 = vector.load %arg1[%c6_77, %c0_78] : memref<9x256xbf16, #tpu.memory_space<vmem>>, vector<1x256xbf16>
    %177 = arith.extf %176 : vector<1x256xbf16> to vector<1x256xf32>
    %178 = vector.broadcast %177 : vector<1x256xf32> to vector<8x256xf32>
    %179 = arith.mulf %175, %178 : vector<8x256xf32>
    %180 = arith.truncf %179 : vector<8x256xf32> to vector<8x256xbf16>
    %c48_79 = arith.constant 48 : index
    %c0_80 = arith.constant 0 : index
    %181 = vector.load %arg10[%c48_79, %c0_80] : memref<72x256xbf16, #tpu.memory_space<vmem>>, vector<8x256xbf16>
    tpu.vector_store %arg10[%c48_79, %c0_80], %180 {strides = array<i32>} : memref<72x256xbf16, #tpu.memory_space<vmem>>, vector<8x256xbf16>,
    %182 = vector.extract_strided_slice %125 {offsets = [0, 16], sizes = [8, 240], strides = [1, 1]} : vector<8x256xf32> to vector<8x240xf32>
    %183 = vector.extract_strided_slice %125 {offsets = [0, 0], sizes = [8, 16], strides = [1, 1]} : vector<8x256xf32> to vector<8x16xf32>
    %184 = tpu.concatenate %182, %183 in 1 : vector<8x240xf32>, vector<8x16xf32> -> vector<8x256xf32>
    %c7_81 = arith.constant 7 : index
    %c0_82 = arith.constant 0 : index
    %185 = vector.load %arg1[%c7_81, %c0_82] : memref<9x256xbf16, #tpu.memory_space<vmem>>, vector<1x256xbf16>
    %186 = arith.extf %185 : vector<1x256xbf16> to vector<1x256xf32>
    %187 = vector.broadcast %186 : vector<1x256xf32> to vector<8x256xf32>
    %188 = arith.mulf %184, %187 : vector<8x256xf32>
    %189 = arith.truncf %188 : vector<8x256xf32> to vector<8x256xbf16>
    %c56_83 = arith.constant 56 : index
    %c0_84 = arith.constant 0 : index
    %190 = vector.load %arg10[%c56_83, %c0_84] : memref<72x256xbf16, #tpu.memory_space<vmem>>, vector<8x256xbf16>
    tpu.vector_store %arg10[%c56_83, %c0_84], %189 {strides = array<i32>} : memref<72x256xbf16, #tpu.memory_space<vmem>>, vector<8x256xbf16>,
    %191 = vector.extract_strided_slice %125 {offsets = [0, 17], sizes = [8, 239], strides = [1, 1]} : vector<8x256xf32> to vector<8x239xf32>
    %192 = vector.extract_strided_slice %125 {offsets = [0, 0], sizes = [8, 17], strides = [1, 1]} : vector<8x256xf32> to vector<8x17xf32>
    %193 = tpu.concatenate %191, %192 in 1 : vector<8x239xf32>, vector<8x17xf32> -> vector<8x256xf32>
    %c8_85 = arith.constant 8 : index
    %c0_86 = arith.constant 0 : index
    %194 = vector.load %arg1[%c8_85, %c0_86] : memref<9x256xbf16, #tpu.memory_space<vmem>>, vector<1x256xbf16>
    %195 = arith.extf %194 : vector<1x256xbf16> to vector<1x256xf32>
    %196 = vector.broadcast %195 : vector<1x256xf32> to vector<8x256xf32>
    %197 = arith.mulf %193, %196 : vector<8x256xf32>
    %198 = arith.truncf %197 : vector<8x256xf32> to vector<8x256xbf16>
    %c64 = arith.constant 64 : index
    %c0_87 = arith.constant 0 : index
    %199 = vector.load %arg10[%c64, %c0_87] : memref<72x256xbf16, #tpu.memory_space<vmem>>, vector<8x256xbf16>
    tpu.vector_store %arg10[%c64, %c0_87], %198 {strides = array<i32>} : memref<72x256xbf16, #tpu.memory_space<vmem>>, vector<8x256xbf16>,
    %c0_88 = arith.constant 0 : index
    %c0_89 = arith.constant 0 : index
    %200 = vector.load %arg6[%c0_88, %c0_89] : memref<8x72xbf16, #tpu.memory_space<vmem>>, vector<8x72xbf16>
    %c0_90 = arith.constant 0 : index
    %c0_91 = arith.constant 0 : index
    %201 = vector.load %arg10[%c0_90, %c0_91] : memref<72x256xbf16, #tpu.memory_space<vmem>>, vector<72x256xbf16>
    %cst_92 = arith.constant dense<0.000000e+00> : vector<8x256xf32>
    %202 = tpu.matmul %200, %201, %cst_92 {dimension_numbers = #tpu.dot_dimension_numbers<[1], [0], [0], [1], [0, 0, 1, 1], [], []>} : vector<8x72xbf16>, vector<72x256xbf16>, vector<8x256xf32> -> vector<8x256xf32>
    %c0_93 = arith.constant 0 : index
    %c0_94 = arith.constant 0 : index
    %203 = vector.load %arg7[%c0_93, %c0_94] : memref<8x1xf32, #tpu.memory_space<vmem>>, vector<8x1xf32>
    %204 = vector.broadcast %203 : vector<8x1xf32> to vector<8x256xf32>
    %205 = arith.addf %202, %204 : vector<8x256xf32>
    %cst_95 = arith.constant 0.000000e+00 : f32
    %206 = vector.broadcast %cst_95 : f32 to vector<8x256xf32>
    %207 = arith.maximumf %205, %206 : vector<8x256xf32>
    %208 = arith.truncf %207 : vector<8x256xf32> to vector<8x256xbf16>
    %c0_96 = arith.constant 0 : index
    %c0_97 = arith.constant 0 : index
    %c0_98 = arith.constant 0 : index
    %209 = vector.load %arg8[%c0_96, %c0_97, %c0_98] : memref<1x8x256xbf16, #tpu.memory_space<vmem>>, vector<1x8x256xbf16>
    %210 = vector.shape_cast %209 : vector<1x8x256xbf16> to vector<8x256xbf16>
    %211 = vector.shape_cast %208 : vector<8x256xbf16> to vector<1x8x256xbf16>
    tpu.vector_store %arg8[%c0_96, %c0_97, %c0_98], %211 {strides = array<i32>} : memref<1x8x256xbf16, #tpu.memory_space<vmem>>, vector<1x8x256xbf16>,
    return
  }
  func.func @transform_0(%arg0: i32) -> (i32, i32) {
    %c0_i32 = arith.constant 0 : i32
    %c0_i32_0 = arith.constant 0 : i32
    %c0_i32_1 = arith.constant 0 : i32
    return %c0_i32, %c0_i32_0 : i32, i32
  }
  func.func @transform_1(%arg0: i32) -> (i32, i32, i32) {
    %c0_i32 = arith.constant 0 : i32
    %c0_i32_0 = arith.constant 0 : i32
    %c0_i32_1 = arith.constant 0 : i32
    return %arg0, %c0_i32, %c0_i32_0 : i32, i32, i32
  }
  func.func @transform_2(%arg0: i32) -> (i32, i32, i32) {
    %c0_i32 = arith.constant 0 : i32
    %c0_i32_0 = arith.constant 0 : i32
    %c0_i32_1 = arith.constant 0 : i32
    return %arg0, %c0_i32, %c0_i32_0 : i32, i32, i32
  }
  func.func @transform_3(%arg0: i32) -> (i32, i32) {
    %c0_i32 = arith.constant 0 : i32
    %c0_i32_0 = arith.constant 0 : i32
    %c0_i32_1 = arith.constant 0 : i32
    return %c0_i32, %c0_i32_0 : i32, i32
  }
  func.func @transform_4(%arg0: i32) -> (i32, i32) {
    %c0_i32 = arith.constant 0 : i32
    %c0_i32_0 = arith.constant 0 : i32
    %c0_i32_1 = arith.constant 0 : i32
    return %c0_i32, %c0_i32_0 : i32, i32
  }
  func.func @transform_5(%arg0: i32) -> (i32, i32) {
    %c0_i32 = arith.constant 0 : i32
    %c0_i32_0 = arith.constant 0 : i32
    %c0_i32_1 = arith.constant 0 : i32
    return %c0_i32, %c0_i32_0 : i32, i32
  }
  func.func @transform_6(%arg0: i32) -> (i32, i32) {
    %c0_i32 = arith.constant 0 : i32
    %c0_i32_0 = arith.constant 0 : i32
    %c0_i32_1 = arith.constant 0 : i32
    return %c0_i32, %c0_i32_0 : i32, i32
  }
  func.func @transform_7(%arg0: i32) -> (i32, i32, i32) {
    %c0_i32 = arith.constant 0 : i32
    %c0_i32_0 = arith.constant 0 : i32
    %c0_i32_1 = arith.constant 0 : i32
    return %arg0, %c0_i32, %c0_i32_0 : i32, i32, i32
  }
}

module attributes {stable_mosaic.version = 11 : i64} {
  func.func @_head_kernel(%arg0: i32, %arg1: i32, %arg2: memref<1x8x256xbf16, #tpu.memory_space<vmem>>, %arg3: memref<4x8xbf16, #tpu.memory_space<vmem>>, %arg4: memref<4x1xf32, #tpu.memory_space<vmem>>, %arg5: memref<1x4x256xf32, #tpu.memory_space<vmem>>) attributes {dimension_semantics = [#tpu.dimension_semantics<parallel>, #tpu.dimension_semantics<parallel>], iteration_bounds = array<i64: 2, 1>, scalar_prefetch = 0 : i64, scratch_operands = 0 : i64, tpu.core_type = #tpu.core_type<tc>, window_params = [{transform_indices = @transform_0, window_bounds = array<i64: 1, 8, 256>}, {pipeline_mode = #tpu.pipeline_mode<synchronous>, transform_indices = @transform_1, window_bounds = array<i64: 4, 8>}, {pipeline_mode = #tpu.pipeline_mode<synchronous>, transform_indices = @transform_2, window_bounds = array<i64: 4, 1>}, {transform_indices = @transform_3, window_bounds = array<i64: 1, 4, 256>}]} {
    %c0 = arith.constant 0 : index
    %c0_0 = arith.constant 0 : index
    %0 = vector.load %arg3[%c0, %c0_0] : memref<4x8xbf16, #tpu.memory_space<vmem>>, vector<4x8xbf16>
    %c0_1 = arith.constant 0 : index
    %c0_2 = arith.constant 0 : index
    %c0_3 = arith.constant 0 : index
    %1 = vector.load %arg2[%c0_1, %c0_2, %c0_3] : memref<1x8x256xbf16, #tpu.memory_space<vmem>>, vector<1x8x256xbf16>
    %2 = vector.shape_cast %1 : vector<1x8x256xbf16> to vector<8x256xbf16>
    %cst = arith.constant dense<0.000000e+00> : vector<4x256xf32>
    %3 = tpu.matmul %0, %2, %cst {dimension_numbers = #tpu.dot_dimension_numbers<[1], [0], [0], [1], [0, 0, 1, 1], [], []>} : vector<4x8xbf16>, vector<8x256xbf16>, vector<4x256xf32> -> vector<4x256xf32>
    %c0_4 = arith.constant 0 : index
    %c0_5 = arith.constant 0 : index
    %4 = vector.load %arg4[%c0_4, %c0_5] : memref<4x1xf32, #tpu.memory_space<vmem>>, vector<4x1xf32>
    %5 = vector.broadcast %4 : vector<4x1xf32> to vector<4x256xf32>
    %6 = arith.addf %3, %5 : vector<4x256xf32>
    %c0_6 = arith.constant 0 : index
    %c0_7 = arith.constant 0 : index
    %c0_8 = arith.constant 0 : index
    %7 = vector.load %arg5[%c0_6, %c0_7, %c0_8] : memref<1x4x256xf32, #tpu.memory_space<vmem>>, vector<1x4x256xf32>
    %8 = vector.shape_cast %7 : vector<1x4x256xf32> to vector<4x256xf32>
    %9 = vector.shape_cast %6 : vector<4x256xf32> to vector<1x4x256xf32>
    tpu.vector_store %arg5[%c0_6, %c0_7, %c0_8], %9 {strides = array<i32>} : memref<1x4x256xf32, #tpu.memory_space<vmem>>, vector<1x4x256xf32>,
    return
  }
  func.func @transform_0(%arg0: i32, %arg1: i32) -> (i32, i32, i32) {
    %c0_i32 = arith.constant 0 : i32
    %c0_i32_0 = arith.constant 0 : i32
    return %arg0, %c0_i32, %arg1 : i32, i32, i32
  }
  func.func @transform_1(%arg0: i32, %arg1: i32) -> (i32, i32) {
    %c0_i32 = arith.constant 0 : i32
    %c0_i32_0 = arith.constant 0 : i32
    %c0_i32_1 = arith.constant 0 : i32
    return %c0_i32, %c0_i32_0 : i32, i32
  }
  func.func @transform_2(%arg0: i32, %arg1: i32) -> (i32, i32) {
    %c0_i32 = arith.constant 0 : i32
    %c0_i32_0 = arith.constant 0 : i32
    %c0_i32_1 = arith.constant 0 : i32
    return %c0_i32, %c0_i32_0 : i32, i32
  }
  func.func @transform_3(%arg0: i32, %arg1: i32) -> (i32, i32, i32) {
    %c0_i32 = arith.constant 0 : i32
    %c0_i32_0 = arith.constant 0 : i32
    return %arg0, %c0_i32, %arg1 : i32, i32, i32
  }
}

module attributes {stable_mosaic.version = 11 : i64} {
  func.func @_fused_double_conv_kernel(%arg0: i32, %arg1: memref<9x256xbf16, #tpu.memory_space<vmem>>, %arg2: memref<1x8x256xbf16, #tpu.memory_space<vmem>>, %arg3: memref<1x8x256xbf16, #tpu.memory_space<vmem>>, %arg4: memref<1x16x256xbf16, #tpu.memory_space<vmem>>, %arg5: memref<8x288xbf16, #tpu.memory_space<vmem>>, %arg6: memref<8x1xf32, #tpu.memory_space<vmem>>, %arg7: memref<8x72xbf16, #tpu.memory_space<vmem>>, %arg8: memref<8x1xf32, #tpu.memory_space<vmem>>, %arg9: memref<1x8x256xbf16, #tpu.memory_space<vmem>>, %arg10: memref<288x256xbf16, #tpu.memory_space<vmem>>, %arg11: memref<72x256xbf16, #tpu.memory_space<vmem>>) attributes {dimension_semantics = [#tpu.dimension_semantics<parallel>], iteration_bounds = array<i64: 2>, scalar_prefetch = 0 : i64, scratch_operands = 2 : i64, tpu.core_type = #tpu.core_type<tc>, window_params = [{pipeline_mode = #tpu.pipeline_mode<synchronous>, transform_indices = @transform_0, window_bounds = array<i64: 9, 256>}, {transform_indices = @transform_1, window_bounds = array<i64: 1, 8, 256>}, {transform_indices = @transform_2, window_bounds = array<i64: 1, 8, 256>}, {transform_indices = @transform_3, window_bounds = array<i64: 1, 16, 256>}, {pipeline_mode = #tpu.pipeline_mode<synchronous>, transform_indices = @transform_4, window_bounds = array<i64: 8, 288>}, {pipeline_mode = #tpu.pipeline_mode<synchronous>, transform_indices = @transform_5, window_bounds = array<i64: 8, 1>}, {pipeline_mode = #tpu.pipeline_mode<synchronous>, transform_indices = @transform_6, window_bounds = array<i64: 8, 72>}, {pipeline_mode = #tpu.pipeline_mode<synchronous>, transform_indices = @transform_7, window_bounds = array<i64: 8, 1>}, {transform_indices = @transform_8, window_bounds = array<i64: 1, 8, 256>}]} {
    %c0 = arith.constant 0 : index
    %c0_0 = arith.constant 0 : index
    %c0_1 = arith.constant 0 : index
    %0 = vector.load %arg2[%c0, %c0_0, %c0_1] : memref<1x8x256xbf16, #tpu.memory_space<vmem>>, vector<1x8x256xbf16>
    %1 = vector.shape_cast %0 : vector<1x8x256xbf16> to vector<8x256xbf16>
    %2 = vector.extract_strided_slice %1 {offsets = [0, 239], sizes = [8, 17], strides = [1, 1]} : vector<8x256xbf16> to vector<8x17xbf16>
    %3 = vector.extract_strided_slice %1 {offsets = [0, 0], sizes = [8, 239], strides = [1, 1]} : vector<8x256xbf16> to vector<8x239xbf16>
    %4 = tpu.concatenate %2, %3 in 1 : vector<8x17xbf16>, vector<8x239xbf16> -> vector<8x256xbf16>
    %c0_2 = arith.constant 0 : index
    %c0_3 = arith.constant 0 : index
    %5 = vector.load %arg1[%c0_2, %c0_3] : memref<9x256xbf16, #tpu.memory_space<vmem>>, vector<1x256xbf16>
    %6 = vector.broadcast %5 : vector<1x256xbf16> to vector<8x256xbf16>
    %7 = arith.mulf %4, %6 : vector<8x256xbf16>
    %c0_4 = arith.constant 0 : index
    %c0_5 = arith.constant 0 : index
    %8 = vector.load %arg10[%c0_4, %c0_5] : memref<288x256xbf16, #tpu.memory_space<vmem>>, vector<8x256xbf16>
    tpu.vector_store %arg10[%c0_4, %c0_5], %7 {strides = array<i32>} : memref<288x256xbf16, #tpu.memory_space<vmem>>, vector<8x256xbf16>,
    %9 = vector.extract_strided_slice %1 {offsets = [0, 240], sizes = [8, 16], strides = [1, 1]} : vector<8x256xbf16> to vector<8x16xbf16>
    %10 = vector.extract_strided_slice %1 {offsets = [0, 0], sizes = [8, 240], strides = [1, 1]} : vector<8x256xbf16> to vector<8x240xbf16>
    %11 = tpu.concatenate %9, %10 in 1 : vector<8x16xbf16>, vector<8x240xbf16> -> vector<8x256xbf16>
    %c1 = arith.constant 1 : index
    %c0_6 = arith.constant 0 : index
    %12 = vector.load %arg1[%c1, %c0_6] : memref<9x256xbf16, #tpu.memory_space<vmem>>, vector<1x256xbf16>
    %13 = vector.broadcast %12 : vector<1x256xbf16> to vector<8x256xbf16>
    %14 = arith.mulf %11, %13 : vector<8x256xbf16>
    %c32 = arith.constant 32 : index
    %c0_7 = arith.constant 0 : index
    %15 = vector.load %arg10[%c32, %c0_7] : memref<288x256xbf16, #tpu.memory_space<vmem>>, vector<8x256xbf16>
    tpu.vector_store %arg10[%c32, %c0_7], %14 {strides = array<i32>} : memref<288x256xbf16, #tpu.memory_space<vmem>>, vector<8x256xbf16>,
    %16 = vector.extract_strided_slice %1 {offsets = [0, 241], sizes = [8, 15], strides = [1, 1]} : vector<8x256xbf16> to vector<8x15xbf16>
    %17 = vector.extract_strided_slice %1 {offsets = [0, 0], sizes = [8, 241], strides = [1, 1]} : vector<8x256xbf16> to vector<8x241xbf16>
    %18 = tpu.concatenate %16, %17 in 1 : vector<8x15xbf16>, vector<8x241xbf16> -> vector<8x256xbf16>
    %c2 = arith.constant 2 : index
    %c0_8 = arith.constant 0 : index
    %19 = vector.load %arg1[%c2, %c0_8] : memref<9x256xbf16, #tpu.memory_space<vmem>>, vector<1x256xbf16>
    %20 = vector.broadcast %19 : vector<1x256xbf16> to vector<8x256xbf16>
    %21 = arith.mulf %18, %20 : vector<8x256xbf16>
    %c64 = arith.constant 64 : index
    %c0_9 = arith.constant 0 : index
    %22 = vector.load %arg10[%c64, %c0_9] : memref<288x256xbf16, #tpu.memory_space<vmem>>, vector<8x256xbf16>
    tpu.vector_store %arg10[%c64, %c0_9], %21 {strides = array<i32>} : memref<288x256xbf16, #tpu.memory_space<vmem>>, vector<8x256xbf16>,
    %23 = vector.extract_strided_slice %1 {offsets = [0, 255], sizes = [8, 1], strides = [1, 1]} : vector<8x256xbf16> to vector<8x1xbf16>
    %24 = vector.extract_strided_slice %1 {offsets = [0, 0], sizes = [8, 255], strides = [1, 1]} : vector<8x256xbf16> to vector<8x255xbf16>
    %25 = tpu.concatenate %23, %24 in 1 : vector<8x1xbf16>, vector<8x255xbf16> -> vector<8x256xbf16>
    %c3 = arith.constant 3 : index
    %c0_10 = arith.constant 0 : index
    %26 = vector.load %arg1[%c3, %c0_10] : memref<9x256xbf16, #tpu.memory_space<vmem>>, vector<1x256xbf16>
    %27 = vector.broadcast %26 : vector<1x256xbf16> to vector<8x256xbf16>
    %28 = arith.mulf %25, %27 : vector<8x256xbf16>
    %c96 = arith.constant 96 : index
    %c0_11 = arith.constant 0 : index
    %29 = vector.load %arg10[%c96, %c0_11] : memref<288x256xbf16, #tpu.memory_space<vmem>>, vector<8x256xbf16>
    tpu.vector_store %arg10[%c96, %c0_11], %28 {strides = array<i32>} : memref<288x256xbf16, #tpu.memory_space<vmem>>, vector<8x256xbf16>,
    %c128 = arith.constant 128 : index
    %c0_12 = arith.constant 0 : index
    %30 = vector.load %arg10[%c128, %c0_12] : memref<288x256xbf16, #tpu.memory_space<vmem>>, vector<8x256xbf16>
    tpu.vector_store %arg10[%c128, %c0_12], %1 {strides = array<i32>} : memref<288x256xbf16, #tpu.memory_space<vmem>>, vector<8x256xbf16>,
    %31 = vector.extract_strided_slice %1 {offsets = [0, 1], sizes = [8, 255], strides = [1, 1]} : vector<8x256xbf16> to vector<8x255xbf16>
    %32 = vector.extract_strided_slice %1 {offsets = [0, 0], sizes = [8, 1], strides = [1, 1]} : vector<8x256xbf16> to vector<8x1xbf16>
    %33 = tpu.concatenate %31, %32 in 1 : vector<8x255xbf16>, vector<8x1xbf16> -> vector<8x256xbf16>
    %c5 = arith.constant 5 : index
    %c0_13 = arith.constant 0 : index
    %34 = vector.load %arg1[%c5, %c0_13] : memref<9x256xbf16, #tpu.memory_space<vmem>>, vector<1x256xbf16>
    %35 = vector.broadcast %34 : vector<1x256xbf16> to vector<8x256xbf16>
    %36 = arith.mulf %33, %35 : vector<8x256xbf16>
    %c160 = arith.constant 160 : index
    %c0_14 = arith.constant 0 : index
    %37 = vector.load %arg10[%c160, %c0_14] : memref<288x256xbf16, #tpu.memory_space<vmem>>, vector<8x256xbf16>
    tpu.vector_store %arg10[%c160, %c0_14], %36 {strides = array<i32>} : memref<288x256xbf16, #tpu.memory_space<vmem>>, vector<8x256xbf16>,
    %38 = vector.extract_strided_slice %1 {offsets = [0, 15], sizes = [8, 241], strides = [1, 1]} : vector<8x256xbf16> to vector<8x241xbf16>
    %39 = vector.extract_strided_slice %1 {offsets = [0, 0], sizes = [8, 15], strides = [1, 1]} : vector<8x256xbf16> to vector<8x15xbf16>
    %40 = tpu.concatenate %38, %39 in 1 : vector<8x241xbf16>, vector<8x15xbf16> -> vector<8x256xbf16>
    %c6 = arith.constant 6 : index
    %c0_15 = arith.constant 0 : index
    %41 = vector.load %arg1[%c6, %c0_15] : memref<9x256xbf16, #tpu.memory_space<vmem>>, vector<1x256xbf16>
    %42 = vector.broadcast %41 : vector<1x256xbf16> to vector<8x256xbf16>
    %43 = arith.mulf %40, %42 : vector<8x256xbf16>
    %c192 = arith.constant 192 : index
    %c0_16 = arith.constant 0 : index
    %44 = vector.load %arg10[%c192, %c0_16] : memref<288x256xbf16, #tpu.memory_space<vmem>>, vector<8x256xbf16>
    tpu.vector_store %arg10[%c192, %c0_16], %43 {strides = array<i32>} : memref<288x256xbf16, #tpu.memory_space<vmem>>, vector<8x256xbf16>,
    %45 = vector.extract_strided_slice %1 {offsets = [0, 16], sizes = [8, 240], strides = [1, 1]} : vector<8x256xbf16> to vector<8x240xbf16>
    %46 = vector.extract_strided_slice %1 {offsets = [0, 0], sizes = [8, 16], strides = [1, 1]} : vector<8x256xbf16> to vector<8x16xbf16>
    %47 = tpu.concatenate %45, %46 in 1 : vector<8x240xbf16>, vector<8x16xbf16> -> vector<8x256xbf16>
    %c7 = arith.constant 7 : index
    %c0_17 = arith.constant 0 : index
    %48 = vector.load %arg1[%c7, %c0_17] : memref<9x256xbf16, #tpu.memory_space<vmem>>, vector<1x256xbf16>
    %49 = vector.broadcast %48 : vector<1x256xbf16> to vector<8x256xbf16>
    %50 = arith.mulf %47, %49 : vector<8x256xbf16>
    %c224 = arith.constant 224 : index
    %c0_18 = arith.constant 0 : index
    %51 = vector.load %arg10[%c224, %c0_18] : memref<288x256xbf16, #tpu.memory_space<vmem>>, vector<8x256xbf16>
    tpu.vector_store %arg10[%c224, %c0_18], %50 {strides = array<i32>} : memref<288x256xbf16, #tpu.memory_space<vmem>>, vector<8x256xbf16>,
    %52 = vector.extract_strided_slice %1 {offsets = [0, 17], sizes = [8, 239], strides = [1, 1]} : vector<8x256xbf16> to vector<8x239xbf16>
    %53 = vector.extract_strided_slice %1 {offsets = [0, 0], sizes = [8, 17], strides = [1, 1]} : vector<8x256xbf16> to vector<8x17xbf16>
    %54 = tpu.concatenate %52, %53 in 1 : vector<8x239xbf16>, vector<8x17xbf16> -> vector<8x256xbf16>
    %c8 = arith.constant 8 : index
    %c0_19 = arith.constant 0 : index
    %55 = vector.load %arg1[%c8, %c0_19] : memref<9x256xbf16, #tpu.memory_space<vmem>>, vector<1x256xbf16>
    %56 = vector.broadcast %55 : vector<1x256xbf16> to vector<8x256xbf16>
    %57 = arith.mulf %54, %56 : vector<8x256xbf16>
    %c256 = arith.constant 256 : index
    %c0_20 = arith.constant 0 : index
    %58 = vector.load %arg10[%c256, %c0_20] : memref<288x256xbf16, #tpu.memory_space<vmem>>, vector<8x256xbf16>
    tpu.vector_store %arg10[%c256, %c0_20], %57 {strides = array<i32>} : memref<288x256xbf16, #tpu.memory_space<vmem>>, vector<8x256xbf16>,
    %c0_21 = arith.constant 0 : index
    %c0_22 = arith.constant 0 : index
    %c0_23 = arith.constant 0 : index
    %59 = vector.load %arg3[%c0_21, %c0_22, %c0_23] : memref<1x8x256xbf16, #tpu.memory_space<vmem>>, vector<1x8x256xbf16>
    %60 = vector.shape_cast %59 : vector<1x8x256xbf16> to vector<8x256xbf16>
    %61 = vector.extract_strided_slice %60 {offsets = [0, 239], sizes = [8, 17], strides = [1, 1]} : vector<8x256xbf16> to vector<8x17xbf16>
    %62 = vector.extract_strided_slice %60 {offsets = [0, 0], sizes = [8, 239], strides = [1, 1]} : vector<8x256xbf16> to vector<8x239xbf16>
    %63 = tpu.concatenate %61, %62 in 1 : vector<8x17xbf16>, vector<8x239xbf16> -> vector<8x256xbf16>
    %c0_24 = arith.constant 0 : index
    %c0_25 = arith.constant 0 : index
    %64 = vector.load %arg1[%c0_24, %c0_25] : memref<9x256xbf16, #tpu.memory_space<vmem>>, vector<1x256xbf16>
    %65 = vector.broadcast %64 : vector<1x256xbf16> to vector<8x256xbf16>
    %66 = arith.mulf %63, %65 : vector<8x256xbf16>
    %c8_26 = arith.constant 8 : index
    %c0_27 = arith.constant 0 : index
    %67 = vector.load %arg10[%c8_26, %c0_27] : memref<288x256xbf16, #tpu.memory_space<vmem>>, vector<8x256xbf16>
    tpu.vector_store %arg10[%c8_26, %c0_27], %66 {strides = array<i32>} : memref<288x256xbf16, #tpu.memory_space<vmem>>, vector<8x256xbf16>,
    %68 = vector.extract_strided_slice %60 {offsets = [0, 240], sizes = [8, 16], strides = [1, 1]} : vector<8x256xbf16> to vector<8x16xbf16>
    %69 = vector.extract_strided_slice %60 {offsets = [0, 0], sizes = [8, 240], strides = [1, 1]} : vector<8x256xbf16> to vector<8x240xbf16>
    %70 = tpu.concatenate %68, %69 in 1 : vector<8x16xbf16>, vector<8x240xbf16> -> vector<8x256xbf16>
    %c1_28 = arith.constant 1 : index
    %c0_29 = arith.constant 0 : index
    %71 = vector.load %arg1[%c1_28, %c0_29] : memref<9x256xbf16, #tpu.memory_space<vmem>>, vector<1x256xbf16>
    %72 = vector.broadcast %71 : vector<1x256xbf16> to vector<8x256xbf16>
    %73 = arith.mulf %70, %72 : vector<8x256xbf16>
    %c40 = arith.constant 40 : index
    %c0_30 = arith.constant 0 : index
    %74 = vector.load %arg10[%c40, %c0_30] : memref<288x256xbf16, #tpu.memory_space<vmem>>, vector<8x256xbf16>
    tpu.vector_store %arg10[%c40, %c0_30], %73 {strides = array<i32>} : memref<288x256xbf16, #tpu.memory_space<vmem>>, vector<8x256xbf16>,
    %75 = vector.extract_strided_slice %60 {offsets = [0, 241], sizes = [8, 15], strides = [1, 1]} : vector<8x256xbf16> to vector<8x15xbf16>
    %76 = vector.extract_strided_slice %60 {offsets = [0, 0], sizes = [8, 241], strides = [1, 1]} : vector<8x256xbf16> to vector<8x241xbf16>
    %77 = tpu.concatenate %75, %76 in 1 : vector<8x15xbf16>, vector<8x241xbf16> -> vector<8x256xbf16>
    %c2_31 = arith.constant 2 : index
    %c0_32 = arith.constant 0 : index
    %78 = vector.load %arg1[%c2_31, %c0_32] : memref<9x256xbf16, #tpu.memory_space<vmem>>, vector<1x256xbf16>
    %79 = vector.broadcast %78 : vector<1x256xbf16> to vector<8x256xbf16>
    %80 = arith.mulf %77, %79 : vector<8x256xbf16>
    %c72 = arith.constant 72 : index
    %c0_33 = arith.constant 0 : index
    %81 = vector.load %arg10[%c72, %c0_33] : memref<288x256xbf16, #tpu.memory_space<vmem>>, vector<8x256xbf16>
    tpu.vector_store %arg10[%c72, %c0_33], %80 {strides = array<i32>} : memref<288x256xbf16, #tpu.memory_space<vmem>>, vector<8x256xbf16>,
    %82 = vector.extract_strided_slice %60 {offsets = [0, 255], sizes = [8, 1], strides = [1, 1]} : vector<8x256xbf16> to vector<8x1xbf16>
    %83 = vector.extract_strided_slice %60 {offsets = [0, 0], sizes = [8, 255], strides = [1, 1]} : vector<8x256xbf16> to vector<8x255xbf16>
    %84 = tpu.concatenate %82, %83 in 1 : vector<8x1xbf16>, vector<8x255xbf16> -> vector<8x256xbf16>
    %c3_34 = arith.constant 3 : index
    %c0_35 = arith.constant 0 : index
    %85 = vector.load %arg1[%c3_34, %c0_35] : memref<9x256xbf16, #tpu.memory_space<vmem>>, vector<1x256xbf16>
    %86 = vector.broadcast %85 : vector<1x256xbf16> to vector<8x256xbf16>
    %87 = arith.mulf %84, %86 : vector<8x256xbf16>
    %c104 = arith.constant 104 : index
    %c0_36 = arith.constant 0 : index
    %88 = vector.load %arg10[%c104, %c0_36] : memref<288x256xbf16, #tpu.memory_space<vmem>>, vector<8x256xbf16>
    tpu.vector_store %arg10[%c104, %c0_36], %87 {strides = array<i32>} : memref<288x256xbf16, #tpu.memory_space<vmem>>, vector<8x256xbf16>,
    %c136 = arith.constant 136 : index
    %c0_37 = arith.constant 0 : index
    %89 = vector.load %arg10[%c136, %c0_37] : memref<288x256xbf16, #tpu.memory_space<vmem>>, vector<8x256xbf16>
    tpu.vector_store %arg10[%c136, %c0_37], %60 {strides = array<i32>} : memref<288x256xbf16, #tpu.memory_space<vmem>>, vector<8x256xbf16>,
    %90 = vector.extract_strided_slice %60 {offsets = [0, 1], sizes = [8, 255], strides = [1, 1]} : vector<8x256xbf16> to vector<8x255xbf16>
    %91 = vector.extract_strided_slice %60 {offsets = [0, 0], sizes = [8, 1], strides = [1, 1]} : vector<8x256xbf16> to vector<8x1xbf16>
    %92 = tpu.concatenate %90, %91 in 1 : vector<8x255xbf16>, vector<8x1xbf16> -> vector<8x256xbf16>
    %c5_38 = arith.constant 5 : index
    %c0_39 = arith.constant 0 : index
    %93 = vector.load %arg1[%c5_38, %c0_39] : memref<9x256xbf16, #tpu.memory_space<vmem>>, vector<1x256xbf16>
    %94 = vector.broadcast %93 : vector<1x256xbf16> to vector<8x256xbf16>
    %95 = arith.mulf %92, %94 : vector<8x256xbf16>
    %c168 = arith.constant 168 : index
    %c0_40 = arith.constant 0 : index
    %96 = vector.load %arg10[%c168, %c0_40] : memref<288x256xbf16, #tpu.memory_space<vmem>>, vector<8x256xbf16>
    tpu.vector_store %arg10[%c168, %c0_40], %95 {strides = array<i32>} : memref<288x256xbf16, #tpu.memory_space<vmem>>, vector<8x256xbf16>,
    %97 = vector.extract_strided_slice %60 {offsets = [0, 15], sizes = [8, 241], strides = [1, 1]} : vector<8x256xbf16> to vector<8x241xbf16>
    %98 = vector.extract_strided_slice %60 {offsets = [0, 0], sizes = [8, 15], strides = [1, 1]} : vector<8x256xbf16> to vector<8x15xbf16>
    %99 = tpu.concatenate %97, %98 in 1 : vector<8x241xbf16>, vector<8x15xbf16> -> vector<8x256xbf16>
    %c6_41 = arith.constant 6 : index
    %c0_42 = arith.constant 0 : index
    %100 = vector.load %arg1[%c6_41, %c0_42] : memref<9x256xbf16, #tpu.memory_space<vmem>>, vector<1x256xbf16>
    %101 = vector.broadcast %100 : vector<1x256xbf16> to vector<8x256xbf16>
    %102 = arith.mulf %99, %101 : vector<8x256xbf16>
    %c200 = arith.constant 200 : index
    %c0_43 = arith.constant 0 : index
    %103 = vector.load %arg10[%c200, %c0_43] : memref<288x256xbf16, #tpu.memory_space<vmem>>, vector<8x256xbf16>
    tpu.vector_store %arg10[%c200, %c0_43], %102 {strides = array<i32>} : memref<288x256xbf16, #tpu.memory_space<vmem>>, vector<8x256xbf16>,
    %104 = vector.extract_strided_slice %60 {offsets = [0, 16], sizes = [8, 240], strides = [1, 1]} : vector<8x256xbf16> to vector<8x240xbf16>
    %105 = vector.extract_strided_slice %60 {offsets = [0, 0], sizes = [8, 16], strides = [1, 1]} : vector<8x256xbf16> to vector<8x16xbf16>
    %106 = tpu.concatenate %104, %105 in 1 : vector<8x240xbf16>, vector<8x16xbf16> -> vector<8x256xbf16>
    %c7_44 = arith.constant 7 : index
    %c0_45 = arith.constant 0 : index
    %107 = vector.load %arg1[%c7_44, %c0_45] : memref<9x256xbf16, #tpu.memory_space<vmem>>, vector<1x256xbf16>
    %108 = vector.broadcast %107 : vector<1x256xbf16> to vector<8x256xbf16>
    %109 = arith.mulf %106, %108 : vector<8x256xbf16>
    %c232 = arith.constant 232 : index
    %c0_46 = arith.constant 0 : index
    %110 = vector.load %arg10[%c232, %c0_46] : memref<288x256xbf16, #tpu.memory_space<vmem>>, vector<8x256xbf16>
    tpu.vector_store %arg10[%c232, %c0_46], %109 {strides = array<i32>} : memref<288x256xbf16, #tpu.memory_space<vmem>>, vector<8x256xbf16>,
    %111 = vector.extract_strided_slice %60 {offsets = [0, 17], sizes = [8, 239], strides = [1, 1]} : vector<8x256xbf16> to vector<8x239xbf16>
    %112 = vector.extract_strided_slice %60 {offsets = [0, 0], sizes = [8, 17], strides = [1, 1]} : vector<8x256xbf16> to vector<8x17xbf16>
    %113 = tpu.concatenate %111, %112 in 1 : vector<8x239xbf16>, vector<8x17xbf16> -> vector<8x256xbf16>
    %c8_47 = arith.constant 8 : index
    %c0_48 = arith.constant 0 : index
    %114 = vector.load %arg1[%c8_47, %c0_48] : memref<9x256xbf16, #tpu.memory_space<vmem>>, vector<1x256xbf16>
    %115 = vector.broadcast %114 : vector<1x256xbf16> to vector<8x256xbf16>
    %116 = arith.mulf %113, %115 : vector<8x256xbf16>
    %c264 = arith.constant 264 : index
    %c0_49 = arith.constant 0 : index
    %117 = vector.load %arg10[%c264, %c0_49] : memref<288x256xbf16, #tpu.memory_space<vmem>>, vector<8x256xbf16>
    tpu.vector_store %arg10[%c264, %c0_49], %116 {strides = array<i32>} : memref<288x256xbf16, #tpu.memory_space<vmem>>, vector<8x256xbf16>,
    %c0_50 = arith.constant 0 : index
    %c0_51 = arith.constant 0 : index
    %c0_52 = arith.constant 0 : index
    %118 = vector.load %arg4[%c0_50, %c0_51, %c0_52] : memref<1x16x256xbf16, #tpu.memory_space<vmem>>, vector<1x16x256xbf16>
    %119 = vector.shape_cast %118 : vector<1x16x256xbf16> to vector<16x256xbf16>
    %120 = vector.extract_strided_slice %119 {offsets = [0, 239], sizes = [16, 17], strides = [1, 1]} : vector<16x256xbf16> to vector<16x17xbf16>
    %121 = vector.extract_strided_slice %119 {offsets = [0, 0], sizes = [16, 239], strides = [1, 1]} : vector<16x256xbf16> to vector<16x239xbf16>
    %122 = tpu.concatenate %120, %121 in 1 : vector<16x17xbf16>, vector<16x239xbf16> -> vector<16x256xbf16>
    %c0_53 = arith.constant 0 : index
    %c0_54 = arith.constant 0 : index
    %123 = vector.load %arg1[%c0_53, %c0_54] : memref<9x256xbf16, #tpu.memory_space<vmem>>, vector<1x256xbf16>
    %124 = vector.broadcast %123 : vector<1x256xbf16> to vector<16x256xbf16>
    %125 = arith.mulf %122, %124 : vector<16x256xbf16>
    %c16 = arith.constant 16 : index
    %c0_55 = arith.constant 0 : index
    %126 = vector.load %arg10[%c16, %c0_55] : memref<288x256xbf16, #tpu.memory_space<vmem>>, vector<16x256xbf16>
    tpu.vector_store %arg10[%c16, %c0_55], %125 {strides = array<i32>} : memref<288x256xbf16, #tpu.memory_space<vmem>>, vector<16x256xbf16>,
    %127 = vector.extract_strided_slice %119 {offsets = [0, 240], sizes = [16, 16], strides = [1, 1]} : vector<16x256xbf16> to vector<16x16xbf16>
    %128 = vector.extract_strided_slice %119 {offsets = [0, 0], sizes = [16, 240], strides = [1, 1]} : vector<16x256xbf16> to vector<16x240xbf16>
    %129 = tpu.concatenate %127, %128 in 1 : vector<16x16xbf16>, vector<16x240xbf16> -> vector<16x256xbf16>
    %c1_56 = arith.constant 1 : index
    %c0_57 = arith.constant 0 : index
    %130 = vector.load %arg1[%c1_56, %c0_57] : memref<9x256xbf16, #tpu.memory_space<vmem>>, vector<1x256xbf16>
    %131 = vector.broadcast %130 : vector<1x256xbf16> to vector<16x256xbf16>
    %132 = arith.mulf %129, %131 : vector<16x256xbf16>
    %c48 = arith.constant 48 : index
    %c0_58 = arith.constant 0 : index
    %133 = vector.load %arg10[%c48, %c0_58] : memref<288x256xbf16, #tpu.memory_space<vmem>>, vector<16x256xbf16>
    tpu.vector_store %arg10[%c48, %c0_58], %132 {strides = array<i32>} : memref<288x256xbf16, #tpu.memory_space<vmem>>, vector<16x256xbf16>,
    %134 = vector.extract_strided_slice %119 {offsets = [0, 241], sizes = [16, 15], strides = [1, 1]} : vector<16x256xbf16> to vector<16x15xbf16>
    %135 = vector.extract_strided_slice %119 {offsets = [0, 0], sizes = [16, 241], strides = [1, 1]} : vector<16x256xbf16> to vector<16x241xbf16>
    %136 = tpu.concatenate %134, %135 in 1 : vector<16x15xbf16>, vector<16x241xbf16> -> vector<16x256xbf16>
    %c2_59 = arith.constant 2 : index
    %c0_60 = arith.constant 0 : index
    %137 = vector.load %arg1[%c2_59, %c0_60] : memref<9x256xbf16, #tpu.memory_space<vmem>>, vector<1x256xbf16>
    %138 = vector.broadcast %137 : vector<1x256xbf16> to vector<16x256xbf16>
    %139 = arith.mulf %136, %138 : vector<16x256xbf16>
    %c80 = arith.constant 80 : index
    %c0_61 = arith.constant 0 : index
    %140 = vector.load %arg10[%c80, %c0_61] : memref<288x256xbf16, #tpu.memory_space<vmem>>, vector<16x256xbf16>
    tpu.vector_store %arg10[%c80, %c0_61], %139 {strides = array<i32>} : memref<288x256xbf16, #tpu.memory_space<vmem>>, vector<16x256xbf16>,
    %141 = vector.extract_strided_slice %119 {offsets = [0, 255], sizes = [16, 1], strides = [1, 1]} : vector<16x256xbf16> to vector<16x1xbf16>
    %142 = vector.extract_strided_slice %119 {offsets = [0, 0], sizes = [16, 255], strides = [1, 1]} : vector<16x256xbf16> to vector<16x255xbf16>
    %143 = tpu.concatenate %141, %142 in 1 : vector<16x1xbf16>, vector<16x255xbf16> -> vector<16x256xbf16>
    %c3_62 = arith.constant 3 : index
    %c0_63 = arith.constant 0 : index
    %144 = vector.load %arg1[%c3_62, %c0_63] : memref<9x256xbf16, #tpu.memory_space<vmem>>, vector<1x256xbf16>
    %145 = vector.broadcast %144 : vector<1x256xbf16> to vector<16x256xbf16>
    %146 = arith.mulf %143, %145 : vector<16x256xbf16>
    %c112 = arith.constant 112 : index
    %c0_64 = arith.constant 0 : index
    %147 = vector.load %arg10[%c112, %c0_64] : memref<288x256xbf16, #tpu.memory_space<vmem>>, vector<16x256xbf16>
    tpu.vector_store %arg10[%c112, %c0_64], %146 {strides = array<i32>} : memref<288x256xbf16, #tpu.memory_space<vmem>>, vector<16x256xbf16>,
    %c144 = arith.constant 144 : index
    %c0_65 = arith.constant 0 : index
    %148 = vector.load %arg10[%c144, %c0_65] : memref<288x256xbf16, #tpu.memory_space<vmem>>, vector<16x256xbf16>
    tpu.vector_store %arg10[%c144, %c0_65], %119 {strides = array<i32>} : memref<288x256xbf16, #tpu.memory_space<vmem>>, vector<16x256xbf16>,
    %149 = vector.extract_strided_slice %119 {offsets = [0, 1], sizes = [16, 255], strides = [1, 1]} : vector<16x256xbf16> to vector<16x255xbf16>
    %150 = vector.extract_strided_slice %119 {offsets = [0, 0], sizes = [16, 1], strides = [1, 1]} : vector<16x256xbf16> to vector<16x1xbf16>
    %151 = tpu.concatenate %149, %150 in 1 : vector<16x255xbf16>, vector<16x1xbf16> -> vector<16x256xbf16>
    %c5_66 = arith.constant 5 : index
    %c0_67 = arith.constant 0 : index
    %152 = vector.load %arg1[%c5_66, %c0_67] : memref<9x256xbf16, #tpu.memory_space<vmem>>, vector<1x256xbf16>
    %153 = vector.broadcast %152 : vector<1x256xbf16> to vector<16x256xbf16>
    %154 = arith.mulf %151, %153 : vector<16x256xbf16>
    %c176 = arith.constant 176 : index
    %c0_68 = arith.constant 0 : index
    %155 = vector.load %arg10[%c176, %c0_68] : memref<288x256xbf16, #tpu.memory_space<vmem>>, vector<16x256xbf16>
    tpu.vector_store %arg10[%c176, %c0_68], %154 {strides = array<i32>} : memref<288x256xbf16, #tpu.memory_space<vmem>>, vector<16x256xbf16>,
    %156 = vector.extract_strided_slice %119 {offsets = [0, 15], sizes = [16, 241], strides = [1, 1]} : vector<16x256xbf16> to vector<16x241xbf16>
    %157 = vector.extract_strided_slice %119 {offsets = [0, 0], sizes = [16, 15], strides = [1, 1]} : vector<16x256xbf16> to vector<16x15xbf16>
    %158 = tpu.concatenate %156, %157 in 1 : vector<16x241xbf16>, vector<16x15xbf16> -> vector<16x256xbf16>
    %c6_69 = arith.constant 6 : index
    %c0_70 = arith.constant 0 : index
    %159 = vector.load %arg1[%c6_69, %c0_70] : memref<9x256xbf16, #tpu.memory_space<vmem>>, vector<1x256xbf16>
    %160 = vector.broadcast %159 : vector<1x256xbf16> to vector<16x256xbf16>
    %161 = arith.mulf %158, %160 : vector<16x256xbf16>
    %c208 = arith.constant 208 : index
    %c0_71 = arith.constant 0 : index
    %162 = vector.load %arg10[%c208, %c0_71] : memref<288x256xbf16, #tpu.memory_space<vmem>>, vector<16x256xbf16>
    tpu.vector_store %arg10[%c208, %c0_71], %161 {strides = array<i32>} : memref<288x256xbf16, #tpu.memory_space<vmem>>, vector<16x256xbf16>,
    %163 = vector.extract_strided_slice %119 {offsets = [0, 16], sizes = [16, 240], strides = [1, 1]} : vector<16x256xbf16> to vector<16x240xbf16>
    %164 = vector.extract_strided_slice %119 {offsets = [0, 0], sizes = [16, 16], strides = [1, 1]} : vector<16x256xbf16> to vector<16x16xbf16>
    %165 = tpu.concatenate %163, %164 in 1 : vector<16x240xbf16>, vector<16x16xbf16> -> vector<16x256xbf16>
    %c7_72 = arith.constant 7 : index
    %c0_73 = arith.constant 0 : index
    %166 = vector.load %arg1[%c7_72, %c0_73] : memref<9x256xbf16, #tpu.memory_space<vmem>>, vector<1x256xbf16>
    %167 = vector.broadcast %166 : vector<1x256xbf16> to vector<16x256xbf16>
    %168 = arith.mulf %165, %167 : vector<16x256xbf16>
    %c240 = arith.constant 240 : index
    %c0_74 = arith.constant 0 : index
    %169 = vector.load %arg10[%c240, %c0_74] : memref<288x256xbf16, #tpu.memory_space<vmem>>, vector<16x256xbf16>
    tpu.vector_store %arg10[%c240, %c0_74], %168 {strides = array<i32>} : memref<288x256xbf16, #tpu.memory_space<vmem>>, vector<16x256xbf16>,
    %170 = vector.extract_strided_slice %119 {offsets = [0, 17], sizes = [16, 239], strides = [1, 1]} : vector<16x256xbf16> to vector<16x239xbf16>
    %171 = vector.extract_strided_slice %119 {offsets = [0, 0], sizes = [16, 17], strides = [1, 1]} : vector<16x256xbf16> to vector<16x17xbf16>
    %172 = tpu.concatenate %170, %171 in 1 : vector<16x239xbf16>, vector<16x17xbf16> -> vector<16x256xbf16>
    %c8_75 = arith.constant 8 : index
    %c0_76 = arith.constant 0 : index
    %173 = vector.load %arg1[%c8_75, %c0_76] : memref<9x256xbf16, #tpu.memory_space<vmem>>, vector<1x256xbf16>
    %174 = vector.broadcast %173 : vector<1x256xbf16> to vector<16x256xbf16>
    %175 = arith.mulf %172, %174 : vector<16x256xbf16>
    %c272 = arith.constant 272 : index
    %c0_77 = arith.constant 0 : index
    %176 = vector.load %arg10[%c272, %c0_77] : memref<288x256xbf16, #tpu.memory_space<vmem>>, vector<16x256xbf16>
    tpu.vector_store %arg10[%c272, %c0_77], %175 {strides = array<i32>} : memref<288x256xbf16, #tpu.memory_space<vmem>>, vector<16x256xbf16>,
    %c0_78 = arith.constant 0 : index
    %c0_79 = arith.constant 0 : index
    %177 = vector.load %arg5[%c0_78, %c0_79] : memref<8x288xbf16, #tpu.memory_space<vmem>>, vector<8x288xbf16>
    %c0_80 = arith.constant 0 : index
    %c0_81 = arith.constant 0 : index
    %178 = vector.load %arg10[%c0_80, %c0_81] : memref<288x256xbf16, #tpu.memory_space<vmem>>, vector<288x256xbf16>
    %cst = arith.constant dense<0.000000e+00> : vector<8x256xf32>
    %179 = tpu.matmul %177, %178, %cst {dimension_numbers = #tpu.dot_dimension_numbers<[1], [0], [0], [1], [0, 0, 1, 1], [], []>} : vector<8x288xbf16>, vector<288x256xbf16>, vector<8x256xf32> -> vector<8x256xf32>
    %c0_82 = arith.constant 0 : index
    %c0_83 = arith.constant 0 : index
    %180 = vector.load %arg6[%c0_82, %c0_83] : memref<8x1xf32, #tpu.memory_space<vmem>>, vector<8x1xf32>
    %181 = vector.broadcast %180 : vector<8x1xf32> to vector<8x256xf32>
    %182 = arith.addf %179, %181 : vector<8x256xf32>
    %cst_84 = arith.constant 0.000000e+00 : f32
    %183 = vector.broadcast %cst_84 : f32 to vector<8x256xf32>
    %184 = arith.maximumf %182, %183 : vector<8x256xf32>
    %185 = vector.extract_strided_slice %184 {offsets = [0, 239], sizes = [8, 17], strides = [1, 1]} : vector<8x256xf32> to vector<8x17xf32>
    %186 = vector.extract_strided_slice %184 {offsets = [0, 0], sizes = [8, 239], strides = [1, 1]} : vector<8x256xf32> to vector<8x239xf32>
    %187 = tpu.concatenate %185, %186 in 1 : vector<8x17xf32>, vector<8x239xf32> -> vector<8x256xf32>
    %c0_85 = arith.constant 0 : index
    %c0_86 = arith.constant 0 : index
    %188 = vector.load %arg1[%c0_85, %c0_86] : memref<9x256xbf16, #tpu.memory_space<vmem>>, vector<1x256xbf16>
    %189 = arith.extf %188 : vector<1x256xbf16> to vector<1x256xf32>
    %190 = vector.broadcast %189 : vector<1x256xf32> to vector<8x256xf32>
    %191 = arith.mulf %187, %190 : vector<8x256xf32>
    %192 = arith.truncf %191 : vector<8x256xf32> to vector<8x256xbf16>
    %c0_87 = arith.constant 0 : index
    %c0_88 = arith.constant 0 : index
    %193 = vector.load %arg11[%c0_87, %c0_88] : memref<72x256xbf16, #tpu.memory_space<vmem>>, vector<8x256xbf16>
    tpu.vector_store %arg11[%c0_87, %c0_88], %192 {strides = array<i32>} : memref<72x256xbf16, #tpu.memory_space<vmem>>, vector<8x256xbf16>,
    %194 = vector.extract_strided_slice %184 {offsets = [0, 240], sizes = [8, 16], strides = [1, 1]} : vector<8x256xf32> to vector<8x16xf32>
    %195 = vector.extract_strided_slice %184 {offsets = [0, 0], sizes = [8, 240], strides = [1, 1]} : vector<8x256xf32> to vector<8x240xf32>
    %196 = tpu.concatenate %194, %195 in 1 : vector<8x16xf32>, vector<8x240xf32> -> vector<8x256xf32>
    %c1_89 = arith.constant 1 : index
    %c0_90 = arith.constant 0 : index
    %197 = vector.load %arg1[%c1_89, %c0_90] : memref<9x256xbf16, #tpu.memory_space<vmem>>, vector<1x256xbf16>
    %198 = arith.extf %197 : vector<1x256xbf16> to vector<1x256xf32>
    %199 = vector.broadcast %198 : vector<1x256xf32> to vector<8x256xf32>
    %200 = arith.mulf %196, %199 : vector<8x256xf32>
    %201 = arith.truncf %200 : vector<8x256xf32> to vector<8x256xbf16>
    %c8_91 = arith.constant 8 : index
    %c0_92 = arith.constant 0 : index
    %202 = vector.load %arg11[%c8_91, %c0_92] : memref<72x256xbf16, #tpu.memory_space<vmem>>, vector<8x256xbf16>
    tpu.vector_store %arg11[%c8_91, %c0_92], %201 {strides = array<i32>} : memref<72x256xbf16, #tpu.memory_space<vmem>>, vector<8x256xbf16>,
    %203 = vector.extract_strided_slice %184 {offsets = [0, 241], sizes = [8, 15], strides = [1, 1]} : vector<8x256xf32> to vector<8x15xf32>
    %204 = vector.extract_strided_slice %184 {offsets = [0, 0], sizes = [8, 241], strides = [1, 1]} : vector<8x256xf32> to vector<8x241xf32>
    %205 = tpu.concatenate %203, %204 in 1 : vector<8x15xf32>, vector<8x241xf32> -> vector<8x256xf32>
    %c2_93 = arith.constant 2 : index
    %c0_94 = arith.constant 0 : index
    %206 = vector.load %arg1[%c2_93, %c0_94] : memref<9x256xbf16, #tpu.memory_space<vmem>>, vector<1x256xbf16>
    %207 = arith.extf %206 : vector<1x256xbf16> to vector<1x256xf32>
    %208 = vector.broadcast %207 : vector<1x256xf32> to vector<8x256xf32>
    %209 = arith.mulf %205, %208 : vector<8x256xf32>
    %210 = arith.truncf %209 : vector<8x256xf32> to vector<8x256xbf16>
    %c16_95 = arith.constant 16 : index
    %c0_96 = arith.constant 0 : index
    %211 = vector.load %arg11[%c16_95, %c0_96] : memref<72x256xbf16, #tpu.memory_space<vmem>>, vector<8x256xbf16>
    tpu.vector_store %arg11[%c16_95, %c0_96], %210 {strides = array<i32>} : memref<72x256xbf16, #tpu.memory_space<vmem>>, vector<8x256xbf16>,
    %212 = vector.extract_strided_slice %184 {offsets = [0, 255], sizes = [8, 1], strides = [1, 1]} : vector<8x256xf32> to vector<8x1xf32>
    %213 = vector.extract_strided_slice %184 {offsets = [0, 0], sizes = [8, 255], strides = [1, 1]} : vector<8x256xf32> to vector<8x255xf32>
    %214 = tpu.concatenate %212, %213 in 1 : vector<8x1xf32>, vector<8x255xf32> -> vector<8x256xf32>
    %c3_97 = arith.constant 3 : index
    %c0_98 = arith.constant 0 : index
    %215 = vector.load %arg1[%c3_97, %c0_98] : memref<9x256xbf16, #tpu.memory_space<vmem>>, vector<1x256xbf16>
    %216 = arith.extf %215 : vector<1x256xbf16> to vector<1x256xf32>
    %217 = vector.broadcast %216 : vector<1x256xf32> to vector<8x256xf32>
    %218 = arith.mulf %214, %217 : vector<8x256xf32>
    %219 = arith.truncf %218 : vector<8x256xf32> to vector<8x256xbf16>
    %c24 = arith.constant 24 : index
    %c0_99 = arith.constant 0 : index
    %220 = vector.load %arg11[%c24, %c0_99] : memref<72x256xbf16, #tpu.memory_space<vmem>>, vector<8x256xbf16>
    tpu.vector_store %arg11[%c24, %c0_99], %219 {strides = array<i32>} : memref<72x256xbf16, #tpu.memory_space<vmem>>, vector<8x256xbf16>,
    %221 = arith.truncf %184 : vector<8x256xf32> to vector<8x256xbf16>
    %c32_100 = arith.constant 32 : index
    %c0_101 = arith.constant 0 : index
    %222 = vector.load %arg11[%c32_100, %c0_101] : memref<72x256xbf16, #tpu.memory_space<vmem>>, vector<8x256xbf16>
    tpu.vector_store %arg11[%c32_100, %c0_101], %221 {strides = array<i32>} : memref<72x256xbf16, #tpu.memory_space<vmem>>, vector<8x256xbf16>,
    %223 = vector.extract_strided_slice %184 {offsets = [0, 1], sizes = [8, 255], strides = [1, 1]} : vector<8x256xf32> to vector<8x255xf32>
    %224 = vector.extract_strided_slice %184 {offsets = [0, 0], sizes = [8, 1], strides = [1, 1]} : vector<8x256xf32> to vector<8x1xf32>
    %225 = tpu.concatenate %223, %224 in 1 : vector<8x255xf32>, vector<8x1xf32> -> vector<8x256xf32>
    %c5_102 = arith.constant 5 : index
    %c0_103 = arith.constant 0 : index
    %226 = vector.load %arg1[%c5_102, %c0_103] : memref<9x256xbf16, #tpu.memory_space<vmem>>, vector<1x256xbf16>
    %227 = arith.extf %226 : vector<1x256xbf16> to vector<1x256xf32>
    %228 = vector.broadcast %227 : vector<1x256xf32> to vector<8x256xf32>
    %229 = arith.mulf %225, %228 : vector<8x256xf32>
    %230 = arith.truncf %229 : vector<8x256xf32> to vector<8x256xbf16>
    %c40_104 = arith.constant 40 : index
    %c0_105 = arith.constant 0 : index
    %231 = vector.load %arg11[%c40_104, %c0_105] : memref<72x256xbf16, #tpu.memory_space<vmem>>, vector<8x256xbf16>
    tpu.vector_store %arg11[%c40_104, %c0_105], %230 {strides = array<i32>} : memref<72x256xbf16, #tpu.memory_space<vmem>>, vector<8x256xbf16>,
    %232 = vector.extract_strided_slice %184 {offsets = [0, 15], sizes = [8, 241], strides = [1, 1]} : vector<8x256xf32> to vector<8x241xf32>
    %233 = vector.extract_strided_slice %184 {offsets = [0, 0], sizes = [8, 15], strides = [1, 1]} : vector<8x256xf32> to vector<8x15xf32>
    %234 = tpu.concatenate %232, %233 in 1 : vector<8x241xf32>, vector<8x15xf32> -> vector<8x256xf32>
    %c6_106 = arith.constant 6 : index
    %c0_107 = arith.constant 0 : index
    %235 = vector.load %arg1[%c6_106, %c0_107] : memref<9x256xbf16, #tpu.memory_space<vmem>>, vector<1x256xbf16>
    %236 = arith.extf %235 : vector<1x256xbf16> to vector<1x256xf32>
    %237 = vector.broadcast %236 : vector<1x256xf32> to vector<8x256xf32>
    %238 = arith.mulf %234, %237 : vector<8x256xf32>
    %239 = arith.truncf %238 : vector<8x256xf32> to vector<8x256xbf16>
    %c48_108 = arith.constant 48 : index
    %c0_109 = arith.constant 0 : index
    %240 = vector.load %arg11[%c48_108, %c0_109] : memref<72x256xbf16, #tpu.memory_space<vmem>>, vector<8x256xbf16>
    tpu.vector_store %arg11[%c48_108, %c0_109], %239 {strides = array<i32>} : memref<72x256xbf16, #tpu.memory_space<vmem>>, vector<8x256xbf16>,
    %241 = vector.extract_strided_slice %184 {offsets = [0, 16], sizes = [8, 240], strides = [1, 1]} : vector<8x256xf32> to vector<8x240xf32>
    %242 = vector.extract_strided_slice %184 {offsets = [0, 0], sizes = [8, 16], strides = [1, 1]} : vector<8x256xf32> to vector<8x16xf32>
    %243 = tpu.concatenate %241, %242 in 1 : vector<8x240xf32>, vector<8x16xf32> -> vector<8x256xf32>
    %c7_110 = arith.constant 7 : index
    %c0_111 = arith.constant 0 : index
    %244 = vector.load %arg1[%c7_110, %c0_111] : memref<9x256xbf16, #tpu.memory_space<vmem>>, vector<1x256xbf16>
    %245 = arith.extf %244 : vector<1x256xbf16> to vector<1x256xf32>
    %246 = vector.broadcast %245 : vector<1x256xf32> to vector<8x256xf32>
    %247 = arith.mulf %243, %246 : vector<8x256xf32>
    %248 = arith.truncf %247 : vector<8x256xf32> to vector<8x256xbf16>
    %c56 = arith.constant 56 : index
    %c0_112 = arith.constant 0 : index
    %249 = vector.load %arg11[%c56, %c0_112] : memref<72x256xbf16, #tpu.memory_space<vmem>>, vector<8x256xbf16>
    tpu.vector_store %arg11[%c56, %c0_112], %248 {strides = array<i32>} : memref<72x256xbf16, #tpu.memory_space<vmem>>, vector<8x256xbf16>,
    %250 = vector.extract_strided_slice %184 {offsets = [0, 17], sizes = [8, 239], strides = [1, 1]} : vector<8x256xf32> to vector<8x239xf32>
    %251 = vector.extract_strided_slice %184 {offsets = [0, 0], sizes = [8, 17], strides = [1, 1]} : vector<8x256xf32> to vector<8x17xf32>
    %252 = tpu.concatenate %250, %251 in 1 : vector<8x239xf32>, vector<8x17xf32> -> vector<8x256xf32>
    %c8_113 = arith.constant 8 : index
    %c0_114 = arith.constant 0 : index
    %253 = vector.load %arg1[%c8_113, %c0_114] : memref<9x256xbf16, #tpu.memory_space<vmem>>, vector<1x256xbf16>
    %254 = arith.extf %253 : vector<1x256xbf16> to vector<1x256xf32>
    %255 = vector.broadcast %254 : vector<1x256xf32> to vector<8x256xf32>
    %256 = arith.mulf %252, %255 : vector<8x256xf32>
    %257 = arith.truncf %256 : vector<8x256xf32> to vector<8x256xbf16>
    %c64_115 = arith.constant 64 : index
    %c0_116 = arith.constant 0 : index
    %258 = vector.load %arg11[%c64_115, %c0_116] : memref<72x256xbf16, #tpu.memory_space<vmem>>, vector<8x256xbf16>
    tpu.vector_store %arg11[%c64_115, %c0_116], %257 {strides = array<i32>} : memref<72x256xbf16, #tpu.memory_space<vmem>>, vector<8x256xbf16>,
    %c0_117 = arith.constant 0 : index
    %c0_118 = arith.constant 0 : index
    %259 = vector.load %arg7[%c0_117, %c0_118] : memref<8x72xbf16, #tpu.memory_space<vmem>>, vector<8x72xbf16>
    %c0_119 = arith.constant 0 : index
    %c0_120 = arith.constant 0 : index
    %260 = vector.load %arg11[%c0_119, %c0_120] : memref<72x256xbf16, #tpu.memory_space<vmem>>, vector<72x256xbf16>
    %cst_121 = arith.constant dense<0.000000e+00> : vector<8x256xf32>
    %261 = tpu.matmul %259, %260, %cst_121 {dimension_numbers = #tpu.dot_dimension_numbers<[1], [0], [0], [1], [0, 0, 1, 1], [], []>} : vector<8x72xbf16>, vector<72x256xbf16>, vector<8x256xf32> -> vector<8x256xf32>
    %c0_122 = arith.constant 0 : index
    %c0_123 = arith.constant 0 : index
    %262 = vector.load %arg8[%c0_122, %c0_123] : memref<8x1xf32, #tpu.memory_space<vmem>>, vector<8x1xf32>
    %263 = vector.broadcast %262 : vector<8x1xf32> to vector<8x256xf32>
    %264 = arith.addf %261, %263 : vector<8x256xf32>
    %cst_124 = arith.constant 0.000000e+00 : f32
    %265 = vector.broadcast %cst_124 : f32 to vector<8x256xf32>
    %266 = arith.maximumf %264, %265 : vector<8x256xf32>
    %267 = arith.truncf %266 : vector<8x256xf32> to vector<8x256xbf16>
    %c0_125 = arith.constant 0 : index
    %c0_126 = arith.constant 0 : index
    %c0_127 = arith.constant 0 : index
    %268 = vector.load %arg9[%c0_125, %c0_126, %c0_127] : memref<1x8x256xbf16, #tpu.memory_space<vmem>>, vector<1x8x256xbf16>
    %269 = vector.shape_cast %268 : vector<1x8x256xbf16> to vector<8x256xbf16>
    %270 = vector.shape_cast %267 : vector<8x256xbf16> to vector<1x8x256xbf16>
    tpu.vector_store %arg9[%c0_125, %c0_126, %c0_127], %270 {strides = array<i32>} : memref<1x8x256xbf16, #tpu.memory_space<vmem>>, vector<1x8x256xbf16>,
    return
  }
  func.func @transform_0(%arg0: i32) -> (i32, i32) {
    %c0_i32 = arith.constant 0 : i32
    %c0_i32_0 = arith.constant 0 : i32
    %c0_i32_1 = arith.constant 0 : i32
    return %c0_i32, %c0_i32_0 : i32, i32
  }
  func.func @transform_1(%arg0: i32) -> (i32, i32, i32) {
    %c0_i32 = arith.constant 0 : i32
    %c0_i32_0 = arith.constant 0 : i32
    %c0_i32_1 = arith.constant 0 : i32
    return %arg0, %c0_i32, %c0_i32_0 : i32, i32, i32
  }
  func.func @transform_2(%arg0: i32) -> (i32, i32, i32) {
    %c0_i32 = arith.constant 0 : i32
    %c0_i32_0 = arith.constant 0 : i32
    %c0_i32_1 = arith.constant 0 : i32
    return %arg0, %c0_i32, %c0_i32_0 : i32, i32, i32
  }
  func.func @transform_3(%arg0: i32) -> (i32, i32, i32) {
    %c0_i32 = arith.constant 0 : i32
    %c0_i32_0 = arith.constant 0 : i32
    %c0_i32_1 = arith.constant 0 : i32
    return %arg0, %c0_i32, %c0_i32_0 : i32, i32, i32
  }
  func.func @transform_4(%arg0: i32) -> (i32, i32) {
    %c0_i32 = arith.constant 0 : i32
    %c0_i32_0 = arith.constant 0 : i32
    %c0_i32_1 = arith.constant 0 : i32
    return %c0_i32, %c0_i32_0 : i32, i32
  }
  func.func @transform_5(%arg0: i32) -> (i32, i32) {
    %c0_i32 = arith.constant 0 : i32
    %c0_i32_0 = arith.constant 0 : i32
    %c0_i32_1 = arith.constant 0 : i32
    return %c0_i32, %c0_i32_0 : i32, i32
  }
  func.func @transform_6(%arg0: i32) -> (i32, i32) {
    %c0_i32 = arith.constant 0 : i32
    %c0_i32_0 = arith.constant 0 : i32
    %c0_i32_1 = arith.constant 0 : i32
    return %c0_i32, %c0_i32_0 : i32, i32
  }
  func.func @transform_7(%arg0: i32) -> (i32, i32) {
    %c0_i32 = arith.constant 0 : i32
    %c0_i32_0 = arith.constant 0 : i32
    %c0_i32_1 = arith.constant 0 : i32
    return %c0_i32, %c0_i32_0 : i32, i32
  }
  func.func @transform_8(%arg0: i32) -> (i32, i32, i32) {
    %c0_i32 = arith.constant 0 : i32
    %c0_i32_0 = arith.constant 0 : i32
    %c0_i32_1 = arith.constant 0 : i32
    return %arg0, %c0_i32, %c0_i32_0 : i32, i32, i32
  }
}

</mosaic_0001>

<bundles_post_ra>
// kernel: seg_qyl_forward.8
= control target key start
LH: loop header
LB: loop body
LE: loop exit
PB: predicated region body
PF: predicated region fallthrough
CT: control target
= control target key end

     0   :  { %s1006_s21 = smov 0   ;;  %s1235_s0 = inlined_call_operand.vmem [shape: bf16[9,64], index: 0, kind: input, shape index: {}]   ;;  %s1236_s1 = inlined_call_operand.vmem [shape: bf16[2,8,64], index: 1, kind: input, shape index: {}]   ;;  %s1237_s2 = inlined_call_operand.vmem [shape: bf16[16,72], index: 2, kind: input, shape index: {}]   ;;  %s1238_s3 = inlined_call_operand.vmem [shape: f32[16,1], index: 3, kind: input, shape index: {}]   ;;  %s1239_s4 = inlined_call_operand.vmem [shape: bf16[16,144], index: 4, kind: input, shape index: {}]   ;;  %s1240_s5 = inlined_call_operand.vmem [shape: f32[16,1], index: 5, kind: input, shape index: {}]   ;;  %s1241_s6 = inlined_call_operand.vmem [shape: bf16[2,16,64], index: 6, kind: output, shape index: {}]  }
   0x1 LB: > { %s859_s22 = sadd.s32 4294967295, %s950_s21   ;;  %p863_p0 = scmp.ge.s32.totalorder %s950_s21, 1  ;;  %s950_s21 = sphi %s1006_s21, %s16_s21  }
   0x2   : > { %p211_p1 = scmp.lt.s32.totalorder %s950_s21, 3 }
   0x4   : > { %p212_p2 = pnand %p863_p0, %p211_p1 }
   0x5   : > { %p240_p3 = scmp.lt.s32.totalorder (!%p212_p2), %s859_s22, 1  ;;  %vm272_vm0 = vcmask (!%p212_p2), 519168   ;;  %s952_s27 = smov (!%p212_p2), 72   ;;  %v954_v2 = vmov (!%p212_p2), 0.0   ;;  %vm969_vm1 = vmmov (!%p212_p2), 0   ;;  %v423_v3 = vld [vmem:[%s1238_s3] sm:$0xff] (!%p212_p2)  ;;  %v267_v6 = vlaneseq (!%p212_p2) }
   0x6   : > { %215 = sbr.rel (%p212_p2) target bundleno = 807 (0x327), region = 44  ;;  %s953_s28 = smov (!%p212_p2), 73   ;;  %891 = vmatprep.subr.bf16.mxu0 (!%p212_p2), %v954_v2  ;;  %901 = vmatprep.mubr.msk.bf16.mxu0 (!%p212_p2), %vm969_vm1, %v954_v2  ;;  %v424_v4 = vld [vmem:[%s1238_s3 + $0x8] sm:$0xff] (!%p212_p2)  ;;  %v970_v5 = vmov (!%p212_p2), 0   ;;  %v283_v7 = vld [vmem:[%s1235_s0] sm:$0x1] (!%p212_p2) }
   0x7   : > { %s955_s29 = smov (!%p212_p2), 8   ;;  %s956_s30 = smov (!%p212_p2), 9   ;;  %932 = vset.pattern.permute.xlu0 (!%p212_p2), %v970_v5  ;;  %933 = vset.pattern.permute.xlu1 (!%p212_p2), %v970_v5  ;;  %v1051_v8 = vshrl.u32 (!%p212_p2), %v267_v6, 7  ;;  %v285_v9 = vshrl.u32 (!%p212_p2), %v283_v7, 16  ;;  %v263_v10 = vld [vmem:[%s1235_s0] sm:$0x1] (!%p212_p2) }
   0x8   : > { %s957_s7 = smov (!%p212_p2), 7   ;;  %s958_s8 = smov (!%p212_p2), 71   ;;  %751 = vmatprep.subr.bf16.mxu1 (!%p212_p2), %v970_v5  ;;  %v265_v13 = vpack.i.b16 (!%p212_p2), %v263_v10, %v263_v10  ;;  %v303_v14 = vld [vmem:[%s1235_s0] sm:$0x2] (!%p212_p2)  ;;  %vm278_vm2 = vcmask (!%p212_p2), 64512   ;;  %vm258_vm3 = vcmask (!%p212_p2), 72704  }
   0x9   : > { %s959_s9 = smov (!%p212_p2), 1   ;;  %s960_s10 = smov (!%p212_p2), 65   ;;  %v1057_v11 = vsub.s32 (!%p212_p2), 0, %v1051_v8  ;;  %v286_v12 = vpack.i.b16 (!%p212_p2), %v285_v9, %v285_v9  ;;  %v322_v15 = vld [vmem:[%s1235_s0] sm:$0x2] (!%p212_p2)  ;;  %v305_v18 = vpack.i.b16 (!%p212_p2), %v303_v14, %v303_v14  ;;  %v1068_v21 = vsub.s32 (!%p212_p2), 1, %v1051_v8 }
   0xa   : > { %s961_s11 = smov (!%p212_p2), 63   ;;  %s962_s12 = smov (!%p212_p2), 127   ;;  %v324_v22 = vshrl.u32 (!%p212_p2), %v322_v15, 16  ;;  %v343_v23 = vld [vmem:[%s1235_s0] sm:$0x4] (!%p212_p2)  ;;  %vm298_vm4 = vcmask (!%p212_p2), 56320  }
   0xb   : > { %s963_s13 = smov (!%p212_p2), 57   ;;  %s964_s14 = smov (!%p212_p2), 121   ;;  %v291_v19 = vrot.slane (!%p212_p2), %v286_v12, %v1057_v11  ;;  %v270_v20 = vrot.slane (!%p212_p2), %v265_v13, %v1057_v11  ;;  %v345_v28 = vshrl.u32 (!%p212_p2), %v343_v23, 16  ;;  %v310_v31 = vrot.slane (!%p212_p2), %v305_v18, %v1068_v21  ;;  %v363_v40 = vld [vmem:[%s1235_s0] sm:$0x8] (!%p212_p2) }
   0xc   : > { %s965_s15 = smov (!%p212_p2), 56   ;;  %s966_s16 = smov (!%p212_p2), 120   ;;  %v325_v32 = vpack.i.b16 (!%p212_p2), %v324_v22, %v324_v22  ;;  %v350_v37 = vsub.s32 (!%p212_p2), 2, %v1051_v8  ;;  %vm317_vm5 = vcmask (!%p212_p2), 7168   ;;  %v382_v41 = vld [vmem:[%s1235_s0] sm:$0x8] (!%p212_p2)  ;;  %v365_v47 = vpack.i.b16 (!%p212_p2), %v363_v40, %v363_v40 }
   0xd   : > { %s1249_s22 = smov (!%p240_p3, %s859_s22), 1  ;;  %s1242_s17 = smov 55   ;;  %v346_v36 = vpack.i.b16 %v345_v28, %v345_v28  ;;  %vm338_vm6 = vcmask 515072   ;;  %v1092_v48 = vsub.s32 3, %v1051_v8  ;;  %v384_v49 = vshrl.u32 %v382_v41, 16  ;;  %v940_v18 = vld [vmem:[%s1237_s2] sm:$0xff]  }
   0xe   : > { %s864_s23 = sshll.u32 %s1249_s22, 2  ;;  %s1244_s18 = smov 119   ;;  %v330_v39 = vrot.slane %v325_v32, %v1068_v21  ;;  %vm358_vm7 = vcmask 465920   ;;  %v402_v57 = vld [vmem:[%s1235_s0 + $0x4] sm:$0x1]  ;;  %vm377_vm8 = vcmask 457728  }
   0xf   : > { %s243_s26 = scalar_lea.vmem %s1236_s1, %s864_s23  ;;  %v351_v45 = vrot.slane %v346_v36, %v350_v37  ;;  %v370_v55 = vrot.slane %v365_v47, %v1092_v48  ;;  %v385_v56 = vpack.i.b16 %v384_v49, %v384_v49  ;;  %v404_v63 = vpack.i.b16 %v402_v57, %v402_v57  ;;  %v727_v32 = vld [vmem:[%s1240_s5 + $0x8] sm:$0xff]  ;;  %v559_v41 = vld [vmem:[%s1235_s0] sm:$0x1] }
  0x10   : > { %v250_v0 = vld [vmem:[%s243_s26] sm:$0xf]  ;;  %vm397_vm9 = vcmask 449536   ;;  %vm471_vm10 = vcmask 1043456   ;;  %vm467_vm11 = vcmask 588800   ;;  %vm543_vm12 = vcmask 523264  }
  0x11   : > { %v867_v1 = vcombine.low %v250_v0, %v250_v0  ;;  %333 = vst.msk [vmem:[#allocation2 + $0x10] sm:$0xf] %vm272_vm0, %v250_v0  ;;  %v390_v62 = vrot.slane %v385_v56, %v1092_v48  ;;  %v409_v7 = vrot.slane %v404_v63, %v1057_v11  ;;  %vm747_vm13 = vcmask 130048  }
  0x12   : > { %v560_v47 = vunpack.c.l.bf16 %v559_v41 }
  0x13   : > { %274 = vrot.lane.b32.xlu1 %v867_v1, %s952_s27  ;;  %254 = vrot.lane.b32.xlu0 %v867_v1, %s953_s28 }
  0x17   : > { %276 = vrot.lane.b32.xlu1 %v867_v1, %s955_s29  ;;  %256 = vrot.lane.b32.xlu0 %v867_v1, %s956_s30 }
  0x1b   : > { %296 = vrot.lane.b32.xlu1 %v867_v1, %s957_s7  ;;  %294 = vrot.lane.b32.xlu0 %v867_v1, %s958_s8 }
  0x1f   : > { %315 = vrot.lane.b32.xlu1 %v867_v1, %s959_s9  ;;  %313 = vrot.lane.b32.xlu0 %v867_v1, %s960_s10 }
  0x23   : > { %336 = vrot.lane.b32.xlu1 %v867_v1, %s961_s11  ;;  %334 = vrot.lane.b32.xlu0 %v867_v1, %s962_s12 }
  0x27   : > { %356 = vrot.lane.b32.xlu1 %v867_v1, %s963_s13  ;;  %354 = vrot.lane.b32.xlu0 %v867_v1, %s964_s14 }
  0x2b   : > { %375 = vrot.lane.b32.xlu1 %v867_v1, %s965_s15  ;;  %373 = vrot.lane.b32.xlu0 %v867_v1, %s966_s16 }
  0x2f   : > { %395 = vrot.lane.b32.xlu1 %v867_v1, %s1242_s17  ;;  %393 = vrot.lane.b32.xlu0 %v867_v1, %s1244_s18 }
  0x33   : > { %427 = vperm.xlu0 %932, %v423_v3   ;;  %432 = vperm.xlu1 %933, %v424_v4  }
  0x85   : > { %v275_v16 = vpop.permute.xlu1 %274  ;;  %v255_v17 = vpop.permute.xlu0 %254 }
  0x89   : > { %v277_v24 = vpop.permute.xlu1 %276  ;;  %v257_v25 = vpop.permute.xlu0 %256 }
  0x8a   : > { %v281_v26 = vsel %vm278_vm2, %v275_v16, %v277_v24  ;;  %v261_v27 = vsel %vm258_vm3, %v255_v17, %v257_v25 }
  0x8b   : > { %v292_v29 = vmul.bf16 %v291_v19, %v281_v26  ;;  %v271_v30 = vmul.bf16 %v270_v20, %v261_v27 }
  0x8d   : > { %293 = vst.msk [vmem:[#allocation2 + $0x4] sm:$0xf] %vm272_vm0, %v292_v29  ;;  %273 = vst.msk [vmem:[#allocation2] sm:$0xf] %vm272_vm0, %v271_v30  ;;  %v297_v33 = vpop.permute.xlu1 %296  ;;  %v295_v34 = vpop.permute.xlu0 %294  ;;  %v726_v30 = vld [vmem:[%s1240_s5] sm:$0xff] }
  0x8e   : > { %v301_v35 = vsel %vm298_vm4, %v295_v34, %v297_v33  ;;  %v534_v33 = vld [vmem:[%s1235_s0] sm:$0x1] }
  0x8f   : > { %v311_v38 = vmul.bf16 %v310_v31, %v301_v35  ;;  %v943_v31 = vld [vmem:[%s1239_s4 + $0x4] ss:$8 sps:$4 sm:$0xff]   ;;  %v535_v35 = vunpack.c.l.bf16 %v534_v33 }
  0x90   : > { %877 = vmatprep.mubr.msk.bf16.mxu1 %vm747_vm13, %v943_v31  ;;  %v657_v31 = vld [vmem:[%s1235_s0] sm:$0x8] }
  0x91   : > { %312 = vst.msk [vmem:[#allocation2 + $0x8] sm:$0xf] %vm272_vm0, %v311_v38  ;;  %v316_v42 = vpop.permute.xlu1 %315  ;;  %v314_v43 = vpop.permute.xlu0 %313  ;;  %v539_v38 = vrot.slane %v535_v35, %v1057_v11 }
  0x92   : > { %v320_v44 = vsel %vm317_vm5, %v314_v43, %v316_v42 }
  0x93   : > { %v331_v46 = vmul.bf16 %v330_v39, %v320_v44 }
  0x94   : > { %v935_v50 = vld [vmem:[#allocation2] sm:$0xff]  }
  0x95   : > { %332 = vst.msk [vmem:[#allocation2 + $0xc] sm:$0xf] %vm272_vm0, %v331_v46  ;;  %v337_v51 = vpop.permute.xlu1 %336  ;;  %v335_v52 = vpop.permute.xlu0 %334  ;;  %892 = vmatpush3.bf16.msra.mxu0 %v935_v50 }
  0x96   : > { %v341_v53 = vsel %vm338_vm6, %v335_v52, %v337_v51  ;;  %893 = vmatprep.subr.bf16.mxu0 %v954_v2  ;;  %v564_v51 = vrot.slane %v560_v47, %v1068_v21 }
  0x97   : > { %v352_v54 = vmul.bf16 %v351_v45, %v341_v53 }
  0x99   : > { %353 = vst.msk [vmem:[#allocation2 + $0x14] sm:$0xf] %vm272_vm0, %v352_v54  ;;  %v357_v58 = vpop.permute.xlu1 %356  ;;  %v355_v59 = vpop.permute.xlu0 %354  ;;  %v583_v54 = vld [vmem:[%s1235_s0] sm:$0x2] }
  0x9a   : > { %v361_v60 = vsel %vm358_vm7, %v355_v59, %v357_v58 }
  0x9b   : > { %v371_v61 = vmul.bf16 %v370_v55, %v361_v60  ;;  %v584_v60 = vunpack.c.l.bf16 %v583_v54 }
  0x9c   : > { %v936_v0 = vld [vmem:[#allocation2 + $0x8] sm:$0xff]  }
  0x9d   : > { %372 = vst.msk [vmem:[#allocation2 + $0x18] sm:$0xf] %vm272_vm0, %v371_v61  ;;  %v376_v1 = vpop.permute.xlu1 %375  ;;  %v374_v3 = vpop.permute.xlu0 %373  ;;  %894 = vmatpush3.bf16.msra.mxu0 %v936_v0  ;;  %v588_v21 = vrot.slane %v584_v60, %v350_v37 }
  0x9e   : > { %v380_v4 = vsel %vm377_vm8, %v374_v3, %v376_v1  ;;  %895 = vmatprep.subr.bf16.mxu0 %v954_v2  ;;  %v607_v3 = vld [vmem:[%s1235_s0] sm:$0x2] }
  0x9f   : > { %v391_v6 = vmul.bf16 %v390_v62, %v380_v4 }
  0xa0   : > { %v937_v9 = vld [vmem:[#allocation2 + $0x10] sm:$0xff]  }
  0xa1   : > { %392 = vst.msk [vmem:[#allocation2 + $0x1c] sm:$0xf] %vm272_vm0, %v391_v6  ;;  %v396_v10 = vpop.permute.xlu1 %395  ;;  %v394_v12 = vpop.permute.xlu0 %393  ;;  %896 = vmatpush3.bf16.msra.mxu0 %v937_v9 }
  0xa2   : > { %v400_v13 = vsel %vm397_vm9, %v394_v12, %v396_v10  ;;  %897 = vmatprep.subr.bf16.mxu0 %v954_v2  ;;  %v608_v12 = vunpack.c.l.bf16 %v607_v3 }
  0xa3   : > { %v410_v14 = vmul.bf16 %v409_v7, %v400_v13 }
  0xa5   : > { %411 = vst.msk [vmem:[#allocation2 + $0x20] sm:$0xf] %vm272_vm0, %v410_v14 }
  0xa8   : > { %v938_v15 = vld [vmem:[#allocation2 + $0x18] sm:$0xff]  }
  0xa9   : > { %898 = vmatpush3.bf16.msra.mxu0 %v938_v15  ;;  %v612_v15 = vrot.slane %v608_v12, %v1092_v48 }
  0xaa   : > { %899 = vmatprep.subr.bf16.mxu0 %v954_v2 }
  0xac   : > { %v939_v16 = vld [vmem:[#allocation2 + $0x20] ss:$0 sps:$4 sm:$0xff]  }
  0xad   : > { %v473_v17 = vsel %vm471_vm10, %v939_v16, 0 }
  0xae   : > { %900 = vmatpush3.bf16.msra.mxu0 %v473_v17 }
  0xb1   : > { %902 = vmatmul.mubr.msk.bf16.vlgmr.msra.gmra.mrb[0].mxu0 %vm467_vm11, %v940_v18  ;;  %v633_v18 = vld [vmem:[%s1235_s0] sm:$0x4] }
  0xb2   : > { %v428_v19 = vpop.permute.xlu0 %427  ;;  %v433_v22 = vpop.permute.xlu1 %432 }
 0x184   : > { %v509_v20 = vpop.f32.mrb[0].mxu0 }
 0x185   : > { %v510_v23 = vadd.f32 %v509_v20, %v428_v19  ;;  %v903_v24 = vpop.f32.mrb[1].mxu0 }
 0x186   : > { %v512_v25 = vpop.f32.mrb[2].mxu0 }
 0x187   : > { %v516_v26 = vmax.f32 %v510_v23, 0.0  ;;  %v513_v27 = vadd.f32 %v512_v25, %v433_v22  ;;  %v904_v28 = vpop.f32.mrb[3].mxu0  ;;  %v634_v25 = vunpack.c.l.bf16 %v633_v18  ;;  %v941_v18 = vld [vmem:[%s1239_s4] ss:$8 sps:$4 sm:$0xff]  }
 0x189   : > { %v517_v2 = vmax.f32 %v513_v27, 0.0  ;;  %520 = vrot.lane.b32.xlu1 %v516_v26, %s953_s28 }
 0x18b   : > { %522 = vrot.lane.b32.xlu0 %v517_v2, %s953_s28  ;;  %v617_v29 = vpack.c.bf16 %v517_v2, %v516_v26  ;;  %s1247_s28 = smov 55  }
 0x18d   : > { %526 = vrot.lane.b32.xlu1 %v516_v26, %s956_s30  ;;  %618 = vst.msk [vmem:[#allocation3 + $0x20] sm:$0xff] %vm543_vm12, %v617_v29 }
 0x18f   : > { %528 = vrot.lane.b32.xlu0 %v517_v2, %s956_s30 }
 0x191   : > { %545 = vrot.lane.b32.xlu1 %v516_v26, %s952_s27 }
 0x193   : > { %547 = vrot.lane.b32.xlu0 %v517_v2, %s952_s27  ;;  %s1246_s27 = smov 119  }
 0x195   : > { %551 = vrot.lane.b32.xlu1 %v516_v26, %s955_s29 }
 0x197   : > { %553 = vrot.lane.b32.xlu0 %v517_v2, %s955_s29 }
 0x199   : > { %569 = vrot.lane.b32.xlu1 %v516_v26, %s958_s8 }
 0x19b   : > { %571 = vrot.lane.b32.xlu0 %v517_v2, %s958_s8 }
 0x19d   : > { %575 = vrot.lane.b32.xlu1 %v516_v26, %s957_s7 }
 0x19f   : > { %577 = vrot.lane.b32.xlu0 %v517_v2, %s957_s7  ;;  %s882_s7 = sshll.u32 %s1249_s22, 3 }
 0x1a1   : > { %593 = vrot.lane.b32.xlu1 %v516_v26, %s960_s10 }
 0x1a3   : > { %595 = vrot.lane.b32.xlu0 %v517_v2, %s960_s10  ;;  %s248_s10 = scalar_lea.vmem %s1241_s6, %s882_s7 }
 0x1a5   : > { %599 = vrot.lane.b32.xlu1 %v516_v26, %s959_s9 }
 0x1a7   : > { %601 = vrot.lane.b32.xlu0 %v517_v2, %s959_s9 }
 0x1a9   : > { %619 = vrot.lane.b32.xlu1 %v516_v26, %s962_s12 }
 0x1ab   : > { %621 = vrot.lane.b32.xlu0 %v517_v2, %s962_s12 }
 0x1ad   : > { %625 = vrot.lane.b32.xlu1 %v516_v26, %s961_s11 }
 0x1af   : > { %627 = vrot.lane.b32.xlu0 %v517_v2, %s961_s11 }
 0x1b1   : > { %643 = vrot.lane.b32.xlu1 %v516_v26, %s964_s14 }
 0x1b3   : > { %645 = vrot.lane.b32.xlu0 %v517_v2, %s964_s14 }
 0x1b5   : > { %649 = vrot.lane.b32.xlu1 %v516_v26, %s963_s13 }
 0x1b7   : > { %651 = vrot.lane.b32.xlu0 %v517_v2, %s963_s13 }
 0x1b9   : > { %667 = vrot.lane.b32.xlu1 %v516_v26, %s966_s16 }
 0x1bb   : > { %669 = vrot.lane.b32.xlu0 %v517_v2, %s966_s16 }
 0x1bd   : > { %673 = vrot.lane.b32.xlu1 %v516_v26, %s965_s15 }
 0x1bf   : > { %675 = vrot.lane.b32.xlu0 %v517_v2, %s965_s15 }
 0x1c1   : > { %691 = vrot.lane.b32.xlu1 %v516_v26, %s1246_s27 }
 0x1c3   : > { %693 = vrot.lane.b32.xlu0 %v517_v2, %s1246_s27 }
 0x1c5   : > { %697 = vrot.lane.b32.xlu1 %v516_v26, %s1247_s28  ;;  %v637_v26 = vsub.s32 5, %v1051_v8 }
 0x1c7   : > { %699 = vrot.lane.b32.xlu0 %v517_v2, %s1247_s28  ;;  %v638_v2 = vrot.slane %v634_v25, %v637_v26 }
 0x1c9   : > { %730 = vperm.xlu1 %933, %v726_v30  }
 0x1cb   : > { %735 = vperm.xlu0 %932, %v727_v32  }
 0x1fb   : > { %v521_v34 = vpop.permute.xlu1 %520 }
 0x1fd   : > { %v523_v36 = vpop.permute.xlu0 %522 }
 0x1ff   : > { %v527_v39 = vpop.permute.xlu1 %526 }
 0x200   : > { %v532_v40 = vsel %vm258_vm3, %v521_v34, %v527_v39  ;;  %v661_v39 = vsub.s32 6, %v1051_v8 }
 0x201   : > { %v529_v42 = vpop.permute.xlu0 %528  ;;  %v540_v44 = vmul.f32 %v539_v38, %v532_v40 }
 0x202   : > { %v533_v43 = vsel %vm258_vm3, %v523_v36, %v529_v42 }
 0x203   : > { %v541_v45 = vmul.f32 %v539_v38, %v533_v43  ;;  %v546_v46 = vpop.permute.xlu1 %545  ;;  %v658_v38 = vunpack.c.l.bf16 %v657_v31 }
 0x205   : > { %v542_v49 = vpack.c.bf16 %v541_v45, %v540_v44  ;;  %v548_v50 = vpop.permute.xlu0 %547  ;;  %v662_v43 = vrot.slane %v658_v38, %v661_v39 }
 0x207   : > { %544 = vst.msk [vmem:[#allocation3] sm:$0xff] %vm543_vm12, %v542_v49  ;;  %v552_v52 = vpop.permute.xlu1 %551 }
 0x208   : > { %v557_v53 = vsel %vm278_vm2, %v546_v46, %v552_v52  ;;  %v681_v46 = vld [vmem:[%s1235_s0] sm:$0x8] }
 0x209   : > { %v554_v55 = vpop.permute.xlu0 %553  ;;  %v565_v57 = vmul.f32 %v564_v51, %v557_v53  ;;  %v682_v54 = vunpack.c.l.bf16 %v681_v46 }
 0x20a   : > { %v558_v56 = vsel %vm278_vm2, %v548_v50, %v554_v55  ;;  %v721_v50 = vld [vmem:[#allocation3 + $0x20] sm:$0xff]  ;;  %v685_v55 = vsub.s32 7, %v1051_v8 }
 0x20b   : > { %v566_v58 = vmul.f32 %v564_v51, %v558_v56  ;;  %v570_v59 = vpop.permute.xlu1 %569 }
 0x20d   : > { %v567_v61 = vpack.c.bf16 %v566_v58, %v565_v57  ;;  %v572_v62 = vpop.permute.xlu0 %571 }
 0x20e   : > { %v717_v63 = vld [vmem:[#allocation3] sm:$0xff] }
 0x20f   : > { %568 = vst.msk [vmem:[#allocation3 + $0x8] sm:$0xff] %vm543_vm12, %v567_v61  ;;  %v576_v0 = vpop.permute.xlu1 %575  ;;  %752 = vmatpush1.bf16.msra.mxu1 %v717_v63 }
 0x210   : > { %v581_v1 = vsel %vm298_vm4, %v570_v59, %v576_v0  ;;  %753 = vmatprep.subr.bf16.mxu1 %v970_v5  ;;  %v686_v59 = vrot.slane %v682_v54, %v685_v55 }
 0x211   : > { %v578_v4 = vpop.permute.xlu0 %577  ;;  %v589_v7 = vmul.f32 %v588_v21, %v581_v1 }
 0x212   : > { %v582_v6 = vsel %vm298_vm4, %v572_v62, %v578_v4  ;;  %v705_v62 = vld [vmem:[%s1235_s0 + $0x4] sm:$0x1] }
 0x213   : > { %v590_v9 = vmul.f32 %v588_v21, %v582_v6  ;;  %v594_v10 = vpop.permute.xlu1 %593  ;;  %v706_v3 = vunpack.c.l.bf16 %v705_v62 }
 0x215   : > { %v591_v13 = vpack.c.bf16 %v590_v9, %v589_v7  ;;  %v596_v14 = vpop.permute.xlu0 %595  ;;  %v710_v9 = vrot.slane %v706_v3, %v1057_v11 }
 0x216   : > { %v718_v37 = vld [vmem:[#allocation3 + $0x8] sm:$0xff] }
 0x217   : > { %592 = vst.msk [vmem:[#allocation3 + $0x10] sm:$0xff] %vm543_vm12, %v591_v13  ;;  %v600_v16 = vpop.permute.xlu1 %599  ;;  %754 = vmatpush1.bf16.msra.mxu1 %v718_v37 }
 0x218   : > { %v605_v17 = vsel %vm317_vm5, %v594_v10, %v600_v16  ;;  %755 = vmatprep.subr.bf16.mxu1 %v970_v5 }
 0x219   : > { %v602_v19 = vpop.permute.xlu0 %601  ;;  %v613_v22 = vmul.f32 %v612_v15, %v605_v17 }
 0x21a   : > { %v606_v20 = vsel %vm317_vm5, %v596_v14, %v602_v19 }
 0x21b   : > { %v614_v23 = vmul.f32 %v612_v15, %v606_v20  ;;  %v620_v24 = vpop.permute.xlu1 %619 }
 0x21d   : > { %v615_v48 = vpack.c.bf16 %v614_v23, %v613_v22  ;;  %v622_v27 = vpop.permute.xlu0 %621 }
 0x21e   : > { %v719_v28 = vld [vmem:[#allocation3 + $0x10] sm:$0xff] }
 0x21f   : > { %616 = vst.msk [vmem:[#allocation3 + $0x18] sm:$0xff] %vm543_vm12, %v615_v48  ;;  %v626_v29 = vpop.permute.xlu1 %625  ;;  %756 = vmatpush1.bf16.msra.mxu1 %v719_v28 }
 0x220   : > { %v631_v30 = vsel %vm338_vm6, %v620_v24, %v626_v29  ;;  %757 = vmatprep.subr.bf16.mxu1 %v970_v5 }
 0x221   : > { %v628_v32 = vpop.permute.xlu0 %627  ;;  %v639_v34 = vmul.f32 %v638_v2, %v631_v30 }
 0x222   : > { %v632_v33 = vsel %vm338_vm6, %v622_v27, %v628_v32 }
 0x223   : > { %v640_v35 = vmul.f32 %v638_v2, %v632_v33  ;;  %v644_v36 = vpop.permute.xlu1 %643 }
 0x225   : > { %v641_v40 = vpack.c.bf16 %v640_v35, %v639_v34  ;;  %v646_v41 = vpop.permute.xlu0 %645 }
 0x226   : > { %v720_v42 = vld [vmem:[#allocation3 + $0x18] sm:$0xff] }
 0x227   : > { %642 = vst.msk [vmem:[#allocation3 + $0x28] sm:$0xff] %vm543_vm12, %v641_v40  ;;  %v650_v44 = vpop.permute.xlu1 %649  ;;  %758 = vmatpush1.bf16.msra.mxu1 %v720_v42 }
 0x228   : > { %v655_v45 = vsel %vm358_vm7, %v644_v36, %v650_v44  ;;  %759 = vmatprep.subr.bf16.mxu1 %v970_v5 }
 0x229   : > { %v652_v47 = vpop.permute.xlu0 %651  ;;  %v663_v51 = vmul.f32 %v662_v43, %v655_v45 }
 0x22a   : > { %v656_v49 = vsel %vm358_vm7, %v646_v41, %v652_v47 }
 0x22b   : > { %v664_v52 = vmul.f32 %v662_v43, %v656_v49  ;;  %v668_v53 = vpop.permute.xlu1 %667  ;;  %760 = vmatpush1.bf16.msra.mxu1 %v721_v50 }
 0x22c   : > { %761 = vmatprep.subr.bf16.mxu1 %v970_v5 }
 0x22d   : > { %v665_v56 = vpack.c.bf16 %v664_v52, %v663_v51  ;;  %v670_v57 = vpop.permute.xlu0 %669 }
 0x22e   : > { %v722_v58 = vld [vmem:[#allocation3 + $0x28] sm:$0xff] }
 0x22f   : > { %666 = vst.msk [vmem:[#allocation3 + $0x30] sm:$0xff] %vm543_vm12, %v665_v56  ;;  %v674_v60 = vpop.permute.xlu1 %673  ;;  %762 = vmatpush1.bf16.msra.mxu1 %v722_v58 }
 0x230   : > { %v679_v61 = vsel %vm377_vm8, %v668_v53, %v674_v60  ;;  %763 = vmatprep.subr.bf16.mxu1 %v970_v5 }
 0x231   : > { %v676_v63 = vpop.permute.xlu0 %675  ;;  %v687_v21 = vmul.f32 %v686_v59, %v679_v61 }
 0x232   : > { %v680_v8 = vsel %vm377_vm8, %v670_v57, %v676_v63 }
 0x233   : > { %v688_v0 = vmul.f32 %v686_v59, %v680_v8  ;;  %v692_v1 = vpop.permute.xlu1 %691 }
 0x235   : > { %v689_v4 = vpack.c.bf16 %v688_v0, %v687_v21  ;;  %v694_v6 = vpop.permute.xlu0 %693 }
 0x236   : > { %v723_v7 = vld [vmem:[#allocation3 + $0x30] sm:$0xff] }
 0x237   : > { %690 = vst.msk [vmem:[#allocation3 + $0x38] sm:$0xff] %vm543_vm12, %v689_v4  ;;  %v698_v10 = vpop.permute.xlu1 %697  ;;  %764 = vmatpush1.bf16.msra.mxu1 %v723_v7 }
 0x238   : > { %v703_v12 = vsel %vm397_vm9, %v692_v1, %v698_v10  ;;  %765 = vmatprep.subr.bf16.mxu1 %v970_v5 }
 0x239   : > { %v700_v13 = vpop.permute.xlu0 %699  ;;  %v711_v37 = vmul.f32 %v710_v9, %v703_v12 }
 0x23a   : > { %v704_v14 = vsel %vm397_vm9, %v694_v6, %v700_v13 }
 0x23b   : > { %v712_v15 = vmul.f32 %v710_v9, %v704_v14 }
 0x23d   : > { %v713_v16 = vpack.c.bf16 %v712_v15, %v711_v37 }
 0x23e   : > { %v724_v17 = vld [vmem:[#allocation3 + $0x38] sm:$0xff] }
 0x23f   : > { %714 = vst.msk [vmem:[#allocation3 + $0x40] sm:$0xff] %vm543_vm12, %v713_v16  ;;  %766 = vmatpush1.bf16.msra.mxu1 %v724_v17 }
 0x240   : > { %767 = vmatprep.subr.bf16.mxu1 %v970_v5 }
 0x246   : > { %v725_v11 = vld [vmem:[#allocation3 + $0x40] sm:$0xff] }
 0x247   : > { %768 = vmatpush1.bf16.msra.mxu1 %v725_v11 }
 0x248   : > { %v731_v19 = vpop.permute.xlu1 %730 }
 0x24a   : > { %784 = vmatmul.mubr.bf16.vlgmr.msra.gmra.mrb[0].mxu1 %v941_v18  ;;  %v736_v24 = vpop.permute.xlu0 %735 }
 0x31d   : > { %v785_v20 = vpop.f32.mrb[0].mxu1 }
 0x31e   : > { %v786_v22 = vadd.f32 %v785_v20, %v731_v19  ;;  %v787_v23 = vpop.f32.mrb[1].mxu1 }
 0x31f   : > { %v788_v25 = vpop.f32.mrb[2].mxu1 }
 0x320   : > { %v792_v26 = vmax.f32 %v786_v22, 0.0  ;;  %v789_v48 = vadd.f32 %v788_v25, %v736_v24  ;;  %v790_v27 = vpop.f32.mrb[3].mxu1 }
 0x322   : > { %v883_v5 = vpack.c.bf16 %v792_v26, %v792_v26  ;;  %v793_v28 = vmax.f32 %v789_v48, 0.0 }
 0x324   : > { %802 = vst.msk [vmem:[%s248_s10] sm:$0xf] %vm272_vm0, %v883_v5  ;;  %v884_v2 = vpack.c.bf16 %v793_v28, %v793_v28 }
 0x326   : > { %803 = vst.msk [vmem:[%s248_s10 + $0x4] sm:$0xf] %vm272_vm0, %v884_v2 }
 0x327 PF: > { %s16_s21 = sadd.s32 1, %s950_s21  }
 0x328   : > { %p13_p4 = scmp.ge.s32.totalorder %s16_s21, 4  }
 0x32a   :  { %15 = sbr.rel (!%p13_p4) target bundleno = 1 (0x1), region = 74 }

// kernel: seg_qyl_forward.7
= control target key start
LH: loop header
LB: loop body
LE: loop exit
PB: predicated region body
PF: predicated region fallthrough
CT: control target
= control target key end

     0   :  { %s1337_s21 = smov 0   ;;  %s1568_s0 = inlined_call_operand.vmem [shape: bf16[9,256], index: 0, kind: input, shape index: {}]   ;;  %s1569_s1 = inlined_call_operand.vmem [shape: bf16[2,8,256], index: 1, kind: input, shape index: {}]   ;;  %s1570_s2 = inlined_call_operand.vmem [shape: bf16[8,72], index: 2, kind: input, shape index: {}]   ;;  %s1571_s3 = inlined_call_operand.vmem [shape: f32[8,1], index: 3, kind: input, shape index: {}]   ;;  %s1572_s4 = inlined_call_operand.vmem [shape: bf16[8,72], index: 4, kind: input, shape index: {}]   ;;  %s1573_s5 = inlined_call_operand.vmem [shape: f32[8,1], index: 5, kind: input, shape index: {}]   ;;  %s1574_s6 = inlined_call_operand.vmem [shape: bf16[2,8,256], index: 6, kind: output, shape index: {}]  }
   0x1 LB: > { %s1147_s22 = sadd.s32 4294967295, %s1291_s21   ;;  %p1151_p0 = scmp.ge.s32.totalorder %s1291_s21, 1  ;;  %s1291_s21 = sphi %s1337_s21, %s16_s21  }
   0x2   : > { %p212_p1 = scmp.lt.s32.totalorder %s1291_s21, 3 }
   0x4   : > { %p213_p2 = pnand %p1151_p0, %p212_p1 }
   0x5   : > { %p242_p3 = scmp.lt.s32.totalorder (!%p213_p2), %s1147_s22, 1  ;;  %s1293_s27 = smov (!%p213_p2), 16   ;;  %v1299_v3 = vmov (!%p213_p2), 0   ;;  %v606_v4 = vld [vmem:[%s1571_s3] sm:$0xff] (!%p213_p2)  ;;  %v280_v6 = vlaneseq (!%p213_p2)  ;;  %vm304_vm0 = vcmask (!%p213_p2), 130048   ;;  %vm263_vm1 = vcmask (!%p213_p2), 138240  }
   0x6   : > { %216 = sbr.rel (%p213_p2) target bundleno = 763 (0x2fb), region = 44  ;;  %s1294_s28 = smov (!%p213_p2), 17   ;;  %700 = vmatprep.mubr.bf16.mxu0 (!%p213_p2), %v1299_v3  ;;  %1266 = vset.pattern.permute.xlu0 (!%p213_p2), %v1299_v3  ;;  %v312_v5 = vld [vmem:[%s1568_s0] sm:$0x11] (!%p213_p2)  ;;  %v396_v11 = vld [vmem:[%s1568_s0] sm:$0x22] (!%p213_p2) }
   0x7   : > { %s1295_s29 = smov (!%p213_p2), 15   ;;  %s1296_s30 = smov (!%p213_p2), 1   ;;  %1072 = vmatprep.mubr.bf16.mxu1 (!%p213_p2), %v1299_v3  ;;  %v1161_v7 = vcombine.low (!%p213_p2), %v312_v5, %v312_v5  ;;  %v1162_v8 = vcombine.high (!%p213_p2), %v312_v5, %v312_v5  ;;  %v271_v9 = vld [vmem:[%s1568_s0] sm:$0x11] (!%p213_p2)  ;;  %v1384_v10 = vshrl.u32 (!%p213_p2), %v280_v6, 7  ;;  %v1167_v17 = vcombine.low (!%p213_p2), %v396_v11, %v396_v11 }
   0x8   : > { %s1297_s7 = smov (!%p213_p2), 127   ;;  %s1298_s8 = smov (!%p213_p2), 113   ;;  %v1158_v13 = vcombine.low (!%p213_p2), %v271_v9, %v271_v9  ;;  %v1159_v14 = vcombine.high (!%p213_p2), %v271_v9, %v271_v9  ;;  %v355_v16 = vld [vmem:[%s1568_s0] sm:$0x22] (!%p213_p2)  ;;  %v1168_v18 = vcombine.high (!%p213_p2), %v396_v11, %v396_v11  ;;  %v440_v20 = vld [vmem:[%s1568_s0] sm:$0x44] (!%p213_p2) }
   0x9   : > { %s1300_s9 = smov (!%p213_p2), 112   ;;  %s1301_s10 = smov (!%p213_p2), 111   ;;  %v319_v12 = vshrl.u32 (!%p213_p2), %v1161_v7, 16  ;;  %v327_v15 = vshrl.u32 (!%p213_p2), %v1162_v8, 16  ;;  %v1393_v19 = vsub.s32 (!%p213_p2), 0, %v1384_v10  ;;  %v1164_v25 = vcombine.low (!%p213_p2), %v355_v16, %v355_v16 }
   0xa   : > { %v278_v22 = vpack.i.b16 (!%p213_p2), %v1158_v13, %v1158_v13  ;;  %v285_v23 = vpack.i.b16 (!%p213_p2), %v1159_v14, %v1159_v14  ;;  %v1165_v26 = vcombine.high (!%p213_p2), %v355_v16, %v355_v16  ;;  %v403_v29 = vshrl.u32 (!%p213_p2), %v1167_v17, 16  ;;  %v524_v54 = vld [vmem:[%s1568_s0] sm:$0x88] (!%p213_p2) }
   0xb   : > { %v320_v21 = vpack.i.b16 (!%p213_p2), %v319_v12, %v319_v12  ;;  %v328_v24 = vpack.i.b16 (!%p213_p2), %v327_v15, %v327_v15  ;;  %v411_v30 = vshrl.u32 (!%p213_p2), %v1168_v18, 16  ;;  %v1170_v31 = vcombine.low (!%p213_p2), %v440_v20, %v440_v20  ;;  %v483_v63 = vld [vmem:[%s1568_s0] sm:$0x88] (!%p213_p2) }
   0xc   : > { %v1171_v32 = vcombine.high (!%p213_p2), %v440_v20, %v440_v20  ;;  %v283_v34 = vrot.slane (!%p213_p2), %v278_v22, %v1393_v19  ;;  %v290_v35 = vrot.slane (!%p213_p2), %v285_v23, %v1393_v19  ;;  %v362_v37 = vpack.i.b16 (!%p213_p2), %v1164_v25, %v1164_v25 }
   0xd   : > { %s1576_s22 = smov (!%p242_p3, %s1147_s22), 1  ;;  %v325_v33 = vrot.slane %v320_v21, %v1393_v19  ;;  %v333_v36 = vrot.slane %v328_v24, %v1393_v19  ;;  %v1403_v38 = vsub.s32 1, %v1384_v10  ;;  %v369_v39 = vpack.i.b16 %v1165_v26, %v1165_v26  ;;  %v567_v24 = vld [vmem:[%s1568_s0 + $0x8] sm:$0x11] }
   0xe   : > { %s1218_s23 = sshll.u32 %s1576_s22, 3  ;;  %v404_v42 = vpack.i.b16 %v403_v29, %v403_v29  ;;  %v412_v43 = vpack.i.b16 %v411_v30, %v411_v30  ;;  %v447_v44 = vshrl.u32 %v1170_v31, 16  ;;  %v455_v45 = vshrl.u32 %v1171_v32, 16 }
   0xf   : > { %s246_s26 = scalar_lea.vmem %s1569_s1, %s1218_s23  ;;  %vm347_vm2 = vcmask 121856   ;;  %v1413_v55 = vsub.s32 2, %v1384_v10  ;;  %v367_v62 = vrot.slane %v362_v37, %v1403_v38  ;;  %v374_v3 = vrot.slane %v369_v39, %v1403_v38 }
  0x10   : > { %v1353_v0 = vld [vmem:[%s246_s26] sm:$0xff]  ;;  %v448_v60 = vpack.i.b16 %v447_v44, %v447_v44  ;;  %v456_v61 = vpack.i.b16 %v455_v45, %v455_v45  ;;  %vm388_vm3 = vcmask 7168   ;;  %v417_v5 = vrot.slane %v412_v43, %v1403_v38 }
  0x11   : > { %v1156_v1 = vcombine.high %v1353_v0, %v1353_v0  ;;  %v1157_v2 = vcombine.low %v1353_v0, %v1353_v0  ;;  %vm432_vm4 = vcmask 1039360   ;;  %v1173_v13 = vcombine.low %v483_v63, %v483_v63 }
  0x12   : > { %v453_v11 = vrot.slane %v448_v60, %v1413_v55  ;;  %v461_v12 = vrot.slane %v456_v61, %v1413_v55  ;;  %v1174_v14 = vcombine.high %v483_v63, %v483_v63  ;;  %v1432_v25 = vsub.s32 3, %v1384_v10 }
  0x13   : > { %300 = vrot.lane.b32.xlu1 %v1156_v1, %s1293_s27  ;;  %257 = vrot.lane.b32.xlu0 %v1156_v1, %s1294_s28  ;;  %v490_v30 = vpack.i.b16 %v1173_v13, %v1173_v13  ;;  %vm475_vm5 = vcmask 924672   ;;  %vm516_vm6 = vcmask 916480   ;;  %vm559_vm7 = vcmask 908288   ;;  %v596_v13 = vld [vmem:[%s1570_s2] sm:$0xf] }
  0x14   : > { %v497_v31 = vpack.i.b16 %v1174_v14, %v1174_v14  ;;  %vm661_vm8 = vcmask 1043456   ;;  %vm657_vm9 = vcmask 588800  }
  0x15   : > { %v495_v44 = vrot.slane %v490_v30, %v1432_v25 }
  0x16   : > { %v502_v45 = vrot.slane %v497_v31, %v1432_v25 }
  0x17   : > { %302 = vrot.lane.b32.xlu1 %v1157_v2, %s1293_s27  ;;  %261 = vrot.lane.b32.xlu0 %v1157_v2, %s1294_s28 }
  0x1b   : > { %345 = vrot.lane.b32.xlu1 %v1157_v2, %s1295_s29  ;;  %343 = vrot.lane.b32.xlu0 %v1156_v1, %s1295_s29 }
  0x1f   : > { %386 = vrot.lane.b32.xlu1 %v1157_v2, %s1296_s30  ;;  %384 = vrot.lane.b32.xlu0 %v1156_v1, %s1296_s30 }
  0x23   : > { %430 = vrot.lane.b32.xlu1 %v1156_v1, %s1297_s7  ;;  %428 = vrot.lane.b32.xlu0 %v1157_v2, %s1297_s7 }
  0x27   : > { %473 = vrot.lane.b32.xlu1 %v1156_v1, %s1298_s8  ;;  %471 = vrot.lane.b32.xlu0 %v1157_v2, %s1298_s8 }
  0x2b   : > { %514 = vrot.lane.b32.xlu1 %v1156_v1, %s1300_s9  ;;  %512 = vrot.lane.b32.xlu0 %v1157_v2, %s1300_s9 }
  0x2f   : > { %557 = vrot.lane.b32.xlu1 %v1156_v1, %s1301_s10  ;;  %555 = vrot.lane.b32.xlu0 %v1157_v2, %s1301_s10  ;;  %v1176_v1 = vcombine.low %v524_v54, %v524_v54  ;;  %v1177_v2 = vcombine.high %v524_v54, %v524_v54 }
  0x31   : > { %v531_v17 = vshrl.u32 %v1176_v1, 16  ;;  %v539_v18 = vshrl.u32 %v1177_v2, 16 }
  0x33   : > { %609 = vperm.xlu0 %1266, %v606_v4   ;;  %v409_v4 = vrot.slane %v404_v42, %v1403_v38  ;;  %v532_v39 = vpack.i.b16 %v531_v17, %v531_v17 }
  0x85   : > { %v301_v27 = vpop.permute.xlu1 %300  ;;  %v258_v28 = vpop.permute.xlu0 %257 }
  0x89   : > { %v303_v40 = vpop.permute.xlu1 %302  ;;  %v262_v41 = vpop.permute.xlu0 %261 }
  0x8a   : > { %v305_v46 = vsel %vm304_vm0, %v303_v40, %v301_v27  ;;  %v310_v47 = vsel %vm304_vm0, %v301_v27, %v303_v40  ;;  %v264_v48 = vsel %vm263_vm1, %v262_v41, %v258_v28  ;;  %v269_v49 = vsel %vm263_vm1, %v258_v28, %v262_v41 }
  0x8b   : > { %v334_v50 = vmul.bf16 %v325_v33, %v310_v47  ;;  %v291_v51 = vmul.bf16 %v283_v34, %v269_v49  ;;  %v292_v52 = vmul.bf16 %v290_v35, %v264_v48  ;;  %v335_v53 = vmul.bf16 %v333_v36, %v305_v46 }
  0x8c   : > { %v1179_v34 = vcombine.low %v567_v24, %v567_v24  ;;  %v1180_v35 = vcombine.high %v567_v24, %v567_v24  ;;  %v540_v40 = vpack.i.b16 %v539_v18, %v539_v18  ;;  %v537_v49 = vrot.slane %v532_v39, %v1432_v25  ;;  %v980_v24 = vld [vmem:[%s1573_s5] sm:$0xff] }
  0x8d   : > { %v346_v56 = vpop.permute.xlu1 %345  ;;  %v344_v57 = vpop.permute.xlu0 %343  ;;  %v1231_v58 = vcombine.low %v292_v52, %v335_v53  ;;  %v1230_v59 = vcombine.low %v291_v51, %v334_v50 }
  0x8e   : > { %v348_v6 = vsel %vm347_vm2, %v346_v56, %v344_v57  ;;  %v353_v7 = vsel %vm347_vm2, %v344_v57, %v346_v56  ;;  %v574_v46 = vpack.i.b16 %v1179_v34, %v1179_v34  ;;  %v581_v47 = vpack.i.b16 %v1180_v35, %v1180_v35  ;;  %v784_v35 = vld [vmem:[%s1568_s0] sm:$0x22] }
  0x8f   : > { %668 = vmatprep.subr.bf16.mxu0 %v1231_v58  ;;  %v375_v20 = vmul.bf16 %v367_v62, %v353_v7  ;;  %v376_v21 = vmul.bf16 %v374_v3, %v348_v6  ;;  %v545_v50 = vrot.slane %v540_v40, %v1432_v25 }
  0x90   : > { %669 = vmatpush1.bf16.msra.mxu0 %v1230_v59  ;;  %v579_v59 = vrot.slane %v574_v46, %v1393_v19  ;;  %v586_v60 = vrot.slane %v581_v47, %v1393_v19 }
  0x91   : > { %v387_v8 = vpop.permute.xlu1 %386  ;;  %v385_v9 = vpop.permute.xlu0 %384 }
  0x92   : > { %v389_v15 = vsel %vm388_vm3, %v387_v8, %v385_v9  ;;  %v394_v16 = vsel %vm388_vm3, %v385_v9, %v387_v8 }
  0x93   : > { %v418_v22 = vmul.bf16 %v409_v4, %v394_v16  ;;  %v419_v23 = vmul.bf16 %v417_v5, %v389_v15 }
  0x95   : > { %v431_v26 = vpop.permute.xlu1 %430  ;;  %v429_v27 = vpop.permute.xlu0 %428  ;;  %v1233_v28 = vcombine.low %v376_v21, %v419_v23  ;;  %v1232_v29 = vcombine.low %v375_v20, %v418_v22 }
  0x96   : > { %v433_v32 = vsel %vm432_vm4, %v429_v27, %v431_v26  ;;  %v438_v33 = vsel %vm432_vm4, %v431_v26, %v429_v27 }
  0x97   : > { %v462_v36 = vmul.bf16 %v453_v11, %v433_v32  ;;  %v463_v37 = vmul.bf16 %v461_v12, %v438_v33  ;;  %670 = vmatprep.subr.bf16.mxu0 %v1233_v28  ;;  %v815_v32 = vld [vmem:[%s1568_s0] sm:$0x22]  ;;  %v722_v33 = vld [vmem:[%s1568_s0] sm:$0x11] }
  0x98   : > { %671 = vmatpush1.bf16.msra.mxu0 %v1232_v29  ;;  %v753_v29 = vld [vmem:[%s1568_s0] sm:$0x11]  ;;  %v817_v40 = vunpack.c.h.bf16 %v815_v32  ;;  %v816_v47 = vunpack.c.l.bf16 %v815_v32 }
  0x99   : > { %v1172_v41 = vcombine.low %v462_v36, %v463_v37  ;;  %v474_v42 = vpop.permute.xlu1 %473  ;;  %v472_v43 = vpop.permute.xlu0 %471  ;;  %v1234_v53 = vcombine.low %v1353_v0, %v462_v36  ;;  %v754_v31 = vunpack.c.l.bf16 %v753_v29  ;;  %v855_v37 = vld [vmem:[%s1568_s0] sm:$0x44]  ;;  %v755_v39 = vunpack.c.h.bf16 %v753_v29  ;;  %v948_v29 = vld [vmem:[%s1568_s0 + $0x8] sm:$0x11] }
  0x9a   : > { %v476_v51 = vsel %vm475_vm5, %v472_v43, %v474_v42  ;;  %v481_v52 = vsel %vm475_vm5, %v474_v42, %v472_v43  ;;  %v724_v42 = vunpack.c.h.bf16 %v722_v33 }
  0x9b   : > { %v1187_v48 = vcombine.high %v1353_v0, %v1172_v41  ;;  %v503_v61 = vmul.bf16 %v495_v44, %v476_v51  ;;  %v504_v62 = vmul.bf16 %v502_v45, %v481_v52  ;;  %v723_v41 = vunpack.c.l.bf16 %v722_v33 }
  0x9c   : > { %v759_v43 = vrot.slane %v754_v31, %v1403_v38  ;;  %v785_v44 = vunpack.c.l.bf16 %v784_v35  ;;  %v786_v45 = vunpack.c.h.bf16 %v784_v35  ;;  %v763_v52 = vrot.slane %v755_v39, %v1403_v38 }
  0x9d   : > { %v515_v54 = vpop.permute.xlu1 %514  ;;  %672 = vmatprep.subr.bf16.mxu0 %v1187_v48  ;;  %v513_v56 = vpop.permute.xlu0 %512  ;;  %v922_v33 = vsub.s32 7, %v1384_v10 }
  0x9e   : > { %v517_v57 = vsel %vm516_vm6, %v513_v56, %v515_v54  ;;  %v522_v58 = vsel %vm516_vm6, %v515_v54, %v513_v56  ;;  %673 = vmatpush1.bf16.msra.mxu0 %v1234_v53  ;;  %v825_v54 = vrot.slane %v817_v40, %v1432_v25  ;;  %v728_v56 = vrot.slane %v723_v41, %v1393_v19 }
  0x9f   : > { %v546_v63 = vmul.bf16 %v537_v49, %v517_v57  ;;  %v547_v1 = vmul.bf16 %v545_v50, %v522_v58  ;;  %v857_v49 = vunpack.c.h.bf16 %v855_v37  ;;  %v860_v50 = vsub.s32 5, %v1384_v10 }
  0xa0   : > { %v732_v57 = vrot.slane %v724_v42, %v1393_v19  ;;  %v790_v58 = vrot.slane %v785_v44, %v1413_v55  ;;  %v950_v41 = vunpack.c.h.bf16 %v948_v29 }
  0xa1   : > { %v558_v2 = vpop.permute.xlu1 %557  ;;  %v556_v3 = vpop.permute.xlu0 %555  ;;  %v1236_v0 = vcombine.low %v504_v62, %v547_v1  ;;  %v1235_v4 = vcombine.low %v503_v61, %v546_v63  ;;  %v794_v62 = vrot.slane %v786_v45, %v1413_v55  ;;  %v821_v63 = vrot.slane %v816_v47, %v1432_v25  ;;  %v917_v25 = vld [vmem:[%s1568_s0] sm:$0x88] }
  0xa2   : > { %v560_v5 = vsel %vm559_vm7, %v556_v3, %v558_v2  ;;  %v565_v6 = vsel %vm559_vm7, %v558_v2, %v556_v3  ;;  %v865_v38 = vrot.slane %v857_v49, %v860_v50  ;;  %v886_v2 = vld [vmem:[%s1568_s0] sm:$0x88] }
  0xa3   : > { %v587_v7 = vmul.bf16 %v579_v59, %v560_v5  ;;  %v588_v8 = vmul.bf16 %v586_v60, %v565_v6  ;;  %674 = vmatprep.subr.bf16.mxu0 %v1236_v0  ;;  %v856_v60 = vunpack.c.l.bf16 %v855_v37 }
  0xa4   : > { %675 = vmatpush1.bf16.msra.mxu0 %v1235_v4 }
  0xa5   : > { %v1237_v9 = vcombine.low %v587_v7, %v587_v7  ;;  %v1238_v11 = vcombine.low %v588_v8, %v588_v8 }
  0xa7   : > { %1192 = vmatprep.subr.msk.bf16.mxu0 %vm661_vm8, %v1238_v11  ;;  %v663_v12 = vsel %vm661_vm8, %v1237_v9, 0  ;;  %v861_v9 = vrot.slane %v856_v60, %v860_v50  ;;  %v887_v11 = vunpack.c.l.bf16 %v886_v2 }
  0xa8   : > { %677 = vmatpush1.bf16.msra.mxu0 %v663_v12  ;;  %v888_v12 = vunpack.c.h.bf16 %v886_v2  ;;  %v970_v2 = vld [vmem:[%s1572_s4] sm:$0xf] }
  0xab   : > { %1193 = vmatmul.mubr.msk.bf16.vlgmr.msra.gmra.mrb[0].mxu0 %vm657_vm9, %v596_v13  ;;  %v891_v13 = vsub.s32 6, %v1384_v10 }
  0xad   : > { %v892_v39 = vrot.slane %v887_v11, %v891_v13 }
  0xb2   : > { %v610_v14 = vpop.permute.xlu0 %609 }
 0x17e   : > { %v702_v15 = vpop.f32.mrb[0].mxu0 }
 0x17f   : > { %v703_v16 = vadd.f32 %v702_v15, %v610_v14  ;;  %v704_v17 = vpop.f32.mrb[1].mxu0 }
 0x180   : > { %v706_v18 = vpop.f32.mrb[2].mxu0  ;;  %v705_v21 = vadd.f32 %v704_v17, %v610_v14 }
 0x181   : > { %v1456_v20 = vmax.f32 %v703_v16, 0.0  ;;  %v707_v22 = vpop.f32.mrb[3].mxu0 }
 0x182   : > { %v1462_v23 = vmax.f32 %v705_v21, 0.0 }
 0x183   : > { %846 = vrot.lane.b32.xlu0 %v1456_v20, %s1297_s7  ;;  %716 = vrot.lane.b32.xlu1 %v1456_v20, %s1294_s28 }
 0x187   : > { %744 = vrot.lane.b32.xlu0 %v1462_v23, %s1293_s27  ;;  %747 = vrot.lane.b32.xlu1 %v1456_v20, %s1293_s27 }
 0x18b   : > { %775 = vrot.lane.b32.xlu0 %v1462_v23, %s1295_s29  ;;  %778 = vrot.lane.b32.xlu1 %v1456_v20, %s1295_s29  ;;  %s251_s29 = scalar_lea.vmem %s1574_s6, %s1218_s23 }
 0x18f   : > { %806 = vrot.lane.b32.xlu0 %v1462_v23, %s1296_s30  ;;  %809 = vrot.lane.b32.xlu1 %v1456_v20, %s1296_s30 }
 0x193   : > { %877 = vrot.lane.b32.xlu0 %v1456_v20, %s1298_s8  ;;  %712 = vrot.lane.b32.xlu1 %v1462_v23, %s1294_s28 }
 0x197   : > { %908 = vrot.lane.b32.xlu0 %v1456_v20, %s1300_s9  ;;  %848 = vrot.lane.b32.xlu1 %v1462_v23, %s1297_s7 }
 0x19b   : > { %939 = vrot.lane.b32.xlu0 %v1456_v20, %s1301_s10  ;;  %879 = vrot.lane.b32.xlu1 %v1462_v23, %s1298_s8 }
 0x19f   : > { %983 = vperm.xlu0 %1266, %v980_v24   ;;  %910 = vrot.lane.b32.xlu1 %v1462_v23, %s1300_s9 }
 0x1a3   : > { %941 = vrot.lane.b32.xlu1 %v1462_v23, %s1301_s10 }
 0x1f5   : > { %v1495_v26 = vpop.permute.xlu0 %846  ;;  %v717_v27 = vpop.permute.xlu1 %716 }
 0x1f9   : > { %v745_v28 = vpop.permute.xlu0 %744  ;;  %v748_v30 = vpop.permute.xlu1 %747 }
 0x1fa   : > { %v752_v51 = vsel %vm304_vm0, %v745_v28, %v748_v30  ;;  %v749_v53 = vsel %vm304_vm0, %v748_v30, %v745_v28  ;;  %v919_v28 = vunpack.c.h.bf16 %v917_v25 }
 0x1fb   : > { %v764_v61 = vmul.f32 %v759_v43, %v752_v51  ;;  %v765_v5 = vmul.f32 %v763_v52, %v749_v53  ;;  %v896_v43 = vrot.slane %v888_v12, %v891_v13  ;;  %v958_v52 = vrot.slane %v950_v41, %v1393_v19 }
 0x1fd   : > { %v776_v34 = vpop.permute.xlu0 %775  ;;  %v779_v36 = vpop.permute.xlu1 %778 }
 0x1fe   : > { %v780_v3 = vsel %vm347_vm2, %v779_v36, %v776_v34  ;;  %v783_v14 = vsel %vm347_vm2, %v776_v34, %v779_v36  ;;  %v949_v36 = vunpack.c.l.bf16 %v948_v29 }
 0x1ff   : > { %v796_v15 = vmul.f32 %v794_v62, %v780_v3  ;;  %v795_v34 = vmul.f32 %v790_v58, %v783_v14 }
 0x201   : > { %v807_v46 = vpop.permute.xlu0 %806  ;;  %v810_v48 = vpop.permute.xlu1 %809 }
 0x202   : > { %v811_v59 = vsel %vm388_vm3, %v810_v48, %v807_v46  ;;  %v814_v6 = vsel %vm388_vm3, %v807_v46, %v810_v48  ;;  %v954_v48 = vrot.slane %v949_v36, %v1393_v19 }
 0x203   : > { %v827_v7 = vmul.f32 %v825_v54, %v811_v59  ;;  %v826_v22 = vmul.f32 %v821_v63, %v814_v6 }
 0x205   : > { %v713_v1 = vpop.permute.xlu1 %712  ;;  %v878_v16 = vpop.permute.xlu0 %877  ;;  %v1242_v32 = vpack.c.bf16 %v827_v7, %v796_v15  ;;  %v1241_v40 = vpack.c.bf16 %v826_v22, %v795_v34 }
 0x206   : > { %v718_v0 = vsel %vm263_vm1, %v717_v27, %v713_v1  ;;  %v721_v4 = vsel %vm263_vm1, %v713_v1, %v717_v27  ;;  %v918_v27 = vunpack.c.l.bf16 %v917_v25 }
 0x207   : > { %v733_v8 = vmul.f32 %v728_v56, %v721_v4  ;;  %v734_v55 = vmul.f32 %v732_v57, %v718_v0 }
 0x208   : > { %v923_v45 = vrot.slane %v918_v27, %v922_v33 }
 0x209   : > { %v849_v17 = vpop.permute.xlu1 %848  ;;  %v1240_v18 = vpack.c.bf16 %v765_v5, %v734_v55  ;;  %v1239_v21 = vpack.c.bf16 %v764_v61, %v733_v8  ;;  %v909_v42 = vpop.permute.xlu0 %908 }
 0x20a   : > { %v854_v24 = vsel %vm432_vm4, %v849_v17, %v1495_v26  ;;  %v850_v30 = vsel %vm432_vm4, %v1495_v26, %v849_v17  ;;  %v927_v26 = vrot.slane %v919_v28, %v922_v33 }
 0x20b   : > { %v867_v31 = vmul.f32 %v865_v38, %v854_v24  ;;  %1040 = vmatprep.subr.bf16.mxu1 %v1240_v18  ;;  %v866_v37 = vmul.f32 %v861_v9, %v850_v30 }
 0x20c   : > { %1041 = vmatpush1.bf16.msra.mxu1 %v1239_v21 }
 0x20d   : > { %1042 = vmatprep.subr.bf16.mxu1 %v1242_v32  ;;  %v880_v35 = vpop.permute.xlu1 %879  ;;  %v1244_v44 = vpack.c.bf16 %v867_v31, %v1462_v23  ;;  %v1243_v51 = vpack.c.bf16 %v866_v37, %v1456_v20  ;;  %v940_v57 = vpop.permute.xlu0 %939 }
 0x20e   : > { %v881_v46 = vsel %vm475_vm5, %v878_v16, %v880_v35  ;;  %v885_v47 = vsel %vm475_vm5, %v880_v35, %v878_v16 }
 0x20f   : > { %v897_v23 = vmul.f32 %v892_v39, %v881_v46  ;;  %v898_v53 = vmul.f32 %v896_v43, %v885_v47 }
 0x210   : > { %1043 = vmatpush1.bf16.msra.mxu1 %v1241_v40 }
 0x211   : > { %1044 = vmatprep.subr.bf16.mxu1 %v1244_v44  ;;  %v911_v10 = vpop.permute.xlu1 %910 }
 0x212   : > { %v912_v49 = vsel %vm516_vm6, %v909_v42, %v911_v10  ;;  %v916_v50 = vsel %vm516_vm6, %v911_v10, %v909_v42 }
 0x213   : > { %v928_v54 = vmul.f32 %v923_v45, %v912_v49  ;;  %v929_v56 = vmul.f32 %v927_v26, %v916_v50 }
 0x214   : > { %1045 = vmatpush1.bf16.msra.mxu1 %v1243_v51 }
 0x215   : > { %v942_v58 = vpop.permute.xlu1 %941  ;;  %v1246_v59 = vpack.c.bf16 %v929_v56, %v898_v53  ;;  %v1245_v60 = vpack.c.bf16 %v928_v54, %v897_v23 }
 0x216   : > { %v943_v61 = vsel %vm559_vm7, %v940_v57, %v942_v58  ;;  %v947_v62 = vsel %vm559_vm7, %v942_v58, %v940_v57 }
 0x217   : > { %v959_v63 = vmul.f32 %v954_v48, %v943_v61  ;;  %v960_v1 = vmul.f32 %v958_v52, %v947_v62  ;;  %1046 = vmatprep.subr.bf16.mxu1 %v1246_v59 }
 0x218   : > { %1047 = vmatpush1.bf16.msra.mxu1 %v1245_v60 }
 0x219   : > { %v1247_v20 = vpack.c.bf16 %v959_v63, %v959_v63  ;;  %v1248_v19 = vpack.c.bf16 %v960_v1, %v960_v1 }
 0x21b   : > { %1213 = vmatprep.subr.msk.bf16.mxu1 %vm661_vm8, %v1248_v19  ;;  %v1035_v38 = vsel %vm661_vm8, %v1247_v20, 0 }
 0x21c   : > { %1049 = vmatpush1.bf16.msra.mxu1 %v1035_v38 }
 0x21e   : > { %v984_v3 = vpop.permute.xlu0 %983 }
 0x21f   : > { %1214 = vmatmul.mubr.msk.bf16.vlgmr.msra.gmra.mrb[0].mxu1 %vm657_vm9, %v970_v2 }
 0x2f2   : > { %v1074_v0 = vpop.f32.mrb[0].mxu1 }
 0x2f3   : > { %v1075_v4 = vadd.f32 %v1074_v0, %v984_v3  ;;  %v1076_v5 = vpop.f32.mrb[1].mxu1 }
 0x2f4   : > { %v1077_v6 = vadd.f32 %v1076_v5, %v984_v3  ;;  %v1078_v7 = vpop.f32.mrb[2].mxu1 }
 0x2f5   : > { %v1081_v8 = vmax.f32 %v1075_v4, 0.0  ;;  %v1079_v55 = vpop.f32.mrb[3].mxu1 }
 0x2f6   : > { %v1082_v25 = vmax.f32 %v1077_v6, 0.0 }
 0x2f8   : > { %v1229_v9 = vpack.c.bf16 %v1082_v25, %v1081_v8 }
 0x2fa   : > { %1091 = vst [vmem:[%s251_s29] sm:$0xff] %v1229_v9 }
 0x2fb PF: > { %s16_s21 = sadd.s32 1, %s1291_s21  }
 0x2fc   : > { %p13_p4 = scmp.ge.s32.totalorder %s16_s21, 4  }
 0x2fe   :  { %15 = sbr.rel (!%p13_p4) target bundleno = 1 (0x1), region = 74 }

// kernel: seg_qyl_forward.9
= control target key start
LH: loop header
LB: loop body
LE: loop exit
PB: predicated region body
PF: predicated region fallthrough
CT: control target
= control target key end

     0   :  { %s1320_s21 = smov 0   ;;  %s1751_s0 = inlined_call_operand.vmem [shape: bf16[9,16], index: 0, kind: input, shape index: {}]   ;;  %s1752_s1 = inlined_call_operand.vmem [shape: bf16[2,16,16], index: 1, kind: input, shape index: {}]   ;;  %s1753_s2 = inlined_call_operand.vmem [shape: bf16[32,144], index: 2, kind: input, shape index: {}]   ;;  %s1754_s3 = inlined_call_operand.vmem [shape: f32[32,1], index: 3, kind: input, shape index: {}]   ;;  %s1755_s4 = inlined_call_operand.vmem [shape: bf16[32,288], index: 4, kind: input, shape index: {}]   ;;  %s1756_s5 = inlined_call_operand.vmem [shape: f32[32,1], index: 5, kind: input, shape index: {}]   ;;  %s1757_s6 = inlined_call_operand.vmem [shape: bf16[2,32,16], index: 6, kind: output, shape index: {}]  }
   0x1 LB: > { %s1142_s22 = sadd.s32 4294967295, %s1266_s21   ;;  %p1146_p0 = scmp.ge.s32.totalorder %s1266_s21, 1  ;;  %s1266_s21 = sphi %s1320_s21, %s16_s21  }
   0x2   : > { %p212_p1 = scmp.lt.s32.totalorder %s1266_s21, 3 }
   0x4   : > { %p213_p2 = pnand %p1146_p0, %p212_p1 }
   0x5   : > { %p242_p3 = scmp.lt.s32.totalorder (!%p213_p2), %s1142_s22, 1  ;;  %vm278_vm0 = vcmask (!%p213_p2), 130048   ;;  %s1268_s27 = smov (!%p213_p2), 116   ;;  %v1270_v1 = vmov (!%p213_p2), 0   ;;  %v1248_v2 = vld [vmem:[%s1753_s2 + $0x4] ss:$8 sps:$4 sm:$0xff] (!%p213_p2)   ;;  %v273_v7 = vlaneseq (!%p213_p2) }
   0x6   : > { %216 = sbr.rel (%p213_p2) target bundleno = 878 (0x36e), region = 44  ;;  %s1269_s28 = smov (!%p213_p2), 117   ;;  %480 = vmatprep.subr.bf16.mxu0 (!%p213_p2), %v1270_v1  ;;  %1244 = vset.pattern.permute.xlu1 (!%p213_p2), %v1270_v1  ;;  %v433_v3 = vld [vmem:[%s1754_s3 + $0x8] sm:$0xff] (!%p213_p2)  ;;  %v432_v4 = vld [vmem:[%s1754_s3] sm:$0xff] (!%p213_p2)  ;;  %v434_v5 = vld [vmem:[%s1754_s3 + $0x10] sm:$0xff] (!%p213_p2)  ;;  %vm284_vm1 = vcmask (!%p213_p2), 31744  }
   0x7   : > { %1243 = vset.pattern.permute.xlu0 (!%p213_p2), %v1270_v1  ;;  %s1271_s29 = smov (!%p213_p2), 4   ;;  %s1272_s30 = smov (!%p213_p2), 5   ;;  %1156 = vmatprep.mubr.msk.bf16.mxu0 (!%p213_p2), %vm278_vm0, %v1248_v2  ;;  %v435_v6 = vld [vmem:[%s1754_s3 + $0x18] sm:$0xff] (!%p213_p2)  ;;  %v289_v8 = vld [vmem:[%s1751_s0] sm:$0x1] (!%p213_p2)  ;;  %v1373_v9 = vshrl.u32 (!%p213_p2), %v273_v7, 7 }
   0x8   : > { %s1273_s7 = smov (!%p213_p2), 3   ;;  %s1274_s8 = smov (!%p213_p2), 115   ;;  %v291_v10 = vshrl.u32 (!%p213_p2), %v289_v8, 16  ;;  %v269_v11 = vld [vmem:[%s1751_s0] sm:$0x1] (!%p213_p2)  ;;  %vm264_vm2 = vcmask (!%p213_p2), 39936  }
   0x9   : > { %s1760_s9 = smov (!%p213_p2), 1   ;;  %s1764_s10 = smov (!%p213_p2), 113   ;;  %v1379_v12 = vsub.s32 (!%p213_p2), 0, %v1373_v9  ;;  %v271_v14 = vpack.i.b16 (!%p213_p2), %v269_v11, %v269_v11  ;;  %v309_v15 = vld [vmem:[%s1751_s0] sm:$0x2] (!%p213_p2)  ;;  %v1390_v22 = vsub.s32 (!%p213_p2), 1, %v1373_v9 }
   0xa   : > { %s1277_s11 = smov (!%p213_p2), 15   ;;  %s1278_s12 = smov (!%p213_p2), 127   ;;  %v292_v13 = vpack.i.b16 (!%p213_p2), %v291_v10, %v291_v10  ;;  %v328_v16 = vld [vmem:[%s1751_s0] sm:$0x2] (!%p213_p2)  ;;  %v311_v19 = vpack.i.b16 (!%p213_p2), %v309_v15, %v309_v15  ;;  %v350_v24 = vld [vmem:[%s1751_s0] sm:$0x4] (!%p213_p2) }
   0xb   : > { %s1279_s13 = smov (!%p213_p2), 13   ;;  %s1280_s14 = smov (!%p213_p2), 125   ;;  %v276_v21 = vrot.slane (!%p213_p2), %v271_v14, %v1379_v12  ;;  %v330_v23 = vshrl.u32 (!%p213_p2), %v328_v16, 16  ;;  %vm304_vm3 = vcmask (!%p213_p2), 23552   ;;  %v352_v29 = vshrl.u32 (!%p213_p2), %v350_v24, 16 }
   0xc   : > { %s1281_s15 = smov (!%p213_p2), 12   ;;  %s1282_s16 = smov (!%p213_p2), 124   ;;  %v297_v20 = vrot.slane (!%p213_p2), %v292_v13, %v1379_v12  ;;  %v316_v32 = vrot.slane (!%p213_p2), %v311_v19, %v1390_v22  ;;  %v357_v38 = vsub.s32 (!%p213_p2), 2, %v1373_v9  ;;  %vm323_vm4 = vcmask (!%p213_p2), 7168   ;;  %v370_v41 = vld [vmem:[%s1751_s0] sm:$0x8] (!%p213_p2) }
   0xd   : > { %s1771_s22 = smov (!%p242_p3, %s1142_s22), 1  ;;  %s1758_s17 = smov 11   ;;  %v331_v33 = vpack.i.b16 %v330_v23, %v330_v23  ;;  %v353_v37 = vpack.i.b16 %v352_v29, %v352_v29  ;;  %v389_v42 = vld [vmem:[%s1751_s0] sm:$0x8]  ;;  %vm345_vm5 = vcmask 121856   ;;  %v372_v48 = vpack.i.b16 %v370_v41, %v370_v41 }
   0xe   : > { %s1172_s23 = sshll.u32 %s1771_s22, 3  ;;  %s1762_s18 = smov 123   ;;  %v1414_v49 = vsub.s32 3, %v1373_v9  ;;  %v391_v50 = vshrl.u32 %v389_v42, 16  ;;  %vm365_vm6 = vcmask 105472   ;;  %vm384_vm7 = vcmask 97280  }
   0xf   : > { %s246_s26 = scalar_lea.vmem %s1752_s1, %s1172_s23  ;;  %v336_v40 = vrot.slane %v331_v33, %v1390_v22  ;;  %v358_v46 = vrot.slane %v353_v37, %v357_v38  ;;  %v409_v59 = vld [vmem:[%s1751_s0 + $0x4] sm:$0x1]  ;;  %vm404_vm8 = vcmask 89088   ;;  %v1249_v23 = vld [vmem:[%s1753_s2 + $0x14] ss:$8 sps:$4 sm:$0xff]   ;;  %s1766_s23 = smov 113  }
  0x10   : > { %v1245_v0 = vld [vmem:[%s246_s26] sm:$0xff]   ;;  %v377_v56 = vrot.slane %v372_v48, %v1414_v49  ;;  %v392_v57 = vpack.i.b16 %v391_v50, %v391_v50  ;;  %v1251_v24 = vld [vmem:[%s1753_s2 + $0x10] ss:$8 sps:$4 sm:$0xff]   ;;  %s1767_s24 = smov 1   ;;  %vm957_vm9 = vcmask 261120   ;;  %s1173_s25 = sshll.u32 %s1771_s22, 4 }
  0x11   : > { %280 = vrot.lane.b32.xlu1 %v1245_v0, %s1268_s27  ;;  %260 = vrot.lane.b32.xlu0 %v1245_v0, %s1269_s28  ;;  %340 = vst.msk [vmem:[#allocation2 + $0x20] sm:$0xff] %vm278_vm0, %v1245_v0  ;;  %v1254_v48 = vld [vmem:[%s1755_s4 + $0x4] ss:$12 sps:$4 sm:$0xff]   ;;  %v565_v50 = vld [vmem:[%s1751_s0] sm:$0x1]  ;;  %s251_s20 = scalar_lea.vmem %s1757_s6, %s1173_s25  ;;  %vm1082_vm10 = vcmask 125952  }
  0x12   : > { %v397_v2 = vrot.slane %v392_v57, %v1414_v49  ;;  %996 = vmatprep.mubr.bf16.mxu1 %v1254_v48  ;;  %v737_v57 = vld [vmem:[%s1751_s0] sm:$0x4] }
  0x15   : > { %282 = vrot.lane.b32.xlu1 %v1245_v0, %s1271_s29  ;;  %262 = vrot.lane.b32.xlu0 %v1245_v0, %s1272_s30 }
  0x18   : > { %v427_v14 = vld [vmem:[#allocation2 + $0x20] sm:$0xff] }
  0x19   : > { %302 = vrot.lane.b32.xlu1 %v1245_v0, %s1273_s7  ;;  %300 = vrot.lane.b32.xlu0 %v1245_v0, %s1274_s8 }
  0x1d   : > { %321 = vrot.lane.b32.xlu1 %v1245_v0, %s1760_s9  ;;  %319 = vrot.lane.b32.xlu0 %v1245_v0, %s1764_s10 }
  0x21   : > { %343 = vrot.lane.b32.xlu1 %v1245_v0, %s1277_s11  ;;  %341 = vrot.lane.b32.xlu0 %v1245_v0, %s1278_s12 }
  0x25   : > { %363 = vrot.lane.b32.xlu1 %v1245_v0, %s1279_s13  ;;  %361 = vrot.lane.b32.xlu0 %v1245_v0, %s1280_s14 }
  0x29   : > { %382 = vrot.lane.b32.xlu1 %v1245_v0, %s1281_s15  ;;  %380 = vrot.lane.b32.xlu0 %v1245_v0, %s1282_s16 }
  0x2d   : > { %402 = vrot.lane.b32.xlu1 %v1245_v0, %s1758_s17  ;;  %400 = vrot.lane.b32.xlu0 %v1245_v0, %s1762_s18 }
  0x31   : > { %443 = vperm.xlu1 %1244, %v433_v3   ;;  %438 = vperm.xlu0 %1243, %v432_v4   ;;  %v411_v3 = vpack.i.b16 %v409_v59, %v409_v59 }
  0x33   : > { %v416_v10 = vrot.slane %v411_v3, %v1379_v12 }
  0x35   : > { %448 = vperm.xlu1 %1244, %v434_v5   ;;  %453 = vperm.xlu0 %1243, %v435_v6  }
  0x83   : > { %v281_v17 = vpop.permute.xlu1 %280  ;;  %v261_v18 = vpop.permute.xlu0 %260 }
  0x87   : > { %v283_v25 = vpop.permute.xlu1 %282  ;;  %v263_v26 = vpop.permute.xlu0 %262 }
  0x88   : > { %v287_v27 = vsel %vm284_vm1, %v281_v17, %v283_v25  ;;  %v267_v28 = vsel %vm264_vm2, %v261_v18, %v263_v26 }
  0x89   : > { %v298_v30 = vmul.bf16 %v297_v20, %v287_v27  ;;  %v277_v31 = vmul.bf16 %v276_v21, %v267_v28  ;;  %v1246_v21 = vld [vmem:[%s1753_s2] ss:$8 sps:$4 sm:$0xff]  }
  0x8b   : > { %299 = vst.msk [vmem:[#allocation2 + $0x8] sm:$0xff] %vm278_vm0, %v298_v30  ;;  %279 = vst.msk [vmem:[#allocation2] sm:$0xff] %vm278_vm0, %v277_v31  ;;  %v303_v34 = vpop.permute.xlu1 %302  ;;  %v301_v35 = vpop.permute.xlu0 %300 }
  0x8c   : > { %v307_v36 = vsel %vm304_vm3, %v301_v35, %v303_v34 }
  0x8d   : > { %v317_v39 = vmul.bf16 %v316_v32, %v307_v36 }
  0x8f   : > { %318 = vst.msk [vmem:[#allocation2 + $0x10] sm:$0xff] %vm278_vm0, %v317_v39  ;;  %v322_v43 = vpop.permute.xlu1 %321  ;;  %v320_v44 = vpop.permute.xlu0 %319 }
  0x90   : > { %v326_v45 = vsel %vm323_vm4, %v320_v44, %v322_v43 }
  0x91   : > { %v337_v47 = vmul.bf16 %v336_v40, %v326_v45 }
  0x92   : > { %v423_v51 = vld [vmem:[#allocation2] sm:$0xff]  ;;  %v424_v58 = vld [vmem:[#allocation2 + $0x8] sm:$0xff] }
  0x93   : > { %481 = vmatpush1.bf16.msra.mxu0 %v423_v51  ;;  %338 = vst.msk [vmem:[#allocation2 + $0x18] sm:$0xff] %vm278_vm0, %v337_v47  ;;  %v344_v52 = vpop.permute.xlu1 %343  ;;  %v342_v53 = vpop.permute.xlu0 %341 }
  0x94   : > { %482 = vmatprep.subr.bf16.mxu0 %v1270_v1  ;;  %v348_v54 = vsel %vm345_vm5, %v342_v53, %v344_v52  ;;  %v566_v52 = vunpack.c.l.bf16 %v565_v50 }
  0x95   : > { %v359_v55 = vmul.bf16 %v358_v46, %v348_v54 }
  0x96   : > { %v425_v62 = vld [vmem:[#allocation2 + $0x10] sm:$0xff]  ;;  %v1590_v54 = vrot.slane %v566_v52, %v1379_v12 }
  0x97   : > { %483 = vmatpush1.bf16.msra.mxu0 %v424_v58  ;;  %360 = vst.msk [vmem:[#allocation2 + $0x28] sm:$0xff] %vm278_vm0, %v359_v55  ;;  %v364_v60 = vpop.permute.xlu1 %363  ;;  %v362_v61 = vpop.permute.xlu0 %361 }
  0x98   : > { %484 = vmatprep.subr.bf16.mxu0 %v1270_v1  ;;  %v368_v63 = vsel %vm365_vm6, %v362_v61, %v364_v60 }
  0x99   : > { %v378_v0 = vmul.bf16 %v377_v56, %v368_v63  ;;  %v738_v63 = vunpack.c.l.bf16 %v737_v57 }
  0x9a   : > { %v426_v6 = vld [vmem:[#allocation2 + $0x18] sm:$0xff] }
  0x9b   : > { %485 = vmatpush1.bf16.msra.mxu0 %v425_v62  ;;  %379 = vst.msk [vmem:[#allocation2 + $0x30] sm:$0xff] %vm278_vm0, %v378_v0  ;;  %v383_v4 = vpop.permute.xlu1 %382  ;;  %v381_v5 = vpop.permute.xlu0 %380  ;;  %v741_v0 = vsub.s32 5, %v1373_v9 }
  0x9c   : > { %486 = vmatprep.subr.bf16.mxu0 %v1270_v1  ;;  %v387_v7 = vsel %vm384_vm7, %v381_v5, %v383_v4  ;;  %v903_v4 = vld [vmem:[%s1756_s5] sm:$0xff] }
  0x9d   : > { %v398_v8 = vmul.bf16 %v397_v2, %v387_v7  ;;  %v1612_v5 = vrot.slane %v738_v63, %v741_v0 }
  0x9e   : > { %v428_v17 = vld [vmem:[#allocation2 + $0x28] sm:$0xff] }
  0x9f   : > { %487 = vmatpush1.bf16.msra.mxu0 %v426_v6  ;;  %399 = vst.msk [vmem:[#allocation2 + $0x38] sm:$0xff] %vm278_vm0, %v398_v8  ;;  %v403_v11 = vpop.permute.xlu1 %402  ;;  %v401_v13 = vpop.permute.xlu0 %400  ;;  %v904_v8 = vld [vmem:[%s1756_s5 + $0x8] sm:$0xff] }
  0xa0   : > { %488 = vmatprep.subr.bf16.mxu0 %v1270_v1  ;;  %v407_v15 = vsel %vm404_vm8, %v401_v13, %v403_v11 }
  0xa1   : > { %v417_v16 = vmul.bf16 %v416_v10, %v407_v15  ;;  %v607_v10 = vld [vmem:[%s1751_s0] sm:$0x1] }
  0xa2   : > { %v429_v18 = vld [vmem:[#allocation2 + $0x30] sm:$0xff] }
  0xa3   : > { %489 = vmatpush1.bf16.msra.mxu0 %v427_v14  ;;  %418 = vst.msk [vmem:[#allocation2 + $0x40] sm:$0xff] %vm278_vm0, %v417_v16  ;;  %v905_v14 = vld [vmem:[%s1756_s5 + $0x10] sm:$0xff] }
  0xa4   : > { %490 = vmatprep.subr.bf16.mxu0 %v1270_v1 }
  0xa6   : > { %v430_v19 = vld [vmem:[#allocation2 + $0x38] sm:$0xff] }
  0xa7   : > { %491 = vmatpush1.bf16.msra.mxu0 %v428_v17 }
  0xa8   : > { %492 = vmatprep.subr.bf16.mxu0 %v1270_v1 }
  0xaa   : > { %v431_v20 = vld [vmem:[#allocation2 + $0x40] sm:$0xff] }
  0xab   : > { %493 = vmatpush1.bf16.msra.mxu0 %v429_v18  ;;  %v608_v18 = vunpack.c.l.bf16 %v607_v10 }
  0xac   : > { %494 = vmatprep.subr.bf16.mxu0 %v1270_v1 }
  0xaf   : > { %495 = vmatpush1.bf16.msra.mxu0 %v430_v19  ;;  %v906_v19 = vld [vmem:[%s1756_s5 + $0x18] sm:$0xff] }
  0xb0   : > { %496 = vmatprep.subr.bf16.mxu0 %v1270_v1  ;;  %v439_v25 = vpop.permute.xlu0 %438  ;;  %v444_v28 = vpop.permute.xlu1 %443 }
  0xb3   : > { %497 = vmatpush1.bf16.msra.mxu0 %v431_v20 }
  0xb4   : > { %v449_v35 = vpop.permute.xlu1 %448  ;;  %v454_v40 = vpop.permute.xlu0 %453 }
  0xb6   : > { %513 = vmatmul.mubr.bf16.vlgmr.msra.gmra.mrb[0].mxu0 %v1246_v21 }
  0xb7   : > { %1157 = vmatprep.mubr.msk.bf16.mxu0 %vm278_vm0, %v1249_v23 }
  0xbe   : > { %521 = vmatmul.mubr.bf16.gmra.mrb[4].mxu0 %v1251_v24  ;;  %v1632_v24 = vrot.slane %v608_v18, %v1390_v22 }
 0x189   : > { %v514_v1 = vpop.f32.mrb[0].mxu0 }
 0x18a   : > { %v515_v26 = vadd.f32 %v514_v1, %v439_v25  ;;  %v516_v27 = vpop.f32.mrb[1].mxu0 }
 0x18b   : > { %v517_v29 = vpop.f32.mrb[2].mxu0  ;;  %v779_v27 = vld [vmem:[%s1751_s0] sm:$0x8] }
 0x18c   : > { %v1449_v30 = vmax.f32 %v515_v26, 0.0  ;;  %v518_v31 = vadd.f32 %v517_v29, %v444_v28  ;;  %v519_v32 = vpop.f32.mrb[3].mxu0  ;;  %v780_v22 = vunpack.c.l.bf16 %v779_v27 }
 0x18e   : > { %v1451_v33 = vmax.f32 %v518_v31, 0.0  ;;  %537 = vrot.lane.b32.xlu1 %v1449_v30, %s1269_s28 }
 0x190   : > { %539 = vrot.lane.b32.xlu0 %v1451_v33, %s1269_s28  ;;  %v705_v34 = vpack.c.bf16 %v1451_v33, %v1449_v30 }
 0x191   : > { %v522_v36 = vpop.f32.mrb[4].mxu0 }
 0x192   : > { %v523_v37 = vadd.f32 %v522_v36, %v449_v35  ;;  %v524_v39 = vpop.f32.mrb[5].mxu0  ;;  %549 = vrot.lane.b32.xlu1 %v1449_v30, %s1272_s30  ;;  %707 = vst.msk [vmem:[#allocation3 + $0x40] sm:$0xff] %vm278_vm0, %v705_v34 }
 0x193   : > { %v525_v41 = vpop.f32.mrb[6].mxu0  ;;  %v649_v39 = vld [vmem:[%s1751_s0] sm:$0x2] }
 0x194   : > { %v526_v42 = vadd.f32 %v525_v41, %v454_v40  ;;  %551 = vrot.lane.b32.xlu0 %v1451_v33, %s1272_s30  ;;  %v527_v43 = vpop.f32.mrb[7].mxu0  ;;  %v1464_v44 = vmax.f32 %v523_v37, 0.0 }
 0x195   : > { %v650_v43 = vunpack.c.l.bf16 %v649_v39 }
 0x196   : > { %v1466_v45 = vmax.f32 %v526_v42, 0.0  ;;  %709 = vrot.lane.b32.xlu1 %v1449_v30, %s1278_s12 }
 0x197   : > { %v1654_v50 = vrot.slane %v650_v43, %v357_v38  ;;  %v825_v38 = vsub.s32 7, %v1373_v9 }
 0x198   : > { %711 = vrot.lane.b32.xlu0 %v1451_v33, %s1278_s12  ;;  %v706_v46 = vpack.c.bf16 %v1466_v45, %v1464_v44 }
 0x199   : > { %v893_v47 = vld [vmem:[#allocation3 + $0x40] sm:$0xff] }
 0x19a   : > { %721 = vrot.lane.b32.xlu1 %v1449_v30, %s1277_s11  ;;  %1178 = vmatprep.subr.bf16.mxu1 %v893_v47  ;;  %708 = vst.msk [vmem:[#allocation3 + $0x48] sm:$0xff] %vm278_vm0, %v706_v46 }
 0x19c   : > { %723 = vrot.lane.b32.xlu0 %v1451_v33, %s1277_s11 }
 0x19e   : > { %579 = vrot.lane.b32.xlu1 %v1449_v30, %s1268_s27 }
 0x1a0   : > { %581 = vrot.lane.b32.xlu0 %v1451_v33, %s1268_s27 }
 0x1a1   : > { %v894_v1 = vld [vmem:[#allocation3 + $0x48] sm:$0xff] }
 0x1a2   : > { %591 = vrot.lane.b32.xlu1 %v1449_v30, %s1271_s29 }
 0x1a4   : > { %593 = vrot.lane.b32.xlu0 %v1451_v33, %s1271_s29 }
 0x1a6   : > { %751 = vrot.lane.b32.xlu1 %v1449_v30, %s1280_s14 }
 0x1a8   : > { %753 = vrot.lane.b32.xlu0 %v1451_v33, %s1280_s14 }
 0x1aa   : > { %763 = vrot.lane.b32.xlu1 %v1449_v30, %s1279_s13 }
 0x1ac   : > { %765 = vrot.lane.b32.xlu0 %v1451_v33, %s1279_s13 }
 0x1ae   : > { %621 = vrot.lane.b32.xlu1 %v1449_v30, %s1274_s8 }
 0x1b0   : > { %623 = vrot.lane.b32.xlu0 %v1451_v33, %s1274_s8 }
 0x1b2   : > { %633 = vrot.lane.b32.xlu1 %v1449_v30, %s1273_s7 }
 0x1b4   : > { %635 = vrot.lane.b32.xlu0 %v1451_v33, %s1273_s7 }
 0x1b6   : > { %793 = vrot.lane.b32.xlu1 %v1449_v30, %s1282_s16 }
 0x1b8   : > { %795 = vrot.lane.b32.xlu0 %v1451_v33, %s1282_s16 }
 0x1ba   : > { %805 = vrot.lane.b32.xlu1 %v1449_v30, %s1281_s15 }
 0x1bc   : > { %807 = vrot.lane.b32.xlu0 %v1451_v33, %s1281_s15 }
 0x1be   : > { %663 = vrot.lane.b32.xlu1 %v1449_v30, %s1766_s23 }
 0x1c0   : > { %665 = vrot.lane.b32.xlu0 %v1451_v33, %s1766_s23 }
 0x1c2   : > { %675 = vrot.lane.b32.xlu1 %v1449_v30, %s1767_s24 }
 0x1c4   : > { %677 = vrot.lane.b32.xlu0 %v1451_v33, %s1767_s24 }
 0x1c6   : > { %541 = vrot.lane.b32.xlu1 %v1464_v44, %s1269_s28 }
 0x1c8   : > { %543 = vrot.lane.b32.xlu0 %v1466_v45, %s1269_s28 }
 0x1ca   : > { %553 = vrot.lane.b32.xlu1 %v1464_v44, %s1272_s30 }
 0x1cc   : > { %555 = vrot.lane.b32.xlu0 %v1466_v45, %s1272_s30 }
 0x1ce   : > { %713 = vrot.lane.b32.xlu1 %v1464_v44, %s1278_s12 }
 0x1d0   : > { %715 = vrot.lane.b32.xlu0 %v1466_v45, %s1278_s12 }
 0x1d2   : > { %725 = vrot.lane.b32.xlu1 %v1464_v44, %s1277_s11 }
 0x1d4   : > { %727 = vrot.lane.b32.xlu0 %v1466_v45, %s1277_s11 }
 0x1d6   : > { %583 = vrot.lane.b32.xlu1 %v1464_v44, %s1268_s27 }
 0x1d8   : > { %585 = vrot.lane.b32.xlu0 %v1466_v45, %s1268_s27 }
 0x1da   : > { %595 = vrot.lane.b32.xlu1 %v1464_v44, %s1271_s29 }
 0x1dc   : > { %597 = vrot.lane.b32.xlu0 %v1466_v45, %s1271_s29 }
 0x1de   : > { %755 = vrot.lane.b32.xlu1 %v1464_v44, %s1280_s14 }
 0x1e0   : > { %757 = vrot.lane.b32.xlu0 %v1466_v45, %s1280_s14 }
 0x1e2   : > { %767 = vrot.lane.b32.xlu1 %v1464_v44, %s1279_s13 }
 0x1e4   : > { %769 = vrot.lane.b32.xlu0 %v1466_v45, %s1279_s13 }
 0x1e6   : > { %625 = vrot.lane.b32.xlu1 %v1464_v44, %s1274_s8 }
 0x1e8   : > { %627 = vrot.lane.b32.xlu0 %v1466_v45, %s1274_s8  ;;  %s1769_s8 = smov 11  }
 0x1ea   : > { %637 = vrot.lane.b32.xlu1 %v1464_v44, %s1273_s7 }
 0x1ec   : > { %639 = vrot.lane.b32.xlu0 %v1466_v45, %s1273_s7  ;;  %s1768_s7 = smov 123  }
 0x1ee   : > { %797 = vrot.lane.b32.xlu1 %v1464_v44, %s1282_s16 }
 0x1f0   : > { %799 = vrot.lane.b32.xlu0 %v1466_v45, %s1282_s16 }
 0x1f2   : > { %809 = vrot.lane.b32.xlu1 %v1464_v44, %s1281_s15 }
 0x1f4   : > { %811 = vrot.lane.b32.xlu0 %v1466_v45, %s1281_s15 }
 0x1f6   : > { %667 = vrot.lane.b32.xlu1 %v1464_v44, %s1766_s23 }
 0x1f8   : > { %669 = vrot.lane.b32.xlu0 %v1466_v45, %s1766_s23 }
 0x1fa   : > { %679 = vrot.lane.b32.xlu1 %v1464_v44, %s1767_s24 }
 0x1fc   : > { %681 = vrot.lane.b32.xlu0 %v1466_v45, %s1767_s24 }
 0x1fe   : > { %835 = vrot.lane.b32.xlu1 %v1449_v30, %s1768_s7 }
 0x200   : > { %837 = vrot.lane.b32.xlu0 %v1451_v33, %s1768_s7  ;;  %v538_v51 = vpop.permute.xlu1 %537 }
 0x202   : > { %v540_v53 = vpop.permute.xlu0 %539  ;;  %847 = vrot.lane.b32.xlu1 %v1449_v30, %s1769_s8 }
 0x204   : > { %849 = vrot.lane.b32.xlu0 %v1451_v33, %s1769_s8  ;;  %v550_v55 = vpop.permute.xlu1 %549  ;;  %v783_v33 = vsub.s32 6, %v1373_v9 }
 0x205   : > { %v561_v56 = vsel %vm264_vm2, %v538_v51, %v550_v55 }
 0x206   : > { %v552_v58 = vpop.permute.xlu0 %551  ;;  %839 = vrot.lane.b32.xlu1 %v1464_v44, %s1768_s7  ;;  %v571_v60 = vmul.f32 %v1590_v54, %v561_v56  ;;  %v1643_v36 = vrot.slane %v780_v22, %v783_v33 }
 0x207   : > { %v562_v59 = vsel %vm264_vm2, %v540_v53, %v552_v58  ;;  %v821_v53 = vld [vmem:[%s1751_s0] sm:$0x8] }
 0x208   : > { %v572_v61 = vmul.f32 %v1590_v54, %v562_v59  ;;  %841 = vrot.lane.b32.xlu0 %v1466_v45, %s1768_s7  ;;  %v710_v62 = vpop.permute.xlu1 %709 }
 0x20a   : > { %v575_v2 = vpack.c.bf16 %v572_v61, %v571_v60  ;;  %v712_v3 = vpop.permute.xlu0 %711  ;;  %851 = vrot.lane.b32.xlu1 %v1464_v44, %s1769_s8  ;;  %v822_v60 = vunpack.c.l.bf16 %v821_v53 }
 0x20c   : > { %577 = vst.msk [vmem:[#allocation3] sm:$0xff] %vm278_vm0, %v575_v2  ;;  %853 = vrot.lane.b32.xlu0 %v1466_v45, %s1769_s8  ;;  %v722_v6 = vpop.permute.xlu1 %721  ;;  %v1666_v63 = vrot.slane %v822_v60, %v825_v38 }
 0x20d   : > { %v733_v7 = vsel %vm345_vm5, %v710_v62, %v722_v6 }
 0x20e   : > { %v724_v11 = vpop.permute.xlu0 %723  ;;  %909 = vperm.xlu1 %1244, %v903_v4   ;;  %v743_v15 = vmul.f32 %v1612_v5, %v733_v7 }
 0x20f   : > { %v734_v13 = vsel %vm345_vm5, %v712_v3, %v724_v11  ;;  %v691_v3 = vld [vmem:[%s1751_s0] sm:$0x2] }
 0x210   : > { %v744_v16 = vmul.f32 %v1612_v5, %v734_v13  ;;  %914 = vperm.xlu0 %1243, %v904_v8   ;;  %v580_v17 = vpop.permute.xlu1 %579  ;;  %v692_v10 = vunpack.c.l.bf16 %v691_v3 }
 0x212   : > { %v747_v20 = vpack.c.bf16 %v744_v16, %v743_v15  ;;  %v582_v21 = vpop.permute.xlu0 %581  ;;  %919 = vperm.xlu1 %1244, %v905_v14   ;;  %v1677_v14 = vrot.slane %v692_v10, %v1414_v49 }
 0x213   : > { %v885_v23 = vld [vmem:[#allocation3] sm:$0xff] }
 0x214   : > { %749 = vst.msk [vmem:[#allocation3 + $0x50] sm:$0xff] %vm278_vm0, %v747_v20  ;;  %924 = vperm.xlu0 %1243, %v906_v19   ;;  %v592_v25 = vpop.permute.xlu1 %591  ;;  %1179 = vmatpush3.bf16.msra.mxu1 %v885_v23 }
 0x215   : > { %v603_v26 = vsel %vm284_vm1, %v580_v17, %v592_v25  ;;  %1180 = vmatprep.subr.bf16.mxu1 %v894_v1 }
 0x216   : > { %v594_v28 = vpop.permute.xlu0 %593  ;;  %v613_v30 = vmul.f32 %v1632_v24, %v603_v26 }
 0x217   : > { %v604_v29 = vsel %vm284_vm1, %v582_v21, %v594_v28 }
 0x218   : > { %v614_v31 = vmul.f32 %v1632_v24, %v604_v29  ;;  %v752_v32 = vpop.permute.xlu1 %751 }
 0x21a   : > { %v617_v34 = vpack.c.bf16 %v614_v31, %v613_v30  ;;  %v754_v35 = vpop.permute.xlu0 %753 }
 0x21c   : > { %619 = vst.msk [vmem:[#allocation3 + $0x10] sm:$0xff] %vm278_vm0, %v617_v34  ;;  %v764_v37 = vpop.permute.xlu1 %763 }
 0x21d   : > { %v775_v40 = vsel %vm365_vm6, %v752_v32, %v764_v37 }
 0x21e   : > { %v766_v41 = vpop.permute.xlu0 %765  ;;  %v785_v44 = vmul.f32 %v1643_v36, %v775_v40 }
 0x21f   : > { %v776_v42 = vsel %vm365_vm6, %v754_v35, %v766_v41 }
 0x220   : > { %v786_v45 = vmul.f32 %v1643_v36, %v776_v42  ;;  %v622_v46 = vpop.permute.xlu1 %621 }
 0x222   : > { %v789_v47 = vpack.c.bf16 %v786_v45, %v785_v44  ;;  %v624_v48 = vpop.permute.xlu0 %623  ;;  %v895_v44 = vld [vmem:[#allocation3 + $0x50] sm:$0xff] }
 0x224   : > { %791 = vst.msk [vmem:[#allocation3 + $0x60] sm:$0xff] %vm278_vm0, %v789_v47  ;;  %v634_v51 = vpop.permute.xlu1 %633 }
 0x225   : > { %v645_v52 = vsel %vm304_vm3, %v622_v46, %v634_v51 }
 0x226   : > { %v636_v55 = vpop.permute.xlu0 %635  ;;  %v655_v57 = vmul.f32 %v1654_v50, %v645_v52 }
 0x227   : > { %v646_v56 = vsel %vm304_vm3, %v624_v48, %v636_v55  ;;  %v887_v48 = vld [vmem:[#allocation3 + $0x10] sm:$0xff] }
 0x228   : > { %v656_v58 = vmul.f32 %v1654_v50, %v646_v56  ;;  %v794_v59 = vpop.permute.xlu1 %793 }
 0x22a   : > { %v659_v61 = vpack.c.bf16 %v656_v58, %v655_v57  ;;  %v796_v62 = vpop.permute.xlu0 %795 }
 0x22c   : > { %661 = vst.msk [vmem:[#allocation3 + $0x20] sm:$0xff] %vm278_vm0, %v659_v61  ;;  %v806_v0 = vpop.permute.xlu1 %805 }
 0x22d   : > { %v817_v2 = vsel %vm384_vm7, %v794_v59, %v806_v0 }
 0x22e   : > { %v808_v4 = vpop.permute.xlu0 %807  ;;  %v827_v7 = vmul.f32 %v1666_v63, %v817_v2 }
 0x22f   : > { %v818_v6 = vsel %vm384_vm7, %v796_v62, %v808_v4  ;;  %v897_v4 = vld [vmem:[#allocation3 + $0x60] sm:$0xff] }
 0x230   : > { %v828_v9 = vmul.f32 %v1666_v63, %v818_v6  ;;  %v664_v8 = vpop.permute.xlu1 %663 }
 0x232   : > { %v831_v11 = vpack.c.bf16 %v828_v9, %v827_v7  ;;  %v666_v13 = vpop.permute.xlu0 %665 }
 0x234   : > { %833 = vst.msk [vmem:[#allocation3 + $0x70] sm:$0xff] %vm278_vm0, %v831_v11  ;;  %v676_v15 = vpop.permute.xlu1 %675 }
 0x235   : > { %v687_v16 = vsel %vm323_vm4, %v664_v8, %v676_v15  ;;  %v889_v8 = vld [vmem:[#allocation3 + $0x20] sm:$0xff] }
 0x236   : > { %v678_v17 = vpop.permute.xlu0 %677  ;;  %v697_v19 = vmul.f32 %v1677_v14, %v687_v16 }
 0x237   : > { %v688_v18 = vsel %vm323_vm4, %v666_v13, %v678_v17 }
 0x238   : > { %v698_v20 = vmul.f32 %v1677_v14, %v688_v18  ;;  %v542_v21 = vpop.permute.xlu1 %541 }
 0x23a   : > { %v701_v23 = vpack.c.bf16 %v698_v20, %v697_v19  ;;  %v544_v25 = vpop.permute.xlu0 %543 }
 0x23c   : > { %703 = vst.msk [vmem:[#allocation3 + $0x30] sm:$0xff] %vm278_vm0, %v701_v23  ;;  %v554_v1 = vpop.permute.xlu1 %553 }
 0x23d   : > { %v563_v26 = vsel %vm264_vm2, %v542_v21, %v554_v1 }
 0x23e   : > { %v556_v49 = vpop.permute.xlu0 %555  ;;  %v573_v28 = vmul.f32 %v1590_v54, %v563_v26 }
 0x23f   : > { %v564_v27 = vsel %vm264_vm2, %v544_v25, %v556_v49 }
 0x240   : > { %v574_v29 = vmul.f32 %v1590_v54, %v564_v27  ;;  %v714_v30 = vpop.permute.xlu1 %713  ;;  %v899_v27 = vld [vmem:[#allocation3 + $0x70] sm:$0xff] }
 0x242   : > { %v576_v31 = vpack.c.bf16 %v574_v29, %v573_v28  ;;  %v716_v32 = vpop.permute.xlu0 %715  ;;  %v863_v29 = vld [vmem:[%s1751_s0 + $0x4] sm:$0x1] }
 0x244   : > { %578 = vst.msk [vmem:[#allocation3 + $0x8] sm:$0xff] %vm278_vm0, %v576_v31  ;;  %v726_v22 = vpop.permute.xlu1 %725 }
 0x245   : > { %v735_v33 = vsel %vm345_vm5, %v714_v30, %v726_v22 }
 0x246   : > { %v728_v34 = vpop.permute.xlu0 %727  ;;  %v745_v37 = vmul.f32 %v1612_v5, %v735_v33 }
 0x247   : > { %v736_v35 = vsel %vm345_vm5, %v716_v32, %v728_v34  ;;  %v864_v34 = vunpack.c.l.bf16 %v863_v29 }
 0x248   : > { %v746_v39 = vmul.f32 %v1612_v5, %v736_v35  ;;  %v584_v40 = vpop.permute.xlu1 %583 }
 0x24a   : > { %v748_v41 = vpack.c.bf16 %v746_v39, %v745_v37  ;;  %v586_v42 = vpop.permute.xlu0 %585 }
 0x24b   : > { %v886_v43 = vld [vmem:[#allocation3 + $0x8] sm:$0xff] }
 0x24c   : > { %750 = vst.msk [vmem:[#allocation3 + $0x58] sm:$0xff] %vm278_vm0, %v748_v41  ;;  %v596_v54 = vpop.permute.xlu1 %595  ;;  %1181 = vmatpush3.bf16.msra.mxu1 %v886_v43 }
 0x24d   : > { %v605_v45 = vsel %vm284_vm1, %v584_v40, %v596_v54  ;;  %1182 = vmatprep.subr.bf16.mxu1 %v895_v44  ;;  %v868_v40 = vrot.slane %v864_v34, %v1379_v12 }
 0x24e   : > { %v598_v46 = vpop.permute.xlu0 %597  ;;  %v615_v51 = vmul.f32 %v1632_v24, %v605_v45 }
 0x24f   : > { %v606_v47 = vsel %vm284_vm1, %v586_v42, %v598_v46 }
 0x250   : > { %v616_v5 = vmul.f32 %v1632_v24, %v606_v47  ;;  %v756_v52 = vpop.permute.xlu1 %755  ;;  %1183 = vmatpush3.bf16.msra.mxu1 %v887_v48 }
 0x252   : > { %v618_v53 = vpack.c.bf16 %v616_v5, %v615_v51  ;;  %v758_v55 = vpop.permute.xlu0 %757  ;;  %v1252_v51 = vld [vmem:[%s1755_s4] ss:$12 sps:$4 sm:$0xff]   ;;  %v1255_v5 = vld [vmem:[%s1755_s4 + $0x1c] ss:$12 sps:$4 sm:$0xff]  }
 0x253   : > { %v896_v56 = vld [vmem:[#allocation3 + $0x58] sm:$0xff] }
 0x254   : > { %620 = vst.msk [vmem:[#allocation3 + $0x18] sm:$0xff] %vm278_vm0, %v618_v53  ;;  %v768_v57 = vpop.permute.xlu1 %767  ;;  %1184 = vmatprep.subr.bf16.mxu1 %v896_v56 }
 0x255   : > { %v777_v58 = vsel %vm365_vm6, %v756_v52, %v768_v57 }
 0x256   : > { %v770_v59 = vpop.permute.xlu0 %769  ;;  %v787_v38 = vmul.f32 %v1643_v36, %v777_v58 }
 0x257   : > { %v778_v60 = vsel %vm365_vm6, %v758_v55, %v770_v59 }
 0x258   : > { %v788_v61 = vmul.f32 %v1643_v36, %v778_v60  ;;  %v626_v62 = vpop.permute.xlu1 %625  ;;  %v1257_v60 = vld [vmem:[%s1755_s4 + $0x18] ss:$12 sps:$4 sm:$0xff]  }
 0x25a   : > { %v790_v24 = vpack.c.bf16 %v788_v61, %v787_v38  ;;  %v628_v0 = vpop.permute.xlu0 %627  ;;  %v1258_v38 = vld [vmem:[%s1755_s4 + $0x8] ss:$12 sps:$4 sm:$0xff]  }
 0x25b   : > { %v888_v2 = vld [vmem:[#allocation3 + $0x18] sm:$0xff] }
 0x25c   : > { %792 = vst.msk [vmem:[#allocation3 + $0x68] sm:$0xff] %vm278_vm0, %v790_v24  ;;  %v638_v3 = vpop.permute.xlu1 %637  ;;  %1185 = vmatpush3.bf16.msra.mxu1 %v888_v2 }
 0x25d   : > { %v647_v6 = vsel %vm304_vm3, %v626_v62, %v638_v3  ;;  %1186 = vmatprep.subr.bf16.mxu1 %v897_v4  ;;  %v1259_v62 = vld [vmem:[%s1755_s4 + $0x20] ss:$12 sps:$4 sm:$0xff]  }
 0x25e   : > { %v640_v7 = vpop.permute.xlu0 %639  ;;  %v657_v10 = vmul.f32 %v1654_v50, %v647_v6 }
 0x25f   : > { %v648_v9 = vsel %vm304_vm3, %v628_v0, %v640_v7 }
 0x260   : > { %v658_v36 = vmul.f32 %v1654_v50, %v648_v9  ;;  %v798_v11 = vpop.permute.xlu1 %797  ;;  %1187 = vmatpush3.bf16.msra.mxu1 %v889_v8 }
 0x262   : > { %v660_v13 = vpack.c.bf16 %v658_v36, %v657_v10  ;;  %v800_v15 = vpop.permute.xlu0 %799 }
 0x263   : > { %v898_v16 = vld [vmem:[#allocation3 + $0x68] sm:$0xff] }
 0x264   : > { %662 = vst.msk [vmem:[#allocation3 + $0x28] sm:$0xff] %vm278_vm0, %v660_v13  ;;  %v810_v17 = vpop.permute.xlu1 %809  ;;  %1188 = vmatprep.subr.bf16.mxu1 %v898_v16 }
 0x265   : > { %v819_v18 = vsel %vm384_vm7, %v798_v11, %v810_v17 }
 0x266   : > { %v812_v19 = vpop.permute.xlu0 %811  ;;  %v829_v21 = vmul.f32 %v1666_v63, %v819_v18 }
 0x267   : > { %v820_v20 = vsel %vm384_vm7, %v800_v15, %v812_v19 }
 0x268   : > { %v830_v23 = vmul.f32 %v1666_v63, %v820_v20  ;;  %v668_v25 = vpop.permute.xlu1 %667  ;;  %v891_v63 = vld [vmem:[#allocation3 + $0x30] sm:$0xff] }
 0x26a   : > { %v832_v50 = vpack.c.bf16 %v830_v23, %v829_v21  ;;  %v670_v1 = vpop.permute.xlu0 %669 }
 0x26b   : > { %v890_v26 = vld [vmem:[#allocation3 + $0x28] sm:$0xff] }
 0x26c   : > { %834 = vst.msk [vmem:[#allocation3 + $0x78] sm:$0xff] %vm278_vm0, %v832_v50  ;;  %v680_v49 = vpop.permute.xlu1 %679  ;;  %1189 = vmatpush3.bf16.msra.mxu1 %v890_v26 }
 0x26d   : > { %v689_v28 = vsel %vm323_vm4, %v668_v25, %v680_v49  ;;  %1190 = vmatprep.subr.bf16.mxu1 %v899_v27 }
 0x26e   : > { %v682_v30 = vpop.permute.xlu0 %681  ;;  %v699_v32 = vmul.f32 %v1677_v14, %v689_v28 }
 0x26f   : > { %v690_v31 = vsel %vm323_vm4, %v670_v1, %v682_v30 }
 0x270   : > { %v700_v22 = vmul.f32 %v1677_v14, %v690_v31  ;;  %v836_v33 = vpop.permute.xlu1 %835  ;;  %1191 = vmatpush3.bf16.msra.mxu1 %v891_v63 }
 0x272   : > { %v702_v35 = vpack.c.bf16 %v700_v22, %v699_v32  ;;  %v838_v37 = vpop.permute.xlu0 %837 }
 0x273   : > { %v900_v39 = vld [vmem:[#allocation3 + $0x78] sm:$0xff] }
 0x274   : > { %704 = vst.msk [vmem:[#allocation3 + $0x38] sm:$0xff] %vm278_vm0, %v702_v35  ;;  %v848_v41 = vpop.permute.xlu1 %847  ;;  %1192 = vmatprep.subr.bf16.mxu1 %v900_v39 }
 0x275   : > { %v859_v42 = vsel %vm404_vm8, %v836_v33, %v848_v41 }
 0x276   : > { %v850_v43 = vpop.permute.xlu0 %849  ;;  %v869_v44 = vmul.f32 %v868_v40, %v859_v42 }
 0x277   : > { %v860_v54 = vsel %vm404_vm8, %v838_v37, %v850_v43 }
 0x278   : > { %v870_v45 = vmul.f32 %v868_v40, %v860_v54  ;;  %v840_v14 = vpop.permute.xlu1 %839 }
 0x27a   : > { %v873_v46 = vpack.c.bf16 %v870_v45, %v869_v44  ;;  %v842_v47 = vpop.permute.xlu0 %841 }
 0x27b   : > { %v892_v48 = vld [vmem:[#allocation3 + $0x38] sm:$0xff] }
 0x27c   : > { %875 = vst.msk [vmem:[#allocation3 + $0x80] sm:$0xff] %vm278_vm0, %v873_v46  ;;  %v852_v12 = vpop.permute.xlu1 %851  ;;  %1193 = vmatpush3.bf16.msra.mxu1 %v892_v48 }
 0x27d   : > { %v861_v52 = vsel %vm404_vm8, %v840_v14, %v852_v12 }
 0x27e   : > { %v854_v53 = vpop.permute.xlu0 %853  ;;  %v871_v56 = vmul.f32 %v868_v40, %v861_v52 }
 0x27f   : > { %v862_v55 = vsel %vm404_vm8, %v842_v47, %v854_v53  ;;  %997 = vmatmul.mubr.bf16.vlgmr.msra.gmra.mrb[0].mxu1 %v1252_v51 }
 0x280   : > { %v872_v57 = vmul.f32 %v868_v40, %v862_v55  ;;  %1004 = vmatprep.mubr.bf16.mxu1 %v1255_v5 }
 0x282   : > { %v874_v58 = vpack.c.bf16 %v872_v57, %v871_v56 }
 0x283   : > { %v901_v59 = vld [vmem:[#allocation3 + $0x80] sm:$0xff] }
 0x284   : > { %876 = vst.msk [vmem:[#allocation3 + $0x88] sm:$0xff] %vm278_vm0, %v874_v58  ;;  %1210 = vmatprep.subr.bf16.mxu1 %v901_v59 }
 0x285   : > { %1211 = vmatpush3.bf16.msra.mxu1 %v901_v59 }
 0x287   : > { %1005 = vmatmul.mubr.bf16.gmra.mrb[4].mxu1 %v1257_v60 }
 0x288   : > { %1214 = vmatprep.mubr.msk.bf16.mxu1 %vm957_vm9, %v1258_v38 }
 0x28b   : > { %v902_v61 = vld [vmem:[#allocation3 + $0x88] sm:$0xff] }
 0x28c   : > { %1212 = vmatprep.subr.bf16.mxu1 %v902_v61 }
 0x28d   : > { %1213 = vmatpush3.bf16.msra.mxu1 %v902_v61  ;;  %v910_v9 = vpop.permute.xlu1 %909 }
 0x28f   : > { %v915_v11 = vpop.permute.xlu0 %914 }
 0x290   : > { %1215 = vmatmul.mubr.msk.bf16.vlgmr.msra.gmra.mrb[8].mxu1 %vm957_vm9, %v1259_v62 }
 0x291   : > { %v920_v16 = vpop.permute.xlu1 %919 }
 0x293   : > { %v925_v18 = vpop.permute.xlu0 %924 }
 0x352   : > { %v1194_v24 = vpop.f32.mrb[0].mxu1 }
 0x353   : > { %v1195_v0 = vpop.f32.mrb[1].mxu1 }
 0x354   : > { %v1196_v2 = vadd.f32 %v1195_v0, %v1194_v24  ;;  %v1197_v3 = vpop.f32.mrb[2].mxu1 }
 0x355   : > { %v1198_v4 = vpop.f32.mrb[3].mxu1 }
 0x356   : > { %v1199_v6 = vadd.f32 %v1198_v4, %v1197_v3  ;;  %v999_v20 = vadd.f32 %v1196_v2, %v910_v9 }
 0x358   : > { %v1002_v26 = vadd.f32 %v1199_v6, %v915_v11 }
 0x35a   : > { %v1200_v7 = vpop.f32.mrb[4].mxu1 }
 0x35b   : > { %v1201_v8 = vpop.f32.mrb[5].mxu1 }
 0x35c   : > { %v1202_v10 = vadd.f32 %v1201_v8, %v1200_v7  ;;  %v1203_v36 = vpop.f32.mrb[6].mxu1 }
 0x35d   : > { %v1204_v13 = vpop.f32.mrb[7].mxu1 }
 0x35e   : > { %v1205_v15 = vadd.f32 %v1204_v13, %v1203_v36  ;;  %v1007_v17 = vadd.f32 %v1202_v10, %v920_v16 }
 0x360   : > { %v1010_v25 = vadd.f32 %v1205_v15, %v925_v18 }
 0x363   : > { %v1216_v19 = vpop.f32.mrb[8].mxu1 }
 0x364   : > { %v1056_v21 = vadd.f32 %v1216_v19, %v1007_v17  ;;  %v1047_v23 = vpop.f32.mrb[9].mxu1 }
 0x365   : > { %v1048_v50 = vadd.f32 %v1047_v23, %v999_v20  ;;  %v1217_v1 = vpop.f32.mrb[10].mxu1 }
 0x366   : > { %v1064_v49 = vmax.f32 %v1056_v21, 0.0  ;;  %v1059_v27 = vadd.f32 %v1217_v1, %v1010_v25  ;;  %v1050_v28 = vpop.f32.mrb[11].mxu1 }
 0x367   : > { %v1062_v29 = vmax.f32 %v1048_v50, 0.0  ;;  %v1051_v30 = vadd.f32 %v1050_v28, %v1002_v26 }
 0x368   : > { %v1176_v31 = vpack.c.bf16 %v1064_v49, %v1064_v49  ;;  %v1065_v63 = vmax.f32 %v1059_v27, 0.0 }
 0x369   : > { %v1174_v32 = vpack.c.bf16 %v1062_v29, %v1062_v29  ;;  %v1063_v22 = vmax.f32 %v1051_v30, 0.0 }
 0x36a   : > { %1085 = vst.msk [vmem:[%s251_s20 + $0x8] sm:$0xf] %vm1082_vm10, %v1176_v31  ;;  %v1177_v33 = vpack.c.bf16 %v1065_v63, %v1065_v63 }
 0x36b   : > { %1083 = vst.msk [vmem:[%s251_s20] sm:$0xf] %vm1082_vm10, %v1174_v32  ;;  %v1175_v34 = vpack.c.bf16 %v1063_v22, %v1063_v22 }
 0x36c   : > { %1086 = vst.msk [vmem:[%s251_s20 + $0xc] sm:$0xf] %vm1082_vm10, %v1177_v33 }
 0x36d   : > { %1084 = vst.msk [vmem:[%s251_s20 + $0x4] sm:$0xf] %vm1082_vm10, %v1175_v34 }
 0x36e PF: > { %s16_s21 = sadd.s32 1, %s1266_s21  }
 0x36f   : > { %p13_p4 = scmp.ge.s32.totalorder %s16_s21, 4  }
 0x371   :  { %15 = sbr.rel (!%p13_p4) target bundleno = 1 (0x1), region = 74 }

// kernel: seg_qyl_forward.11
= control target key start
LH: loop header
LB: loop body
LE: loop exit
PB: predicated region body
PF: predicated region fallthrough
CT: control target
= control target key end

     0   :  { %s1372_s24 = smov 0   ;;  %s1760_s0 = inlined_call_operand.vmem [shape: bf16[9,64], index: 0, kind: input, shape index: {}]   ;;  %s1761_s1 = inlined_call_operand.vmem [shape: bf16[2,16,64], index: 1, kind: input, shape index: {}]   ;;  %s1762_s2 = inlined_call_operand.vmem [shape: bf16[2,32,64], index: 2, kind: input, shape index: {}]   ;;  %s1763_s3 = inlined_call_operand.vmem [shape: bf16[16,432], index: 3, kind: input, shape index: {}]   ;;  %s1764_s4 = inlined_call_operand.vmem [shape: f32[16,1], index: 4, kind: input, shape index: {}]   ;;  %s1765_s5 = inlined_call_operand.vmem [shape: bf16[16,144], index: 5, kind: input, shape index: {}]   ;;  %s1766_s6 = inlined_call_operand.vmem [shape: f32[16,1], index: 6, kind: input, shape index: {}]   ;;  %s1767_s7 = inlined_call_operand.vmem [shape: bf16[2,16,64], index: 7, kind: output, shape index: {}]  }
   0x1 LB: > { %s1215_s25 = sadd.s32 4294967295, %s1313_s24   ;;  %p1219_p0 = scmp.ge.s32.totalorder %s1313_s24, 1  ;;  %s1313_s24 = sphi %s1372_s24, %s17_s24  }
   0x2   : > { %p247_p1 = scmp.lt.s32.totalorder %s1313_s24, 3 }
   0x4   : > { %p248_p2 = pnand %p1219_p0, %p247_p1 }
   0x5   : > { %p284_p3 = scmp.lt.s32.totalorder (!%p248_p2), %s1215_s25, 1  ;;  %vm325_vm0 = vcmask (!%p248_p2), 523264   ;;  %s1315_s11 = smov (!%p248_p2), 127   ;;  %v1316_v3 = vmov (!%p248_p2), 0   ;;  %v1300_v4 = vld [vmem:[%s1763_s3 + $0x4] ss:$16 sps:$4 sm:$0xff] (!%p248_p2)   ;;  %v320_v8 = vlaneseq (!%p248_p2) }
   0x6   : > { %251 = sbr.rel (%p248_p2) target bundleno = 868 (0x364), region = 48  ;;  %819 = vmatprep.subr.bf16.mxu1 (!%p248_p2), %v1316_v3  ;;  %1294 = vset.pattern.permute.xlu1 (!%p248_p2), %v1316_v3  ;;  %s1317_s12 = smov (!%p248_p2), 63   ;;  %v1303_v5 = vld [vmem:[%s1763_s3 + $0xc] ss:$16 sps:$4 sm:$0xff] (!%p248_p2)   ;;  %vm774_vm1 = vcmask (!%p248_p2), 392192   ;;  %v743_v7 = vld [vmem:[%s1764_s4] sm:$0xff] (!%p248_p2) }
   0x7   : > { %1293 = vset.pattern.permute.xlu0 (!%p248_p2), %v1316_v3  ;;  %s1318_s13 = smov (!%p248_p2), 7   ;;  %s1319_s14 = smov (!%p248_p2), 71   ;;  %810 = vmatprep.mubr.bf16.mxu0 (!%p248_p2), %v1300_v4  ;;  %v744_v6 = vld [vmem:[%s1764_s4 + $0x8] sm:$0xff] (!%p248_p2)  ;;  %v614_v9 = vld [vmem:[%s1760_s0] sm:$0x4] (!%p248_p2)  ;;  %v1499_v10 = vshrl.u32 (!%p248_p2), %v320_v8, 7 }
   0x8   : > { %s1320_s15 = smov (!%p248_p2), 9   ;;  %s1321_s16 = smov (!%p248_p2), 73   ;;  %1233 = vmatprep.mubr.msk.bf16.mxu1 (!%p248_p2), %vm774_vm1, %v1303_v5  ;;  %v616_v11 = vshrl.u32 (!%p248_p2), %v614_v9, 16  ;;  %v553_v15 = vld [vmem:[%s1760_s0] sm:$0x2] (!%p248_p2)  ;;  %vm392_vm2 = vcmask (!%p248_p2), 515072  }
   0x9   : > { %s1322_s17 = smov (!%p248_p2), 57   ;;  %s1323_s18 = smov (!%p248_p2), 121   ;;  %v1502_v12 = vsub.s32 (!%p248_p2), 2, %v1499_v10  ;;  %v1509_v18 = vsub.s32 (!%p248_p2), 1, %v1499_v10  ;;  %v555_v19 = vpack.i.b16 (!%p248_p2), %v553_v15, %v553_v15  ;;  %v316_v20 = vld [vmem:[%s1760_s0] sm:$0x1] (!%p248_p2) }
   0xa   : > { %s1324_s19 = smov (!%p248_p2), 1   ;;  %s1325_s20 = smov (!%p248_p2), 65   ;;  %v617_v13 = vpack.i.b16 (!%p248_p2), %v616_v11, %v616_v11  ;;  %v318_v26 = vpack.i.b16 (!%p248_p2), %v316_v20, %v316_v20  ;;  %v1517_v27 = vsub.s32 (!%p248_p2), 0, %v1499_v10  ;;  %vm351_vm3 = vcmask (!%p248_p2), 56320   ;;  %v417_v31 = vld [vmem:[%s1760_s0] sm:$0x8] (!%p248_p2) }
   0xb   : > { %s1326_s21 = smov (!%p248_p2), 8   ;;  %s1327_s22 = smov (!%p248_p2), 72   ;;  %v1520_v29 = vrot.slane (!%p248_p2), %v555_v19, %v1509_v18  ;;  %v375_v32 = vld [vmem:[%s1760_s0] sm:$0x2] (!%p248_p2)  ;;  %vm311_vm4 = vcmask (!%p248_p2), 72704   ;;  %v419_v37 = vpack.i.b16 (!%p248_p2), %v417_v31, %v417_v31  ;;  %v1534_v38 = vsub.s32 (!%p248_p2), 3, %v1499_v10 }
   0xc   : > { %s1769_s23 = smov (!%p248_p2), 56   ;;  %s1330_s28 = smov (!%p248_p2), 55   ;;  %v622_v17 = vrot.slane (!%p248_p2), %v617_v13, %v1502_v12  ;;  %v323_v35 = vrot.slane (!%p248_p2), %v318_v26, %v1517_v27  ;;  %v377_v39 = vshrl.u32 (!%p248_p2), %v375_v32, 16  ;;  %vm412_vm5 = vcmask (!%p248_p2), 465920   ;;  %v496_v48 = vld [vmem:[%s1760_s0] sm:$0x1] (!%p248_p2) }
   0xd   : > { %s1774_s25 = smov (!%p284_p3, %s1215_s25), 1  ;;  %s1331_s29 = smov 119   ;;  %v424_v44 = vrot.slane %v419_v37, %v1534_v38  ;;  %vm370_vm6 = vcmask 7168   ;;  %v498_v53 = vpack.i.b16 %v496_v48, %v496_v48  ;;  %v643_v54 = vld [vmem:[%s1760_s0] sm:$0x8]  ;;  %vm331_vm7 = vcmask 64512  }
   0xe   : > { %s1242_s26 = sshll.u32 %s1774_s25, 4  ;;  %s1768_s27 = sshll.u32 %s1774_s25, 3  ;;  %v378_v45 = vpack.i.b16 %v377_v39, %v377_v39  ;;  %v581_v58 = vld [vmem:[%s1760_s0] sm:$0x2]  ;;  %v645_v63 = vpack.i.b16 %v643_v54, %v643_v54  ;;  %vm431_vm8 = vcmask 457728   ;;  %vm451_vm9 = vcmask 449536  }
   0xf   : > { %s293_s30 = scalar_lea.vmem %s1762_s2, %s1242_s26  ;;  %s288_s10 = scalar_lea.vmem %s1761_s1, %s1768_s27  ;;  %v503_v62 = vrot.slane %v498_v53, %v1517_v27  ;;  %vm1090_vm10 = vcmask 130048   ;;  %vm1145_vm11 = vcmask 519168  }
  0x10   : > { %v1392_v0 = vld [vmem:[%s293_s30 + $0x8] sm:$0xff]   ;;  %v1394_v1 = vld [vmem:[%s293_s30] sm:$0xff]   ;;  %s1329_s26 = smov 120   ;;  %v383_v52 = vrot.slane %v378_v45, %v1509_v18 }
  0x11   : > { %600 = vrot.lane.b32.xlu1 %v1392_v0, %s1315_s11  ;;  %v1297_v2 = vld [vmem:[%s288_s10] sm:$0xff]   ;;  %597 = vst.msk [vmem:[#allocation2 + $0x70] sm:$0xff] %vm325_vm0, %v1392_v0  ;;  %598 = vrot.lane.b32.xlu0 %v1394_v1, %s1315_s11  ;;  %596 = vst.msk [vmem:[#allocation2 + $0x68] sm:$0xff] %vm325_vm0, %v1394_v1 }
  0x12   : > { %387 = vst.msk [vmem:[#allocation2 + $0x60] sm:$0xff] %vm325_vm0, %v1297_v2 }
  0x15   : > { %604 = vrot.lane.b32.xlu1 %v1392_v0, %s1317_s12  ;;  %602 = vrot.lane.b32.xlu0 %v1394_v1, %s1317_s12 }
  0x19   : > { %543 = vrot.lane.b32.xlu1 %v1392_v0, %s1318_s13  ;;  %539 = vrot.lane.b32.xlu0 %v1392_v0, %s1319_s14 }
  0x1d   : > { %309 = vrot.lane.b32.xlu1 %v1297_v2, %s1320_s15  ;;  %307 = vrot.lane.b32.xlu0 %v1297_v2, %s1321_s16 }
  0x21   : > { %410 = vrot.lane.b32.xlu1 %v1297_v2, %s1322_s17  ;;  %408 = vrot.lane.b32.xlu0 %v1297_v2, %s1323_s18 }
  0x25   : > { %368 = vrot.lane.b32.xlu1 %v1297_v2, %s1324_s19  ;;  %366 = vrot.lane.b32.xlu0 %v1297_v2, %s1325_s20 }
  0x29   : > { %484 = vrot.lane.b32.xlu1 %v1394_v1, %s1320_s15  ;;  %480 = vrot.lane.b32.xlu0 %v1394_v1, %s1321_s16 }
  0x2d   : > { %631 = vrot.lane.b32.xlu1 %v1394_v1, %s1322_s17  ;;  %627 = vrot.lane.b32.xlu0 %v1394_v1, %s1323_s18 }
  0x31   : > { %569 = vrot.lane.b32.xlu1 %v1394_v1, %s1324_s19  ;;  %565 = vrot.lane.b32.xlu0 %v1394_v1, %s1325_s20 }
  0x35   : > { %486 = vrot.lane.b32.xlu1 %v1392_v0, %s1320_s15  ;;  %482 = vrot.lane.b32.xlu0 %v1392_v0, %s1321_s16 }
  0x39   : > { %633 = vrot.lane.b32.xlu1 %v1392_v0, %s1322_s17  ;;  %629 = vrot.lane.b32.xlu0 %v1392_v0, %s1323_s18 }
  0x3d   : > { %571 = vrot.lane.b32.xlu1 %v1392_v0, %s1324_s19  ;;  %567 = vrot.lane.b32.xlu0 %v1392_v0, %s1325_s20 }
  0x41   : > { %329 = vrot.lane.b32.xlu1 %v1297_v2, %s1326_s21  ;;  %327 = vrot.lane.b32.xlu0 %v1297_v2, %s1327_s22 }
  0x45   : > { %429 = vrot.lane.b32.xlu1 %v1297_v2, %s1769_s23  ;;  %427 = vrot.lane.b32.xlu0 %v1297_v2, %s1329_s26 }
  0x49   : > { %512 = vrot.lane.b32.xlu1 %v1394_v1, %s1326_s21  ;;  %508 = vrot.lane.b32.xlu0 %v1394_v1, %s1327_s22 }
  0x4d   : > { %659 = vrot.lane.b32.xlu1 %v1394_v1, %s1769_s23  ;;  %655 = vrot.lane.b32.xlu0 %v1394_v1, %s1329_s26 }
  0x51   : > { %514 = vrot.lane.b32.xlu1 %v1392_v0, %s1326_s21  ;;  %510 = vrot.lane.b32.xlu0 %v1392_v0, %s1327_s22 }
  0x55   : > { %661 = vrot.lane.b32.xlu1 %v1392_v0, %s1769_s23  ;;  %657 = vrot.lane.b32.xlu0 %v1392_v0, %s1329_s26 }
  0x59   : > { %349 = vrot.lane.b32.xlu1 %v1297_v2, %s1318_s13  ;;  %347 = vrot.lane.b32.xlu0 %v1297_v2, %s1319_s14 }
  0x5d   : > { %449 = vrot.lane.b32.xlu1 %v1297_v2, %s1330_s28  ;;  %447 = vrot.lane.b32.xlu0 %v1297_v2, %s1331_s29 }
  0x61   : > { %390 = vrot.lane.b32.xlu1 %v1297_v2, %s1317_s12  ;;  %388 = vrot.lane.b32.xlu0 %v1297_v2, %s1315_s11 }
  0x65   : > { %541 = vrot.lane.b32.xlu1 %v1394_v1, %s1318_s13  ;;  %537 = vrot.lane.b32.xlu0 %v1394_v1, %s1319_s14 }
  0x69   : > { %688 = vrot.lane.b32.xlu1 %v1394_v1, %s1330_s28  ;;  %684 = vrot.lane.b32.xlu0 %v1394_v1, %s1331_s29 }
  0x6d   : > { %690 = vrot.lane.b32.xlu1 %v1392_v0, %s1330_s28  ;;  %686 = vrot.lane.b32.xlu0 %v1392_v0, %s1331_s29  ;;  %v583_v0 = vshrl.u32 %v581_v58, 16 }
  0x6f   : > { %v584_v8 = vpack.i.b16 %v583_v0, %v583_v0 }
  0x71   : > { %752 = vperm.xlu1 %1294, %v744_v6   ;;  %747 = vperm.xlu0 %1293, %v743_v7   ;;  %v650_v7 = vrot.slane %v645_v63, %v1534_v38 }
  0x83   : > { %v601_v14 = vpop.permute.xlu1 %600  ;;  %v599_v16 = vpop.permute.xlu0 %598 }
  0x87   : > { %v605_v21 = vpop.permute.xlu1 %604  ;;  %v603_v23 = vpop.permute.xlu0 %602 }
  0x88   : > { %v612_v22 = vsel %vm392_vm2, %v601_v14, %v605_v21  ;;  %v608_v25 = vsel %vm392_vm2, %v599_v16, %v603_v23  ;;  %v589_v16 = vrot.slane %v584_v8, %v1509_v18 }
  0x89   : > { %v624_v24 = vmul.bf16 %v622_v17, %v612_v22  ;;  %v623_v28 = vmul.bf16 %v622_v17, %v608_v25  ;;  %v336_v25 = vld [vmem:[%s1760_s0] sm:$0x1] }
  0x8a   : > { %v338_v31 = vshrl.u32 %v336_v25, 16  ;;  %v729_v25 = vld [vmem:[#allocation2 + $0x68] sm:$0xff] }
  0x8b   : > { %626 = vst.msk [vmem:[#allocation2 + $0x88] sm:$0xff] %vm325_vm0, %v624_v24  ;;  %v544_v30 = vpop.permute.xlu1 %543  ;;  %625 = vst.msk [vmem:[#allocation2 + $0x80] sm:$0xff] %vm325_vm0, %v623_v28  ;;  %v540_v33 = vpop.permute.xlu0 %539 }
  0x8c   : > { %v551_v34 = vsel %vm351_vm3, %v540_v33, %v544_v30  ;;  %v339_v39 = vpack.i.b16 %v338_v31, %v338_v31  ;;  %v397_v31 = vld [vmem:[%s1760_s0] sm:$0x4] }
  0x8d   : > { %v562_v36 = vmul.bf16 %v1520_v29, %v551_v34  ;;  %v436_v34 = vld [vmem:[%s1760_s0] sm:$0x8] }
  0x8f   : > { %v310_v40 = vpop.permute.xlu1 %309  ;;  %564 = vst.msk [vmem:[#allocation2 + $0x40] sm:$0xff] %vm325_vm0, %v562_v36  ;;  %v308_v41 = vpop.permute.xlu0 %307 }
  0x90   : > { %v314_v42 = vsel %vm311_vm4, %v308_v41, %v310_v40  ;;  %v438_v40 = vshrl.u32 %v436_v34, 16 }
  0x91   : > { %v324_v43 = vmul.bf16 %v323_v35, %v314_v42 }
  0x92   : > { %v732_v46 = vld [vmem:[#allocation2 + $0x80] sm:$0xff]  ;;  %v733_v56 = vld [vmem:[#allocation2 + $0x88] sm:$0xff]  ;;  %v439_v48 = vpack.i.b16 %v438_v40, %v438_v40 }
  0x93   : > { %v411_v47 = vpop.permute.xlu1 %410  ;;  %326 = vst.msk [vmem:[#allocation2] sm:$0xff] %vm325_vm0, %v324_v43  ;;  %820 = vmatpush1.bf16.msra.mxu1 %v732_v46  ;;  %v409_v49 = vpop.permute.xlu0 %408  ;;  %v524_v43 = vld [vmem:[%s1760_s0] sm:$0x1] }
  0x94   : > { %v415_v50 = vsel %vm412_vm5, %v409_v49, %v411_v47  ;;  %821 = vmatprep.subr.bf16.mxu1 %v1316_v3  ;;  %v344_v47 = vrot.slane %v339_v39, %v1517_v27  ;;  %v526_v49 = vshrl.u32 %v524_v43, 16 }
  0x95   : > { %v425_v51 = vmul.bf16 %v424_v44, %v415_v50 }
  0x96   : > { %v724_v55 = vld [vmem:[#allocation2 + $0x40] sm:$0xff] }
  0x97   : > { %v369_v57 = vpop.permute.xlu1 %368  ;;  %426 = vst.msk [vmem:[#allocation2 + $0x90] sm:$0xff] %vm325_vm0, %v425_v51  ;;  %1246 = vmatprep.subr.bf16.mxu0 %v724_v55  ;;  %822 = vmatpush1.bf16.msra.mxu1 %v733_v56  ;;  %v367_v59 = vpop.permute.xlu0 %366  ;;  %v444_v56 = vrot.slane %v439_v48, %v1534_v38 }
  0x98   : > { %v373_v60 = vsel %vm370_vm6, %v367_v59, %v369_v57  ;;  %823 = vmatprep.subr.bf16.mxu1 %v1316_v3  ;;  %v527_v57 = vpack.i.b16 %v526_v49, %v526_v49 }
  0x99   : > { %v384_v61 = vmul.bf16 %v383_v52, %v373_v60  ;;  %v671_v52 = vld [vmem:[%s1760_s0] sm:$0x8] }
  0x9a   : > { %v716_v2 = vld [vmem:[#allocation2] sm:$0xff]  ;;  %v673_v58 = vshrl.u32 %v671_v52, 16  ;;  %v532_v0 = vrot.slane %v527_v57, %v1517_v27 }
  0x9b   : > { %v485_v1 = vpop.permute.xlu1 %484  ;;  %385 = vst.msk [vmem:[#allocation2 + $0x48] sm:$0xff] %vm325_vm0, %v384_v61  ;;  %1247 = vmatpush3.bf16.msra.mxu0 %v716_v2  ;;  %v481_v4 = vpop.permute.xlu0 %480 }
  0x9c   : > { %v490_v5 = vsel %vm311_vm4, %v481_v4, %v485_v1  ;;  %v674_v1 = vpack.i.b16 %v673_v58, %v673_v58 }
  0x9d   : > { %v504_v6 = vmul.bf16 %v503_v62, %v490_v5 }
  0x9e   : > { %v734_v11 = vld [vmem:[#allocation2 + $0x90] sm:$0xff]  ;;  %v679_v8 = vrot.slane %v674_v1, %v1534_v38 }
  0x9f   : > { %v632_v9 = vpop.permute.xlu1 %631  ;;  %506 = vst.msk [vmem:[#allocation2 + $0x8] sm:$0xff] %vm325_vm0, %v504_v6  ;;  %824 = vmatpush1.bf16.msra.mxu1 %v734_v11  ;;  %v628_v13 = vpop.permute.xlu0 %627 }
  0xa0   : > { %v637_v14 = vsel %vm412_vm5, %v628_v13, %v632_v9  ;;  %825 = vmatprep.subr.bf16.mxu1 %v1316_v3  ;;  %v728_v9 = vld [vmem:[#allocation2 + $0x60] sm:$0xff] }
  0xa1   : > { %v651_v15 = vmul.bf16 %v650_v7, %v637_v14 }
  0xa2   : > { %v725_v19 = vld [vmem:[#allocation2 + $0x48] sm:$0xff] }
  0xa3   : > { %v570_v17 = vpop.permute.xlu1 %569  ;;  %653 = vst.msk [vmem:[#allocation2 + $0x98] sm:$0xff] %vm325_vm0, %v651_v15  ;;  %1248 = vmatprep.subr.bf16.mxu0 %v725_v19  ;;  %v566_v20 = vpop.permute.xlu0 %565 }
  0xa4   : > { %v575_v21 = vsel %vm370_vm6, %v566_v20, %v570_v17  ;;  %v356_v20 = vld [vmem:[%s1760_s0] sm:$0x2] }
  0xa5   : > { %v590_v22 = vmul.bf16 %v589_v16, %v575_v21 }
  0xa6   : > { %v717_v24 = vld [vmem:[#allocation2 + $0x8] sm:$0xff] }
  0xa7   : > { %v487_v23 = vpop.permute.xlu1 %486  ;;  %592 = vst.msk [vmem:[#allocation2 + $0x50] sm:$0xff] %vm325_vm0, %v590_v22  ;;  %1249 = vmatpush3.bf16.msra.mxu0 %v717_v24  ;;  %v483_v26 = vpop.permute.xlu0 %482  ;;  %v358_v24 = vpack.i.b16 %v356_v20, %v356_v20 }
  0xa8   : > { %v494_v28 = vsel %vm311_vm4, %v483_v26, %v487_v23 }
  0xa9   : > { %v505_v30 = vmul.bf16 %v503_v62, %v494_v28 }
  0xaa   : > { %v735_v33 = vld [vmem:[#allocation2 + $0x98] sm:$0xff] }
  0xab   : > { %v634_v32 = vpop.permute.xlu1 %633  ;;  %507 = vst.msk [vmem:[#allocation2 + $0x10] sm:$0xff] %vm325_vm0, %v505_v30  ;;  %826 = vmatpush1.bf16.msra.mxu1 %v735_v33  ;;  %v630_v35 = vpop.permute.xlu0 %629  ;;  %v456_v30 = vld [vmem:[%s1760_s0 + $0x4] sm:$0x1] }
  0xac   : > { %v641_v36 = vsel %vm412_vm5, %v630_v35, %v634_v32  ;;  %827 = vmatprep.subr.bf16.mxu1 %v1316_v3  ;;  %v363_v35 = vrot.slane %v358_v24, %v1509_v18 }
  0xad   : > { %v652_v37 = vmul.bf16 %v650_v7, %v641_v36  ;;  %v458_v36 = vpack.i.b16 %v456_v30, %v456_v30 }
  0xae   : > { %v726_v42 = vld [vmem:[#allocation2 + $0x50] sm:$0xff] }
  0xaf   : > { %v572_v41 = vpop.permute.xlu1 %571  ;;  %654 = vst.msk [vmem:[#allocation2 + $0xa0] sm:$0xff] %vm325_vm0, %v652_v37  ;;  %1250 = vmatprep.subr.bf16.mxu0 %v726_v42  ;;  %v568_v44 = vpop.permute.xlu0 %567  ;;  %v399_v37 = vshrl.u32 %v397_v31, 16 }
  0xb0   : > { %v579_v45 = vsel %vm370_vm6, %v568_v44, %v572_v41  ;;  %v463_v44 = vrot.slane %v458_v36, %v1517_v27 }
  0xb1   : > { %v591_v46 = vmul.bf16 %v589_v16, %v579_v45  ;;  %v400_v45 = vpack.i.b16 %v399_v37, %v399_v37 }
  0xb2   : > { %v718_v51 = vld [vmem:[#allocation2 + $0x10] sm:$0xff] }
  0xb3   : > { %v330_v50 = vpop.permute.xlu1 %329  ;;  %593 = vst.msk [vmem:[#allocation2 + $0x58] sm:$0xff] %vm325_vm0, %v591_v46  ;;  %1251 = vmatpush3.bf16.msra.mxu0 %v718_v51  ;;  %v328_v53 = vpop.permute.xlu0 %327  ;;  %v730_v46 = vld [vmem:[#allocation2 + $0x70] sm:$0xff]  ;;  %v405_v52 = vrot.slane %v400_v45, %v1502_v12  ;;  %v878_v45 = vld [vmem:[%s1760_s0] sm:$0x1] }
  0xb4   : > { %v334_v54 = vsel %vm331_vm7, %v328_v53, %v330_v50 }
  0xb5   : > { %v345_v55 = vmul.bf16 %v344_v47, %v334_v54 }
  0xb6   : > { %v736_v60 = vld [vmem:[#allocation2 + $0xa0] sm:$0xff] }
  0xb7   : > { %v430_v59 = vpop.permute.xlu1 %429  ;;  %346 = vst.msk [vmem:[#allocation2 + $0x18] sm:$0xff] %vm325_vm0, %v345_v55  ;;  %828 = vmatpush1.bf16.msra.mxu1 %v736_v60  ;;  %v428_v61 = vpop.permute.xlu0 %427  ;;  %v700_v55 = vld [vmem:[%s1760_s0 + $0x4] sm:$0x1] }
  0xb8   : > { %v434_v62 = vsel %vm431_vm8, %v428_v61, %v430_v59  ;;  %829 = vmatprep.subr.bf16.mxu1 %v1316_v3  ;;  %v702_v59 = vpack.i.b16 %v700_v55, %v700_v55 }
  0xb9   : > { %v445_v63 = vmul.bf16 %v444_v56, %v434_v62 }
  0xba   : > { %v727_v4 = vld [vmem:[#allocation2 + $0x58] sm:$0xff]  ;;  %v707_v1 = vrot.slane %v702_v59, %v1517_v27 }
  0xbb   : > { %v513_v2 = vpop.permute.xlu1 %512  ;;  %446 = vst.msk [vmem:[#allocation2 + $0xa8] sm:$0xff] %vm325_vm0, %v445_v63  ;;  %1252 = vmatprep.subr.bf16.mxu0 %v727_v4  ;;  %v509_v5 = vpop.permute.xlu0 %508 }
  0xbc   : > { %v518_v6 = vsel %vm331_vm7, %v509_v5, %v513_v2 }
  0xbd   : > { %v533_v7 = vmul.bf16 %v532_v0, %v518_v6 }
  0xbe   : > { %v719_v13 = vld [vmem:[#allocation2 + $0x18] sm:$0xff] }
  0xbf   : > { %v660_v11 = vpop.permute.xlu1 %659  ;;  %535 = vst.msk [vmem:[#allocation2 + $0x20] sm:$0xff] %vm325_vm0, %v533_v7  ;;  %1253 = vmatpush3.bf16.msra.mxu0 %v719_v13  ;;  %v656_v14 = vpop.permute.xlu0 %655 }
  0xc0   : > { %v665_v15 = vsel %vm431_vm8, %v656_v14, %v660_v11  ;;  %1254 = vmatprep.subr.bf16.mxu0 %v728_v9 }
  0xc1   : > { %v680_v16 = vmul.bf16 %v679_v8, %v665_v15  ;;  %v1298_v15 = vld [vmem:[%s1763_s3] ss:$16 sps:$4 sm:$0xff]  }
  0xc2   : > { %v737_v19 = vld [vmem:[#allocation2 + $0xa8] sm:$0xff] }
  0xc3   : > { %v515_v17 = vpop.permute.xlu1 %514  ;;  %682 = vst.msk [vmem:[#allocation2 + $0xb0] sm:$0xff] %vm325_vm0, %v680_v16  ;;  %830 = vmatpush1.bf16.msra.mxu1 %v737_v19  ;;  %v511_v21 = vpop.permute.xlu0 %510  ;;  %v1301_v19 = vld [vmem:[%s1763_s3 + $0x8] ss:$16 sps:$4 sm:$0xff]  }
  0xc4   : > { %v522_v22 = vsel %vm331_vm7, %v511_v21, %v515_v17  ;;  %831 = vmatprep.subr.bf16.mxu1 %v1316_v3 }
  0xc5   : > { %v534_v23 = vmul.bf16 %v532_v0, %v522_v22 }
  0xc6   : > { %v720_v28 = vld [vmem:[#allocation2 + $0x20] sm:$0xff] }
  0xc7   : > { %v662_v26 = vpop.permute.xlu1 %661  ;;  %536 = vst.msk [vmem:[#allocation2 + $0x28] sm:$0xff] %vm325_vm0, %v534_v23  ;;  %v658_v32 = vpop.permute.xlu0 %657  ;;  %1255 = vmatpush3.bf16.msra.mxu0 %v720_v28 }
  0xc8   : > { %v669_v33 = vsel %vm431_vm8, %v658_v32, %v662_v26  ;;  %1256 = vmatprep.subr.bf16.mxu0 %v729_v25 }
  0xc9   : > { %v681_v34 = vmul.bf16 %v679_v8, %v669_v33 }
  0xca   : > { %v738_v40 = vld [vmem:[#allocation2 + $0xb0] sm:$0xff] }
  0xcb   : > { %v350_v39 = vpop.permute.xlu1 %349  ;;  %683 = vst.msk [vmem:[#allocation2 + $0xb8] sm:$0xff] %vm325_vm0, %v681_v34  ;;  %832 = vmatpush1.bf16.msra.mxu1 %v738_v40  ;;  %v348_v41 = vpop.permute.xlu0 %347 }
  0xcc   : > { %v354_v42 = vsel %vm351_vm3, %v348_v41, %v350_v39  ;;  %833 = vmatprep.subr.bf16.mxu1 %v1316_v3 }
  0xcd   : > { %v364_v43 = vmul.bf16 %v363_v35, %v354_v42  ;;  %v1069_v42 = vld [vmem:[%s1766_s6] sm:$0xff] }
  0xce   : > { %v721_v48 = vld [vmem:[#allocation2 + $0x28] sm:$0xff] }
  0xcf   : > { %v450_v47 = vpop.permute.xlu1 %449  ;;  %365 = vst.msk [vmem:[#allocation2 + $0x30] sm:$0xff] %vm325_vm0, %v364_v43  ;;  %v448_v49 = vpop.permute.xlu0 %447  ;;  %1257 = vmatpush3.bf16.msra.mxu0 %v721_v48  ;;  %v1304_v43 = vld [vmem:[%s1765_s5 + $0x4] ss:$8 sps:$4 sm:$0xff]  }
  0xd0   : > { %v454_v50 = vsel %vm451_vm9, %v448_v49, %v450_v47  ;;  %1258 = vmatprep.subr.bf16.mxu0 %v730_v46  ;;  %v879_v47 = vunpack.c.l.bf16 %v878_v45 }
  0xd1   : > { %v464_v51 = vmul.bf16 %v463_v44, %v454_v50  ;;  %v1070_v44 = vld [vmem:[%s1766_s6 + $0x8] sm:$0xff] }
  0xd2   : > { %v739_v54 = vld [vmem:[#allocation2 + $0xb8] sm:$0xff]  ;;  %v883_v49 = vrot.slane %v879_v47, %v1517_v27 }
  0xd3   : > { %v391_v53 = vpop.permute.xlu1 %390  ;;  %465 = vst.msk [vmem:[#allocation2 + $0xc0] sm:$0xff] %vm325_vm0, %v464_v51  ;;  %834 = vmatpush1.bf16.msra.mxu1 %v739_v54  ;;  %v389_v56 = vpop.permute.xlu0 %388 }
  0xd4   : > { %v395_v57 = vsel %vm392_vm2, %v389_v56, %v391_v53  ;;  %835 = vmatprep.subr.bf16.mxu1 %v1316_v3 }
  0xd5   : > { %v406_v58 = vmul.bf16 %v405_v52, %v395_v57  ;;  %v902_v52 = vld [vmem:[%s1760_s0] sm:$0x1] }
  0xd6   : > { %v722_v61 = vld [vmem:[#allocation2 + $0x30] sm:$0xff] }
  0xd7   : > { %v542_v60 = vpop.permute.xlu1 %541  ;;  %407 = vst.msk [vmem:[#allocation2 + $0x78] sm:$0xff] %vm325_vm0, %v406_v58  ;;  %v538_v62 = vpop.permute.xlu0 %537  ;;  %1259 = vmatpush3.bf16.msra.mxu0 %v722_v61  ;;  %v903_v58 = vunpack.c.l.bf16 %v902_v52 }
  0xd8   : > { %v547_v63 = vsel %vm351_vm3, %v538_v62, %v542_v60 }
  0xd9   : > { %v561_v0 = vmul.bf16 %v1520_v29, %v547_v63  ;;  %v907_v61 = vrot.slane %v903_v58, %v1509_v18 }
  0xda   : > { %v740_v4 = vld [vmem:[#allocation2 + $0xc0] sm:$0xff] }
  0xdb   : > { %v689_v2 = vpop.permute.xlu1 %688  ;;  %563 = vst.msk [vmem:[#allocation2 + $0x38] sm:$0xff] %vm325_vm0, %v561_v0  ;;  %836 = vmatpush1.bf16.msra.mxu1 %v740_v4  ;;  %v685_v5 = vpop.permute.xlu0 %684  ;;  %v926_v0 = vld [vmem:[%s1760_s0] sm:$0x2] }
  0xdc   : > { %v694_v6 = vsel %vm451_vm9, %v685_v5, %v689_v2  ;;  %837 = vmatprep.subr.bf16.mxu1 %v1316_v3 }
  0xdd   : > { %v708_v7 = vmul.bf16 %v707_v1, %v694_v6 }
  0xde   : > { %v731_v9 = vld [vmem:[#allocation2 + $0x78] sm:$0xff] }
  0xdf   : > { %v691_v8 = vpop.permute.xlu1 %690  ;;  %710 = vst.msk [vmem:[#allocation2 + $0xc8] sm:$0xff] %vm325_vm0, %v708_v7  ;;  %v687_v11 = vpop.permute.xlu0 %686  ;;  %1260 = vmatprep.subr.bf16.mxu0 %v731_v9  ;;  %v927_v7 = vunpack.c.l.bf16 %v926_v0 }
  0xe0   : > { %v698_v29 = vsel %vm451_vm9, %v687_v11, %v691_v8 }
  0xe1   : > { %v709_v13 = vmul.bf16 %v707_v1, %v698_v29  ;;  %v931_v18 = vrot.slane %v927_v7, %v1502_v12 }
  0xe2   : > { %v723_v14 = vld [vmem:[#allocation2 + $0x38] sm:$0xff] }
  0xe3   : > { %711 = vst.msk [vmem:[#allocation2 + $0xd0] sm:$0xff] %vm325_vm0, %v709_v13  ;;  %1261 = vmatpush3.bf16.msra.mxu0 %v723_v14  ;;  %v950_v14 = vld [vmem:[%s1760_s0] sm:$0x2] }
  0xe4   : > { %1094 = vmatprep.subr.bf16.mxu0 %v1316_v3 }
  0xe6   : > { %811 = vmatmul.mubr.bf16.vlgmr.msra.gmra.mrb[0].mxu0 %v1298_v15  ;;  %v741_v16 = vld [vmem:[#allocation2 + $0xc8] sm:$0xff] }
  0xe7   : > { %838 = vmatpush1.bf16.msra.mxu1 %v741_v16  ;;  %1236 = vmatprep.mubr.msk.bf16.mxu0 %vm1090_vm10, %v1304_v43  ;;  %v1000_v43 = vld [vmem:[%s1760_s0] sm:$0x8] }
  0xe8   : > { %839 = vmatprep.subr.bf16.mxu1 %v1316_v3 }
  0xea   : > { %v742_v17 = vld [vmem:[#allocation2 + $0xd0] sm:$0xff] }
  0xeb   : > { %840 = vmatpush1.bf16.msra.mxu1 %v742_v17 }
  0xee   : > { %852 = vmatmul.mubr.bf16.vlgmr.msra.gmra.mrb[0].mxu1 %v1301_v19 }
  0xf0   : > { %v748_v24 = vpop.permute.xlu0 %747  ;;  %v753_v30 = vpop.permute.xlu1 %752 }
 0x1b9   : > { %v1262_v20 = vpop.f32.mrb[0].mxu0 }
 0x1ba   : > { %v1263_v21 = vpop.f32.mrb[1].mxu0 }
 0x1bb   : > { %v1264_v22 = vadd.f32 %v1263_v21, %v1262_v20  ;;  %v1265_v23 = vpop.f32.mrb[2].mxu0  ;;  %v951_v21 = vunpack.c.l.bf16 %v950_v14 }
 0x1bc   : > { %v1266_v25 = vpop.f32.mrb[3].mxu0 }
 0x1bd   : > { %v1267_v26 = vadd.f32 %v1266_v25, %v1265_v23  ;;  %v813_v28 = vadd.f32 %v1264_v22, %v748_v24  ;;  %v955_v12 = vrot.slane %v951_v21, %v1534_v38 }
 0x1bf   : > { %v816_v32 = vadd.f32 %v1267_v26, %v753_v30 }
 0x1c1   : > { %v853_v31 = vpop.f32.mrb[0].mxu1 }
 0x1c2   : > { %v854_v33 = vadd.f32 %v853_v31, %v813_v28  ;;  %v855_v34 = vpop.f32.mrb[1].mxu1  ;;  %v976_v28 = vld [vmem:[%s1760_s0] sm:$0x4] }
 0x1c3   : > { %v856_v35 = vpop.f32.mrb[2].mxu1 }
 0x1c4   : > { %v860_v36 = vmax.f32 %v854_v33, 0.0  ;;  %v857_v37 = vadd.f32 %v856_v35, %v816_v32  ;;  %v858_v39 = vpop.f32.mrb[3].mxu1  ;;  %v977_v35 = vunpack.c.l.bf16 %v976_v28  ;;  %v1306_v28 = vld [vmem:[%s1765_s5] ss:$8 sps:$4 sm:$0xff]  }
 0x1c6   : > { %v861_v40 = vmax.f32 %v857_v37, 0.0  ;;  %864 = vrot.lane.b32.xlu1 %v860_v36, %s1321_s16 }
 0x1c8   : > { %866 = vrot.lane.b32.xlu0 %v861_v40, %s1321_s16  ;;  %v960_v41 = vpack.c.bf16 %v861_v40, %v860_v36 }
 0x1ca   : > { %870 = vrot.lane.b32.xlu1 %v860_v36, %s1320_s15  ;;  %961 = vst.msk [vmem:[#allocation3 + $0x20] sm:$0xff] %vm325_vm0, %v960_v41 }
 0x1cc   : > { %872 = vrot.lane.b32.xlu0 %v861_v40, %s1320_s15  ;;  %s1772_s15 = sshll.u32 %s1774_s25, 3 }
 0x1ce   : > { %888 = vrot.lane.b32.xlu1 %v860_v36, %s1327_s22 }
 0x1d0   : > { %890 = vrot.lane.b32.xlu0 %v861_v40, %s1327_s22 }
 0x1d2   : > { %894 = vrot.lane.b32.xlu1 %v860_v36, %s1326_s21 }
 0x1d4   : > { %896 = vrot.lane.b32.xlu0 %v861_v40, %s1326_s21 }
 0x1d6   : > { %912 = vrot.lane.b32.xlu1 %v860_v36, %s1319_s14 }
 0x1d8   : > { %914 = vrot.lane.b32.xlu0 %v861_v40, %s1319_s14 }
 0x1da   : > { %918 = vrot.lane.b32.xlu1 %v860_v36, %s1318_s13 }
 0x1dc   : > { %920 = vrot.lane.b32.xlu0 %v861_v40, %s1318_s13  ;;  %s1771_s13 = smov 56  }
 0x1de   : > { %936 = vrot.lane.b32.xlu1 %v860_v36, %s1325_s20 }
 0x1e0   : > { %938 = vrot.lane.b32.xlu0 %v861_v40, %s1325_s20 }
 0x1e2   : > { %942 = vrot.lane.b32.xlu1 %v860_v36, %s1324_s19 }
 0x1e4   : > { %944 = vrot.lane.b32.xlu0 %v861_v40, %s1324_s19 }
 0x1e6   : > { %962 = vrot.lane.b32.xlu1 %v860_v36, %s1315_s11 }
 0x1e8   : > { %964 = vrot.lane.b32.xlu0 %v861_v40, %s1315_s11 }
 0x1ea   : > { %968 = vrot.lane.b32.xlu1 %v860_v36, %s1317_s12 }
 0x1ec   : > { %970 = vrot.lane.b32.xlu0 %v861_v40, %s1317_s12 }
 0x1ee   : > { %986 = vrot.lane.b32.xlu1 %v860_v36, %s1323_s18 }
 0x1f0   : > { %988 = vrot.lane.b32.xlu0 %v861_v40, %s1323_s18  ;;  %s298_s18 = scalar_lea.vmem %s1767_s7, %s1772_s15 }
 0x1f2   : > { %992 = vrot.lane.b32.xlu1 %v860_v36, %s1322_s17 }
 0x1f4   : > { %994 = vrot.lane.b32.xlu0 %v861_v40, %s1322_s17 }
 0x1f6   : > { %1010 = vrot.lane.b32.xlu1 %v860_v36, %s1329_s26 }
 0x1f8   : > { %1012 = vrot.lane.b32.xlu0 %v861_v40, %s1329_s26 }
 0x1fa   : > { %1016 = vrot.lane.b32.xlu1 %v860_v36, %s1771_s13 }
 0x1fc   : > { %1018 = vrot.lane.b32.xlu0 %v861_v40, %s1771_s13 }
 0x1fe   : > { %1034 = vrot.lane.b32.xlu1 %v860_v36, %s1331_s29 }
 0x200   : > { %1036 = vrot.lane.b32.xlu0 %v861_v40, %s1331_s29 }
 0x202   : > { %1040 = vrot.lane.b32.xlu1 %v860_v36, %s1330_s28  ;;  %v980_v36 = vsub.s32 5, %v1499_v10 }
 0x204   : > { %1042 = vrot.lane.b32.xlu0 %v861_v40, %s1330_s28  ;;  %v981_v40 = vrot.slane %v977_v35, %v980_v36 }
 0x206   : > { %1073 = vperm.xlu1 %1294, %v1069_v42  }
 0x208   : > { %1078 = vperm.xlu0 %1293, %v1070_v44  }
 0x238   : > { %v865_v46 = vpop.permute.xlu1 %864 }
 0x23a   : > { %v867_v48 = vpop.permute.xlu0 %866 }
 0x23c   : > { %v871_v50 = vpop.permute.xlu1 %870 }
 0x23d   : > { %v876_v51 = vsel %vm311_vm4, %v865_v46, %v871_v50  ;;  %v1004_v50 = vsub.s32 6, %v1499_v10 }
 0x23e   : > { %v873_v53 = vpop.permute.xlu0 %872  ;;  %v884_v55 = vmul.f32 %v883_v49, %v876_v51 }
 0x23f   : > { %v877_v54 = vsel %vm311_vm4, %v867_v48, %v873_v53 }
 0x240   : > { %v885_v56 = vmul.f32 %v883_v49, %v877_v54  ;;  %v889_v57 = vpop.permute.xlu1 %888  ;;  %v1001_v49 = vunpack.c.l.bf16 %v1000_v43 }
 0x242   : > { %v886_v59 = vpack.c.bf16 %v885_v56, %v884_v55  ;;  %v891_v60 = vpop.permute.xlu0 %890  ;;  %v1005_v54 = vrot.slane %v1001_v49, %v1004_v50 }
 0x244   : > { %887 = vst.msk [vmem:[#allocation3] sm:$0xff] %vm325_vm0, %v886_v59  ;;  %v895_v62 = vpop.permute.xlu1 %894 }
 0x245   : > { %v900_v63 = vsel %vm331_vm7, %v889_v57, %v895_v62  ;;  %v1024_v57 = vld [vmem:[%s1760_s0] sm:$0x8] }
 0x246   : > { %v897_v1 = vpop.permute.xlu0 %896  ;;  %v908_v4 = vmul.f32 %v907_v61, %v900_v63  ;;  %v1025_v0 = vunpack.c.l.bf16 %v1024_v57 }
 0x247   : > { %v901_v2 = vsel %vm331_vm7, %v891_v60, %v897_v1  ;;  %v1064_v60 = vld [vmem:[#allocation3 + $0x20] sm:$0xff]  ;;  %v1028_v1 = vsub.s32 7, %v1499_v10 }
 0x248   : > { %v909_v5 = vmul.f32 %v907_v61, %v901_v2  ;;  %v913_v6 = vpop.permute.xlu1 %912 }
 0x24a   : > { %v910_v8 = vpack.c.bf16 %v909_v5, %v908_v4  ;;  %v915_v9 = vpop.permute.xlu0 %914 }
 0x24b   : > { %v1060_v11 = vld [vmem:[#allocation3] sm:$0xff] }
 0x24c   : > { %911 = vst.msk [vmem:[#allocation3 + $0x8] sm:$0xff] %vm325_vm0, %v910_v8  ;;  %1095 = vmatpush1.bf16.msra.mxu0 %v1060_v11  ;;  %v919_v29 = vpop.permute.xlu1 %918 }
 0x24d   : > { %v924_v13 = vsel %vm351_vm3, %v913_v6, %v919_v29  ;;  %1096 = vmatprep.subr.bf16.mxu0 %v1316_v3  ;;  %v1029_v6 = vrot.slane %v1025_v0, %v1028_v1 }
 0x24e   : > { %v921_v15 = vpop.permute.xlu0 %920  ;;  %v932_v17 = vmul.f32 %v931_v18, %v924_v13 }
 0x24f   : > { %v925_v16 = vsel %vm351_vm3, %v915_v9, %v921_v15  ;;  %v1048_v9 = vld [vmem:[%s1760_s0 + $0x4] sm:$0x1] }
 0x250   : > { %v933_v19 = vmul.f32 %v931_v18, %v925_v16  ;;  %v937_v20 = vpop.permute.xlu1 %936  ;;  %v1049_v14 = vunpack.c.l.bf16 %v1048_v9 }
 0x252   : > { %v934_v22 = vpack.c.bf16 %v933_v19, %v932_v17  ;;  %v939_v23 = vpop.permute.xlu0 %938  ;;  %v1053_v19 = vrot.slane %v1049_v14, %v1517_v27 }
 0x253   : > { %v1061_v24 = vld [vmem:[#allocation3 + $0x8] sm:$0xff] }
 0x254   : > { %935 = vst.msk [vmem:[#allocation3 + $0x10] sm:$0xff] %vm325_vm0, %v934_v22  ;;  %1097 = vmatpush1.bf16.msra.mxu0 %v1061_v24  ;;  %v943_v25 = vpop.permute.xlu1 %942 }
 0x255   : > { %v948_v26 = vsel %vm370_vm6, %v937_v20, %v943_v25  ;;  %1098 = vmatprep.subr.bf16.mxu0 %v1316_v3 }
 0x256   : > { %v945_v30 = vpop.permute.xlu0 %944  ;;  %v956_v32 = vmul.f32 %v955_v12, %v948_v26 }
 0x257   : > { %v949_v31 = vsel %vm370_vm6, %v939_v23, %v945_v30 }
 0x258   : > { %v957_v33 = vmul.f32 %v955_v12, %v949_v31  ;;  %v963_v34 = vpop.permute.xlu1 %962 }
 0x25a   : > { %v958_v37 = vpack.c.bf16 %v957_v33, %v956_v32  ;;  %v965_v38 = vpop.permute.xlu0 %964 }
 0x25b   : > { %v1062_v39 = vld [vmem:[#allocation3 + $0x10] sm:$0xff] }
 0x25c   : > { %959 = vst.msk [vmem:[#allocation3 + $0x18] sm:$0xff] %vm325_vm0, %v958_v37  ;;  %1099 = vmatpush1.bf16.msra.mxu0 %v1062_v39  ;;  %v969_v41 = vpop.permute.xlu1 %968 }
 0x25d   : > { %v974_v42 = vsel %vm392_vm2, %v963_v34, %v969_v41  ;;  %1100 = vmatprep.subr.bf16.mxu0 %v1316_v3 }
 0x25e   : > { %v971_v44 = vpop.permute.xlu0 %970  ;;  %v982_v46 = vmul.f32 %v981_v40, %v974_v42 }
 0x25f   : > { %v975_v45 = vsel %vm392_vm2, %v965_v38, %v971_v44 }
 0x260   : > { %v983_v47 = vmul.f32 %v981_v40, %v975_v45  ;;  %v987_v48 = vpop.permute.xlu1 %986 }
 0x262   : > { %v984_v51 = vpack.c.bf16 %v983_v47, %v982_v46  ;;  %v989_v52 = vpop.permute.xlu0 %988 }
 0x263   : > { %v1063_v53 = vld [vmem:[#allocation3 + $0x18] sm:$0xff] }
 0x264   : > { %985 = vst.msk [vmem:[#allocation3 + $0x28] sm:$0xff] %vm325_vm0, %v984_v51  ;;  %1101 = vmatpush1.bf16.msra.mxu0 %v1063_v53  ;;  %v993_v55 = vpop.permute.xlu1 %992 }
 0x265   : > { %v998_v56 = vsel %vm412_vm5, %v987_v48, %v993_v55  ;;  %1102 = vmatprep.subr.bf16.mxu0 %v1316_v3 }
 0x266   : > { %v995_v58 = vpop.permute.xlu0 %994  ;;  %v1006_v61 = vmul.f32 %v1005_v54, %v998_v56 }
 0x267   : > { %v999_v59 = vsel %vm412_vm5, %v989_v52, %v995_v58 }
 0x268   : > { %v1007_v62 = vmul.f32 %v1005_v54, %v999_v59  ;;  %v1011_v63 = vpop.permute.xlu1 %1010  ;;  %1103 = vmatpush1.bf16.msra.mxu0 %v1064_v60 }
 0x269   : > { %1104 = vmatprep.subr.bf16.mxu0 %v1316_v3 }
 0x26a   : > { %v1008_v2 = vpack.c.bf16 %v1007_v62, %v1006_v61  ;;  %v1013_v4 = vpop.permute.xlu0 %1012 }
 0x26b   : > { %v1065_v5 = vld [vmem:[#allocation3 + $0x28] sm:$0xff] }
 0x26c   : > { %1009 = vst.msk [vmem:[#allocation3 + $0x30] sm:$0xff] %vm325_vm0, %v1008_v2  ;;  %v1017_v7 = vpop.permute.xlu1 %1016  ;;  %1105 = vmatpush1.bf16.msra.mxu0 %v1065_v5 }
 0x26d   : > { %v1022_v8 = vsel %vm431_vm8, %v1011_v63, %v1017_v7  ;;  %1106 = vmatprep.subr.bf16.mxu0 %v1316_v3 }
 0x26e   : > { %v1019_v11 = vpop.permute.xlu0 %1018  ;;  %v1030_v18 = vmul.f32 %v1029_v6, %v1022_v8 }
 0x26f   : > { %v1023_v10 = vsel %vm431_vm8, %v1013_v4, %v1019_v11 }
 0x270   : > { %v1031_v29 = vmul.f32 %v1029_v6, %v1023_v10  ;;  %v1035_v13 = vpop.permute.xlu1 %1034 }
 0x272   : > { %v1032_v15 = vpack.c.bf16 %v1031_v29, %v1030_v18  ;;  %v1037_v16 = vpop.permute.xlu0 %1036 }
 0x273   : > { %v1066_v17 = vld [vmem:[#allocation3 + $0x30] sm:$0xff] }
 0x274   : > { %1033 = vst.msk [vmem:[#allocation3 + $0x38] sm:$0xff] %vm325_vm0, %v1032_v15  ;;  %v1041_v20 = vpop.permute.xlu1 %1040  ;;  %1107 = vmatpush1.bf16.msra.mxu0 %v1066_v17 }
 0x275   : > { %v1046_v21 = vsel %vm451_vm9, %v1035_v13, %v1041_v20  ;;  %1108 = vmatprep.subr.bf16.mxu0 %v1316_v3 }
 0x276   : > { %v1043_v22 = vpop.permute.xlu0 %1042  ;;  %v1054_v24 = vmul.f32 %v1053_v19, %v1046_v21 }
 0x277   : > { %v1047_v23 = vsel %vm451_vm9, %v1037_v16, %v1043_v22 }
 0x278   : > { %v1055_v12 = vmul.f32 %v1053_v19, %v1047_v23 }
 0x27a   : > { %v1056_v25 = vpack.c.bf16 %v1055_v12, %v1054_v24 }
 0x27b   : > { %v1067_v26 = vld [vmem:[#allocation3 + $0x38] sm:$0xff] }
 0x27c   : > { %1057 = vst.msk [vmem:[#allocation3 + $0x40] sm:$0xff] %vm325_vm0, %v1056_v25  ;;  %1109 = vmatpush1.bf16.msra.mxu0 %v1067_v26 }
 0x27d   : > { %1110 = vmatprep.subr.bf16.mxu0 %v1316_v3 }
 0x283   : > { %v1068_v27 = vld [vmem:[#allocation3 + $0x40] sm:$0xff] }
 0x284   : > { %1111 = vmatpush1.bf16.msra.mxu0 %v1068_v27 }
 0x285   : > { %v1074_v30 = vpop.permute.xlu1 %1073 }
 0x287   : > { %1127 = vmatmul.mubr.bf16.vlgmr.msra.gmra.mrb[4].mxu0 %v1306_v28  ;;  %v1079_v34 = vpop.permute.xlu0 %1078 }
 0x35a   : > { %v1128_v31 = vpop.f32.mrb[4].mxu0 }
 0x35b   : > { %v1129_v32 = vadd.f32 %v1128_v31, %v1074_v30  ;;  %v1130_v33 = vpop.f32.mrb[5].mxu0 }
 0x35c   : > { %v1131_v35 = vpop.f32.mrb[6].mxu0 }
 0x35d   : > { %v1135_v36 = vmax.f32 %v1129_v32, 0.0  ;;  %v1132_v37 = vadd.f32 %v1131_v35, %v1079_v34  ;;  %v1133_v38 = vpop.f32.mrb[7].mxu0 }
 0x35f   : > { %v1244_v3 = vpack.c.bf16 %v1135_v36, %v1135_v36  ;;  %v1136_v39 = vmax.f32 %v1132_v37, 0.0 }
 0x361   : > { %1146 = vst.msk [vmem:[%s298_s18] sm:$0xf] %vm1145_vm11, %v1244_v3  ;;  %v1245_v40 = vpack.c.bf16 %v1136_v39, %v1136_v39 }
 0x363   : > { %1147 = vst.msk [vmem:[%s298_s18 + $0x4] sm:$0xf] %vm1145_vm11, %v1245_v40 }
 0x364 PF: > { %s17_s24 = sadd.s32 1, %s1313_s24  }
 0x365   : > { %p14_p4 = scmp.ge.s32.totalorder %s17_s24, 4  }
 0x367   :  { %16 = sbr.rel (!%p14_p4) target bundleno = 1 (0x1), region = 81 }

// kernel: seg_qyl_forward.13
= control target key start
LH: loop header
LB: loop body
LE: loop exit
PB: predicated region body
PF: predicated region fallthrough
CT: control target
= control target key end

     0   :  { %s458_s12 = smov 0   ;;  %s460_s13 = smov 0   ;;  %s497_s0 = inlined_call_operand.vmem [shape: bf16[2,8,256], index: 0, kind: input, shape index: {}]   ;;  %s498_s1 = inlined_call_operand.vmem [shape: bf16[4,8], index: 1, kind: input, shape index: {}]   ;;  %s499_s2 = inlined_call_operand.vmem [shape: f32[4,1], index: 2, kind: input, shape index: {}]   ;;  %s500_s3 = inlined_call_operand.vmem [shape: f32[2,4,256], index: 3, kind: output, shape index: {}]  }
   0x1   :  { %s462_s14 = smov 0  }
   0x2 LB: > { %s25_s15 = sadd.s32 1, %s431_s13  ;;  %p372_p0 = scmp.ge.s32.totalorder %s435_s14, 1  ;;  %s435_s14 = sphi %s462_s14, %s13_s14   ;;  %s431_s13 = sphi %s460_s13, %s502_s13   ;;  %s427_s12 = sphi %s458_s12, %s501_s12  }
   0x3   : > { %p27_p1 = scmp.ge.s32.totalorder %s25_s15, 2  ;;  %p158_p2 = scmp.lt.s32.totalorder %s435_s14, 3 }
   0x5   : > { %s504_s15 = smov (%p27_p1, %s25_s15), 0  ;;  %p159_p3 = pnand %p372_p0, %p158_p2 }
   0x6   : > { %p191_p4 = scmp.lt.s32.totalorder (!%p159_p3), %s427_s12, 1  ;;  %v437_v0 = vmov (!%p159_p3), 0   ;;  %v213_v1 = vld [vmem:[%s499_s2] sm:$0xf] (!%p159_p3)  ;;  %vm228_vm0 = vcmask (!%p159_p3), 1043456   ;;  %vm224_vm1 = vcmask (!%p159_p3), 64512  }
   0x7   : > { %162 = sbr.rel (%p159_p3) target bundleno = 242 (0xf2), region = 32  ;;  %267 = vmatprep.mubr.bf16.mxu0 (!%p159_p3), %v437_v0  ;;  %410 = vset.pattern.permute.xlu0 (!%p159_p3), %v437_v0  ;;  %v211_v6 = vld [vmem:[%s498_s1] sm:$0x3] (!%p159_p3) }
   0x8   : > { %216 = vperm.xlu0 (!%p159_p3), %410, %v213_v1  }
   0xe   : > { %s506_s12 = smov (!%p191_p4, %s427_s12), 1 }
   0xf   : > { %s383_s18 = sshll.u32 %s506_s12, 3 }
  0x10   : > { %s198_s21 = scalar_lea.vmem %s497_s0, %s383_s18  ;;  %s208_s26 = scalar_lea.vmem %s500_s3, %s383_s18 }
  0x11   : > { %v212_v2 = vld [vmem:[%s198_s21] sm:$0xff] }
  0x12   : > { %v378_v3 = vcombine.high %v212_v2, %v212_v2  ;;  %v377_v4 = vcombine.low %v212_v2, %v212_v2 }
  0x14   : > { %379 = vmatprep.subr.msk.bf16.mxu0 %vm228_vm0, %v378_v3  ;;  %v230_v5 = vsel %vm228_vm0, %v377_v4, 0 }
  0x15   : > { %236 = vmatpush1.bf16.msra.mxu0 %v230_v5 }
  0x18   : > { %380 = vmatmul.mubr.msk.bf16.vlgmr.msra.gmra.mrb[0].mxu0 %vm224_vm1, %v211_v6 }
  0x87   : > { %v217_v7 = vpop.permute.xlu0 %216 }
  0xeb   : > { %v269_v8 = vpop.f32.mrb[0].mxu0 }
  0xec   : > { %v270_v9 = vadd.f32 %v269_v8, %v217_v7  ;;  %v271_v10 = vpop.f32.mrb[1].mxu0 }
  0xed   : > { %v272_v11 = vadd.f32 %v271_v10, %v217_v7  ;;  %v273_v12 = vpop.f32.mrb[2].mxu0 }
  0xee   : > { %v274_v13 = vpop.f32.mrb[3].mxu0 }
  0xef   : > { %v278_v14 = vcombine.low %v270_v9, %v272_v11 }
  0xf1   : > { %280 = vst [vmem:[%s208_s26] sm:$0xff] %v278_v14 }
  0xf2 PF: > { %s13_s14 = sadd.s32 1, %s435_s14   ;;  %s501_s12 = smov %s431_s13 }
  0xf3   : > { %p10_p5 = scmp.ge.s32.totalorder %s13_s14, 4   ;;  %s502_s13 = smov %s504_s15 }
  0xf5   :  { %12 = sbr.rel (!%p10_p5) target bundleno = 2 (0x2), region = 62 }

// kernel: seg_qyl_forward.10
= control target key start
LH: loop header
LB: loop body
LE: loop exit
PB: predicated region body
PF: predicated region fallthrough
CT: control target
= control target key end

     0   :  { %s1973_s24 = smov 0   ;;  %s2302_s0 = inlined_call_operand.vmem [shape: bf16[9,256], index: 0, kind: input, shape index: {}]   ;;  %s2303_s1 = inlined_call_operand.vmem [shape: bf16[2,8,256], index: 1, kind: input, shape index: {}]   ;;  %s2304_s2 = inlined_call_operand.vmem [shape: bf16[2,16,256], index: 2, kind: input, shape index: {}]   ;;  %s2305_s3 = inlined_call_operand.vmem [shape: bf16[8,216], index: 3, kind: input, shape index: {}]   ;;  %s2306_s4 = inlined_call_operand.vmem [shape: f32[8,1], index: 4, kind: input, shape index: {}]   ;;  %s2307_s5 = inlined_call_operand.vmem [shape: bf16[8,72], index: 5, kind: input, shape index: {}]   ;;  %s2308_s6 = inlined_call_operand.vmem [shape: f32[8,1], index: 6, kind: input, shape index: {}]   ;;  %s2309_s7 = inlined_call_operand.vmem [shape: bf16[2,8,256], index: 7, kind: output, shape index: {}]  }
   0x1 LB: > { %s1693_s25 = sadd.s32 4294967295, %s1922_s24   ;;  %p1697_p0 = scmp.ge.s32.totalorder %s1922_s24, 1  ;;  %s1922_s24 = sphi %s1973_s24, %s17_s24  }
   0x2   : > { %p247_p1 = scmp.lt.s32.totalorder %s1922_s24, 3 }
   0x4   : > { %p248_p2 = pnand %p1697_p0, %p247_p1 }
   0x5   : > { %p284_p3 = scmp.lt.s32.totalorder (!%p248_p2), %s1693_s25, 1  ;;  %s1924_s11 = smov (!%p248_p2), 17   ;;  %v2044_v9 = vld [vmem:[%s2305_s3] sm:$0xff] (!%p248_p2)  ;;  %vm1190_vm0 = vcmask (!%p248_p2), 719872   ;;  %v1932_v11 = vmov (!%p248_p2), 0   ;;  %v327_v14 = vlaneseq (!%p248_p2)  ;;  %vm310_vm1 = vcmask (!%p248_p2), 138240  }
   0x6   : > { %251 = sbr.rel (%p248_p2) target bundleno = 800 (0x320), region = 48  ;;  %s1925_s12 = smov (!%p248_p2), 16   ;;  %v1765_v10 = vcombine.high (!%p248_p2), %v2044_v9, %v2044_v9  ;;  %1877 = vset.pattern.permute.xlu0 (!%p248_p2), %v1932_v11  ;;  %v1043_v12 = vld [vmem:[%s2306_s4] sm:$0xff] (!%p248_p2)  ;;  %1606 = vmatprep.mubr.bf16.mxu1 (!%p248_p2), %v1932_v11  ;;  %vm351_vm2 = vcmask (!%p248_p2), 130048   ;;  %vm394_vm3 = vcmask (!%p248_p2), 121856   ;;  %vm435_vm4 = vcmask (!%p248_p2), 7168  }
   0x7   : > { %s1926_s13 = smov (!%p248_p2), 15   ;;  %s1927_s14 = smov (!%p248_p2), 1   ;;  %v359_v13 = vld [vmem:[%s2302_s0] sm:$0x11] (!%p248_p2)  ;;  %v2062_v20 = vshrl.u32 (!%p248_p2), %v327_v14, 7  ;;  %vm479_vm5 = vcmask (!%p248_p2), 1039360  }
   0x8   : > { %s1928_s15 = smov (!%p248_p2), 127   ;;  %s1929_s16 = smov (!%p248_p2), 113   ;;  %1795 = vmatprep.mubr.msk.bf16.mxu0 (!%p248_p2), %vm1190_vm0, %v1765_v10  ;;  %v663_v15 = vld [vmem:[%s2302_s0] sm:$0x11] (!%p248_p2)  ;;  %v1709_v17 = vcombine.low (!%p248_p2), %v359_v13, %v359_v13  ;;  %v1710_v18 = vcombine.high (!%p248_p2), %v359_v13, %v359_v13  ;;  %v443_v51 = vld [vmem:[%s2302_s0] sm:$0x22] (!%p248_p2) }
   0x9   : > { %s1930_s17 = smov (!%p248_p2), 112   ;;  %s1931_s18 = smov (!%p248_p2), 111   ;;  %v318_v16 = vld [vmem:[%s2302_s0] sm:$0x11] (!%p248_p2)  ;;  %v1732_v19 = vcombine.low (!%p248_p2), %v663_v15, %v663_v15  ;;  %v1733_v21 = vcombine.high (!%p248_p2), %v663_v15, %v663_v15  ;;  %v2068_v28 = vsub.s32 (!%p248_p2), 0, %v2062_v20  ;;  %vm522_vm6 = vcmask (!%p248_p2), 924672  }
   0xa   : > { %v1706_v22 = vcombine.low (!%p248_p2), %v318_v16, %v318_v16  ;;  %v1707_v23 = vcombine.high (!%p248_p2), %v318_v16, %v318_v16  ;;  %v366_v24 = vshrl.u32 (!%p248_p2), %v1709_v17, 16  ;;  %v374_v25 = vshrl.u32 (!%p248_p2), %v1710_v18, 16  ;;  %v707_v26 = vld [vmem:[%s2302_s0] sm:$0x11] (!%p248_p2)  ;;  %v402_v56 = vld [vmem:[%s2302_s0] sm:$0x22] (!%p248_p2) }
   0xb   : > { %v670_v27 = vpack.i.b16 (!%p248_p2), %v1732_v19, %v1732_v19  ;;  %v677_v29 = vpack.i.b16 (!%p248_p2), %v1733_v21, %v1733_v21  ;;  %v1737_v32 = vcombine.high (!%p248_p2), %v707_v26, %v707_v26  ;;  %v1736_v41 = vcombine.low (!%p248_p2), %v707_v26, %v707_v26  ;;  %v753_v59 = vld [vmem:[%s2302_s0] sm:$0x22] (!%p248_p2) }
   0xc   : > { %v325_v30 = vpack.i.b16 (!%p248_p2), %v1706_v22, %v1706_v22  ;;  %v332_v31 = vpack.i.b16 (!%p248_p2), %v1707_v23, %v1707_v23  ;;  %v367_v35 = vpack.i.b16 (!%p248_p2), %v366_v24, %v366_v24  ;;  %v375_v36 = vpack.i.b16 (!%p248_p2), %v374_v25, %v374_v25  ;;  %v797_v24 = vld [vmem:[%s2302_s0] sm:$0x22] (!%p248_p2) }
   0xd   : > { %s2311_s25 = smov (!%p284_p3, %s1693_s25), 1  ;;  %v675_v37 = vrot.slane %v670_v27, %v2068_v28  ;;  %v682_v38 = vrot.slane %v677_v29, %v2068_v28  ;;  %v722_v42 = vshrl.u32 %v1737_v32, 16  ;;  %v714_v57 = vshrl.u32 %v1736_v41, 16 }
   0xe   : > { %s1821_s26 = sshll.u32 %s2311_s25, 4  ;;  %s1820_s27 = sshll.u32 %s2311_s25, 3  ;;  %v330_v39 = vrot.slane %v325_v30, %v2068_v28  ;;  %v337_v40 = vrot.slane %v332_v31, %v2068_v28  ;;  %v372_v45 = vrot.slane %v367_v35, %v2068_v28  ;;  %v380_v46 = vrot.slane %v375_v36, %v2068_v28 }
   0xf   : > { %s293_s30 = scalar_lea.vmem %s2304_s2, %s1821_s26  ;;  %s288_s10 = scalar_lea.vmem %s2303_s1, %s1820_s27  ;;  %v723_v58 = vpack.i.b16 %v722_v42, %v722_v42  ;;  %v1712_v10 = vcombine.low %v402_v56, %v402_v56  ;;  %v1713_v11 = vcombine.high %v402_v56, %v402_v56  ;;  %v1740_v14 = vcombine.low %v753_v59, %v753_v59 }
  0x10   : > { %v1993_v0 = vld [vmem:[%s293_s30] sm:$0xff]  ;;  %v1995_v1 = vld [vmem:[%s293_s30 + $0x8] sm:$0xff]  ;;  %v1741_v15 = vcombine.high %v753_v59, %v753_v59  ;;  %v715_v16 = vpack.i.b16 %v714_v57, %v714_v57  ;;  %v2097_v29 = vsub.s32 1, %v2062_v20  ;;  %vm563_vm7 = vcmask 916480  }
  0x11   : > { %v1997_v2 = vld [vmem:[%s288_s10] sm:$0xff]  ;;  %v1730_v3 = vcombine.high %v1993_v0, %v1995_v1  ;;  %v1731_v5 = vcombine.low %v1993_v0, %v1995_v1  ;;  %v728_v19 = vrot.slane %v723_v58, %v2068_v28  ;;  %v409_v27 = vpack.i.b16 %v1712_v10, %v1712_v10 }
  0x12   : > { %v1704_v4 = vcombine.high %v1997_v2, %v1997_v2  ;;  %v1705_v6 = vcombine.low %v1997_v2, %v1997_v2  ;;  %v1779_v7 = vcombine.high %v1997_v2, %v1993_v0  ;;  %v1778_v8 = vcombine.low %v1997_v2, %v1993_v0 }
  0x13   : > { %650 = vrot.lane.b32.xlu1 %v1730_v3, %s1924_s11  ;;  %v416_v31 = vpack.i.b16 %v1713_v11, %v1713_v11  ;;  %v760_v32 = vpack.i.b16 %v1740_v14, %v1740_v14  ;;  %v720_v35 = vrot.slane %v715_v16, %v2068_v28  ;;  %vm606_vm8 = vcmask 908288  }
  0x14   : > { %304 = vrot.lane.b32.xlu0 %v1704_v4, %s1924_s11  ;;  %vm1194_vm9 = vcmask 1043456   ;;  %vm1564_vm10 = vcmask 588800  }
  0x17   : > { %655 = vrot.lane.b32.xlu1 %v1731_v5, %s1924_s11 }
  0x18   : > { %308 = vrot.lane.b32.xlu0 %v1705_v6, %s1924_s11 }
  0x1b   : > { %349 = vrot.lane.b32.xlu1 %v1705_v6, %s1925_s12 }
  0x1c   : > { %347 = vrot.lane.b32.xlu0 %v1704_v4, %s1925_s12 }
  0x1f   : > { %699 = vrot.lane.b32.xlu1 %v1731_v5, %s1925_s12 }
  0x20   : > { %697 = vrot.lane.b32.xlu0 %v1730_v3, %s1925_s12 }
  0x23   : > { %392 = vrot.lane.b32.xlu1 %v1705_v6, %s1926_s13 }
  0x24   : > { %390 = vrot.lane.b32.xlu0 %v1704_v4, %s1926_s13 }
  0x27   : > { %745 = vrot.lane.b32.xlu1 %v1731_v5, %s1926_s13 }
  0x28   : > { %743 = vrot.lane.b32.xlu0 %v1730_v3, %s1926_s13 }
  0x2b   : > { %433 = vrot.lane.b32.xlu1 %v1705_v6, %s1927_s14 }
  0x2c   : > { %431 = vrot.lane.b32.xlu0 %v1704_v4, %s1927_s14 }
  0x2f   : > { %789 = vrot.lane.b32.xlu1 %v1731_v5, %s1927_s14 }
  0x30   : > { %787 = vrot.lane.b32.xlu0 %v1730_v3, %s1927_s14 }
  0x33   : > { %477 = vrot.lane.b32.xlu1 %v1704_v4, %s1928_s15 }
  0x34   : > { %475 = vrot.lane.b32.xlu0 %v1705_v6, %s1928_s15 }
  0x37   : > { %837 = vrot.lane.b32.xlu1 %v1730_v3, %s1928_s15 }
  0x38   : > { %835 = vrot.lane.b32.xlu0 %v1731_v5, %s1928_s15 }
  0x3b   : > { %520 = vrot.lane.b32.xlu1 %v1704_v4, %s1929_s16 }
  0x3c   : > { %518 = vrot.lane.b32.xlu0 %v1705_v6, %s1929_s16 }
  0x3f   : > { %883 = vrot.lane.b32.xlu1 %v1730_v3, %s1929_s16 }
  0x40   : > { %881 = vrot.lane.b32.xlu0 %v1731_v5, %s1929_s16 }
  0x43   : > { %561 = vrot.lane.b32.xlu1 %v1704_v4, %s1930_s17 }
  0x44   : > { %559 = vrot.lane.b32.xlu0 %v1705_v6, %s1930_s17 }
  0x47   : > { %927 = vrot.lane.b32.xlu1 %v1730_v3, %s1930_s17 }
  0x48   : > { %925 = vrot.lane.b32.xlu0 %v1731_v5, %s1930_s17 }
  0x4b   : > { %604 = vrot.lane.b32.xlu1 %v1704_v4, %s1931_s18  ;;  %v1716_v4 = vcombine.high %v443_v51, %v443_v51 }
  0x4c   : > { %602 = vrot.lane.b32.xlu0 %v1705_v6, %s1931_s18 }
  0x4d   : > { %v458_v23 = vshrl.u32 %v1716_v4, 16 }
  0x4f   : > { %973 = vrot.lane.b32.xlu1 %v1730_v3, %s1931_s18  ;;  %v1715_v3 = vcombine.low %v443_v51, %v443_v51 }
  0x50   : > { %971 = vrot.lane.b32.xlu0 %v1731_v5, %s1931_s18 }
  0x51   : > { %v450_v22 = vshrl.u32 %v1715_v3, 16 }
  0x53   : > { %v451_v42 = vpack.i.b16 %v450_v22, %v450_v22  ;;  %v2120_v22 = vsub.s32 2, %v2062_v20 }
  0x54   : > { %1046 = vperm.xlu0 %1877, %v1043_v12  }
  0x55   : > { %v456_v56 = vrot.slane %v451_v42, %v2097_v29 }
  0x85   : > { %v651_v33 = vpop.permute.xlu1 %650 }
  0x86   : > { %v305_v34 = vpop.permute.xlu0 %304 }
  0x89   : > { %v656_v43 = vpop.permute.xlu1 %655 }
  0x8a   : > { %v309_v44 = vpop.permute.xlu0 %308  ;;  %v657_v47 = vsel %vm310_vm1, %v656_v43, %v651_v33  ;;  %v661_v48 = vsel %vm310_vm1, %v651_v33, %v656_v43  ;;  %v767_v33 = vpack.i.b16 %v1741_v15, %v1741_v15  ;;  %v459_v43 = vpack.i.b16 %v458_v23, %v458_v23  ;;  %v845_v15 = vld [vmem:[%s2302_s0] sm:$0x44] }
  0x8b   : > { %v311_v49 = vsel %vm310_vm1, %v309_v44, %v305_v34  ;;  %v316_v50 = vsel %vm310_vm1, %v305_v34, %v309_v44  ;;  %v683_v52 = vmul.bf16 %v675_v37, %v661_v48  ;;  %v684_v53 = vmul.bf16 %v682_v38, %v657_v47  ;;  %v487_v34 = vld [vmem:[%s2302_s0] sm:$0x44] }
  0x8c   : > { %v338_v54 = vmul.bf16 %v330_v39, %v316_v50  ;;  %v339_v55 = vmul.bf16 %v337_v40, %v311_v49  ;;  %v1745_v37 = vcombine.high %v797_v24, %v797_v24  ;;  %v1718_v44 = vcombine.low %v487_v34, %v487_v34 }
  0x8d   : > { %v350_v60 = vpop.permute.xlu1 %349  ;;  %v1735_v25 = vcombine.high %v683_v52, %v684_v53  ;;  %v421_v47 = vrot.slane %v416_v31, %v2097_v29  ;;  %v765_v48 = vrot.slane %v760_v32, %v2097_v29  ;;  %v772_v49 = vrot.slane %v767_v33, %v2097_v29 }
  0x8e   : > { %v348_v61 = vpop.permute.xlu0 %347  ;;  %v1834_v62 = vcombine.low %v339_v55, %v684_v53  ;;  %v1833_v63 = vcombine.low %v338_v54, %v683_v52  ;;  %v464_v57 = vrot.slane %v459_v43, %v2097_v29  ;;  %v812_v58 = vshrl.u32 %v1745_v37, 16  ;;  %v891_v43 = vld [vmem:[%s2302_s0] sm:$0x88] }
  0x8f   : > { %v352_v5 = vsel %vm351_vm2, %v350_v60, %v348_v61  ;;  %v357_v6 = vsel %vm351_vm2, %v348_v61, %v350_v60  ;;  %v494_v61 = vshrl.u32 %v1718_v44, 16  ;;  %v1748_v32 = vcombine.low %v845_v15, %v845_v15 }
  0x90   : > { %v381_v12 = vmul.bf16 %v372_v45, %v357_v6  ;;  %v382_v13 = vmul.bf16 %v380_v46, %v352_v5  ;;  %1201 = vmatprep.subr.bf16.mxu0 %v1834_v62  ;;  %v1719_v45 = vcombine.high %v487_v34, %v487_v34  ;;  %v414_v46 = vrot.slane %v409_v27, %v2097_v29 }
  0x91   : > { %1202 = vmatpush1.bf16.msra.mxu0 %v1833_v63  ;;  %v700_v18 = vpop.permute.xlu1 %699  ;;  %v813_v14 = vpack.i.b16 %v812_v58, %v812_v58 }
  0x92   : > { %v1711_v17 = vcombine.low %v381_v12, %v382_v13  ;;  %v698_v21 = vpop.permute.xlu0 %697  ;;  %v1835_v36 = vcombine.low %v1735_v25, %v381_v12  ;;  %v502_v62 = vshrl.u32 %v1719_v45, 16  ;;  %v1749_v25 = vcombine.high %v845_v15, %v845_v15 }
  0x93   : > { %v701_v26 = vsel %vm351_vm2, %v700_v18, %v698_v21  ;;  %v705_v38 = vsel %vm351_vm2, %v698_v21, %v700_v18  ;;  %v495_v18 = vpack.i.b16 %v494_v61, %v494_v61 }
  0x94   : > { %v1836_v30 = vcombine.high %v684_v53, %v1711_v17  ;;  %v730_v39 = vmul.bf16 %v728_v19, %v701_v26  ;;  %v729_v50 = vmul.bf16 %v720_v35, %v705_v38  ;;  %v1744_v53 = vcombine.low %v797_v24, %v797_v24  ;;  %v530_v38 = vld [vmem:[%s2302_s0] sm:$0x88] }
  0x95   : > { %v393_v40 = vpop.permute.xlu1 %392  ;;  %v503_v23 = vpack.i.b16 %v502_v62, %v502_v62  ;;  %v860_v42 = vshrl.u32 %v1749_v25, 16 }
  0x96   : > { %1203 = vmatprep.subr.bf16.mxu0 %v1836_v30  ;;  %v391_v41 = vpop.permute.xlu0 %390  ;;  %v804_v6 = vshrl.u32 %v1744_v53, 16  ;;  %v818_v30 = vrot.slane %v813_v14, %v2097_v29 }
  0x97   : > { %1204 = vmatpush1.bf16.msra.mxu0 %v1835_v36  ;;  %v395_v51 = vsel %vm394_vm3, %v393_v40, %v391_v41  ;;  %v400_v52 = vsel %vm394_vm3, %v391_v41, %v393_v40  ;;  %v500_v36 = vrot.slane %v495_v18, %v2120_v22  ;;  %v508_v37 = vrot.slane %v503_v23, %v2120_v22 }
  0x98   : > { %1205 = vmatprep.subr.bf16.mxu0 %v730_v39  ;;  %v422_v63 = vmul.bf16 %v414_v46, %v400_v52  ;;  %v423_v3 = vmul.bf16 %v421_v47, %v395_v51  ;;  %v805_v24 = vpack.i.b16 %v804_v6, %v804_v6  ;;  %v571_v39 = vld [vmem:[%s2302_s0] sm:$0x88]  ;;  %v1722_v51 = vcombine.high %v530_v38, %v530_v38 }
  0x99   : > { %v746_v54 = vpop.permute.xlu1 %745  ;;  %v1724_v52 = vcombine.low %v571_v39, %v571_v39  ;;  %v861_v58 = vpack.i.b16 %v860_v42, %v860_v42  ;;  %v2146_v6 = vsub.s32 3, %v2062_v20 }
  0x9a   : > { %v744_v55 = vpop.permute.xlu0 %743  ;;  %v810_v40 = vrot.slane %v805_v24, %v2097_v29 }
  0x9b   : > { %v747_v59 = vsel %vm394_vm3, %v746_v54, %v744_v55  ;;  %v751_v60 = vsel %vm394_vm3, %v744_v55, %v746_v54  ;;  %1206 = vmatpush1.bf16.msra.mxu0 %v729_v50  ;;  %v1753_v55 = vcombine.high %v891_v43, %v891_v43 }
  0x9c   : > { %v773_v4 = vmul.bf16 %v765_v48, %v751_v60  ;;  %v774_v5 = vmul.bf16 %v772_v49, %v747_v59  ;;  %v852_v48 = vshrl.u32 %v1748_v32, 16  ;;  %v1752_v59 = vcombine.low %v891_v43, %v891_v43 }
  0x9d   : > { %v434_v10 = vpop.permute.xlu1 %433 }
  0x9e   : > { %v432_v11 = vpop.permute.xlu0 %431  ;;  %v1838_v12 = vcombine.low %v423_v3, %v774_v5  ;;  %v1837_v13 = vcombine.low %v422_v63, %v773_v4  ;;  %v1743_v33 = vcombine.high %v773_v4, %v774_v5  ;;  %v1721_v63 = vcombine.low %v530_v38, %v530_v38 }
  0x9f   : > { %v436_v16 = vsel %vm435_vm4, %v434_v10, %v432_v11  ;;  %v441_v17 = vsel %vm435_vm4, %v432_v11, %v434_v10  ;;  %v853_v3 = vpack.i.b16 %v852_v48, %v852_v48  ;;  %v578_v4 = vshrl.u32 %v1724_v52, 16 }
  0xa0   : > { %v465_v19 = vmul.bf16 %v456_v56, %v441_v17  ;;  %v466_v21 = vmul.bf16 %v464_v57, %v436_v16  ;;  %1207 = vmatprep.subr.bf16.mxu0 %v1838_v12  ;;  %v1725_v56 = vcombine.high %v571_v39, %v571_v39  ;;  %v544_v10 = vpack.i.b16 %v1722_v51, %v1722_v51 }
  0xa1   : > { %1208 = vmatpush1.bf16.msra.mxu0 %v1837_v13  ;;  %v790_v27 = vpop.permute.xlu1 %789  ;;  %v905_v11 = vpack.i.b16 %v1753_v55, %v1753_v55  ;;  %v866_v13 = vrot.slane %v861_v58, %v2120_v22  ;;  %v898_v14 = vpack.i.b16 %v1752_v59, %v1752_v59  ;;  %v537_v16 = vpack.i.b16 %v1721_v63, %v1721_v63 }
  0xa2   : > { %v1717_v26 = vcombine.low %v465_v19, %v466_v21  ;;  %v788_v31 = vpop.permute.xlu0 %787  ;;  %v1839_v41 = vcombine.low %v1743_v33, %v465_v19  ;;  %v586_v12 = vshrl.u32 %v1725_v56, 16  ;;  %v858_v23 = vrot.slane %v853_v3, %v2120_v22 }
  0xa3   : > { %v791_v34 = vsel %vm435_vm4, %v790_v27, %v788_v31  ;;  %v795_v44 = vsel %vm435_vm4, %v788_v31, %v790_v27  ;;  %v549_v24 = vrot.slane %v544_v10, %v2146_v6  ;;  %v910_v25 = vrot.slane %v905_v11, %v2146_v6 }
  0xa4   : > { %v1840_v35 = vcombine.high %v774_v5, %v1717_v26  ;;  %v820_v45 = vmul.bf16 %v818_v30, %v791_v34  ;;  %v819_v57 = vmul.bf16 %v810_v40, %v795_v44  ;;  %v935_v5 = vld [vmem:[%s2302_s0] sm:$0x88]  ;;  %v587_v26 = vpack.i.b16 %v586_v12, %v586_v12 }
  0xa5   : > { %v478_v46 = vpop.permute.xlu1 %477  ;;  %v1757_v19 = vcombine.high %v935_v5, %v935_v5  ;;  %v903_v30 = vrot.slane %v898_v14, %v2146_v6  ;;  %v1756_v32 = vcombine.low %v935_v5, %v935_v5  ;;  %v542_v2 = vrot.slane %v537_v16, %v2146_v6 }
  0xa6   : > { %1209 = vmatprep.subr.bf16.mxu0 %v1840_v35  ;;  %v476_v47 = vpop.permute.xlu0 %475  ;;  %v592_v42 = vrot.slane %v587_v26, %v2146_v6 }
  0xa7   : > { %v480_v49 = vsel %vm479_vm5, %v476_v47, %v478_v46  ;;  %v485_v50 = vsel %vm479_vm5, %v478_v46, %v476_v47  ;;  %1210 = vmatpush1.bf16.msra.mxu0 %v1839_v41  ;;  %v950_v35 = vshrl.u32 %v1757_v19, 16  ;;  %v981_v46 = vld [vmem:[%s2302_s0 + $0x8] sm:$0x11] }
  0xa8   : > { %v509_v53 = vmul.bf16 %v500_v36, %v480_v49  ;;  %v510_v54 = vmul.bf16 %v508_v37, %v485_v50  ;;  %1211 = vmatprep.subr.bf16.mxu0 %v820_v45  ;;  %v942_v45 = vshrl.u32 %v1756_v32, 16  ;;  %v1760_v58 = vcombine.low %v981_v46, %v981_v46 }
  0xa9   : > { %v838_v61 = vpop.permute.xlu1 %837  ;;  %v951_v50 = vpack.i.b16 %v950_v35, %v950_v35  ;;  %v1761_v59 = vcombine.high %v981_v46, %v981_v46 }
  0xaa   : > { %v1720_v60 = vcombine.low %v509_v53, %v510_v54  ;;  %v836_v62 = vpop.permute.xlu0 %835  ;;  %v1841_v31 = vcombine.low %v1995_v1, %v509_v53  ;;  %v988_v14 = vpack.i.b16 %v1760_v58, %v1760_v58  ;;  %v1255_v58 = vld [vmem:[%s2302_s0] sm:$0x11] }
  0xab   : > { %1212 = vmatpush1.bf16.msra.mxu0 %v819_v57  ;;  %v843_v21 = vsel %vm479_vm5, %v838_v61, %v836_v62  ;;  %v839_v33 = vsel %vm479_vm5, %v836_v62, %v838_v61  ;;  %v956_v3 = vrot.slane %v951_v50, %v2146_v6 }
  0xac   : > { %1213 = vmatprep.subr.bf16.mxu0 %v1779_v7  ;;  %v1781_v18 = vcombine.high %v1995_v1, %v1720_v60  ;;  %v579_v7 = vpack.i.b16 %v578_v4, %v578_v4  ;;  %v868_v0 = vmul.bf16 %v866_v13, %v843_v21  ;;  %v614_v1 = vld [vmem:[%s2302_s0 + $0x8] sm:$0x11]  ;;  %v867_v43 = vmul.bf16 %v858_v23, %v839_v33 }
  0xad   : > { %v521_v15 = vpop.permute.xlu1 %520  ;;  %v1727_v51 = vcombine.low %v614_v1, %v614_v1  ;;  %v1728_v55 = vcombine.high %v614_v1, %v614_v1  ;;  %v943_v60 = vpack.i.b16 %v942_v45, %v942_v45 }
  0xae   : > { %v519_v17 = vpop.permute.xlu0 %518  ;;  %v584_v38 = vrot.slane %v579_v7, %v2146_v6 }
  0xaf   : > { %1214 = vmatpush1.bf16.msra.mxu0 %v1778_v8  ;;  %v528_v27 = vsel %vm522_vm6, %v521_v15, %v519_v17  ;;  %v523_v39 = vsel %vm522_vm6, %v519_v17, %v521_v15  ;;  %v621_v11 = vpack.i.b16 %v1727_v51, %v1727_v51  ;;  %v628_v13 = vpack.i.b16 %v1728_v55, %v1728_v55 }
  0xb0   : > { %1215 = vmatprep.subr.bf16.mxu0 %v1781_v18  ;;  %v551_v40 = vmul.bf16 %v549_v24, %v528_v27  ;;  %v550_v52 = vmul.bf16 %v542_v2, %v523_v39  ;;  %v995_v15 = vpack.i.b16 %v1761_v59, %v1761_v59  ;;  %v948_v16 = vrot.slane %v943_v60, %v2146_v6  ;;  %v1317_v60 = vld [vmem:[%s2302_s0] sm:$0x22] }
  0xb1   : > { %v884_v8 = vpop.permute.xlu1 %883  ;;  %v626_v23 = vrot.slane %v621_v11, %v2068_v28  ;;  %v633_v24 = vrot.slane %v628_v13, %v2068_v28  ;;  %v1318_v11 = vunpack.c.l.bf16 %v1317_v60 }
  0xb2   : > { %v882_v34 = vpop.permute.xlu0 %881  ;;  %v1000_v26 = vrot.slane %v995_v15, %v2068_v28 }
  0xb3   : > { %v885_v36 = vsel %vm522_vm6, %v882_v34, %v884_v8  ;;  %v889_v37 = vsel %vm522_vm6, %v884_v8, %v882_v34  ;;  %1216 = vmatpush1.bf16.msra.mxu0 %v1841_v31 }
  0xb4   : > { %v912_v41 = vmul.bf16 %v910_v25, %v889_v37  ;;  %1217 = vmatprep.subr.bf16.mxu0 %v868_v0  ;;  %v911_v44 = vmul.bf16 %v903_v30, %v885_v36  ;;  %v993_v25 = vrot.slane %v988_v14, %v2068_v28 }
  0xb5   : > { %v562_v47 = vpop.permute.xlu1 %561 }
  0xb6   : > { %v560_v48 = vpop.permute.xlu0 %559  ;;  %v1843_v49 = vcombine.low %v551_v40, %v912_v41  ;;  %v1842_v61 = vcombine.low %v550_v52, %v911_v44  ;;  %v1755_v5 = vcombine.high %v911_v44, %v912_v41 }
  0xb7   : > { %v564_v53 = vsel %vm563_vm7, %v560_v48, %v562_v47  ;;  %v569_v54 = vsel %vm563_vm7, %v562_v47, %v560_v48  ;;  %1218 = vmatpush1.bf16.msra.mxu0 %v867_v43 }
  0xb8   : > { %v593_v56 = vmul.bf16 %v584_v38, %v564_v53  ;;  %v594_v57 = vmul.bf16 %v592_v42, %v569_v54  ;;  %1219 = vmatprep.subr.bf16.mxu0 %v1843_v49  ;;  %v1286_v54 = vld [vmem:[%s2302_s0] sm:$0x11] }
  0xb9   : > { %v928_v63 = vpop.permute.xlu1 %927 }
  0xba   : > { %v1726_v62 = vcombine.low %v593_v56, %v594_v57  ;;  %v926_v4 = vpop.permute.xlu0 %925  ;;  %v1844_v17 = vcombine.low %v1755_v5, %v593_v56  ;;  %v1287_v56 = vunpack.c.l.bf16 %v1286_v54  ;;  %v1348_v57 = vld [vmem:[%s2302_s0] sm:$0x22]  ;;  %v1257_v5 = vunpack.c.h.bf16 %v1255_v58 }
  0xbb   : > { %v933_v10 = vsel %vm563_vm7, %v928_v63, %v926_v4  ;;  %1220 = vmatpush1.bf16.msra.mxu0 %v1842_v61  ;;  %v929_v18 = vsel %vm563_vm7, %v926_v4, %v928_v63  ;;  %v1288_v63 = vunpack.c.h.bf16 %v1286_v54  ;;  %v1256_v4 = vunpack.c.l.bf16 %v1255_v58  ;;  %v1481_v54 = vld [vmem:[%s2302_s0 + $0x8] sm:$0x11] }
  0xbc   : > { %v1845_v12 = vcombine.high %v912_v41, %v1726_v62  ;;  %v958_v19 = vmul.bf16 %v956_v3, %v933_v10  ;;  %v957_v27 = vmul.bf16 %v948_v16, %v929_v18  ;;  %v1764_v41 = vcombine.low %v2044_v9, %v2044_v9  ;;  %v1513_v9 = vld [vmem:[%s2308_s6] sm:$0xff] }
  0xbd   : > { %v605_v21 = vpop.permute.xlu1 %604  ;;  %v1388_v62 = vld [vmem:[%s2302_s0] sm:$0x44]  ;;  %v1350_v3 = vunpack.c.h.bf16 %v1348_v57  ;;  %v1292_v10 = vrot.slane %v1287_v56, %v2097_v29  ;;  %v1349_v14 = vunpack.c.l.bf16 %v1348_v57  ;;  %v1455_v58 = vsub.s32 7, %v2062_v20 }
  0xbe   : > { %1221 = vmatprep.subr.bf16.mxu0 %v1845_v12  ;;  %v603_v7 = vpop.permute.xlu0 %602  ;;  %v1319_v12 = vunpack.c.h.bf16 %v1317_v60  ;;  %v1390_v16 = vunpack.c.h.bf16 %v1388_v62 }
  0xbf   : > { %1222 = vmatpush1.bf16.msra.mxu0 %v1844_v17  ;;  %v607_v30 = vsel %vm606_vm8, %v603_v7, %v605_v21  ;;  %v612_v31 = vsel %vm606_vm8, %v605_v21, %v603_v7  ;;  %v1393_v17 = vsub.s32 5, %v2062_v20  ;;  %v1358_v7 = vrot.slane %v1350_v3, %v2146_v6 }
  0xc0   : > { %1223 = vmatprep.subr.bf16.mxu0 %v958_v19  ;;  %v634_v8 = vmul.bf16 %v626_v23, %v607_v30  ;;  %v635_v34 = vmul.bf16 %v633_v24, %v612_v31  ;;  %v1296_v19 = vrot.slane %v1288_v63, %v2097_v29  ;;  %v1261_v23 = vrot.slane %v1256_v4, %v2068_v28 }
  0xc1   : > { %v974_v32 = vpop.permute.xlu1 %973  ;;  %v1265_v24 = vrot.slane %v1257_v5, %v2068_v28  ;;  %v1327_v31 = vrot.slane %v1319_v12, %v2120_v22  ;;  %v1398_v29 = vrot.slane %v1390_v16, %v1393_v17  ;;  %v1483_v4 = vunpack.c.h.bf16 %v1481_v54 }
  0xc2   : > { %v972_v33 = vpop.permute.xlu0 %971 }
  0xc3   : > { %v975_v0 = vsel %vm606_vm8, %v972_v33, %v974_v32  ;;  %v979_v2 = vsel %vm606_vm8, %v974_v32, %v972_v33  ;;  %1224 = vmatpush1.bf16.msra.mxu0 %v957_v27  ;;  %v1389_v27 = vunpack.c.l.bf16 %v1388_v62  ;;  %v1354_v32 = vrot.slane %v1349_v14, %v2146_v6  ;;  %v1450_v6 = vld [vmem:[%s2302_s0] sm:$0x88] }
  0xc4   : > { %v1001_v35 = vmul.bf16 %v993_v25, %v975_v0  ;;  %v1002_v36 = vmul.bf16 %v1000_v26, %v979_v2  ;;  %v1323_v25 = vrot.slane %v1318_v11, %v2120_v22  ;;  %v1419_v0 = vld [vmem:[%s2302_s0] sm:$0x88] }
  0xc6   : > { %v1847_v37 = vcombine.low %v635_v34, %v1002_v36  ;;  %v1846_v38 = vcombine.low %v634_v8, %v1001_v35  ;;  %v1849_v1 = vcombine.high %v1002_v36, %v1002_v36  ;;  %v1848_v39 = vcombine.high %v1001_v35, %v1001_v35 }
  0xc8   : > { %1225 = vmatprep.subr.bf16.mxu0 %v1847_v37  ;;  %v1196_v40 = vsel %vm1194_vm9, %v1848_v39, 0  ;;  %v1420_v39 = vunpack.c.l.bf16 %v1419_v0 }
  0xc9   : > { %1226 = vmatpush1.bf16.msra.mxu0 %v1846_v38 }
  0xca   : > { %1794 = vmatprep.subr.msk.bf16.mxu0 %vm1194_vm9, %v1849_v1  ;;  %v1394_v1 = vrot.slane %v1389_v27, %v1393_v17 }
  0xcd   : > { %1228 = vmatpush1.bf16.msra.mxu0 %v1196_v40  ;;  %v1421_v40 = vunpack.c.h.bf16 %v1419_v0  ;;  %v1503_v0 = vld [vmem:[%s2307_s5] sm:$0xf] }
  0xd0   : > { %1234 = vmatmul.mubr.bf16.vlgmr.msra.gmra.mrb[0].mxu0 %v1764_v41  ;;  %v1424_v41 = vsub.s32 6, %v2062_v20 }
  0xd2   : > { %v1425_v63 = vrot.slane %v1420_v39, %v1424_v41 }
  0xd3   : > { %v1047_v42 = vpop.permute.xlu0 %1046 }
 0x1a3   : > { %v1235_v43 = vpop.f32.mrb[0].mxu0 }
 0x1a4   : > { %v1236_v44 = vadd.f32 %v1235_v43, %v1047_v42  ;;  %v1237_v45 = vpop.f32.mrb[1].mxu0 }
 0x1a5   : > { %v1239_v46 = vpop.f32.mrb[2].mxu0  ;;  %v1238_v48 = vadd.f32 %v1237_v45, %v1047_v42 }
 0x1a6   : > { %v2191_v47 = vmax.f32 %v1236_v44, 0.0  ;;  %v1240_v49 = vpop.f32.mrb[3].mxu0 }
 0x1a7   : > { %v2197_v50 = vmax.f32 %v1238_v48, 0.0 }
 0x1a8   : > { %1379 = vrot.lane.b32.xlu0 %v2191_v47, %s1928_s15  ;;  %1249 = vrot.lane.b32.xlu1 %v2191_v47, %s1924_s11 }
 0x1ac   : > { %1277 = vrot.lane.b32.xlu0 %v2197_v50, %s1925_s12  ;;  %1280 = vrot.lane.b32.xlu1 %v2191_v47, %s1925_s12 }
 0x1b0   : > { %1308 = vrot.lane.b32.xlu0 %v2197_v50, %s1926_s13  ;;  %1311 = vrot.lane.b32.xlu1 %v2191_v47, %s1926_s13 }
 0x1b4   : > { %1339 = vrot.lane.b32.xlu0 %v2197_v50, %s1927_s14  ;;  %1342 = vrot.lane.b32.xlu1 %v2191_v47, %s1927_s14 }
 0x1b8   : > { %1410 = vrot.lane.b32.xlu0 %v2191_v47, %s1929_s16  ;;  %1245 = vrot.lane.b32.xlu1 %v2197_v50, %s1924_s11  ;;  %s298_s11 = scalar_lea.vmem %s2309_s7, %s1820_s27 }
 0x1bc   : > { %1441 = vrot.lane.b32.xlu0 %v2191_v47, %s1930_s17  ;;  %1381 = vrot.lane.b32.xlu1 %v2197_v50, %s1928_s15 }
 0x1c0   : > { %1472 = vrot.lane.b32.xlu0 %v2191_v47, %s1931_s18  ;;  %1412 = vrot.lane.b32.xlu1 %v2197_v50, %s1929_s16 }
 0x1c4   : > { %1516 = vperm.xlu0 %1877, %v1513_v9   ;;  %1443 = vrot.lane.b32.xlu1 %v2197_v50, %s1930_s17 }
 0x1c8   : > { %1474 = vrot.lane.b32.xlu1 %v2197_v50, %s1931_s18 }
 0x21a   : > { %v2230_v51 = vpop.permute.xlu0 %1379  ;;  %v1250_v52 = vpop.permute.xlu1 %1249 }
 0x21e   : > { %v1278_v53 = vpop.permute.xlu0 %1277  ;;  %v1281_v55 = vpop.permute.xlu1 %1280 }
 0x21f   : > { %v1285_v18 = vsel %vm351_vm2, %v1278_v53, %v1281_v55  ;;  %v1282_v21 = vsel %vm351_vm2, %v1281_v55, %v1278_v53  ;;  %v1452_v53 = vunpack.c.h.bf16 %v1450_v6 }
 0x220   : > { %v1297_v30 = vmul.f32 %v1292_v10, %v1285_v18  ;;  %v1298_v35 = vmul.f32 %v1296_v19, %v1282_v21  ;;  %v1429_v10 = vrot.slane %v1421_v40, %v1424_v41  ;;  %v1491_v19 = vrot.slane %v1483_v4, %v2068_v28 }
 0x222   : > { %v1309_v59 = vpop.permute.xlu0 %1308  ;;  %v1312_v61 = vpop.permute.xlu1 %1311 }
 0x223   : > { %v1313_v2 = vsel %vm394_vm3, %v1312_v61, %v1309_v59  ;;  %v1316_v42 = vsel %vm394_vm3, %v1309_v59, %v1312_v61  ;;  %v1482_v61 = vunpack.c.l.bf16 %v1481_v54 }
 0x224   : > { %v1329_v43 = vmul.f32 %v1327_v31, %v1313_v2  ;;  %v1328_v59 = vmul.f32 %v1323_v25, %v1316_v42 }
 0x226   : > { %v1340_v13 = vpop.permute.xlu0 %1339  ;;  %v1343_v15 = vpop.permute.xlu1 %1342 }
 0x227   : > { %v1344_v26 = vsel %vm435_vm4, %v1343_v15, %v1340_v13  ;;  %v1347_v36 = vsel %vm435_vm4, %v1340_v13, %v1343_v15  ;;  %v1487_v15 = vrot.slane %v1482_v61, %v2068_v28 }
 0x228   : > { %v1360_v37 = vmul.f32 %v1358_v7, %v1344_v26  ;;  %v1359_v49 = vmul.f32 %v1354_v32, %v1347_v36 }
 0x22a   : > { %v1246_v33 = vpop.permute.xlu1 %1245  ;;  %v1411_v44 = vpop.permute.xlu0 %1410  ;;  %v1853_v57 = vpack.c.bf16 %v1360_v37, %v1329_v43  ;;  %v1852_v3 = vpack.c.bf16 %v1359_v49, %v1328_v59 }
 0x22b   : > { %v1251_v8 = vsel %vm310_vm1, %v1250_v52, %v1246_v33  ;;  %v1254_v34 = vsel %vm310_vm1, %v1246_v33, %v1250_v52  ;;  %v1451_v52 = vunpack.c.l.bf16 %v1450_v6 }
 0x22c   : > { %v1266_v38 = vmul.f32 %v1261_v23, %v1254_v34  ;;  %v1267_v22 = vmul.f32 %v1265_v24, %v1251_v8 }
 0x22d   : > { %v1456_v12 = vrot.slane %v1451_v52, %v1455_v58 }
 0x22e   : > { %v1382_v45 = vpop.permute.xlu1 %1381  ;;  %v1851_v46 = vpack.c.bf16 %v1298_v35, %v1267_v22  ;;  %v1850_v48 = vpack.c.bf16 %v1297_v30, %v1266_v38  ;;  %v1442_v5 = vpop.permute.xlu0 %1441 }
 0x22f   : > { %v1387_v9 = vsel %vm479_vm5, %v1382_v45, %v2230_v51  ;;  %v1383_v55 = vsel %vm479_vm5, %v2230_v51, %v1382_v45  ;;  %v1460_v51 = vrot.slane %v1452_v53, %v1455_v58 }
 0x230   : > { %v1400_v56 = vmul.f32 %v1398_v29, %v1387_v9  ;;  %1574 = vmatprep.subr.bf16.mxu1 %v1851_v46  ;;  %v1399_v62 = vmul.f32 %v1394_v1, %v1383_v55 }
 0x231   : > { %1575 = vmatpush1.bf16.msra.mxu1 %v1850_v48 }
 0x232   : > { %1576 = vmatprep.subr.bf16.mxu1 %v1853_v57  ;;  %v1413_v60 = vpop.permute.xlu1 %1412  ;;  %v1855_v11 = vpack.c.bf16 %v1400_v56, %v2197_v50  ;;  %v1854_v18 = vpack.c.bf16 %v1399_v62, %v2191_v47  ;;  %v1473_v24 = vpop.permute.xlu0 %1472 }
 0x233   : > { %v1414_v13 = vsel %vm522_vm6, %v1411_v44, %v1413_v60  ;;  %v1418_v14 = vsel %vm522_vm6, %v1413_v60, %v1411_v44 }
 0x234   : > { %v1430_v50 = vmul.f32 %v1425_v63, %v1414_v13  ;;  %v1431_v21 = vmul.f32 %v1429_v10, %v1418_v14 }
 0x235   : > { %1577 = vmatpush1.bf16.msra.mxu1 %v1852_v3 }
 0x236   : > { %1578 = vmatprep.subr.bf16.mxu1 %v1855_v11  ;;  %v1444_v20 = vpop.permute.xlu1 %1443 }
 0x237   : > { %v1445_v16 = vsel %vm563_vm7, %v1442_v5, %v1444_v20  ;;  %v1449_v17 = vsel %vm563_vm7, %v1444_v20, %v1442_v5 }
 0x238   : > { %v1461_v7 = vmul.f32 %v1456_v12, %v1445_v16  ;;  %v1462_v23 = vmul.f32 %v1460_v51, %v1449_v17 }
 0x239   : > { %1579 = vmatpush1.bf16.msra.mxu1 %v1854_v18 }
 0x23a   : > { %v1475_v25 = vpop.permute.xlu1 %1474  ;;  %v1857_v26 = vpack.c.bf16 %v1462_v23, %v1431_v21  ;;  %v1856_v27 = vpack.c.bf16 %v1461_v7, %v1430_v50 }
 0x23b   : > { %v1476_v30 = vsel %vm606_vm8, %v1473_v24, %v1475_v25  ;;  %v1480_v31 = vsel %vm606_vm8, %v1475_v25, %v1473_v24 }
 0x23c   : > { %v1492_v32 = vmul.f32 %v1487_v15, %v1476_v30  ;;  %v1493_v33 = vmul.f32 %v1491_v19, %v1480_v31  ;;  %1580 = vmatprep.subr.bf16.mxu1 %v1857_v26 }
 0x23d   : > { %1581 = vmatpush1.bf16.msra.mxu1 %v1856_v27 }
 0x23e   : > { %v1858_v47 = vpack.c.bf16 %v1492_v32, %v1492_v32  ;;  %v1859_v29 = vpack.c.bf16 %v1493_v33, %v1493_v33 }
 0x240   : > { %1815 = vmatprep.subr.msk.bf16.mxu1 %vm1194_vm9, %v1859_v29  ;;  %v1569_v28 = vsel %vm1194_vm9, %v1858_v47, 0 }
 0x241   : > { %1583 = vmatpush1.bf16.msra.mxu1 %v1569_v28 }
 0x243   : > { %v1517_v2 = vpop.permute.xlu0 %1516 }
 0x244   : > { %1816 = vmatmul.mubr.msk.bf16.vlgmr.msra.gmra.mrb[0].mxu1 %vm1564_vm10, %v1503_v0 }
 0x317   : > { %v1608_v8 = vpop.f32.mrb[0].mxu1 }
 0x318   : > { %v1609_v34 = vadd.f32 %v1608_v8, %v1517_v2  ;;  %v1610_v35 = vpop.f32.mrb[1].mxu1 }
 0x319   : > { %v1611_v36 = vadd.f32 %v1610_v35, %v1517_v2  ;;  %v1612_v37 = vpop.f32.mrb[2].mxu1 }
 0x31a   : > { %v1615_v38 = vmax.f32 %v1609_v34, 0.0  ;;  %v1613_v22 = vpop.f32.mrb[3].mxu1 }
 0x31b   : > { %v1616_v6 = vmax.f32 %v1611_v36, 0.0 }
 0x31d   : > { %v1832_v1 = vpack.c.bf16 %v1616_v6, %v1615_v38 }
 0x31f   : > { %1625 = vst [vmem:[%s298_s11] sm:$0xff] %v1832_v1 }
 0x320 PF: > { %s17_s24 = sadd.s32 1, %s1922_s24  }
 0x321   : > { %p14_p4 = scmp.ge.s32.totalorder %s17_s24, 4  }
 0x323   :  { %16 = sbr.rel (!%p14_p4) target bundleno = 1 (0x1), region = 81 }

// kernel: seg_qyl_forward.12
= control target key start
LH: loop header
LB: loop body
LE: loop exit
PB: predicated region body
PF: predicated region fallthrough
CT: control target
= control target key end

     0   :  { %s2150_s27 = smov 0   ;;  %s2594_s0 = inlined_call_operand.vmem [shape: bf16[9,256], index: 0, kind: input, shape index: {}]   ;;  %s2595_s1 = inlined_call_operand.vmem [shape: bf16[2,8,256], index: 1, kind: input, shape index: {}]   ;;  %s2596_s2 = inlined_call_operand.vmem [shape: bf16[2,8,256], index: 2, kind: input, shape index: {}]   ;;  %s2597_s3 = inlined_call_operand.vmem [shape: bf16[2,16,256], index: 3, kind: input, shape index: {}]   ;;  %s2598_s4 = inlined_call_operand.vmem [shape: bf16[8,288], index: 4, kind: input, shape index: {}]   ;;  %s2599_s5 = inlined_call_operand.vmem [shape: f32[8,1], index: 5, kind: input, shape index: {}]   ;;  %s2600_s6 = inlined_call_operand.vmem [shape: bf16[8,72], index: 6, kind: input, shape index: {}]   ;;  %s2601_s7 = inlined_call_operand.vmem [shape: f32[8,1], index: 7, kind: input, shape index: {}]   ;;  %s2602_s8 = inlined_call_operand.vmem [shape: bf16[2,8,256], index: 8, kind: output, shape index: {}]  }
   0x1 LB: > { %s1889_s28 = sadd.s32 4294967295, %s2094_s27   ;;  %p1893_p0 = scmp.ge.s32.totalorder %s2094_s27, 1  ;;  %s2094_s27 = sphi %s2150_s27, %s18_s27  }
   0x2   : > { %p282_p1 = scmp.lt.s32.totalorder %s2094_s27, 3 }
   0x4   : > { %p283_p2 = pnand %p1893_p0, %p282_p1 }
   0x5   : > { %p326_p3 = scmp.lt.s32.totalorder (!%p283_p2), %s1889_s28, 1  ;;  %s2096_s18 = smov (!%p283_p2), 17   ;;  %v2232_v8 = vld [vmem:[%s2598_s4] sm:$0xff] (!%p283_p2)  ;;  %v2104_v10 = vmov (!%p283_p2), 0   ;;  %v374_v12 = vlaneseq (!%p283_p2)  ;;  %vm357_vm0 = vcmask (!%p283_p2), 138240   ;;  %vm393_vm1 = vcmask (!%p283_p2), 130048  }
   0x6   : > { %286 = sbr.rel (%p283_p2) target bundleno = 830 (0x33e), region = 52  ;;  %s2097_s19 = smov (!%p283_p2), 16   ;;  %v1957_v9 = vcombine.high (!%p283_p2), %v2232_v8, %v2232_v8  ;;  %1416 = vmatprep.mubr.bf16.mxu1 (!%p283_p2), %v2104_v10  ;;  %2029 = vset.pattern.permute.xlu0 (!%p283_p2), %v2104_v10  ;;  %v1323_v11 = vld [vmem:[%s2599_s5] sm:$0xff] (!%p283_p2)  ;;  %vm431_vm2 = vcmask (!%p283_p2), 121856   ;;  %vm467_vm3 = vcmask (!%p283_p2), 7168   ;;  %vm509_vm4 = vcmask (!%p283_p2), 1039360  }
   0x7   : > { %s2098_s20 = smov (!%p283_p2), 15   ;;  %s2099_s21 = smov (!%p283_p2), 1   ;;  %v669_v13 = vld [vmem:[%s2594_s0] sm:$0x11] (!%p283_p2)  ;;  %v2263_v18 = vshrl.u32 (!%p283_p2), %v374_v12, 7  ;;  %vm547_vm5 = vcmask (!%p283_p2), 924672  }
   0x8   : > { %s2100_s22 = smov (!%p283_p2), 127   ;;  %s2101_s23 = smov (!%p283_p2), 113   ;;  %1375 = vmatprep.mubr.bf16.mxu0 (!%p283_p2), %v1957_v9  ;;  %v365_v14 = vld [vmem:[%s2594_s0] sm:$0x11] (!%p283_p2)  ;;  %v1922_v17 = vcombine.low (!%p283_p2), %v669_v13, %v669_v13  ;;  %v1923_v19 = vcombine.high (!%p283_p2), %v669_v13, %v669_v13  ;;  %vm583_vm6 = vcmask (!%p283_p2), 916480   ;;  %vm621_vm7 = vcmask (!%p283_p2), 908288  }
   0x9   : > { %s2102_s24 = smov (!%p283_p2), 112   ;;  %s2103_s25 = smov (!%p283_p2), 111   ;;  %v1011_v15 = vld [vmem:[%s2594_s0] sm:$0x11] (!%p283_p2)  ;;  %v1904_v20 = vcombine.low (!%p283_p2), %v365_v14, %v365_v14  ;;  %v1905_v21 = vcombine.high (!%p283_p2), %v365_v14, %v365_v14  ;;  %v2269_v28 = vsub.s32 (!%p283_p2), 0, %v2263_v18  ;;  %vm1339_vm8 = vcmask (!%p283_p2), 261120  }
   0xa   : > { %v709_v16 = vld [vmem:[%s2594_s0] sm:$0x11] (!%p283_p2)  ;;  %v1940_v22 = vcombine.low (!%p283_p2), %v1011_v15, %v1011_v15  ;;  %v1941_v23 = vcombine.high (!%p283_p2), %v1011_v15, %v1011_v15  ;;  %v676_v26 = vpack.i.b16 (!%p283_p2), %v1922_v17, %v1922_v17  ;;  %v683_v29 = vpack.i.b16 (!%p283_p2), %v1923_v19, %v1923_v19  ;;  %v751_v19 = vld [vmem:[%s2594_s0] sm:$0x22] (!%p283_p2) }
   0xb   : > { %v1924_v24 = vcombine.low (!%p283_p2), %v709_v16, %v709_v16  ;;  %v1925_v25 = vcombine.high (!%p283_p2), %v709_v16, %v709_v16  ;;  %v401_v27 = vld [vmem:[%s2594_s0] sm:$0x11] (!%p283_p2)  ;;  %v372_v30 = vpack.i.b16 (!%p283_p2), %v1904_v20, %v1904_v20  ;;  %v379_v31 = vpack.i.b16 (!%p283_p2), %v1905_v21, %v1905_v21 }
   0xc   : > { %v1018_v32 = vpack.i.b16 (!%p283_p2), %v1940_v22, %v1940_v22  ;;  %v1025_v33 = vpack.i.b16 (!%p283_p2), %v1941_v23, %v1941_v23  ;;  %v1906_v38 = vcombine.low (!%p283_p2), %v401_v27, %v401_v27  ;;  %v1907_v39 = vcombine.high (!%p283_p2), %v401_v27, %v401_v27  ;;  %v1045_v40 = vld [vmem:[%s2594_s0] sm:$0x11] (!%p283_p2)  ;;  %v439_v27 = vld [vmem:[%s2594_s0] sm:$0x22] (!%p283_p2) }
   0xd   : > { %s2604_s28 = smov (!%p326_p3, %s1889_s28), 1  ;;  %v716_v34 = vshrl.u32 %v1924_v24, 16  ;;  %v724_v37 = vshrl.u32 %v1925_v25, 16  ;;  %v681_v41 = vrot.slane %v676_v26, %v2269_v28  ;;  %v688_v42 = vrot.slane %v683_v29, %v2269_v28 }
   0xe   : > { %s2158_s29 = sshll.u32 %s2604_s28, 3  ;;  %s1986_s30 = sshll.u32 %s2604_s28, 4  ;;  %v377_v43 = vrot.slane %v372_v30, %v2269_v28  ;;  %v384_v44 = vrot.slane %v379_v31, %v2269_v28  ;;  %v2279_v45 = vrot.slane %v1018_v32, %v2269_v28  ;;  %v2282_v46 = vrot.slane %v1025_v33, %v2269_v28 }
   0xf   : > { %s335_s11 = scalar_lea.vmem %s2596_s2, %s2158_s29  ;;  %s330_s14 = scalar_lea.vmem %s2595_s1, %s2158_s29  ;;  %v717_v47 = vpack.i.b16 %v716_v34, %v716_v34  ;;  %v1942_v48 = vcombine.low %v1045_v40, %v1045_v40  ;;  %v725_v51 = vpack.i.b16 %v724_v37, %v724_v37  ;;  %v408_v52 = vshrl.u32 %v1906_v38, 16 }
  0x10   : > { %v653_v0 = vld [vmem:[%s335_s11] sm:$0xff]  ;;  %s340_s17 = scalar_lea.vmem %s2597_s3, %s1986_s30  ;;  %v416_v53 = vshrl.u32 %v1907_v39, 16  ;;  %v1943_v54 = vcombine.high %v1045_v40, %v1045_v40  ;;  %v1926_v31 = vcombine.low %v751_v19, %v751_v19  ;;  %v1927_v32 = vcombine.high %v751_v19, %v751_v19 }
  0x11   : > { %v347_v1 = vld [vmem:[%s330_s14] sm:$0xff]  ;;  %v1920_v2 = vcombine.high %v653_v0, %v653_v0  ;;  %v1921_v4 = vcombine.low %v653_v0, %v653_v0  ;;  %v1052_v63 = vshrl.u32 %v1942_v48, 16  ;;  %v722_v15 = vrot.slane %v717_v47, %v2269_v28 }
  0x12   : > { %v1902_v3 = vcombine.high %v347_v1, %v347_v1  ;;  %v1903_v5 = vcombine.low %v347_v1, %v347_v1  ;;  %v2171_v6 = vld [vmem:[%s340_s17 + $0x4] ss:$8 sps:$4 sm:$0xff]   ;;  %v2173_v7 = vld [vmem:[%s340_s17] ss:$8 sps:$4 sm:$0xff]   ;;  %v1060_v12 = vshrl.u32 %v1943_v54, 16  ;;  %v730_v16 = vrot.slane %v725_v51, %v2269_v28 }
  0x13   : > { %657 = vrot.lane.b32.xlu0 %v1920_v2, %s2096_s18  ;;  %826 = vst [vmem:[#allocation2 + $0x88] sm:$0xf0] %v1920_v2  ;;  %825 = vst [vmem:[#allocation2 + $0x80] sm:$0xf0] %v1921_v4  ;;  %v1053_v17 = vpack.i.b16 %v1052_v63, %v1052_v63  ;;  %v1908_v38 = vcombine.low %v439_v27, %v439_v27  ;;  %v1909_v39 = vcombine.high %v439_v27, %v439_v27  ;;  %v791_v51 = vld [vmem:[%s2594_s0] sm:$0x22] }
  0x14   : > { %351 = vrot.lane.b32.xlu1 %v1902_v3, %s2096_s18  ;;  %504 = vst [vmem:[#allocation2 + $0x88] sm:$0xf] %v1902_v3  ;;  %503 = vst [vmem:[#allocation2 + $0x80] sm:$0xf] %v1903_v5  ;;  %v1061_v26 = vpack.i.b16 %v1060_v12, %v1060_v12  ;;  %vm1751_vm9 = vcmask 1043456   ;;  %vm1747_vm10 = vcmask 588800  }
  0x15   : > { %v2308_v33 = vrot.slane %v1053_v17, %v2269_v28  ;;  %v446_v54 = vpack.i.b16 %v1908_v38, %v1908_v38  ;;  %v837_v38 = vld [vmem:[%s2594_s0] sm:$0x44] }
  0x17   : > { %661 = vrot.lane.b32.xlu0 %v1921_v4, %s2096_s18 }
  0x18   : > { %355 = vrot.lane.b32.xlu1 %v1903_v5, %s2096_s18 }
  0x1b   : > { %998 = vrot.lane.b32.xlu0 %v2171_v6, %s2096_s18 }
  0x1c   : > { %1003 = vrot.lane.b32.xlu1 %v2173_v7, %s2096_s18 }
  0x1f   : > { %699 = vrot.lane.b32.xlu0 %v1920_v2, %s2097_s19 }
  0x20   : > { %701 = vrot.lane.b32.xlu1 %v1921_v4, %s2097_s19 }
  0x23   : > { %389 = vrot.lane.b32.xlu0 %v1902_v3, %s2097_s19 }
  0x24   : > { %391 = vrot.lane.b32.xlu1 %v1903_v5, %s2097_s19 }
  0x27   : > { %1035 = vrot.lane.b32.xlu0 %v2171_v6, %s2097_s19 }
  0x28   : > { %1037 = vrot.lane.b32.xlu1 %v2173_v7, %s2097_s19 }
  0x2b   : > { %741 = vrot.lane.b32.xlu0 %v1920_v2, %s2098_s20 }
  0x2c   : > { %743 = vrot.lane.b32.xlu1 %v1921_v4, %s2098_s20 }
  0x2f   : > { %427 = vrot.lane.b32.xlu0 %v1902_v3, %s2098_s20 }
  0x30   : > { %429 = vrot.lane.b32.xlu1 %v1903_v5, %s2098_s20 }
  0x33   : > { %1071 = vrot.lane.b32.xlu0 %v2171_v6, %s2098_s20 }
  0x34   : > { %1073 = vrot.lane.b32.xlu1 %v2173_v7, %s2098_s20 }
  0x37   : > { %781 = vrot.lane.b32.xlu0 %v1920_v2, %s2099_s21 }
  0x38   : > { %783 = vrot.lane.b32.xlu1 %v1921_v4, %s2099_s21 }
  0x3b   : > { %463 = vrot.lane.b32.xlu0 %v1902_v3, %s2099_s21 }
  0x3c   : > { %465 = vrot.lane.b32.xlu1 %v1903_v5, %s2099_s21 }
  0x3f   : > { %1105 = vrot.lane.b32.xlu0 %v2171_v6, %s2099_s21 }
  0x40   : > { %1107 = vrot.lane.b32.xlu1 %v2173_v7, %s2099_s21 }
  0x43   : > { %827 = vrot.lane.b32.xlu0 %v1921_v4, %s2100_s22 }
  0x44   : > { %829 = vrot.lane.b32.xlu1 %v1920_v2, %s2100_s22 }
  0x47   : > { %505 = vrot.lane.b32.xlu0 %v1903_v5, %s2100_s22 }
  0x48   : > { %507 = vrot.lane.b32.xlu1 %v1902_v3, %s2100_s22 }
  0x4b   : > { %1145 = vrot.lane.b32.xlu0 %v2173_v7, %s2100_s22 }
  0x4c   : > { %1147 = vrot.lane.b32.xlu1 %v2171_v6, %s2100_s22 }
  0x4f   : > { %869 = vrot.lane.b32.xlu0 %v1921_v4, %s2101_s23 }
  0x50   : > { %871 = vrot.lane.b32.xlu1 %v1920_v2, %s2101_s23 }
  0x53   : > { %543 = vrot.lane.b32.xlu0 %v1903_v5, %s2101_s23 }
  0x54   : > { %545 = vrot.lane.b32.xlu1 %v1902_v3, %s2101_s23 }
  0x57   : > { %1181 = vrot.lane.b32.xlu0 %v2173_v7, %s2101_s23 }
  0x58   : > { %1183 = vrot.lane.b32.xlu1 %v2171_v6, %s2101_s23 }
  0x5b   : > { %909 = vrot.lane.b32.xlu0 %v1921_v4, %s2102_s24 }
  0x5c   : > { %911 = vrot.lane.b32.xlu1 %v1920_v2, %s2102_s24 }
  0x5f   : > { %579 = vrot.lane.b32.xlu0 %v1903_v5, %s2102_s24 }
  0x60   : > { %581 = vrot.lane.b32.xlu1 %v1902_v3, %s2102_s24 }
  0x63   : > { %951 = vrot.lane.b32.xlu0 %v1921_v4, %s2103_s25  ;;  %v409_v4 = vpack.i.b16 %v408_v52, %v408_v52 }
  0x64   : > { %953 = vrot.lane.b32.xlu1 %v1920_v2, %s2103_s25 }
  0x65   : > { %v414_v22 = vrot.slane %v409_v4, %v2269_v28 }
  0x67   : > { %617 = vrot.lane.b32.xlu0 %v1903_v5, %s2103_s25 }
  0x68   : > { %619 = vrot.lane.b32.xlu1 %v1902_v3, %s2103_s25 }
  0x6b   : > { %1215 = vrot.lane.b32.xlu0 %v2173_v7, %s2102_s24 }
  0x6c   : > { %1217 = vrot.lane.b32.xlu1 %v2171_v6, %s2102_s24 }
  0x6f   : > { %1251 = vrot.lane.b32.xlu0 %v2173_v7, %s2103_s25 }
  0x70   : > { %1253 = vrot.lane.b32.xlu1 %v2171_v6, %s2103_s25 }
  0x73   : > { %1326 = vperm.xlu0 %2029, %v1323_v11   ;;  %v417_v11 = vpack.i.b16 %v416_v53, %v416_v53 }
  0x75   : > { %v422_v25 = vrot.slane %v417_v11, %v2269_v28 }
  0x85   : > { %v658_v35 = vpop.permute.xlu0 %657 }
  0x86   : > { %v352_v36 = vpop.permute.xlu1 %351 }
  0x89   : > { %v662_v49 = vpop.permute.xlu0 %661 }
  0x8a   : > { %v356_v50 = vpop.permute.xlu1 %355  ;;  %v663_v55 = vsel %vm357_vm0, %v662_v49, %v658_v35  ;;  %v667_v56 = vsel %vm357_vm0, %v658_v35, %v662_v49  ;;  %v758_v49 = vpack.i.b16 %v1926_v31, %v1926_v31 }
  0x8b   : > { %v358_v57 = vsel %vm357_vm0, %v356_v50, %v352_v36  ;;  %v363_v58 = vsel %vm357_vm0, %v352_v36, %v356_v50  ;;  %v689_v59 = vmul.bf16 %v681_v41, %v667_v56  ;;  %v690_v60 = vmul.bf16 %v688_v42, %v663_v55 }
  0x8c   : > { %v385_v61 = vmul.bf16 %v377_v43, %v363_v58  ;;  %v386_v62 = vmul.bf16 %v384_v44, %v358_v57  ;;  %v2313_v44 = vrot.slane %v1061_v26, %v2269_v28  ;;  %v765_v50 = vpack.i.b16 %v1927_v32, %v1927_v32 }
  0x8d   : > { %v693_v0 = vrot.slane %v689_v59, 4  ;;  %v694_v1 = vrot.slane %v690_v60, 4  ;;  %v999_v2 = vpop.permute.xlu0 %998  ;;  %v453_v55 = vpack.i.b16 %v1909_v39, %v1909_v39  ;;  %v1928_v60 = vcombine.low %v791_v51, %v791_v51 }
  0x8e   : > { %387 = vst [vmem:[#allocation2] sm:$0xf] %v385_v61  ;;  %388 = vst [vmem:[#allocation2 + $0x8] sm:$0xf] %v386_v62  ;;  %v1004_v3 = vpop.permute.xlu1 %1003  ;;  %v1929_v61 = vcombine.high %v791_v51, %v791_v51 }
  0x8f   : > { %v1005_v5 = vsel %vm357_vm0, %v1004_v3, %v999_v2  ;;  %v2290_v9 = vsel %vm357_vm0, %v999_v2, %v1004_v3  ;;  %697 = vst [vmem:[#allocation2] sm:$0xf0] %v693_v0  ;;  %698 = vst [vmem:[#allocation2 + $0x8] sm:$0xf0] %v694_v1  ;;  %v475_v2 = vld [vmem:[%s2594_s0] sm:$0x22] }
  0x90   : > { %v1031_v13 = vmul.bf16 %v2279_v45, %v2290_v9  ;;  %v1032_v14 = vmul.bf16 %v2282_v46, %v1005_v5  ;;  %v2316_v45 = vsub.s32 1, %v2263_v18  ;;  %v1081_v46 = vld [vmem:[%s2594_s0] sm:$0x22]  ;;  %v806_v17 = vshrl.u32 %v1929_v61, 16 }
  0x91   : > { %v700_v20 = vpop.permute.xlu0 %699  ;;  %v1944_v56 = vcombine.low %v1081_v46, %v1081_v46  ;;  %v1945_v57 = vcombine.high %v1081_v46, %v1081_v46 }
  0x92   : > { %v702_v21 = vpop.permute.xlu1 %701  ;;  %v763_v0 = vrot.slane %v758_v49, %v2316_v45  ;;  %v770_v1 = vrot.slane %v765_v50, %v2316_v45  ;;  %v451_v5 = vrot.slane %v446_v54, %v2316_v45  ;;  %v458_v9 = vrot.slane %v453_v55, %v2316_v45 }
  0x93   : > { %v703_v23 = vsel %vm393_vm1, %v702_v21, %v700_v20  ;;  %v707_v24 = vsel %vm393_vm1, %v700_v20, %v702_v21  ;;  %v1088_v11 = vpack.i.b16 %v1944_v56, %v1944_v56  ;;  %v1095_v12 = vpack.i.b16 %v1945_v57, %v1945_v57 }
  0x94   : > { %v731_v29 = vmul.bf16 %v722_v15, %v707_v24  ;;  %v732_v30 = vmul.bf16 %v730_v16, %v703_v23  ;;  %v798_v16 = vshrl.u32 %v1928_v60, 16  ;;  %v1910_v21 = vcombine.low %v475_v2, %v475_v2 }
  0x95   : > { %v390_v36 = vpop.permute.xlu0 %389  ;;  %v2341_v32 = vrot.slane %v1088_v11, %v2316_v45  ;;  %v1931_v49 = vcombine.high %v837_v38, %v837_v38 }
  0x96   : > { %v735_v34 = vrot.slane %v731_v29, 4  ;;  %v736_v35 = vrot.slane %v732_v30, 4  ;;  %v392_v37 = vpop.permute.xlu1 %391  ;;  %v1288_v42 = vld [vmem:[#allocation2 + $0x8] sm:$0xff]  ;;  %v1287_v43 = vld [vmem:[#allocation2] sm:$0xff] }
  0x97   : > { %v394_v40 = vsel %vm393_vm1, %v392_v37, %v390_v36  ;;  %v399_v41 = vsel %vm393_vm1, %v390_v36, %v392_v37  ;;  %1343 = vmatprep.subr.bf16.mxu0 %v1288_v42  ;;  %v799_v36 = vpack.i.b16 %v798_v16, %v798_v16  ;;  %v807_v37 = vpack.i.b16 %v806_v17, %v806_v17 }
  0x98   : > { %739 = vst [vmem:[#allocation2 + $0x20] sm:$0xf0] %v735_v34  ;;  %740 = vst [vmem:[#allocation2 + $0x28] sm:$0xf0] %v736_v35  ;;  %v423_v47 = vmul.bf16 %v414_v22, %v399_v41  ;;  %v424_v48 = vmul.bf16 %v422_v25, %v394_v40  ;;  %1344 = vmatpush1.bf16.msra.mxu0 %v1287_v43  ;;  %v1911_v22 = vcombine.high %v475_v2, %v475_v2 }
  0x99   : > { %v1036_v52 = vpop.permute.xlu0 %1035  ;;  %1345 = vmatprep.subr.bf16.mxu0 %v1032_v14  ;;  %v1115_v14 = vld [vmem:[%s2594_s0] sm:$0x22]  ;;  %v482_v41 = vshrl.u32 %v1910_v21, 16  ;;  %v2371_v17 = vsub.s32 2, %v2263_v18 }
  0x9a   : > { %425 = vst [vmem:[#allocation2 + $0x20] sm:$0xf] %v423_v47  ;;  %426 = vst [vmem:[#allocation2 + $0x28] sm:$0xf] %v424_v48  ;;  %v1038_v53 = vpop.permute.xlu1 %1037  ;;  %v1946_v25 = vcombine.low %v1115_v14, %v1115_v14  ;;  %v1947_v26 = vcombine.high %v1115_v14, %v1115_v14  ;;  %v490_v42 = vshrl.u32 %v1911_v22, 16  ;;  %v1930_v48 = vcombine.low %v837_v38, %v837_v38 }
  0x9b   : > { %v1039_v58 = vsel %vm393_vm1, %v1038_v53, %v1036_v52  ;;  %v1043_v59 = vsel %vm393_vm1, %v1036_v52, %v1038_v53  ;;  %v804_v52 = vrot.slane %v799_v36, %v2316_v45  ;;  %v812_v53 = vrot.slane %v807_v37, %v2316_v45 }
  0x9c   : > { %v1067_v62 = vmul.bf16 %v2308_v33, %v1043_v59  ;;  %v1068_v63 = vmul.bf16 %v2313_v44, %v1039_v58  ;;  %1346 = vmatpush1.bf16.msra.mxu0 %v1031_v13  ;;  %v2344_v33 = vrot.slane %v1095_v12, %v2316_v45  ;;  %v1122_v43 = vshrl.u32 %v1946_v25, 16  ;;  %v517_v58 = vld [vmem:[%s2594_s0] sm:$0x44] }
  0x9d   : > { %v742_v3 = vpop.permute.xlu0 %741  ;;  %v1130_v44 = vshrl.u32 %v1947_v26, 16  ;;  %v483_v56 = vpack.i.b16 %v482_v41, %v482_v41  ;;  %v491_v57 = vpack.i.b16 %v490_v42, %v490_v42 }
  0x9e   : > { %v744_v4 = vpop.permute.xlu1 %743  ;;  %v1123_v59 = vpack.i.b16 %v1122_v43, %v1122_v43 }
  0x9f   : > { %v745_v15 = vsel %vm431_vm2, %v744_v4, %v742_v3  ;;  %v749_v13 = vsel %vm431_vm2, %v742_v3, %v744_v4  ;;  %v1131_v60 = vpack.i.b16 %v1130_v44, %v1130_v44  ;;  %v1912_v3 = vcombine.low %v517_v58, %v517_v58 }
  0xa0   : > { %v771_v19 = vmul.bf16 %v763_v0, %v749_v13  ;;  %v772_v20 = vmul.bf16 %v770_v1, %v745_v15  ;;  %v844_v0 = vshrl.u32 %v1930_v48, 16  ;;  %v1913_v4 = vcombine.high %v517_v58, %v517_v58 }
  0xa1   : > { %v1292_v23 = vld [vmem:[#allocation2 + $0x28] sm:$0xff]  ;;  %v1291_v24 = vld [vmem:[#allocation2 + $0x20] sm:$0xff]  ;;  %v428_v30 = vpop.permute.xlu0 %427  ;;  %v488_v11 = vrot.slane %v483_v56, %v2316_v45  ;;  %v496_v12 = vrot.slane %v491_v57, %v2316_v45  ;;  %v2365_v13 = vrot.slane %v1123_v59, %v2316_v45  ;;  %v2368_v16 = vrot.slane %v1131_v60, %v2316_v45 }
  0xa2   : > { %v775_v27 = vrot.slane %v771_v19, 4  ;;  %v776_v29 = vrot.slane %v772_v20, 4  ;;  %1347 = vmatprep.subr.bf16.mxu0 %v1292_v23  ;;  %v430_v31 = vpop.permute.xlu1 %429  ;;  %v1155_v19 = vld [vmem:[%s2594_s0] sm:$0x44]  ;;  %v555_v57 = vld [vmem:[%s2594_s0] sm:$0x88] }
  0xa3   : > { %v432_v34 = vsel %vm431_vm2, %v430_v31, %v428_v30  ;;  %v437_v35 = vsel %vm431_vm2, %v428_v30, %v430_v31  ;;  %1348 = vmatpush1.bf16.msra.mxu0 %v1291_v24  ;;  %v845_v24 = vpack.i.b16 %v844_v0, %v844_v0  ;;  %v532_v30 = vshrl.u32 %v1913_v4, 16 }
  0xa4   : > { %779 = vst [vmem:[#allocation2 + $0x40] sm:$0xf0] %v775_v27  ;;  %780 = vst [vmem:[#allocation2 + $0x48] sm:$0xf0] %v776_v29  ;;  %v459_v39 = vmul.bf16 %v451_v5, %v437_v35  ;;  %v460_v40 = vmul.bf16 %v458_v9, %v432_v34  ;;  %1349 = vmatprep.subr.bf16.mxu0 %v1068_v63  ;;  %v524_v29 = vshrl.u32 %v1912_v3, 16 }
  0xa5   : > { %v1072_v46 = vpop.permute.xlu0 %1071  ;;  %v1949_v34 = vcombine.high %v1155_v19, %v1155_v19  ;;  %v850_v37 = vrot.slane %v845_v24, %v2371_v17  ;;  %v533_v43 = vpack.i.b16 %v532_v30, %v532_v30 }
  0xa6   : > { %461 = vst [vmem:[#allocation2 + $0x40] sm:$0xf] %v459_v39  ;;  %462 = vst [vmem:[#allocation2 + $0x48] sm:$0xf] %v460_v40  ;;  %v1074_v47 = vpop.permute.xlu1 %1073  ;;  %v879_v39 = vld [vmem:[%s2594_s0] sm:$0x88]  ;;  %v525_v42 = vpack.i.b16 %v524_v29, %v524_v29 }
  0xa7   : > { %v1075_v50 = vsel %vm431_vm2, %v1074_v47, %v1072_v46  ;;  %v1079_v51 = vsel %vm431_vm2, %v1072_v46, %v1074_v47  ;;  %1350 = vmatpush1.bf16.msra.mxu0 %v1067_v62  ;;  %v852_v62 = vshrl.u32 %v1931_v49, 16  ;;  %v1170_v48 = vshrl.u32 %v1949_v34, 16 }
  0xa8   : > { %v1101_v54 = vmul.bf16 %v2341_v32, %v1079_v51  ;;  %v1102_v55 = vmul.bf16 %v2344_v33, %v1075_v50  ;;  %v1948_v33 = vcombine.low %v1155_v19, %v1155_v19  ;;  %v1932_v49 = vcombine.low %v879_v39, %v879_v39 }
  0xa9   : > { %v782_v61 = vpop.permute.xlu0 %781  ;;  %v853_v25 = vpack.i.b16 %v852_v62, %v852_v62  ;;  %v1933_v50 = vcombine.high %v879_v39, %v879_v39  ;;  %v530_v56 = vrot.slane %v525_v42, %v2371_v17  ;;  %v2395_v62 = vsub.s32 3, %v2263_v18 }
  0xaa   : > { %v784_v63 = vpop.permute.xlu1 %783  ;;  %v1162_v47 = vshrl.u32 %v1948_v33, 16 }
  0xab   : > { %v785_v1 = vsel %vm467_vm3, %v784_v63, %v782_v61  ;;  %v789_v2 = vsel %vm467_vm3, %v782_v61, %v784_v63  ;;  %v858_v38 = vrot.slane %v853_v25, %v2371_v17  ;;  %v1171_v61 = vpack.i.b16 %v1170_v48, %v1170_v48 }
  0xac   : > { %v813_v5 = vmul.bf16 %v804_v52, %v789_v2  ;;  %v814_v9 = vmul.bf16 %v812_v53, %v785_v1  ;;  %v1163_v60 = vpack.i.b16 %v1162_v47, %v1162_v47  ;;  %v886_v1 = vpack.i.b16 %v1932_v49, %v1932_v49 }
  0xad   : > { %v1296_v14 = vld [vmem:[#allocation2 + $0x48] sm:$0xff]  ;;  %v1295_v15 = vld [vmem:[#allocation2 + $0x40] sm:$0xff]  ;;  %v464_v22 = vpop.permute.xlu0 %463  ;;  %v893_v2 = vpack.i.b16 %v1933_v50, %v1933_v50 }
  0xae   : > { %v817_v20 = vrot.slane %v813_v5, 4  ;;  %v818_v21 = vrot.slane %v814_v9, 4  ;;  %1351 = vmatprep.subr.bf16.mxu0 %v1296_v14  ;;  %v466_v23 = vpop.permute.xlu1 %465  ;;  %v2400_v19 = vrot.slane %v1163_v60, %v2371_v17 }
  0xaf   : > { %v468_v26 = vsel %vm467_vm3, %v466_v23, %v464_v22  ;;  %v473_v27 = vsel %vm467_vm3, %v464_v22, %v466_v23  ;;  %1352 = vmatpush1.bf16.msra.mxu0 %v1295_v15  ;;  %v1304_v22 = vld [vmem:[#allocation2 + $0x88] sm:$0xff]  ;;  %v1191_v23 = vld [vmem:[%s2594_s0] sm:$0x88] }
  0xb0   : > { %821 = vst [vmem:[#allocation2 + $0x60] sm:$0xf0] %v817_v20  ;;  %822 = vst [vmem:[#allocation2 + $0x68] sm:$0xf0] %v818_v21  ;;  %v497_v31 = vmul.bf16 %v488_v11, %v473_v27  ;;  %v498_v32 = vmul.bf16 %v496_v12, %v468_v26  ;;  %1353 = vmatprep.subr.bf16.mxu0 %v1102_v55  ;;  %v1914_v11 = vcombine.low %v555_v57, %v555_v57  ;;  %v919_v21 = vld [vmem:[%s2594_s0] sm:$0x88] }
  0xb1   : > { %v1106_v35 = vpop.permute.xlu0 %1105  ;;  %v1915_v12 = vcombine.high %v555_v57, %v555_v57  ;;  %v2403_v20 = vrot.slane %v1171_v61, %v2371_v17  ;;  %v891_v26 = vrot.slane %v886_v1, %v2395_v62  ;;  %v898_v27 = vrot.slane %v893_v2, %v2395_v62 }
  0xb2   : > { %499 = vst [vmem:[#allocation2 + $0x60] sm:$0xf] %v497_v31  ;;  %500 = vst [vmem:[#allocation2 + $0x68] sm:$0xf] %v498_v32  ;;  %v1108_v36 = vpop.permute.xlu1 %1107  ;;  %v562_v29 = vpack.i.b16 %v1914_v11, %v1914_v11  ;;  %v1934_v33 = vcombine.low %v919_v21, %v919_v21  ;;  %v1935_v34 = vcombine.high %v919_v21, %v919_v21  ;;  %v961_v11 = vld [vmem:[%s2594_s0 + $0x8] sm:$0x11] }
  0xb3   : > { %v1109_v40 = vsel %vm467_vm3, %v1108_v36, %v1106_v35  ;;  %v1113_v41 = vsel %vm467_vm3, %v1106_v35, %v1108_v36  ;;  %1354 = vmatpush1.bf16.msra.mxu0 %v1101_v54  ;;  %v538_v54 = vrot.slane %v533_v43, %v2371_v17  ;;  %v569_v30 = vpack.i.b16 %v1915_v12, %v1915_v12  ;;  %v591_v35 = vld [vmem:[%s2594_s0] sm:$0x88] }
  0xb4   : > { %v1137_v44 = vmul.bf16 %v2365_v13, %v1113_v41  ;;  %v1138_v46 = vmul.bf16 %v2368_v16, %v1109_v40  ;;  %v1950_v39 = vcombine.low %v1191_v23, %v1191_v23  ;;  %v1951_v40 = vcombine.high %v1191_v23, %v1191_v23  ;;  %v629_v23 = vld [vmem:[%s2594_s0 + $0x8] sm:$0x11] }
  0xb5   : > { %v828_v51 = vpop.permute.xlu0 %827  ;;  %v567_v43 = vrot.slane %v562_v29, %v2395_v62  ;;  %v1917_v47 = vcombine.high %v591_v35, %v591_v35  ;;  %v926_v50 = vshrl.u32 %v1934_v33, 16  ;;  %v1225_v29 = vld [vmem:[%s2594_s0] sm:$0x88] }
  0xb6   : > { %v830_v52 = vpop.permute.xlu1 %829 }
  0xb7   : > { %v831_v53 = vsel %vm509_vm4, %v828_v51, %v830_v52  ;;  %v835_v55 = vsel %vm509_vm4, %v830_v52, %v828_v51  ;;  %v934_v51 = vshrl.u32 %v1935_v34, 16  ;;  %v606_v61 = vshrl.u32 %v1917_v47, 16 }
  0xb8   : > { %v859_v58 = vmul.bf16 %v850_v37, %v831_v53  ;;  %v860_v59 = vmul.bf16 %v858_v38, %v835_v55  ;;  %v1303_v38 = vld [vmem:[#allocation2 + $0x80] sm:$0xff]  ;;  %v1198_v55 = vpack.i.b16 %v1950_v39, %v1950_v39  ;;  %v927_v2 = vpack.i.b16 %v926_v50, %v926_v50 }
  0xb9   : > { %v1300_v63 = vld [vmem:[#allocation2 + $0x68] sm:$0xff]  ;;  %v1299_v0 = vld [vmem:[#allocation2 + $0x60] sm:$0xff]  ;;  %v506_v5 = vpop.permute.xlu0 %505 }
  0xba   : > { %v863_v3 = vrot.slane %v859_v58, 4  ;;  %v864_v4 = vrot.slane %v860_v59, 4  ;;  %1355 = vmatprep.subr.bf16.mxu0 %v1300_v63  ;;  %v508_v9 = vpop.permute.xlu1 %507  ;;  %v932_v21 = vrot.slane %v927_v2, %v2395_v62 }
  0xbb   : > { %v510_v14 = vsel %vm509_vm4, %v506_v5, %v508_v9  ;;  %v515_v15 = vsel %vm509_vm4, %v508_v9, %v506_v5  ;;  %1356 = vmatpush1.bf16.msra.mxu0 %v1299_v0  ;;  %v2435_v5 = vrot.slane %v1198_v55, %v2395_v62 }
  0xbc   : > { %867 = vst [vmem:[#allocation2 + $0xa0] sm:$0xf0] %v863_v3  ;;  %868 = vst [vmem:[#allocation2 + $0xa8] sm:$0xf0] %v864_v4  ;;  %v539_v13 = vmul.bf16 %v530_v56, %v510_v14  ;;  %v540_v16 = vmul.bf16 %v538_v54, %v515_v15  ;;  %1357 = vmatprep.subr.bf16.mxu0 %v1138_v46  ;;  %v1916_v46 = vcombine.low %v591_v35, %v591_v35 }
  0xbd   : > { %v1146_v24 = vpop.permute.xlu0 %1145  ;;  %v1205_v56 = vpack.i.b16 %v1951_v40, %v1951_v40  ;;  %v935_v3 = vpack.i.b16 %v934_v51, %v934_v51  ;;  %v1918_v35 = vcombine.low %v629_v23, %v629_v23 }
  0xbe   : > { %541 = vst [vmem:[#allocation2 + $0xa0] sm:$0xf] %v539_v13  ;;  %542 = vst [vmem:[#allocation2 + $0xa8] sm:$0xf] %v540_v16  ;;  %v1148_v25 = vpop.permute.xlu1 %1147  ;;  %v598_v60 = vshrl.u32 %v1916_v46, 16  ;;  %v607_v13 = vpack.i.b16 %v606_v61, %v606_v61 }
  0xbf   : > { %v2414_v31 = vsel %vm509_vm4, %v1146_v24, %v1148_v25  ;;  %v2417_v32 = vsel %vm509_vm4, %v1148_v25, %v1146_v24  ;;  %1358 = vmatpush1.bf16.msra.mxu0 %v1137_v44  ;;  %v574_v44 = vrot.slane %v569_v30, %v2395_v62  ;;  %v1210_v9 = vrot.slane %v1205_v56, %v2395_v62 }
  0xc0   : > { %v1177_v36 = vmul.bf16 %v2400_v19, %v2414_v31  ;;  %v1178_v37 = vmul.bf16 %v2403_v20, %v2417_v32  ;;  %1359 = vmatprep.subr.bf16.mxu0 %v1304_v22  ;;  %v599_v15 = vpack.i.b16 %v598_v60, %v598_v60  ;;  %v940_v22 = vrot.slane %v935_v3, %v2395_v62  ;;  %v1261_v60 = vld [vmem:[%s2594_s0 + $0x8] sm:$0x11] }
  0xc1   : > { %v870_v41 = vpop.permute.xlu0 %869  ;;  %v612_v34 = vrot.slane %v607_v13, %v2395_v62 }
  0xc2   : > { %v872_v42 = vpop.permute.xlu1 %871  ;;  %v604_v33 = vrot.slane %v599_v15, %v2395_v62 }
  0xc3   : > { %v873_v48 = vsel %vm547_vm5, %v870_v41, %v872_v42  ;;  %v877_v49 = vsel %vm547_vm5, %v872_v42, %v870_v41  ;;  %1360 = vmatpush1.bf16.msra.mxu0 %v1303_v38  ;;  %v1919_v38 = vcombine.high %v629_v23, %v629_v23  ;;  %v1953_v41 = vcombine.high %v1225_v29, %v1225_v29 }
  0xc4   : > { %v899_v52 = vmul.bf16 %v891_v26, %v873_v48  ;;  %v900_v53 = vmul.bf16 %v898_v27, %v877_v49  ;;  %1361 = vmatprep.subr.bf16.mxu0 %v2171_v6  ;;  %v1936_v26 = vcombine.low %v961_v11, %v961_v11  ;;  %v1937_v27 = vcombine.high %v961_v11, %v961_v11 }
  0xc5   : > { %v544_v58 = vpop.permute.xlu0 %543  ;;  %v1308_v1 = vld [vmem:[#allocation2 + $0xa8] sm:$0xff]  ;;  %v1307_v14 = vld [vmem:[#allocation2 + $0xa0] sm:$0xff]  ;;  %v643_v55 = vpack.i.b16 %v1919_v38, %v1919_v38  ;;  %v1954_v11 = vcombine.low %v1261_v60, %v1261_v60 }
  0xc6   : > { %v903_v54 = vrot.slane %v899_v52, 4  ;;  %v904_v57 = vrot.slane %v900_v53, 4  ;;  %v546_v59 = vpop.permute.xlu1 %545  ;;  %v975_v46 = vpack.i.b16 %v1937_v27, %v1937_v27  ;;  %v636_v53 = vpack.i.b16 %v1918_v35, %v1918_v35 }
  0xc7   : > { %v548_v63 = vsel %vm547_vm5, %v544_v58, %v546_v59  ;;  %v553_v0 = vsel %vm547_vm5, %v546_v59, %v544_v58  ;;  %1362 = vmatpush1.bf16.msra.mxu0 %v2173_v7 }
  0xc8   : > { %907 = vst [vmem:[#allocation2 + $0xc0] sm:$0xf0] %v903_v54  ;;  %908 = vst [vmem:[#allocation2 + $0xc8] sm:$0xf0] %v904_v57  ;;  %v575_v6 = vmul.bf16 %v567_v43, %v548_v63  ;;  %v576_v4 = vmul.bf16 %v574_v44, %v553_v0  ;;  %1363 = vmatprep.subr.bf16.mxu0 %v1308_v1  ;;  %v968_v44 = vpack.i.b16 %v1936_v26, %v1936_v26 }
  0xc9   : > { %v1182_v7 = vpop.permute.xlu0 %1181  ;;  %v980_v59 = vrot.slane %v975_v46, %v2269_v28  ;;  %v641_v0 = vrot.slane %v636_v53, %v2269_v28  ;;  %v648_v1 = vrot.slane %v643_v55, %v2269_v28 }
  0xca   : > { %577 = vst [vmem:[#allocation2 + $0xc0] sm:$0xf] %v575_v6  ;;  %578 = vst [vmem:[#allocation2 + $0xc8] sm:$0xf] %v576_v4  ;;  %v1184_v12 = vpop.permute.xlu1 %1183  ;;  %v973_v58 = vrot.slane %v968_v44, %v2269_v28 }
  0xcb   : > { %v1185_v16 = vsel %vm547_vm5, %v1182_v7, %v1184_v12  ;;  %v1189_v20 = vsel %vm547_vm5, %v1184_v12, %v1182_v7  ;;  %1364 = vmatpush1.bf16.msra.mxu0 %v1307_v14  ;;  %v1955_v7 = vcombine.high %v1261_v60, %v1261_v60 }
  0xcc   : > { %v1211_v24 = vmul.bf16 %v2435_v5, %v1185_v16  ;;  %v1212_v25 = vmul.bf16 %v1210_v9, %v1189_v20  ;;  %1365 = vmatprep.subr.bf16.mxu0 %v1178_v37  ;;  %v1952_v37 = vcombine.low %v1225_v29, %v1225_v29 }
  0xcd   : > { %v910_v30 = vpop.permute.xlu0 %909  ;;  %v1275_v26 = vpack.i.b16 %v1955_v7, %v1955_v7 }
  0xce   : > { %v912_v32 = vpop.permute.xlu1 %911  ;;  %v1232_v31 = vshrl.u32 %v1952_v37, 16 }
  0xcf   : > { %v913_v39 = vsel %vm583_vm6, %v910_v30, %v912_v32  ;;  %v917_v40 = vsel %vm583_vm6, %v912_v32, %v910_v30  ;;  %1366 = vmatpush1.bf16.msra.mxu0 %v1177_v36  ;;  %v1240_v36 = vshrl.u32 %v1953_v41, 16 }
  0xd0   : > { %v941_v42 = vmul.bf16 %v932_v21, %v913_v39  ;;  %v942_v43 = vmul.bf16 %v940_v22, %v917_v40  ;;  %v1233_v6 = vpack.i.b16 %v1232_v31, %v1232_v31  ;;  %v1280_v40 = vrot.slane %v1275_v26, %v2269_v28 }
  0xd1   : > { %v1312_v47 = vld [vmem:[#allocation2 + $0xc8] sm:$0xff]  ;;  %v1311_v48 = vld [vmem:[#allocation2 + $0xc0] sm:$0xff]  ;;  %v580_v51 = vpop.permute.xlu0 %579  ;;  %v1241_v4 = vpack.i.b16 %v1240_v36, %v1240_v36 }
  0xd2   : > { %v945_v49 = vrot.slane %v941_v42, 4  ;;  %v946_v50 = vrot.slane %v942_v43, 4  ;;  %v582_v52 = vpop.permute.xlu1 %581  ;;  %1367 = vmatprep.subr.bf16.mxu0 %v1312_v47  ;;  %v1238_v21 = vrot.slane %v1233_v6, %v2395_v62  ;;  %v1956_v42 = vcombine.low %v2232_v8, %v2232_v8 }
  0xd3   : > { %v584_v56 = vsel %vm583_vm6, %v580_v51, %v582_v52  ;;  %v589_v19 = vsel %vm583_vm6, %v582_v52, %v580_v51  ;;  %1368 = vmatpush1.bf16.msra.mxu0 %v1311_v48  ;;  %v1246_v22 = vrot.slane %v1241_v4, %v2395_v62  ;;  %v1531_v4 = vld [vmem:[%s2594_s0] sm:$0x22] }
  0xd4   : > { %949 = vst [vmem:[#allocation2 + $0xe0] sm:$0xf0] %v945_v49  ;;  %950 = vst [vmem:[#allocation2 + $0xe8] sm:$0xf0] %v946_v50  ;;  %v613_v54 = vmul.bf16 %v604_v33, %v584_v56  ;;  %v614_v57 = vmul.bf16 %v612_v34, %v589_v19  ;;  %1369 = vmatprep.subr.bf16.mxu0 %v1212_v25  ;;  %v1268_v25 = vpack.i.b16 %v1954_v11, %v1954_v11  ;;  %v2087_v50 = vld [vmem:[%s2598_s4 + $0x8] ss:$0 sps:$4 sm:$0xff]  }
  0xd5   : > { %v952_v61 = vpop.permute.xlu0 %951  ;;  %v1500_v11 = vld [vmem:[%s2594_s0] sm:$0x22] }
  0xd6   : > { %615 = vst [vmem:[#allocation2 + $0xe0] sm:$0xf] %v613_v54  ;;  %616 = vst [vmem:[#allocation2 + $0xe8] sm:$0xf] %v614_v57  ;;  %v954_v63 = vpop.permute.xlu1 %953  ;;  %v1273_v39 = vrot.slane %v1268_v25, %v2269_v28 }
  0xd7   : > { %v955_v2 = vsel %vm621_vm7, %v952_v61, %v954_v63  ;;  %v959_v3 = vsel %vm621_vm7, %v954_v63, %v952_v61  ;;  %1370 = vmatpush1.bf16.msra.mxu0 %v1211_v24  ;;  %v1696_v61 = vld [vmem:[%s2601_s7] sm:$0xff] }
  0xd8   : > { %v981_v5 = vmul.bf16 %v973_v58, %v955_v2  ;;  %v982_v9 = vmul.bf16 %v980_v59, %v959_v3  ;;  %v1469_v2 = vld [vmem:[%s2594_s0] sm:$0x11] }
  0xd9   : > { %v618_v15 = vpop.permute.xlu0 %617  ;;  %v1470_v6 = vunpack.c.l.bf16 %v1469_v2 }
  0xda   : > { %v985_v12 = vrot.slane %v981_v5, 4  ;;  %v986_v14 = vrot.slane %v982_v9, 4  ;;  %v620_v13 = vpop.permute.xlu1 %619  ;;  %v1438_v5 = vld [vmem:[%s2594_s0] sm:$0x11] }
  0xdb   : > { %v622_v16 = vsel %vm621_vm7, %v618_v15, %v620_v13  ;;  %v627_v20 = vsel %vm621_vm7, %v620_v13, %v618_v15  ;;  %v1533_v15 = vunpack.c.h.bf16 %v1531_v4  ;;  %v1439_v13 = vunpack.c.l.bf16 %v1438_v5 }
  0xdc   : > { %989 = vst [vmem:[#allocation2 + $0x100] sm:$0xf0] %v985_v12  ;;  %990 = vst [vmem:[#allocation2 + $0x108] sm:$0xf0] %v986_v14  ;;  %v649_v23 = vmul.bf16 %v641_v0, %v622_v16  ;;  %v650_v24 = vmul.bf16 %v648_v1, %v627_v20  ;;  %v1471_v12 = vunpack.c.h.bf16 %v1469_v2  ;;  %v1571_v14 = vld [vmem:[%s2594_s0] sm:$0x44]  ;;  %v1440_v16 = vunpack.c.h.bf16 %v1438_v5 }
  0xdd   : > { %v1316_v27 = vld [vmem:[#allocation2 + $0xe8] sm:$0xff]  ;;  %v1315_v29 = vld [vmem:[#allocation2 + $0xe0] sm:$0xff]  ;;  %v1216_v30 = vpop.permute.xlu0 %1215  ;;  %v1475_v20 = vrot.slane %v1470_v6, %v2316_v45  ;;  %v1573_v26 = vunpack.c.h.bf16 %v1571_v14  ;;  %v1638_v5 = vsub.s32 7, %v2263_v18 }
  0xde   : > { %651 = vst [vmem:[#allocation2 + $0x100] sm:$0xf] %v649_v23  ;;  %652 = vst [vmem:[#allocation2 + $0x108] sm:$0xf] %v650_v24  ;;  %v1218_v32 = vpop.permute.xlu1 %1217  ;;  %1371 = vmatprep.subr.bf16.mxu0 %v1316_v27  ;;  %v1532_v24 = vunpack.c.l.bf16 %v1531_v4  ;;  %v1576_v27 = vsub.s32 5, %v2263_v18 }
  0xdf   : > { %v1219_v33 = vsel %vm583_vm6, %v1216_v30, %v1218_v32  ;;  %v1223_v34 = vsel %vm583_vm6, %v1218_v32, %v1216_v30  ;;  %1372 = vmatpush1.bf16.msra.mxu0 %v1315_v29  ;;  %v1479_v29 = vrot.slane %v1471_v12, %v2316_v45  ;;  %v1664_v2 = vld [vmem:[%s2594_s0 + $0x8] sm:$0x11] }
  0xe0   : > { %v1247_v35 = vmul.bf16 %v1238_v21, %v1219_v33  ;;  %v1248_v38 = vmul.bf16 %v1246_v22, %v1223_v34  ;;  %v1501_v21 = vunpack.c.l.bf16 %v1500_v11  ;;  %v1502_v22 = vunpack.c.h.bf16 %v1500_v11 }
  0xe1   : > { %v1252_v37 = vpop.permute.xlu0 %1251  ;;  %v1541_v33 = vrot.slane %v1533_v15, %v2395_v62  ;;  %v1444_v34 = vrot.slane %v1439_v13, %v2269_v28  ;;  %v1537_v45 = vrot.slane %v1532_v24, %v2395_v62  ;;  %v1633_v62 = vld [vmem:[%s2594_s0] sm:$0x88]  ;;  %v1666_v13 = vunpack.c.h.bf16 %v1664_v2 }
  0xe2   : > { %v1254_v41 = vpop.permute.xlu1 %1253  ;;  %1373 = vmatprep.subr.bf16.mxu0 %v1248_v38  ;;  %v1506_v38 = vrot.slane %v1501_v21, %v2371_v17 }
  0xe3   : > { %v1255_v43 = vsel %vm621_vm7, %v1252_v37, %v1254_v41  ;;  %v1259_v44 = vsel %vm621_vm7, %v1254_v41, %v1252_v37  ;;  %1374 = vmatpush1.bf16.msra.mxu0 %v1247_v35  ;;  %v1448_v35 = vrot.slane %v1440_v16, %v2269_v28  ;;  %v1510_v41 = vrot.slane %v1502_v22, %v2371_v17 }
  0xe4   : > { %v1281_v46 = vmul.bf16 %v1273_v39, %v1255_v43  ;;  %v1282_v47 = vmul.bf16 %v1280_v40, %v1259_v44  ;;  %v1572_v40 = vunpack.c.l.bf16 %v1571_v14  ;;  %v1581_v43 = vrot.slane %v1573_v26, %v1576_v27  ;;  %v1602_v44 = vld [vmem:[%s2594_s0] sm:$0x88] }
  0xe5   : > { %v1320_v48 = vld [vmem:[#allocation2 + $0x108] sm:$0xff]  ;;  %v1319_v49 = vld [vmem:[#allocation2 + $0x100] sm:$0xff] }
  0xe6   : > { %1384 = vmatprep.subr.bf16.mxu1 %v1320_v48  ;;  %1376 = vmatmul.mubr.bf16.vlgmr.msra.gmra.mrb[0].mxu0 %v1956_v42 }
  0xe7   : > { %1385 = vmatpush1.bf16.msra.mxu1 %v1319_v49 }
  0xe8   : > { %1386 = vmatprep.subr.bf16.mxu1 %v1282_v47 }
  0xeb   : > { %1387 = vmatpush1.bf16.msra.mxu1 %v1281_v46 }
  0xee   : > { %1959 = vmatmul.mubr.msk.bf16.vlgmr.msra.gmra.mrb[0].mxu1 %vm1339_vm8, %v2087_v50 }
  0xef   : > { %1790 = vmatprep.mubr.bf16.mxu1 %v2104_v10 }
  0xf2   : > { %v1327_v52 = vpop.permute.xlu0 %1326 }
 0x1b9   : > { %v1377_v8 = vpop.f32.mrb[0].mxu0 }
 0x1ba   : > { %v1379_v51 = vpop.f32.mrb[1].mxu0  ;;  %v1378_v56 = vadd.f32 %v1377_v8, %v1327_v52 }
 0x1bb   : > { %v1381_v53 = vpop.f32.mrb[2].mxu0  ;;  %v1380_v19 = vadd.f32 %v1379_v51, %v1327_v52  ;;  %v1577_v52 = vrot.slane %v1572_v40, %v1576_v27 }
 0x1bc   : > { %v1382_v55 = vpop.f32.mrb[3].mxu0  ;;  %v1603_v53 = vunpack.c.l.bf16 %v1602_v44 }
 0x1bd   : > { %v1604_v55 = vunpack.c.h.bf16 %v1602_v44  ;;  %v1686_v44 = vld [vmem:[%s2600_s6] sm:$0xf] }
 0x1c1   : > { %v1418_v31 = vpop.f32.mrb[0].mxu1 }
 0x1c2   : > { %v1419_v36 = vadd.f32 %v1418_v31, %v1378_v56  ;;  %v1420_v54 = vpop.f32.mrb[1].mxu1  ;;  %v1607_v56 = vsub.s32 6, %v2263_v18 }
 0x1c3   : > { %v1421_v57 = vadd.f32 %v1420_v54, %v1380_v19  ;;  %v1422_v58 = vpop.f32.mrb[2].mxu1 }
 0x1c4   : > { %v2486_v59 = vmax.f32 %v1419_v36, 0.0  ;;  %v1423_v60 = vpop.f32.mrb[3].mxu1  ;;  %v1608_v15 = vrot.slane %v1603_v53, %v1607_v56 }
 0x1c5   : > { %v2492_v10 = vmax.f32 %v1421_v57, 0.0 }
 0x1c6   : > { %1562 = vrot.lane.b32.xlu0 %v2486_v59, %s2100_s22  ;;  %1432 = vrot.lane.b32.xlu1 %v2486_v59, %s2096_s18 }
 0x1ca   : > { %1460 = vrot.lane.b32.xlu0 %v2492_v10, %s2097_s19  ;;  %1463 = vrot.lane.b32.xlu1 %v2486_v59, %s2097_s19 }
 0x1ce   : > { %1491 = vrot.lane.b32.xlu0 %v2492_v10, %s2098_s20  ;;  %1494 = vrot.lane.b32.xlu1 %v2486_v59, %s2098_s20 }
 0x1d2   : > { %1522 = vrot.lane.b32.xlu0 %v2492_v10, %s2099_s21  ;;  %1525 = vrot.lane.b32.xlu1 %v2486_v59, %s2099_s21 }
 0x1d6   : > { %1593 = vrot.lane.b32.xlu0 %v2486_v59, %s2101_s23  ;;  %1428 = vrot.lane.b32.xlu1 %v2492_v10, %s2096_s18  ;;  %s345_s18 = scalar_lea.vmem %s2602_s8, %s2158_s29 }
 0x1da   : > { %1624 = vrot.lane.b32.xlu0 %v2486_v59, %s2102_s24  ;;  %1564 = vrot.lane.b32.xlu1 %v2492_v10, %s2100_s22 }
 0x1de   : > { %1655 = vrot.lane.b32.xlu0 %v2486_v59, %s2103_s25  ;;  %1595 = vrot.lane.b32.xlu1 %v2492_v10, %s2101_s23 }
 0x1e2   : > { %1699 = vperm.xlu0 %2029, %v1696_v61   ;;  %1626 = vrot.lane.b32.xlu1 %v2492_v10, %s2102_s24 }
 0x1e6   : > { %1657 = vrot.lane.b32.xlu1 %v2492_v10, %s2103_s25 }
 0x238   : > { %v2525_v63 = vpop.permute.xlu0 %1562  ;;  %v1433_v0 = vpop.permute.xlu1 %1432 }
 0x23c   : > { %v1461_v1 = vpop.permute.xlu0 %1460  ;;  %v1464_v3 = vpop.permute.xlu1 %1463 }
 0x23d   : > { %v1468_v30 = vsel %vm393_vm1, %v1461_v1, %v1464_v3  ;;  %v1465_v32 = vsel %vm393_vm1, %v1464_v3, %v1461_v1  ;;  %v1635_v1 = vunpack.c.h.bf16 %v1633_v62 }
 0x23e   : > { %v1480_v37 = vmul.f32 %v1475_v20, %v1468_v30  ;;  %v1481_v46 = vmul.f32 %v1479_v29, %v1465_v32  ;;  %v1612_v20 = vrot.slane %v1604_v55, %v1607_v56  ;;  %v1674_v30 = vrot.slane %v1666_v13, %v2269_v28 }
 0x240   : > { %v1492_v9 = vpop.permute.xlu0 %1491  ;;  %v1495_v7 = vpop.permute.xlu1 %1494 }
 0x241   : > { %v1496_v47 = vsel %vm431_vm2, %v1495_v7, %v1492_v9  ;;  %v1499_v19 = vsel %vm431_vm2, %v1492_v9, %v1495_v7  ;;  %v1665_v7 = vunpack.c.l.bf16 %v1664_v2 }
 0x242   : > { %v1512_v31 = vmul.f32 %v1510_v41, %v1496_v47  ;;  %v1511_v9 = vmul.f32 %v1506_v38, %v1499_v19 }
 0x244   : > { %v1523_v23 = vpop.permute.xlu0 %1522  ;;  %v1526_v25 = vpop.permute.xlu1 %1525 }
 0x245   : > { %v1527_v39 = vsel %vm467_vm3, %v1526_v25, %v1523_v23  ;;  %v1530_v50 = vsel %vm467_vm3, %v1523_v23, %v1526_v25  ;;  %v1670_v25 = vrot.slane %v1665_v7, %v2269_v28 }
 0x246   : > { %v1543_v8 = vmul.f32 %v1541_v33, %v1527_v39  ;;  %v1542_v60 = vmul.f32 %v1537_v45, %v1530_v50 }
 0x248   : > { %v1429_v42 = vpop.permute.xlu1 %1428  ;;  %v1594_v36 = vpop.permute.xlu0 %1593  ;;  %v2001_v4 = vpack.c.bf16 %v1543_v8, %v1512_v31  ;;  %v2000_v12 = vpack.c.bf16 %v1542_v60, %v1511_v9 }
 0x249   : > { %v1434_v48 = vsel %vm357_vm0, %v1433_v0, %v1429_v42  ;;  %v1437_v49 = vsel %vm357_vm0, %v1429_v42, %v1433_v0  ;;  %v1634_v0 = vunpack.c.l.bf16 %v1633_v62 }
 0x24a   : > { %v1449_v51 = vmul.f32 %v1444_v34, %v1437_v49  ;;  %v1450_v17 = vmul.f32 %v1448_v35, %v1434_v48 }
 0x24b   : > { %v1639_v22 = vrot.slane %v1634_v0, %v1638_v5 }
 0x24c   : > { %v1998_v54 = vpack.c.bf16 %v1480_v37, %v1449_v51  ;;  %v1565_v57 = vpop.permute.xlu1 %1564  ;;  %v1999_v58 = vpack.c.bf16 %v1481_v46, %v1450_v17  ;;  %v1625_v16 = vpop.permute.xlu0 %1624 }
 0x24d   : > { %v1570_v61 = vsel %vm509_vm4, %v1565_v57, %v2525_v63  ;;  %v1566_v3 = vsel %vm509_vm4, %v2525_v63, %v1565_v57  ;;  %v1643_v63 = vrot.slane %v1635_v1, %v1638_v5 }
 0x24e   : > { %v1583_v6 = vmul.f32 %v1581_v43, %v1570_v61  ;;  %1758 = vmatprep.subr.bf16.mxu1 %v1999_v58  ;;  %v1582_v14 = vmul.f32 %v1577_v52, %v1566_v3 }
 0x24f   : > { %1759 = vmatpush1.bf16.msra.mxu1 %v1998_v54 }
 0x250   : > { %1760 = vmatprep.subr.bf16.mxu1 %v2001_v4  ;;  %v1596_v11 = vpop.permute.xlu1 %1595  ;;  %v2003_v21 = vpack.c.bf16 %v1583_v6, %v2492_v10  ;;  %v2002_v26 = vpack.c.bf16 %v1582_v14, %v2486_v59  ;;  %v1656_v35 = vpop.permute.xlu0 %1655 }
 0x251   : > { %v1597_v23 = vsel %vm547_vm5, %v1594_v36, %v1596_v11  ;;  %v1601_v24 = vsel %vm547_vm5, %v1596_v11, %v1594_v36 }
 0x252   : > { %v1613_v10 = vmul.f32 %v1608_v15, %v1597_v23  ;;  %v1614_v32 = vmul.f32 %v1612_v20, %v1601_v24 }
 0x253   : > { %1761 = vmatpush1.bf16.msra.mxu1 %v2000_v12 }
 0x254   : > { %1762 = vmatprep.subr.bf16.mxu1 %v2003_v21  ;;  %v1627_v18 = vpop.permute.xlu1 %1626 }
 0x255   : > { %v1628_v27 = vsel %vm583_vm6, %v1625_v16, %v1627_v18  ;;  %v1632_v29 = vsel %vm583_vm6, %v1627_v18, %v1625_v16 }
 0x256   : > { %v1644_v33 = vmul.f32 %v1639_v22, %v1628_v27  ;;  %v1645_v34 = vmul.f32 %v1643_v63, %v1632_v29 }
 0x257   : > { %1763 = vmatpush1.bf16.msra.mxu1 %v2002_v26 }
 0x258   : > { %v2004_v38 = vpack.c.bf16 %v1644_v33, %v1613_v10  ;;  %v1658_v39 = vpop.permute.xlu1 %1657  ;;  %v2005_v40 = vpack.c.bf16 %v1645_v34, %v1614_v32 }
 0x259   : > { %v1659_v37 = vsel %vm621_vm7, %v1656_v35, %v1658_v39  ;;  %v1663_v41 = vsel %vm621_vm7, %v1658_v39, %v1656_v35 }
 0x25a   : > { %v1675_v59 = vmul.f32 %v1670_v25, %v1659_v37  ;;  %v1676_v45 = vmul.f32 %v1674_v30, %v1663_v41  ;;  %1764 = vmatprep.subr.bf16.mxu1 %v2005_v40 }
 0x25b   : > { %1765 = vmatpush1.bf16.msra.mxu1 %v2004_v38 }
 0x25c   : > { %v2006_v42 = vpack.c.bf16 %v1675_v59, %v1675_v59  ;;  %v2007_v28 = vpack.c.bf16 %v1676_v45, %v1676_v45 }
 0x25e   : > { %1979 = vmatprep.subr.msk.bf16.mxu1 %vm1751_vm9, %v2007_v28  ;;  %v1753_v43 = vsel %vm1751_vm9, %v2006_v42, 0 }
 0x25f   : > { %1767 = vmatpush1.bf16.msra.mxu1 %v1753_v43 }
 0x261   : > { %v1700_v46 = vpop.permute.xlu0 %1699 }
 0x262   : > { %1980 = vmatmul.mubr.msk.bf16.vlgmr.msra.gmra.mrb[4].mxu1 %vm1747_vm10, %v1686_v44 }
 0x335   : > { %v1792_v47 = vpop.f32.mrb[4].mxu1 }
 0x336   : > { %v1793_v48 = vadd.f32 %v1792_v47, %v1700_v46  ;;  %v1794_v49 = vpop.f32.mrb[5].mxu1 }
 0x337   : > { %v1795_v50 = vadd.f32 %v1794_v49, %v1700_v46  ;;  %v1796_v8 = vpop.f32.mrb[6].mxu1 }
 0x338   : > { %v1799_v51 = vmax.f32 %v1793_v48, 0.0  ;;  %v1797_v17 = vpop.f32.mrb[7].mxu1 }
 0x339   : > { %v1800_v62 = vmax.f32 %v1795_v50, 0.0 }
 0x33b   : > { %v1997_v52 = vpack.c.bf16 %v1800_v62, %v1799_v51 }
 0x33d   : > { %1809 = vst [vmem:[%s345_s18] sm:$0xff] %v1997_v52 }
 0x33e PF: > { %s18_s27 = sadd.s32 1, %s2094_s27  }
 0x33f   : > { %p15_p4 = scmp.ge.s32.totalorder %s18_s27, 4  }
 0x341   :  { %17 = sbr.rel (!%p15_p4) target bundleno = 1 (0x1), region = 88 }

</bundles_post_ra>
